<compile_context>
chip_gen: v7x
topology: tpu7x:2x2x1
jax: 0.10.0
libtpu: 0.0.40
codegen_flags: <defaults>
</compile_context>

<pallas_src>
import functools

import numpy as np
import jax
import jax.numpy as jnp
from jax.experimental import pallas as pl
from jax.experimental.pallas import tpu as pltpu


# --------------------------------------------------------------------------
# pltpu.roll direction probe (runs once, outside jit)
# --------------------------------------------------------------------------

@functools.lru_cache(maxsize=None)
def _roll_backward_sign():
    """Empirically determine pltpu.roll's rotation direction.

    Returns +1 if roll(x, s)[i] == x[i + s], else -1 (jnp.roll semantics,
    roll(x, s)[i] == x[i - s]).  Probing once makes the conv tap mapping robust
    to either convention; defaults to jnp.roll semantics if the probe cannot
    run concretely (e.g. first called under a trace).
    """
    def probe(o_ref):
        lane = jax.lax.broadcasted_iota(jnp.int32, (8, 128), 1).astype(jnp.float32)
        o_ref[...] = pltpu.roll(lane, 1, axis=1)

    try:
        out = pl.pallas_call(
            probe, out_shape=jax.ShapeDtypeStruct((8, 128), jnp.float32))()
        first = float(jax.device_get(out)[0, 0])
    except Exception:          # e.g. traced abstract value
        return -1
    return 1 if abs(first - 1.0) < 0.5 else -1


# --------------------------------------------------------------------------
# trace-time structure constants (all 0/1 valued -> exact in bf16)
# --------------------------------------------------------------------------

def _edge_masks(h, w, n_img):
    """(9, n*h*w) masks: 1 where tap k's source pixel lies inside the image the
    lane belongs to ('same' zero padding + kills cross-image roll wrap)."""
    size = h * w
    idx = np.arange(size)
    y, x = idx // w, idx % w
    m = np.zeros((9, size), np.float32)
    for k in range(9):
        dy, dx = k // 3 - 1, k % 3 - 1
        ok = (y + dy >= 0) & (y + dy < h) & (x + dx >= 0) & (x + dx < w)
        m[k, ok] = 1.0
    return np.tile(m, (1, n_img))


def _row_group(h, w, n_img):
    """(L, L) matrix: (x*x) @ P broadcasts each image-row's sum of squares to
    every lane of that row (the dim=-1 reduction of the PyTorch RMSNorm)."""
    g = np.arange(n_img * h * w) // w
    return (g[:, None] == g[None, :]).astype(np.float32)


def _unshuffle_select(h, w, n_img):
    """(4, Lf, Lh) lane-gather matrices for pixel_unshuffle(2); the transpose of
    slice s scatters sub-grid s back for pixel_shuffle(2)."""
    hh, wh = h // 2, w // 2
    lf, lh = n_img * h * w, n_img * hh * wh
    sel = np.zeros((4, lf, lh), np.float32)
    ih = np.arange(hh * wh)
    yh, xh = ih // wh, ih % wh
    for ni in range(n_img):
        for s in range(4):
            sy, sx = s // 2, s % 2
            src = ni * h * w + (2 * yh + sy) * w + (2 * xh + sx)
            dst = ni * hh * wh + ih
            sel[s, src, dst] = 1.0
    return sel


# --------------------------------------------------------------------------
# fused kernel
# --------------------------------------------------------------------------

def _generator_kernel(x_ref, masks_ref, pfull_ref, phalf_ref, seld_ref,
                      selu_ref, wglob_ref, wconv_ref, wpw_ref, bglob_ref,
                      bres_ref, o_ref, *,
                      img_w, img_w_half, c_in, cmid, hidden, c_out, layers,
                      eps, roll_sign, boffs, wseg):
    f32, bf16 = jnp.float32, jnp.bfloat16
    half = hidden // 2
    l_full = x_ref.shape[-1]
    l_half = l_full // 4

    masks = masks_ref[...]                    # (9, Lf + Lh) f32
    mask_f = masks[:, :l_full]
    mask_h = masks[:, l_full:]

    def rolls9(h, mask, w_img, ltot):
        # 9 shifted + edge-masked copies: XLU rolls + VPU masks, bf16 for MXU.
        outs = []
        for k in range(9):
            off = (k // 3 - 1) * w_img + (k % 3 - 1)
            shift = (roll_sign * off) % ltot
            r = h if shift == 0 else pltpu.roll(h, shift, axis=1)
            outs.append((r * mask[k:k + 1, :]).astype(bf16))
        return outs

    def conv3x3(h, w, b, mask, w_img, ltot):
        # 'same' 3x3 conv as ONE (Cout, 9*Cin)@(9*Cin, L) MXU call.
        s = jnp.concatenate(rolls9(h, mask, w_img, ltot), axis=0)
        return jnp.dot(w, s, preferred_element_type=f32) + b

    def rmsnorm(h, scale, p, row_w):
        ss = jnp.dot((h * h).astype(bf16), p, preferred_element_type=f32)
        rms = jnp.sqrt(ss) * (1.0 / float(row_w) ** 0.5)
        return scale * h * pl.reciprocal(rms + eps, approx=True)

    # biases / scales packed in one f32 column slab
    b_in = bglob_ref[boffs[0]:boffs[0] + cmid, :]
    b_dn = bglob_ref[boffs[1]:boffs[1] + hidden, :]
    b_up = bglob_ref[boffs[2]:boffs[2] + cmid, :]
    onorm = bglob_ref[boffs[3]:boffs[3] + cmid, :]
    b_out = bglob_ref[boffs[4]:boffs[4] + c_out, :]

    # global bf16 matmul weights packed in one slab (lane segments of 128)
    w_in = wglob_ref[0:cmid, 0:9 * c_in]
    w_dn = wglob_ref[0:hidden, wseg:wseg + 4 * cmid]
    w_up = wglob_ref[0:4 * cmid, 2 * wseg:2 * wseg + hidden]
    w_out = wglob_ref[0:c_out, 3 * wseg:3 * wseg + 9 * cmid]

    # ---- in_conv: 3x3 at full resolution ---------------------------------
    x = x_ref[...].astype(f32)                                    # (c_in, Lf)
    h = conv3x3(x, w_in, b_in, mask_f, img_w, l_full)             # (cmid, Lf)

    # ---- DownBlock: pixel_unshuffle gather fused with its 1x1 conv --------
    hb = h.astype(bf16)
    subs = [jnp.dot(hb, seld_ref[s], preferred_element_type=f32)  # (cmid, Lh)
            for s in range(4)]
    s_dn = jnp.concatenate(subs, axis=0).astype(bf16)             # (4*cmid, Lh)
    h = jnp.dot(w_dn, s_dn, preferred_element_type=f32) + b_dn    # (hidden, Lh)

    # ---- SimpleResNetBlocks (grouped conv as two lin/gate matmuls) --------
    p_half = phalf_ref[...]
    for l in range(layers):
        rms_s = bres_ref[l, 0:hidden, :]
        b_cv = bres_ref[l, hidden:2 * hidden, :]
        b_pw = bres_ref[l, 2 * hidden:3 * hidden, :]
        xn = rmsnorm(h, rms_s, p_half, img_w_half)
        parts = rolls9(xn, mask_h, img_w_half, l_half)
        s_lin = jnp.concatenate([p[:half, :] for p in parts], axis=0)
        s_gate = jnp.concatenate([p[half:, :] for p in parts], axis=0)
        w_l = wconv_ref[l]                                        # (hidden, 9*half)
        lin = jnp.dot(w_l[:half, :], s_lin,
                      preferred_element_type=f32) + b_cv[:half, :]
        gate = jnp.dot(w_l[half:, :], s_gate,
                       preferred_element_type=f32) + b_cv[half:, :]
        g = (lin * jnp.sin(gate)).astype(bf16)                    # (half, Lh)
        h = h + jnp.dot(wpw_ref[l], g, preferred_element_type=f32) + b_pw

    # ---- UpBlock: 1x1 conv fused with the pixel_shuffle scatter -----------
    subs_all = jnp.dot(w_up, h.astype(bf16),
                       preferred_element_type=f32)                # (4*cmid, Lh)
    sb = subs_all.astype(bf16)
    acc = None
    for s in range(4):
        t = jnp.dot(sb[s * cmid:(s + 1) * cmid, :], selu_ref[s],
                    preferred_element_type=f32)                   # (cmid, Lf)
        acc = t if acc is None else acc + t
    h = acc + b_up

    # ---- out_norm + out_conv + tanh ---------------------------------------
    h = rmsnorm(h, onorm, pfull_ref[...], img_w)
    y = conv3x3(h, w_out, b_out, mask_f, img_w, l_full)
    o_ref[...] = jnp.tanh(y).astype(o_ref.dtype)


# --------------------------------------------------------------------------
# forward wrapper
# --------------------------------------------------------------------------

def generator_forward(x, params, eps=1e-8):
    n, c_in, height, width = x.shape
    hh, wh = height // 2, width // 2
    l_full, l_half = n * height * width, n * hh * wh
    hidden = params["down_w"].shape[0]
    cmid = params["in_conv_w"].shape[0]
    half = hidden // 2
    c_out = params["out_conv_w"].shape[0]
    layers = len(params["res_blocks"])
    bf16 = jnp.bfloat16

    # Batch is packed along the lane axis: lane = n*H*W + y*W + x.  Keeps rolls
    # on 128-multiple lane axes and fills vregs on single-TC chips (v5e/v6e).
    assert height % 2 == 0 and width % 2 == 0
    assert l_half % 128 == 0, "need batch*Hh*Wh to be a multiple of 128 lanes"

    roll_sign = _roll_backward_sign()

    # structure constants (trace-time numpy; 0/1 valued -> exact in bf16)
    masks = jnp.asarray(np.concatenate(
        [_edge_masks(height, width, n), _edge_masks(hh, wh, n)], axis=1))
    p_full = jnp.asarray(_row_group(height, width, n), bf16)
    p_half = jnp.asarray(_row_group(hh, wh, n), bf16)
    seld_np = _unshuffle_select(height, width, n)
    seld = jnp.asarray(seld_np, bf16)
    selu = jnp.asarray(np.transpose(seld_np, (0, 2, 1)), bf16)

    def taps_flat(w):   # (Cout,Cin,3,3) -> (Cout, 9*Cin); column = tap*Cin + cin
        co, ci = w.shape[0], w.shape[1]
        return jnp.transpose(w, (0, 2, 3, 1)).reshape(co, 9 * ci)

    # global weights packed into one bf16 slab (one DMA instead of four)
    wseg = 128
    w_in = taps_flat(params["in_conv_w"])                         # (cmid, 9*c_in)
    dw = params["down_w"].reshape(hidden, cmid, 4)
    w_dn = jnp.transpose(dw, (0, 2, 1)).reshape(hidden, 4 * cmid)
    uw = params["up_w"].reshape(cmid, hidden // 4)
    w_up = jnp.zeros((4 * cmid, hidden), jnp.float32)
    for s in range(4):      # fold the pixel_shuffle channel gather into the weight
        w_up = w_up.at[s * cmid:(s + 1) * cmid, s::4].set(uw)
    w_out = taps_flat(params["out_conv_w"])                       # (c_out, 9*cmid)
    assert max(9 * c_in, 4 * cmid, hidden, 9 * cmid) <= wseg
    wrows = max(cmid, hidden, 4 * cmid, c_out)
    wglob = jnp.zeros((wrows, 4 * wseg), jnp.float32)
    wglob = wglob.at[:cmid, 0:9 * c_in].set(w_in)
    wglob = wglob.at[:hidden, wseg:wseg + 4 * cmid].set(w_dn)
    wglob = wglob.at[:4 * cmid, 2 * wseg:2 * wseg + hidden].set(w_up)
    wglob = wglob.at[:c_out, 3 * wseg:3 * wseg + 9 * cmid].set(w_out)
    wglob = wglob.astype(bf16)

    # per-layer weights (bf16): grouped-conv taps stacked [lin; gate], pointwise
    wconv = jnp.stack([jnp.concatenate(
        [taps_flat(b["conv_w"][:half]), taps_flat(b["conv_w"][half:])], axis=0)
        for b in params["res_blocks"]]).astype(bf16)              # (layers, hidden, 9*half)
    wpw = jnp.stack([b["pw_w"].reshape(hidden, half)
                     for b in params["res_blocks"]]).astype(bf16)

    # biases / scales packed into two f32 refs (8-row aligned segments)
    ceil8 = lambda v: ((v + 7) // 8) * 8
    off_in = 0
    off_dn = off_in + ceil8(cmid)
    off_up = off_dn + ceil8(hidden)
    off_on = off_up + ceil8(cmid)
    off_out = off_on + ceil8(cmid)
    brows = off_out + ceil8(c_out)
    boffs = (off_in, off_dn, off_up, off_on, off_out)
    bglob = jnp.zeros((brows, 1), jnp.float32)
    bglob = bglob.at[off_in:off_in + cmid, 0].set(params["in_conv_b"])
    bglob = bglob.at[off_dn:off_dn + hidden, 0].set(params["down_b"])
    bglob = bglob.at[off_up:off_up + cmid, 0].set(params["up_b"])
    bglob = bglob.at[off_on:off_on + cmid, 0].set(params["out_norm_scale"])
    bglob = bglob.at[off_out:off_out + c_out, 0].set(params["out_conv_b"])
    bres = jnp.stack([jnp.concatenate(
        [b["rms_scale"], b["conv_b"], b["pw_b"]]).reshape(3 * hidden, 1)
        for b in params["res_blocks"]])

    x_packed = jnp.transpose(x, (1, 0, 2, 3)).reshape(c_in, l_full)

    operands = [x_packed, masks, p_full, p_half, seld, selu,
                wglob, wconv, wpw, bglob, bres]

    def whole(a):
        nd = a.ndim
        return pl.BlockSpec(a.shape, lambda i, _nd=nd: (0,) * _nd)

    kernel = functools.partial(
        _generator_kernel, img_w=width, img_w_half=wh, c_in=c_in, cmid=cmid,
        hidden=hidden, c_out=c_out, layers=layers, eps=eps,
        roll_sign=roll_sign, boffs=boffs, wseg=wseg)

    out = pl.pallas_call(
        kernel,
        out_shape=jax.ShapeDtypeStruct((c_out, l_full), jnp.float32),
        grid_spec=pltpu.PrefetchScalarGridSpec(
            num_scalar_prefetch=0,
            grid=(1,),
            in_specs=[whole(a) for a in operands],
            out_specs=pl.BlockSpec((c_out, l_full), lambda i: (0, 0)),
        ),
        compiler_params=pltpu.CompilerParams(
            dimension_semantics=("arbitrary",),
            vmem_limit_bytes=32 * 1024 * 1024),   # actual use is ~4 MB
    )(*operands)
    return jnp.transpose(out.reshape(c_out, n, height, width), (1, 0, 2, 3))


# --------------------------------------------------------------------------
# parameters
# --------------------------------------------------------------------------

def init_params(key, in_channels, out_channels, hidden_dim, layer_count, ps):
    cmid = hidden_dim // ps ** 2
    half = hidden_dim // 2
    keys = iter(jax.random.split(key, 8 + 4 * layer_count))

    def nrm(shape, s=0.05):
        return jax.random.normal(next(keys), shape, jnp.float32) * s

    params = {
        "in_conv_w": nrm((cmid, in_channels, 3, 3)),
        "in_conv_b": nrm((cmid,)),
        "down_w": nrm((hidden_dim, cmid * 4, 1, 1)),
        "down_b": nrm((hidden_dim,)),
        "up_w": nrm((cmid, hidden_dim // 4, 1, 1)),
        "up_b": nrm((cmid,)),
        # TODO(synk): reference builds RMSNorm(hidden_dim) here but the tensor at
        # this point has hidden_dim // ps**2 channels (shape bug in model.py);
        # the scale is sized to the actual channel count so the broadcast works.
        "out_norm_scale": jnp.ones((cmid,), jnp.float32),
        "out_conv_w": nrm((out_channels, cmid, 3, 3)),
        "out_conv_b": nrm((out_channels,)),
        "res_blocks": [],
    }
    for _ in range(layer_count):
        params["res_blocks"].append({
            "rms_scale": jnp.ones((hidden_dim,), jnp.float32),
            "conv_w": nrm((hidden_dim, half, 3, 3)),   # grouped 3x3 conv, groups=2
            "conv_b": nrm((hidden_dim,)),
            # PyTorch zero-inits the pointwise conv; small random values keep the
            # numerical check exercising the full gated path.
            "pw_w": nrm((hidden_dim, half, 1, 1)),
            "pw_b": nrm((hidden_dim,)),
        })
    return params


# --------------------------------------------------------------------------
# pure-JAX reference
# --------------------------------------------------------------------------

def reference_forward(x, params, eps=1e-8):
    """Independent reference built on lax.conv_general_dilated (NCHW / 'SAME')."""
    hi = jax.lax.Precision.HIGHEST

    def conv(t, w, b, groups=1):
        y = jax.lax.conv_general_dilated(
            t, w, window_strides=(1, 1), padding="SAME",
            dimension_numbers=("NCHW", "OIHW", "NCHW"),
            feature_group_count=groups, precision=hi)
        return y + b[None, :, None, None]

    def rms(t, scale):
        norm = jnp.sqrt(jnp.sum(t * t, axis=-1, keepdims=True))
        r = norm / (t.shape[-1] ** 0.5)
        return scale[None, :, None, None] * t / (r + eps)

    def unshuffle2(t):
        b, c, h, w = t.shape
        t = t.reshape(b, c, h // 2, 2, w // 2, 2).transpose(0, 1, 3, 5, 2, 4)
        return t.reshape(b, c * 4, h // 2, w // 2)

    def shuffle2(t):
        b, c, h, w = t.shape
        t = t.reshape(b, c // 4, 2, 2, h, w).transpose(0, 1, 4, 2, 5, 3)
        return t.reshape(b, c // 4, h * 2, w * 2)

    x = conv(x, params["in_conv_w"], params["in_conv_b"])
    x = conv(unshuffle2(x), params["down_w"], params["down_b"])
    for blk in params["res_blocks"]:
        skip = x
        xn = rms(x, blk["rms_scale"])
        c = conv(xn, blk["conv_w"], blk["conv_b"], groups=2)
        half = c.shape[1] // 2
        g = c[:, :half] * jnp.sin(c[:, half:])
        x = skip + conv(g, blk["pw_w"], blk["pw_b"])
    x = conv(shuffle2(x), params["up_w"], params["up_b"])
    x = rms(x, params["out_norm_scale"])
    x = conv(x, params["out_conv_w"], params["out_conv_b"])
    return jnp.tanh(x)


# --------------------------------------------------------------------------
# main
# --------------------------------------------------------------------------

if __name__ == "__main__":
    in_channels, out_channels = 4, 4
    hidden_dim, layer_count, pixel_shuffle_factor = 32, 3, 4

    key = jax.random.PRNGKey(0)
    pkey, xkey = jax.random.split(key)
    params = init_params(pkey, in_channels, out_channels, hidden_dim,
                         layer_count, pixel_shuffle_factor)
    x = jax.random.normal(xkey, (2, in_channels, 16, 16), jnp.float32)

    _roll_backward_sign()            # prime the static roll-direction probe

    fwd = jax.jit(generator_forward)
    out = jax.block_until_ready(fwd(x, params))
    assert out.shape == (2, out_channels, 16, 16), out.shape
    assert bool(jnp.all(jnp.isfinite(out)))

    ref = jax.block_until_ready(reference_forward(x, params))
    max_err = float(jnp.max(jnp.abs(out - ref)))
    assert bool(jnp.allclose(out, ref, atol=2e-2, rtol=2e-2)), max_err

    print("KERNEL_OK")
</pallas_src>

<mosaic_0001>
module attributes {stable_mosaic.version = 11 : i64} {
  func.func @_generator_kernel(%arg0: i32, %arg1: memref<4x512xf32, #tpu.memory_space<vmem>>, %arg2: memref<9x640xf32, #tpu.memory_space<vmem>>, %arg3: memref<512x512xbf16, #tpu.memory_space<vmem>>, %arg4: memref<128x128xbf16, #tpu.memory_space<vmem>>, %arg5: memref<4x512x128xbf16, #tpu.memory_space<vmem>>, %arg6: memref<4x128x512xbf16, #tpu.memory_space<vmem>>, %arg7: memref<32x512xbf16, #tpu.memory_space<vmem>>, %arg8: memref<3x32x144xbf16, #tpu.memory_space<vmem>>, %arg9: memref<3x32x16xbf16, #tpu.memory_space<vmem>>, %arg10: memref<64x1xf32, #tpu.memory_space<vmem>>, %arg11: memref<3x96x1xf32, #tpu.memory_space<vmem>>, %arg12: memref<4x512xf32, #tpu.memory_space<vmem>>) attributes {dimension_semantics = [#tpu.dimension_semantics<arbitrary>], iteration_bounds = array<i64: 1>, scalar_prefetch = 0 : i64, scratch_operands = 0 : i64, tpu.core_type = #tpu.core_type<tc>, window_params = [{pipeline_mode = #tpu.pipeline_mode<synchronous>, transform_indices = @transform_0, window_bounds = array<i64: 4, 512>}, {pipeline_mode = #tpu.pipeline_mode<synchronous>, transform_indices = @transform_1, window_bounds = array<i64: 9, 640>}, {pipeline_mode = #tpu.pipeline_mode<synchronous>, transform_indices = @transform_2, window_bounds = array<i64: 512, 512>}, {pipeline_mode = #tpu.pipeline_mode<synchronous>, transform_indices = @transform_3, window_bounds = array<i64: 128, 128>}, {pipeline_mode = #tpu.pipeline_mode<synchronous>, transform_indices = @transform_4, window_bounds = array<i64: 4, 512, 128>}, {pipeline_mode = #tpu.pipeline_mode<synchronous>, transform_indices = @transform_5, window_bounds = array<i64: 4, 128, 512>}, {pipeline_mode = #tpu.pipeline_mode<synchronous>, transform_indices = @transform_6, window_bounds = array<i64: 32, 512>}, {pipeline_mode = #tpu.pipeline_mode<synchronous>, transform_indices = @transform_7, window_bounds = array<i64: 3, 32, 144>}, {pipeline_mode = #tpu.pipeline_mode<synchronous>, transform_indices = @transform_8, window_bounds = array<i64: 3, 32, 16>}, {pipeline_mode = #tpu.pipeline_mode<synchronous>, transform_indices = @transform_9, window_bounds = array<i64: 64, 1>}, {pipeline_mode = #tpu.pipeline_mode<synchronous>, transform_indices = @transform_10, window_bounds = array<i64: 3, 96, 1>}, {pipeline_mode = #tpu.pipeline_mode<synchronous>, transform_indices = @transform_11, window_bounds = array<i64: 4, 512>}]} {
    %c0 = arith.constant 0 : index
    %c0_0 = arith.constant 0 : index
    %0 = vector.load %arg2[%c0, %c0_0] : memref<9x640xf32, #tpu.memory_space<vmem>>, vector<9x640xf32>
    %1 = vector.extract_strided_slice %0 {offsets = [0, 0], sizes = [9, 512], strides = [1, 1]} : vector<9x640xf32> to vector<9x512xf32>
    %2 = vector.extract_strided_slice %0 {offsets = [0, 512], sizes = [9, 128], strides = [1, 1]} : vector<9x640xf32> to vector<9x128xf32>
    %c0_1 = arith.constant 0 : index
    %c0_2 = arith.constant 0 : index
    %3 = vector.load %arg10[%c0_1, %c0_2] : memref<64x1xf32, #tpu.memory_space<vmem>>, vector<2x1xf32>
    %c8 = arith.constant 8 : index
    %c0_3 = arith.constant 0 : index
    %4 = vector.load %arg10[%c8, %c0_3] : memref<64x1xf32, #tpu.memory_space<vmem>>, vector<32x1xf32>
    %c40 = arith.constant 40 : index
    %c0_4 = arith.constant 0 : index
    %5 = vector.load %arg10[%c40, %c0_4] : memref<64x1xf32, #tpu.memory_space<vmem>>, vector<2x1xf32>
    %c48 = arith.constant 48 : index
    %c0_5 = arith.constant 0 : index
    %6 = vector.load %arg10[%c48, %c0_5] : memref<64x1xf32, #tpu.memory_space<vmem>>, vector<2x1xf32>
    %c56 = arith.constant 56 : index
    %c0_6 = arith.constant 0 : index
    %7 = vector.load %arg10[%c56, %c0_6] : memref<64x1xf32, #tpu.memory_space<vmem>>, vector<4x1xf32>
    %c0_7 = arith.constant 0 : index
    %c0_8 = arith.constant 0 : index
    %8 = vector.load %arg7[%c0_7, %c0_8] : memref<32x512xbf16, #tpu.memory_space<vmem>>, vector<2x36xbf16>
    %c0_9 = arith.constant 0 : index
    %c128 = arith.constant 128 : index
    %9 = vector.load %arg7[%c0_9, %c128] : memref<32x512xbf16, #tpu.memory_space<vmem>>, vector<32x8xbf16>
    %c0_10 = arith.constant 0 : index
    %c256 = arith.constant 256 : index
    %10 = vector.load %arg7[%c0_10, %c256] : memref<32x512xbf16, #tpu.memory_space<vmem>>, vector<8x32xbf16>
    %c0_11 = arith.constant 0 : index
    %c384 = arith.constant 384 : index
    %11 = vector.load %arg7[%c0_11, %c384] : memref<32x512xbf16, #tpu.memory_space<vmem>>, vector<4x18xbf16>
    %c0_12 = arith.constant 0 : index
    %c0_13 = arith.constant 0 : index
    %12 = vector.load %arg1[%c0_12, %c0_13] : memref<4x512xf32, #tpu.memory_space<vmem>>, vector<4x512xf32>
    %c17_i32 = arith.constant 17 : i32
    %13 = tpu.dynamic_rotate %12 by %c17_i32 dim 1 : vector<4x512xf32>, i32 -> vector<4x512xf32>
    %14 = vector.extract_strided_slice %1 {offsets = [0, 0], sizes = [1, 512], strides = [1, 1]} : vector<9x512xf32> to vector<1x512xf32>
    %15 = vector.broadcast %14 : vector<1x512xf32> to vector<4x512xf32>
    %16 = arith.mulf %13, %15 : vector<4x512xf32>
    %17 = arith.truncf %16 : vector<4x512xf32> to vector<4x512xbf16>
    %c16_i32 = arith.constant 16 : i32
    %18 = tpu.dynamic_rotate %12 by %c16_i32 dim 1 : vector<4x512xf32>, i32 -> vector<4x512xf32>
    %19 = vector.extract_strided_slice %1 {offsets = [1, 0], sizes = [1, 512], strides = [1, 1]} : vector<9x512xf32> to vector<1x512xf32>
    %20 = vector.broadcast %19 : vector<1x512xf32> to vector<4x512xf32>
    %21 = arith.mulf %18, %20 : vector<4x512xf32>
    %22 = arith.truncf %21 : vector<4x512xf32> to vector<4x512xbf16>
    %c15_i32 = arith.constant 15 : i32
    %23 = tpu.dynamic_rotate %12 by %c15_i32 dim 1 : vector<4x512xf32>, i32 -> vector<4x512xf32>
    %24 = vector.extract_strided_slice %1 {offsets = [2, 0], sizes = [1, 512], strides = [1, 1]} : vector<9x512xf32> to vector<1x512xf32>
    %25 = vector.broadcast %24 : vector<1x512xf32> to vector<4x512xf32>
    %26 = arith.mulf %23, %25 : vector<4x512xf32>
    %27 = arith.truncf %26 : vector<4x512xf32> to vector<4x512xbf16>
    %c1_i32 = arith.constant 1 : i32
    %28 = tpu.dynamic_rotate %12 by %c1_i32 dim 1 : vector<4x512xf32>, i32 -> vector<4x512xf32>
    %29 = vector.extract_strided_slice %1 {offsets = [3, 0], sizes = [1, 512], strides = [1, 1]} : vector<9x512xf32> to vector<1x512xf32>
    %30 = vector.broadcast %29 : vector<1x512xf32> to vector<4x512xf32>
    %31 = arith.mulf %28, %30 : vector<4x512xf32>
    %32 = arith.truncf %31 : vector<4x512xf32> to vector<4x512xbf16>
    %33 = vector.extract_strided_slice %1 {offsets = [4, 0], sizes = [1, 512], strides = [1, 1]} : vector<9x512xf32> to vector<1x512xf32>
    %34 = vector.broadcast %33 : vector<1x512xf32> to vector<4x512xf32>
    %35 = arith.mulf %12, %34 : vector<4x512xf32>
    %36 = arith.truncf %35 : vector<4x512xf32> to vector<4x512xbf16>
    %c511_i32 = arith.constant 511 : i32
    %37 = tpu.dynamic_rotate %12 by %c511_i32 dim 1 : vector<4x512xf32>, i32 -> vector<4x512xf32>
    %38 = vector.extract_strided_slice %1 {offsets = [5, 0], sizes = [1, 512], strides = [1, 1]} : vector<9x512xf32> to vector<1x512xf32>
    %39 = vector.broadcast %38 : vector<1x512xf32> to vector<4x512xf32>
    %40 = arith.mulf %37, %39 : vector<4x512xf32>
    %41 = arith.truncf %40 : vector<4x512xf32> to vector<4x512xbf16>
    %c497_i32 = arith.constant 497 : i32
    %42 = tpu.dynamic_rotate %12 by %c497_i32 dim 1 : vector<4x512xf32>, i32 -> vector<4x512xf32>
    %43 = vector.extract_strided_slice %1 {offsets = [6, 0], sizes = [1, 512], strides = [1, 1]} : vector<9x512xf32> to vector<1x512xf32>
    %44 = vector.broadcast %43 : vector<1x512xf32> to vector<4x512xf32>
    %45 = arith.mulf %42, %44 : vector<4x512xf32>
    %46 = arith.truncf %45 : vector<4x512xf32> to vector<4x512xbf16>
    %c496_i32 = arith.constant 496 : i32
    %47 = tpu.dynamic_rotate %12 by %c496_i32 dim 1 : vector<4x512xf32>, i32 -> vector<4x512xf32>
    %48 = vector.extract_strided_slice %1 {offsets = [7, 0], sizes = [1, 512], strides = [1, 1]} : vector<9x512xf32> to vector<1x512xf32>
    %49 = vector.broadcast %48 : vector<1x512xf32> to vector<4x512xf32>
    %50 = arith.mulf %47, %49 : vector<4x512xf32>
    %51 = arith.truncf %50 : vector<4x512xf32> to vector<4x512xbf16>
    %c495_i32 = arith.constant 495 : i32
    %52 = tpu.dynamic_rotate %12 by %c495_i32 dim 1 : vector<4x512xf32>, i32 -> vector<4x512xf32>
    %53 = vector.extract_strided_slice %1 {offsets = [8, 0], sizes = [1, 512], strides = [1, 1]} : vector<9x512xf32> to vector<1x512xf32>
    %54 = vector.broadcast %53 : vector<1x512xf32> to vector<4x512xf32>
    %55 = arith.mulf %52, %54 : vector<4x512xf32>
    %56 = arith.truncf %55 : vector<4x512xf32> to vector<4x512xbf16>
    %57 = tpu.concatenate %17, %22, %27, %32, %36, %41, %46, %51, %56 in 0 : vector<4x512xbf16>, vector<4x512xbf16>, vector<4x512xbf16>, vector<4x512xbf16>, vector<4x512xbf16>, vector<4x512xbf16>, vector<4x512xbf16>, vector<4x512xbf16>, vector<4x512xbf16> -> vector<36x512xbf16>
    %cst = arith.constant dense<0.000000e+00> : vector<2x512xf32>
    %58 = tpu.matmul %8, %57, %cst {dimension_numbers = #tpu.dot_dimension_numbers<[1], [0], [0], [1], [0, 0, 1, 1], [], []>} : vector<2x36xbf16>, vector<36x512xbf16>, vector<2x512xf32> -> vector<2x512xf32>
    %59 = vector.broadcast %3 : vector<2x1xf32> to vector<2x512xf32>
    %60 = arith.addf %58, %59 : vector<2x512xf32>
    %61 = arith.truncf %60 : vector<2x512xf32> to vector<2x512xbf16>
    %c0_14 = arith.constant 0 : index
    %c0_15 = arith.constant 0 : index
    %c0_16 = arith.constant 0 : index
    %62 = vector.load %arg5[%c0_14, %c0_15, %c0_16] : memref<4x512x128xbf16, #tpu.memory_space<vmem>>, vector<1x512x128xbf16>
    %63 = vector.shape_cast %62 : vector<1x512x128xbf16> to vector<512x128xbf16>
    %cst_17 = arith.constant dense<0.000000e+00> : vector<2x128xf32>
    %64 = tpu.matmul %61, %63, %cst_17 {dimension_numbers = #tpu.dot_dimension_numbers<[1], [0], [0], [1], [0, 0, 1, 1], [], []>} : vector<2x512xbf16>, vector<512x128xbf16>, vector<2x128xf32> -> vector<2x128xf32>
    %c1 = arith.constant 1 : index
    %c0_18 = arith.constant 0 : index
    %c0_19 = arith.constant 0 : index
    %65 = vector.load %arg5[%c1, %c0_18, %c0_19] : memref<4x512x128xbf16, #tpu.memory_space<vmem>>, vector<1x512x128xbf16>
    %66 = vector.shape_cast %65 : vector<1x512x128xbf16> to vector<512x128xbf16>
    %cst_20 = arith.constant dense<0.000000e+00> : vector<2x128xf32>
    %67 = tpu.matmul %61, %66, %cst_20 {dimension_numbers = #tpu.dot_dimension_numbers<[1], [0], [0], [1], [0, 0, 1, 1], [], []>} : vector<2x512xbf16>, vector<512x128xbf16>, vector<2x128xf32> -> vector<2x128xf32>
    %c2 = arith.constant 2 : index
    %c0_21 = arith.constant 0 : index
    %c0_22 = arith.constant 0 : index
    %68 = vector.load %arg5[%c2, %c0_21, %c0_22] : memref<4x512x128xbf16, #tpu.memory_space<vmem>>, vector<1x512x128xbf16>
    %69 = vector.shape_cast %68 : vector<1x512x128xbf16> to vector<512x128xbf16>
    %cst_23 = arith.constant dense<0.000000e+00> : vector<2x128xf32>
    %70 = tpu.matmul %61, %69, %cst_23 {dimension_numbers = #tpu.dot_dimension_numbers<[1], [0], [0], [1], [0, 0, 1, 1], [], []>} : vector<2x512xbf16>, vector<512x128xbf16>, vector<2x128xf32> -> vector<2x128xf32>
    %c3 = arith.constant 3 : index
    %c0_24 = arith.constant 0 : index
    %c0_25 = arith.constant 0 : index
    %71 = vector.load %arg5[%c3, %c0_24, %c0_25] : memref<4x512x128xbf16, #tpu.memory_space<vmem>>, vector<1x512x128xbf16>
    %72 = vector.shape_cast %71 : vector<1x512x128xbf16> to vector<512x128xbf16>
    %cst_26 = arith.constant dense<0.000000e+00> : vector<2x128xf32>
    %73 = tpu.matmul %61, %72, %cst_26 {dimension_numbers = #tpu.dot_dimension_numbers<[1], [0], [0], [1], [0, 0, 1, 1], [], []>} : vector<2x512xbf16>, vector<512x128xbf16>, vector<2x128xf32> -> vector<2x128xf32>
    %74 = tpu.concatenate %64, %67, %70, %73 in 0 : vector<2x128xf32>, vector<2x128xf32>, vector<2x128xf32>, vector<2x128xf32> -> vector<8x128xf32>
    %75 = arith.truncf %74 : vector<8x128xf32> to vector<8x128xbf16>
    %cst_27 = arith.constant dense<0.000000e+00> : vector<32x128xf32>
    %76 = tpu.matmul %9, %75, %cst_27 {dimension_numbers = #tpu.dot_dimension_numbers<[1], [0], [0], [1], [0, 0, 1, 1], [], []>} : vector<32x8xbf16>, vector<8x128xbf16>, vector<32x128xf32> -> vector<32x128xf32>
    %77 = vector.broadcast %4 : vector<32x1xf32> to vector<32x128xf32>
    %78 = arith.addf %76, %77 : vector<32x128xf32>
    %c0_28 = arith.constant 0 : index
    %c0_29 = arith.constant 0 : index
    %79 = vector.load %arg4[%c0_28, %c0_29] : memref<128x128xbf16, #tpu.memory_space<vmem>>, vector<128x128xbf16>
    %c0_30 = arith.constant 0 : index
    %c0_31 = arith.constant 0 : index
    %c0_32 = arith.constant 0 : index
    %80 = vector.load %arg11[%c0_30, %c0_31, %c0_32] : memref<3x96x1xf32, #tpu.memory_space<vmem>>, vector<1x32x1xf32>
    %81 = vector.shape_cast %80 : vector<1x32x1xf32> to vector<32x1xf32>
    %c0_33 = arith.constant 0 : index
    %c32 = arith.constant 32 : index
    %c0_34 = arith.constant 0 : index
    %82 = vector.load %arg11[%c0_33, %c32, %c0_34] : memref<3x96x1xf32, #tpu.memory_space<vmem>>, vector<1x32x1xf32>
    %83 = vector.shape_cast %82 : vector<1x32x1xf32> to vector<32x1xf32>
    %c0_35 = arith.constant 0 : index
    %c64 = arith.constant 64 : index
    %c0_36 = arith.constant 0 : index
    %84 = vector.load %arg11[%c0_35, %c64, %c0_36] : memref<3x96x1xf32, #tpu.memory_space<vmem>>, vector<1x32x1xf32>
    %85 = vector.shape_cast %84 : vector<1x32x1xf32> to vector<32x1xf32>
    %86 = arith.mulf %78, %78 : vector<32x128xf32>
    %87 = arith.truncf %86 : vector<32x128xf32> to vector<32x128xbf16>
    %cst_37 = arith.constant dense<0.000000e+00> : vector<32x128xf32>
    %88 = tpu.matmul %87, %79, %cst_37 {dimension_numbers = #tpu.dot_dimension_numbers<[1], [0], [0], [1], [0, 0, 1, 1], [], []>} : vector<32x128xbf16>, vector<128x128xbf16>, vector<32x128xf32> -> vector<32x128xf32>
    %89 = math.sqrt %88 : vector<32x128xf32>
    %cst_38 = arith.constant 0.353553385 : f32
    %90 = vector.broadcast %cst_38 : f32 to vector<32x128xf32>
    %91 = arith.mulf %89, %90 : vector<32x128xf32>
    %92 = vector.broadcast %81 : vector<32x1xf32> to vector<32x128xf32>
    %93 = arith.mulf %92, %78 : vector<32x128xf32>
    %cst_39 = arith.constant 9.99999993E-9 : f32
    %94 = vector.broadcast %cst_39 : f32 to vector<32x128xf32>
    %95 = arith.addf %91, %94 : vector<32x128xf32>
    %96 = tpu.reciprocal %95 {approx = true} : vector<32x128xf32> -> vector<32x128xf32>
    %97 = arith.mulf %93, %96 : vector<32x128xf32>
    %c9_i32 = arith.constant 9 : i32
    %98 = tpu.dynamic_rotate %97 by %c9_i32 dim 1 : vector<32x128xf32>, i32 -> vector<32x128xf32>
    %99 = vector.extract_strided_slice %2 {offsets = [0, 0], sizes = [1, 128], strides = [1, 1]} : vector<9x128xf32> to vector<1x128xf32>
    %100 = vector.broadcast %99 : vector<1x128xf32> to vector<32x128xf32>
    %101 = arith.mulf %98, %100 : vector<32x128xf32>
    %102 = arith.truncf %101 : vector<32x128xf32> to vector<32x128xbf16>
    %c8_i32 = arith.constant 8 : i32
    %103 = tpu.dynamic_rotate %97 by %c8_i32 dim 1 : vector<32x128xf32>, i32 -> vector<32x128xf32>
    %104 = vector.extract_strided_slice %2 {offsets = [1, 0], sizes = [1, 128], strides = [1, 1]} : vector<9x128xf32> to vector<1x128xf32>
    %105 = vector.broadcast %104 : vector<1x128xf32> to vector<32x128xf32>
    %106 = arith.mulf %103, %105 : vector<32x128xf32>
    %107 = arith.truncf %106 : vector<32x128xf32> to vector<32x128xbf16>
    %c7_i32 = arith.constant 7 : i32
    %108 = tpu.dynamic_rotate %97 by %c7_i32 dim 1 : vector<32x128xf32>, i32 -> vector<32x128xf32>
    %109 = vector.extract_strided_slice %2 {offsets = [2, 0], sizes = [1, 128], strides = [1, 1]} : vector<9x128xf32> to vector<1x128xf32>
    %110 = vector.broadcast %109 : vector<1x128xf32> to vector<32x128xf32>
    %111 = arith.mulf %108, %110 : vector<32x128xf32>
    %112 = arith.truncf %111 : vector<32x128xf32> to vector<32x128xbf16>
    %c1_i32_40 = arith.constant 1 : i32
    %113 = tpu.dynamic_rotate %97 by %c1_i32_40 dim 1 : vector<32x128xf32>, i32 -> vector<32x128xf32>
    %114 = vector.extract_strided_slice %2 {offsets = [3, 0], sizes = [1, 128], strides = [1, 1]} : vector<9x128xf32> to vector<1x128xf32>
    %115 = vector.broadcast %114 : vector<1x128xf32> to vector<32x128xf32>
    %116 = arith.mulf %113, %115 : vector<32x128xf32>
    %117 = arith.truncf %116 : vector<32x128xf32> to vector<32x128xbf16>
    %118 = vector.extract_strided_slice %2 {offsets = [4, 0], sizes = [1, 128], strides = [1, 1]} : vector<9x128xf32> to vector<1x128xf32>
    %119 = vector.broadcast %118 : vector<1x128xf32> to vector<32x128xf32>
    %120 = arith.mulf %97, %119 : vector<32x128xf32>
    %121 = arith.truncf %120 : vector<32x128xf32> to vector<32x128xbf16>
    %c127_i32 = arith.constant 127 : i32
    %122 = tpu.dynamic_rotate %97 by %c127_i32 dim 1 : vector<32x128xf32>, i32 -> vector<32x128xf32>
    %123 = vector.extract_strided_slice %2 {offsets = [5, 0], sizes = [1, 128], strides = [1, 1]} : vector<9x128xf32> to vector<1x128xf32>
    %124 = vector.broadcast %123 : vector<1x128xf32> to vector<32x128xf32>
    %125 = arith.mulf %122, %124 : vector<32x128xf32>
    %126 = arith.truncf %125 : vector<32x128xf32> to vector<32x128xbf16>
    %c121_i32 = arith.constant 121 : i32
    %127 = tpu.dynamic_rotate %97 by %c121_i32 dim 1 : vector<32x128xf32>, i32 -> vector<32x128xf32>
    %128 = vector.extract_strided_slice %2 {offsets = [6, 0], sizes = [1, 128], strides = [1, 1]} : vector<9x128xf32> to vector<1x128xf32>
    %129 = vector.broadcast %128 : vector<1x128xf32> to vector<32x128xf32>
    %130 = arith.mulf %127, %129 : vector<32x128xf32>
    %131 = arith.truncf %130 : vector<32x128xf32> to vector<32x128xbf16>
    %c120_i32 = arith.constant 120 : i32
    %132 = tpu.dynamic_rotate %97 by %c120_i32 dim 1 : vector<32x128xf32>, i32 -> vector<32x128xf32>
    %133 = vector.extract_strided_slice %2 {offsets = [7, 0], sizes = [1, 128], strides = [1, 1]} : vector<9x128xf32> to vector<1x128xf32>
    %134 = vector.broadcast %133 : vector<1x128xf32> to vector<32x128xf32>
    %135 = arith.mulf %132, %134 : vector<32x128xf32>
    %136 = arith.truncf %135 : vector<32x128xf32> to vector<32x128xbf16>
    %c119_i32 = arith.constant 119 : i32
    %137 = tpu.dynamic_rotate %97 by %c119_i32 dim 1 : vector<32x128xf32>, i32 -> vector<32x128xf32>
    %138 = vector.extract_strided_slice %2 {offsets = [8, 0], sizes = [1, 128], strides = [1, 1]} : vector<9x128xf32> to vector<1x128xf32>
    %139 = vector.broadcast %138 : vector<1x128xf32> to vector<32x128xf32>
    %140 = arith.mulf %137, %139 : vector<32x128xf32>
    %141 = arith.truncf %140 : vector<32x128xf32> to vector<32x128xbf16>
    %142 = vector.extract_strided_slice %102 {offsets = [0, 0], sizes = [16, 128], strides = [1, 1]} : vector<32x128xbf16> to vector<16x128xbf16>
    %143 = vector.extract_strided_slice %107 {offsets = [0, 0], sizes = [16, 128], strides = [1, 1]} : vector<32x128xbf16> to vector<16x128xbf16>
    %144 = vector.extract_strided_slice %112 {offsets = [0, 0], sizes = [16, 128], strides = [1, 1]} : vector<32x128xbf16> to vector<16x128xbf16>
    %145 = vector.extract_strided_slice %117 {offsets = [0, 0], sizes = [16, 128], strides = [1, 1]} : vector<32x128xbf16> to vector<16x128xbf16>
    %146 = vector.extract_strided_slice %121 {offsets = [0, 0], sizes = [16, 128], strides = [1, 1]} : vector<32x128xbf16> to vector<16x128xbf16>
    %147 = vector.extract_strided_slice %126 {offsets = [0, 0], sizes = [16, 128], strides = [1, 1]} : vector<32x128xbf16> to vector<16x128xbf16>
    %148 = vector.extract_strided_slice %131 {offsets = [0, 0], sizes = [16, 128], strides = [1, 1]} : vector<32x128xbf16> to vector<16x128xbf16>
    %149 = vector.extract_strided_slice %136 {offsets = [0, 0], sizes = [16, 128], strides = [1, 1]} : vector<32x128xbf16> to vector<16x128xbf16>
    %150 = vector.extract_strided_slice %141 {offsets = [0, 0], sizes = [16, 128], strides = [1, 1]} : vector<32x128xbf16> to vector<16x128xbf16>
    %151 = tpu.concatenate %142, %143, %144, %145, %146, %147, %148, %149, %150 in 0 : vector<16x128xbf16>, vector<16x128xbf16>, vector<16x128xbf16>, vector<16x128xbf16>, vector<16x128xbf16>, vector<16x128xbf16>, vector<16x128xbf16>, vector<16x128xbf16>, vector<16x128xbf16> -> vector<144x128xbf16>
    %152 = vector.extract_strided_slice %102 {offsets = [16, 0], sizes = [16, 128], strides = [1, 1]} : vector<32x128xbf16> to vector<16x128xbf16>
    %153 = vector.extract_strided_slice %107 {offsets = [16, 0], sizes = [16, 128], strides = [1, 1]} : vector<32x128xbf16> to vector<16x128xbf16>
    %154 = vector.extract_strided_slice %112 {offsets = [16, 0], sizes = [16, 128], strides = [1, 1]} : vector<32x128xbf16> to vector<16x128xbf16>
    %155 = vector.extract_strided_slice %117 {offsets = [16, 0], sizes = [16, 128], strides = [1, 1]} : vector<32x128xbf16> to vector<16x128xbf16>
    %156 = vector.extract_strided_slice %121 {offsets = [16, 0], sizes = [16, 128], strides = [1, 1]} : vector<32x128xbf16> to vector<16x128xbf16>
    %157 = vector.extract_strided_slice %126 {offsets = [16, 0], sizes = [16, 128], strides = [1, 1]} : vector<32x128xbf16> to vector<16x128xbf16>
    %158 = vector.extract_strided_slice %131 {offsets = [16, 0], sizes = [16, 128], strides = [1, 1]} : vector<32x128xbf16> to vector<16x128xbf16>
    %159 = vector.extract_strided_slice %136 {offsets = [16, 0], sizes = [16, 128], strides = [1, 1]} : vector<32x128xbf16> to vector<16x128xbf16>
    %160 = vector.extract_strided_slice %141 {offsets = [16, 0], sizes = [16, 128], strides = [1, 1]} : vector<32x128xbf16> to vector<16x128xbf16>
    %161 = tpu.concatenate %152, %153, %154, %155, %156, %157, %158, %159, %160 in 0 : vector<16x128xbf16>, vector<16x128xbf16>, vector<16x128xbf16>, vector<16x128xbf16>, vector<16x128xbf16>, vector<16x128xbf16>, vector<16x128xbf16>, vector<16x128xbf16>, vector<16x128xbf16> -> vector<144x128xbf16>
    %c0_41 = arith.constant 0 : index
    %c0_42 = arith.constant 0 : index
    %c0_43 = arith.constant 0 : index
    %162 = vector.load %arg8[%c0_41, %c0_42, %c0_43] : memref<3x32x144xbf16, #tpu.memory_space<vmem>>, vector<1x32x144xbf16>
    %163 = vector.shape_cast %162 : vector<1x32x144xbf16> to vector<32x144xbf16>
    %164 = vector.extract_strided_slice %163 {offsets = [0, 0], sizes = [16, 144], strides = [1, 1]} : vector<32x144xbf16> to vector<16x144xbf16>
    %cst_44 = arith.constant dense<0.000000e+00> : vector<16x128xf32>
    %165 = tpu.matmul %164, %151, %cst_44 {dimension_numbers = #tpu.dot_dimension_numbers<[1], [0], [0], [1], [0, 0, 1, 1], [], []>} : vector<16x144xbf16>, vector<144x128xbf16>, vector<16x128xf32> -> vector<16x128xf32>
    %166 = vector.extract_strided_slice %83 {offsets = [0, 0], sizes = [16, 1], strides = [1, 1]} : vector<32x1xf32> to vector<16x1xf32>
    %167 = vector.broadcast %166 : vector<16x1xf32> to vector<16x128xf32>
    %168 = arith.addf %165, %167 : vector<16x128xf32>
    %169 = vector.extract_strided_slice %163 {offsets = [16, 0], sizes = [16, 144], strides = [1, 1]} : vector<32x144xbf16> to vector<16x144xbf16>
    %cst_45 = arith.constant dense<0.000000e+00> : vector<16x128xf32>
    %170 = tpu.matmul %169, %161, %cst_45 {dimension_numbers = #tpu.dot_dimension_numbers<[1], [0], [0], [1], [0, 0, 1, 1], [], []>} : vector<16x144xbf16>, vector<144x128xbf16>, vector<16x128xf32> -> vector<16x128xf32>
    %171 = vector.extract_strided_slice %83 {offsets = [16, 0], sizes = [16, 1], strides = [1, 1]} : vector<32x1xf32> to vector<16x1xf32>
    %172 = vector.broadcast %171 : vector<16x1xf32> to vector<16x128xf32>
    %173 = arith.addf %170, %172 : vector<16x128xf32>
    %174 = math.sin %173 : vector<16x128xf32>
    %175 = arith.mulf %168, %174 : vector<16x128xf32>
    %176 = arith.truncf %175 : vector<16x128xf32> to vector<16x128xbf16>
    %c0_46 = arith.constant 0 : index
    %c0_47 = arith.constant 0 : index
    %c0_48 = arith.constant 0 : index
    %177 = vector.load %arg9[%c0_46, %c0_47, %c0_48] : memref<3x32x16xbf16, #tpu.memory_space<vmem>>, vector<1x32x16xbf16>
    %178 = vector.shape_cast %177 : vector<1x32x16xbf16> to vector<32x16xbf16>
    %cst_49 = arith.constant dense<0.000000e+00> : vector<32x128xf32>
    %179 = tpu.matmul %178, %176, %cst_49 {dimension_numbers = #tpu.dot_dimension_numbers<[1], [0], [0], [1], [0, 0, 1, 1], [], []>} : vector<32x16xbf16>, vector<16x128xbf16>, vector<32x128xf32> -> vector<32x128xf32>
    %180 = arith.addf %78, %179 : vector<32x128xf32>
    %181 = vector.broadcast %85 : vector<32x1xf32> to vector<32x128xf32>
    %182 = arith.addf %180, %181 : vector<32x128xf32>
    %c1_50 = arith.constant 1 : index
    %c0_51 = arith.constant 0 : index
    %c0_52 = arith.constant 0 : index
    %183 = vector.load %arg11[%c1_50, %c0_51, %c0_52] : memref<3x96x1xf32, #tpu.memory_space<vmem>>, vector<1x32x1xf32>
    %184 = vector.shape_cast %183 : vector<1x32x1xf32> to vector<32x1xf32>
    %c1_53 = arith.constant 1 : index
    %c32_54 = arith.constant 32 : index
    %c0_55 = arith.constant 0 : index
    %185 = vector.load %arg11[%c1_53, %c32_54, %c0_55] : memref<3x96x1xf32, #tpu.memory_space<vmem>>, vector<1x32x1xf32>
    %186 = vector.shape_cast %185 : vector<1x32x1xf32> to vector<32x1xf32>
    %c1_56 = arith.constant 1 : index
    %c64_57 = arith.constant 64 : index
    %c0_58 = arith.constant 0 : index
    %187 = vector.load %arg11[%c1_56, %c64_57, %c0_58] : memref<3x96x1xf32, #tpu.memory_space<vmem>>, vector<1x32x1xf32>
    %188 = vector.shape_cast %187 : vector<1x32x1xf32> to vector<32x1xf32>
    %189 = arith.mulf %182, %182 : vector<32x128xf32>
    %190 = arith.truncf %189 : vector<32x128xf32> to vector<32x128xbf16>
    %cst_59 = arith.constant dense<0.000000e+00> : vector<32x128xf32>
    %191 = tpu.matmul %190, %79, %cst_59 {dimension_numbers = #tpu.dot_dimension_numbers<[1], [0], [0], [1], [0, 0, 1, 1], [], []>} : vector<32x128xbf16>, vector<128x128xbf16>, vector<32x128xf32> -> vector<32x128xf32>
    %192 = math.sqrt %191 : vector<32x128xf32>
    %cst_60 = arith.constant 0.353553385 : f32
    %193 = vector.broadcast %cst_60 : f32 to vector<32x128xf32>
    %194 = arith.mulf %192, %193 : vector<32x128xf32>
    %195 = vector.broadcast %184 : vector<32x1xf32> to vector<32x128xf32>
    %196 = arith.mulf %195, %182 : vector<32x128xf32>
    %cst_61 = arith.constant 9.99999993E-9 : f32
    %197 = vector.broadcast %cst_61 : f32 to vector<32x128xf32>
    %198 = arith.addf %194, %197 : vector<32x128xf32>
    %199 = tpu.reciprocal %198 {approx = true} : vector<32x128xf32> -> vector<32x128xf32>
    %200 = arith.mulf %196, %199 : vector<32x128xf32>
    %c9_i32_62 = arith.constant 9 : i32
    %201 = tpu.dynamic_rotate %200 by %c9_i32_62 dim 1 : vector<32x128xf32>, i32 -> vector<32x128xf32>
    %202 = vector.extract_strided_slice %2 {offsets = [0, 0], sizes = [1, 128], strides = [1, 1]} : vector<9x128xf32> to vector<1x128xf32>
    %203 = vector.broadcast %202 : vector<1x128xf32> to vector<32x128xf32>
    %204 = arith.mulf %201, %203 : vector<32x128xf32>
    %205 = arith.truncf %204 : vector<32x128xf32> to vector<32x128xbf16>
    %c8_i32_63 = arith.constant 8 : i32
    %206 = tpu.dynamic_rotate %200 by %c8_i32_63 dim 1 : vector<32x128xf32>, i32 -> vector<32x128xf32>
    %207 = vector.extract_strided_slice %2 {offsets = [1, 0], sizes = [1, 128], strides = [1, 1]} : vector<9x128xf32> to vector<1x128xf32>
    %208 = vector.broadcast %207 : vector<1x128xf32> to vector<32x128xf32>
    %209 = arith.mulf %206, %208 : vector<32x128xf32>
    %210 = arith.truncf %209 : vector<32x128xf32> to vector<32x128xbf16>
    %c7_i32_64 = arith.constant 7 : i32
    %211 = tpu.dynamic_rotate %200 by %c7_i32_64 dim 1 : vector<32x128xf32>, i32 -> vector<32x128xf32>
    %212 = vector.extract_strided_slice %2 {offsets = [2, 0], sizes = [1, 128], strides = [1, 1]} : vector<9x128xf32> to vector<1x128xf32>
    %213 = vector.broadcast %212 : vector<1x128xf32> to vector<32x128xf32>
    %214 = arith.mulf %211, %213 : vector<32x128xf32>
    %215 = arith.truncf %214 : vector<32x128xf32> to vector<32x128xbf16>
    %c1_i32_65 = arith.constant 1 : i32
    %216 = tpu.dynamic_rotate %200 by %c1_i32_65 dim 1 : vector<32x128xf32>, i32 -> vector<32x128xf32>
    %217 = vector.extract_strided_slice %2 {offsets = [3, 0], sizes = [1, 128], strides = [1, 1]} : vector<9x128xf32> to vector<1x128xf32>
    %218 = vector.broadcast %217 : vector<1x128xf32> to vector<32x128xf32>
    %219 = arith.mulf %216, %218 : vector<32x128xf32>
    %220 = arith.truncf %219 : vector<32x128xf32> to vector<32x128xbf16>
    %221 = vector.extract_strided_slice %2 {offsets = [4, 0], sizes = [1, 128], strides = [1, 1]} : vector<9x128xf32> to vector<1x128xf32>
    %222 = vector.broadcast %221 : vector<1x128xf32> to vector<32x128xf32>
    %223 = arith.mulf %200, %222 : vector<32x128xf32>
    %224 = arith.truncf %223 : vector<32x128xf32> to vector<32x128xbf16>
    %c127_i32_66 = arith.constant 127 : i32
    %225 = tpu.dynamic_rotate %200 by %c127_i32_66 dim 1 : vector<32x128xf32>, i32 -> vector<32x128xf32>
    %226 = vector.extract_strided_slice %2 {offsets = [5, 0], sizes = [1, 128], strides = [1, 1]} : vector<9x128xf32> to vector<1x128xf32>
    %227 = vector.broadcast %226 : vector<1x128xf32> to vector<32x128xf32>
    %228 = arith.mulf %225, %227 : vector<32x128xf32>
    %229 = arith.truncf %228 : vector<32x128xf32> to vector<32x128xbf16>
    %c121_i32_67 = arith.constant 121 : i32
    %230 = tpu.dynamic_rotate %200 by %c121_i32_67 dim 1 : vector<32x128xf32>, i32 -> vector<32x128xf32>
    %231 = vector.extract_strided_slice %2 {offsets = [6, 0], sizes = [1, 128], strides = [1, 1]} : vector<9x128xf32> to vector<1x128xf32>
    %232 = vector.broadcast %231 : vector<1x128xf32> to vector<32x128xf32>
    %233 = arith.mulf %230, %232 : vector<32x128xf32>
    %234 = arith.truncf %233 : vector<32x128xf32> to vector<32x128xbf16>
    %c120_i32_68 = arith.constant 120 : i32
    %235 = tpu.dynamic_rotate %200 by %c120_i32_68 dim 1 : vector<32x128xf32>, i32 -> vector<32x128xf32>
    %236 = vector.extract_strided_slice %2 {offsets = [7, 0], sizes = [1, 128], strides = [1, 1]} : vector<9x128xf32> to vector<1x128xf32>
    %237 = vector.broadcast %236 : vector<1x128xf32> to vector<32x128xf32>
    %238 = arith.mulf %235, %237 : vector<32x128xf32>
    %239 = arith.truncf %238 : vector<32x128xf32> to vector<32x128xbf16>
    %c119_i32_69 = arith.constant 119 : i32
    %240 = tpu.dynamic_rotate %200 by %c119_i32_69 dim 1 : vector<32x128xf32>, i32 -> vector<32x128xf32>
    %241 = vector.extract_strided_slice %2 {offsets = [8, 0], sizes = [1, 128], strides = [1, 1]} : vector<9x128xf32> to vector<1x128xf32>
    %242 = vector.broadcast %241 : vector<1x128xf32> to vector<32x128xf32>
    %243 = arith.mulf %240, %242 : vector<32x128xf32>
    %244 = arith.truncf %243 : vector<32x128xf32> to vector<32x128xbf16>
    %245 = vector.extract_strided_slice %205 {offsets = [0, 0], sizes = [16, 128], strides = [1, 1]} : vector<32x128xbf16> to vector<16x128xbf16>
    %246 = vector.extract_strided_slice %210 {offsets = [0, 0], sizes = [16, 128], strides = [1, 1]} : vector<32x128xbf16> to vector<16x128xbf16>
    %247 = vector.extract_strided_slice %215 {offsets = [0, 0], sizes = [16, 128], strides = [1, 1]} : vector<32x128xbf16> to vector<16x128xbf16>
    %248 = vector.extract_strided_slice %220 {offsets = [0, 0], sizes = [16, 128], strides = [1, 1]} : vector<32x128xbf16> to vector<16x128xbf16>
    %249 = vector.extract_strided_slice %224 {offsets = [0, 0], sizes = [16, 128], strides = [1, 1]} : vector<32x128xbf16> to vector<16x128xbf16>
    %250 = vector.extract_strided_slice %229 {offsets = [0, 0], sizes = [16, 128], strides = [1, 1]} : vector<32x128xbf16> to vector<16x128xbf16>
    %251 = vector.extract_strided_slice %234 {offsets = [0, 0], sizes = [16, 128], strides = [1, 1]} : vector<32x128xbf16> to vector<16x128xbf16>
    %252 = vector.extract_strided_slice %239 {offsets = [0, 0], sizes = [16, 128], strides = [1, 1]} : vector<32x128xbf16> to vector<16x128xbf16>
    %253 = vector.extract_strided_slice %244 {offsets = [0, 0], sizes = [16, 128], strides = [1, 1]} : vector<32x128xbf16> to vector<16x128xbf16>
    %254 = tpu.concatenate %245, %246, %247, %248, %249, %250, %251, %252, %253 in 0 : vector<16x128xbf16>, vector<16x128xbf16>, vector<16x128xbf16>, vector<16x128xbf16>, vector<16x128xbf16>, vector<16x128xbf16>, vector<16x128xbf16>, vector<16x128xbf16>, vector<16x128xbf16> -> vector<144x128xbf16>
    %255 = vector.extract_strided_slice %205 {offsets = [16, 0], sizes = [16, 128], strides = [1, 1]} : vector<32x128xbf16> to vector<16x128xbf16>
    %256 = vector.extract_strided_slice %210 {offsets = [16, 0], sizes = [16, 128], strides = [1, 1]} : vector<32x128xbf16> to vector<16x128xbf16>
    %257 = vector.extract_strided_slice %215 {offsets = [16, 0], sizes = [16, 128], strides = [1, 1]} : vector<32x128xbf16> to vector<16x128xbf16>
    %258 = vector.extract_strided_slice %220 {offsets = [16, 0], sizes = [16, 128], strides = [1, 1]} : vector<32x128xbf16> to vector<16x128xbf16>
    %259 = vector.extract_strided_slice %224 {offsets = [16, 0], sizes = [16, 128], strides = [1, 1]} : vector<32x128xbf16> to vector<16x128xbf16>
    %260 = vector.extract_strided_slice %229 {offsets = [16, 0], sizes = [16, 128], strides = [1, 1]} : vector<32x128xbf16> to vector<16x128xbf16>
    %261 = vector.extract_strided_slice %234 {offsets = [16, 0], sizes = [16, 128], strides = [1, 1]} : vector<32x128xbf16> to vector<16x128xbf16>
    %262 = vector.extract_strided_slice %239 {offsets = [16, 0], sizes = [16, 128], strides = [1, 1]} : vector<32x128xbf16> to vector<16x128xbf16>
    %263 = vector.extract_strided_slice %244 {offsets = [16, 0], sizes = [16, 128], strides = [1, 1]} : vector<32x128xbf16> to vector<16x128xbf16>
    %264 = tpu.concatenate %255, %256, %257, %258, %259, %260, %261, %262, %263 in 0 : vector<16x128xbf16>, vector<16x128xbf16>, vector<16x128xbf16>, vector<16x128xbf16>, vector<16x128xbf16>, vector<16x128xbf16>, vector<16x128xbf16>, vector<16x128xbf16>, vector<16x128xbf16> -> vector<144x128xbf16>
    %c1_70 = arith.constant 1 : index
    %c0_71 = arith.constant 0 : index
    %c0_72 = arith.constant 0 : index
    %265 = vector.load %arg8[%c1_70, %c0_71, %c0_72] : memref<3x32x144xbf16, #tpu.memory_space<vmem>>, vector<1x32x144xbf16>
    %266 = vector.shape_cast %265 : vector<1x32x144xbf16> to vector<32x144xbf16>
    %267 = vector.extract_strided_slice %266 {offsets = [0, 0], sizes = [16, 144], strides = [1, 1]} : vector<32x144xbf16> to vector<16x144xbf16>
    %cst_73 = arith.constant dense<0.000000e+00> : vector<16x128xf32>
    %268 = tpu.matmul %267, %254, %cst_73 {dimension_numbers = #tpu.dot_dimension_numbers<[1], [0], [0], [1], [0, 0, 1, 1], [], []>} : vector<16x144xbf16>, vector<144x128xbf16>, vector<16x128xf32> -> vector<16x128xf32>
    %269 = vector.extract_strided_slice %186 {offsets = [0, 0], sizes = [16, 1], strides = [1, 1]} : vector<32x1xf32> to vector<16x1xf32>
    %270 = vector.broadcast %269 : vector<16x1xf32> to vector<16x128xf32>
    %271 = arith.addf %268, %270 : vector<16x128xf32>
    %272 = vector.extract_strided_slice %266 {offsets = [16, 0], sizes = [16, 144], strides = [1, 1]} : vector<32x144xbf16> to vector<16x144xbf16>
    %cst_74 = arith.constant dense<0.000000e+00> : vector<16x128xf32>
    %273 = tpu.matmul %272, %264, %cst_74 {dimension_numbers = #tpu.dot_dimension_numbers<[1], [0], [0], [1], [0, 0, 1, 1], [], []>} : vector<16x144xbf16>, vector<144x128xbf16>, vector<16x128xf32> -> vector<16x128xf32>
    %274 = vector.extract_strided_slice %186 {offsets = [16, 0], sizes = [16, 1], strides = [1, 1]} : vector<32x1xf32> to vector<16x1xf32>
    %275 = vector.broadcast %274 : vector<16x1xf32> to vector<16x128xf32>
    %276 = arith.addf %273, %275 : vector<16x128xf32>
    %277 = math.sin %276 : vector<16x128xf32>
    %278 = arith.mulf %271, %277 : vector<16x128xf32>
    %279 = arith.truncf %278 : vector<16x128xf32> to vector<16x128xbf16>
    %c1_75 = arith.constant 1 : index
    %c0_76 = arith.constant 0 : index
    %c0_77 = arith.constant 0 : index
    %280 = vector.load %arg9[%c1_75, %c0_76, %c0_77] : memref<3x32x16xbf16, #tpu.memory_space<vmem>>, vector<1x32x16xbf16>
    %281 = vector.shape_cast %280 : vector<1x32x16xbf16> to vector<32x16xbf16>
    %cst_78 = arith.constant dense<0.000000e+00> : vector<32x128xf32>
    %282 = tpu.matmul %281, %279, %cst_78 {dimension_numbers = #tpu.dot_dimension_numbers<[1], [0], [0], [1], [0, 0, 1, 1], [], []>} : vector<32x16xbf16>, vector<16x128xbf16>, vector<32x128xf32> -> vector<32x128xf32>
    %283 = arith.addf %182, %282 : vector<32x128xf32>
    %284 = vector.broadcast %188 : vector<32x1xf32> to vector<32x128xf32>
    %285 = arith.addf %283, %284 : vector<32x128xf32>
    %c2_79 = arith.constant 2 : index
    %c0_80 = arith.constant 0 : index
    %c0_81 = arith.constant 0 : index
    %286 = vector.load %arg11[%c2_79, %c0_80, %c0_81] : memref<3x96x1xf32, #tpu.memory_space<vmem>>, vector<1x32x1xf32>
    %287 = vector.shape_cast %286 : vector<1x32x1xf32> to vector<32x1xf32>
    %c2_82 = arith.constant 2 : index
    %c32_83 = arith.constant 32 : index
    %c0_84 = arith.constant 0 : index
    %288 = vector.load %arg11[%c2_82, %c32_83, %c0_84] : memref<3x96x1xf32, #tpu.memory_space<vmem>>, vector<1x32x1xf32>
    %289 = vector.shape_cast %288 : vector<1x32x1xf32> to vector<32x1xf32>
    %c2_85 = arith.constant 2 : index
    %c64_86 = arith.constant 64 : index
    %c0_87 = arith.constant 0 : index
    %290 = vector.load %arg11[%c2_85, %c64_86, %c0_87] : memref<3x96x1xf32, #tpu.memory_space<vmem>>, vector<1x32x1xf32>
    %291 = vector.shape_cast %290 : vector<1x32x1xf32> to vector<32x1xf32>
    %292 = arith.mulf %285, %285 : vector<32x128xf32>
    %293 = arith.truncf %292 : vector<32x128xf32> to vector<32x128xbf16>
    %cst_88 = arith.constant dense<0.000000e+00> : vector<32x128xf32>
    %294 = tpu.matmul %293, %79, %cst_88 {dimension_numbers = #tpu.dot_dimension_numbers<[1], [0], [0], [1], [0, 0, 1, 1], [], []>} : vector<32x128xbf16>, vector<128x128xbf16>, vector<32x128xf32> -> vector<32x128xf32>
    %295 = math.sqrt %294 : vector<32x128xf32>
    %cst_89 = arith.constant 0.353553385 : f32
    %296 = vector.broadcast %cst_89 : f32 to vector<32x128xf32>
    %297 = arith.mulf %295, %296 : vector<32x128xf32>
    %298 = vector.broadcast %287 : vector<32x1xf32> to vector<32x128xf32>
    %299 = arith.mulf %298, %285 : vector<32x128xf32>
    %cst_90 = arith.constant 9.99999993E-9 : f32
    %300 = vector.broadcast %cst_90 : f32 to vector<32x128xf32>
    %301 = arith.addf %297, %300 : vector<32x128xf32>
    %302 = tpu.reciprocal %301 {approx = true} : vector<32x128xf32> -> vector<32x128xf32>
    %303 = arith.mulf %299, %302 : vector<32x128xf32>
    %c9_i32_91 = arith.constant 9 : i32
    %304 = tpu.dynamic_rotate %303 by %c9_i32_91 dim 1 : vector<32x128xf32>, i32 -> vector<32x128xf32>
    %305 = vector.extract_strided_slice %2 {offsets = [0, 0], sizes = [1, 128], strides = [1, 1]} : vector<9x128xf32> to vector<1x128xf32>
    %306 = vector.broadcast %305 : vector<1x128xf32> to vector<32x128xf32>
    %307 = arith.mulf %304, %306 : vector<32x128xf32>
    %308 = arith.truncf %307 : vector<32x128xf32> to vector<32x128xbf16>
    %c8_i32_92 = arith.constant 8 : i32
    %309 = tpu.dynamic_rotate %303 by %c8_i32_92 dim 1 : vector<32x128xf32>, i32 -> vector<32x128xf32>
    %310 = vector.extract_strided_slice %2 {offsets = [1, 0], sizes = [1, 128], strides = [1, 1]} : vector<9x128xf32> to vector<1x128xf32>
    %311 = vector.broadcast %310 : vector<1x128xf32> to vector<32x128xf32>
    %312 = arith.mulf %309, %311 : vector<32x128xf32>
    %313 = arith.truncf %312 : vector<32x128xf32> to vector<32x128xbf16>
    %c7_i32_93 = arith.constant 7 : i32
    %314 = tpu.dynamic_rotate %303 by %c7_i32_93 dim 1 : vector<32x128xf32>, i32 -> vector<32x128xf32>
    %315 = vector.extract_strided_slice %2 {offsets = [2, 0], sizes = [1, 128], strides = [1, 1]} : vector<9x128xf32> to vector<1x128xf32>
    %316 = vector.broadcast %315 : vector<1x128xf32> to vector<32x128xf32>
    %317 = arith.mulf %314, %316 : vector<32x128xf32>
    %318 = arith.truncf %317 : vector<32x128xf32> to vector<32x128xbf16>
    %c1_i32_94 = arith.constant 1 : i32
    %319 = tpu.dynamic_rotate %303 by %c1_i32_94 dim 1 : vector<32x128xf32>, i32 -> vector<32x128xf32>
    %320 = vector.extract_strided_slice %2 {offsets = [3, 0], sizes = [1, 128], strides = [1, 1]} : vector<9x128xf32> to vector<1x128xf32>
    %321 = vector.broadcast %320 : vector<1x128xf32> to vector<32x128xf32>
    %322 = arith.mulf %319, %321 : vector<32x128xf32>
    %323 = arith.truncf %322 : vector<32x128xf32> to vector<32x128xbf16>
    %324 = vector.extract_strided_slice %2 {offsets = [4, 0], sizes = [1, 128], strides = [1, 1]} : vector<9x128xf32> to vector<1x128xf32>
    %325 = vector.broadcast %324 : vector<1x128xf32> to vector<32x128xf32>
    %326 = arith.mulf %303, %325 : vector<32x128xf32>
    %327 = arith.truncf %326 : vector<32x128xf32> to vector<32x128xbf16>
    %c127_i32_95 = arith.constant 127 : i32
    %328 = tpu.dynamic_rotate %303 by %c127_i32_95 dim 1 : vector<32x128xf32>, i32 -> vector<32x128xf32>
    %329 = vector.extract_strided_slice %2 {offsets = [5, 0], sizes = [1, 128], strides = [1, 1]} : vector<9x128xf32> to vector<1x128xf32>
    %330 = vector.broadcast %329 : vector<1x128xf32> to vector<32x128xf32>
    %331 = arith.mulf %328, %330 : vector<32x128xf32>
    %332 = arith.truncf %331 : vector<32x128xf32> to vector<32x128xbf16>
    %c121_i32_96 = arith.constant 121 : i32
    %333 = tpu.dynamic_rotate %303 by %c121_i32_96 dim 1 : vector<32x128xf32>, i32 -> vector<32x128xf32>
    %334 = vector.extract_strided_slice %2 {offsets = [6, 0], sizes = [1, 128], strides = [1, 1]} : vector<9x128xf32> to vector<1x128xf32>
    %335 = vector.broadcast %334 : vector<1x128xf32> to vector<32x128xf32>
    %336 = arith.mulf %333, %335 : vector<32x128xf32>
    %337 = arith.truncf %336 : vector<32x128xf32> to vector<32x128xbf16>
    %c120_i32_97 = arith.constant 120 : i32
    %338 = tpu.dynamic_rotate %303 by %c120_i32_97 dim 1 : vector<32x128xf32>, i32 -> vector<32x128xf32>
    %339 = vector.extract_strided_slice %2 {offsets = [7, 0], sizes = [1, 128], strides = [1, 1]} : vector<9x128xf32> to vector<1x128xf32>
    %340 = vector.broadcast %339 : vector<1x128xf32> to vector<32x128xf32>
    %341 = arith.mulf %338, %340 : vector<32x128xf32>
    %342 = arith.truncf %341 : vector<32x128xf32> to vector<32x128xbf16>
    %c119_i32_98 = arith.constant 119 : i32
    %343 = tpu.dynamic_rotate %303 by %c119_i32_98 dim 1 : vector<32x128xf32>, i32 -> vector<32x128xf32>
    %344 = vector.extract_strided_slice %2 {offsets = [8, 0], sizes = [1, 128], strides = [1, 1]} : vector<9x128xf32> to vector<1x128xf32>
    %345 = vector.broadcast %344 : vector<1x128xf32> to vector<32x128xf32>
    %346 = arith.mulf %343, %345 : vector<32x128xf32>
    %347 = arith.truncf %346 : vector<32x128xf32> to vector<32x128xbf16>
    %348 = vector.extract_strided_slice %308 {offsets = [0, 0], sizes = [16, 128], strides = [1, 1]} : vector<32x128xbf16> to vector<16x128xbf16>
    %349 = vector.extract_strided_slice %313 {offsets = [0, 0], sizes = [16, 128], strides = [1, 1]} : vector<32x128xbf16> to vector<16x128xbf16>
    %350 = vector.extract_strided_slice %318 {offsets = [0, 0], sizes = [16, 128], strides = [1, 1]} : vector<32x128xbf16> to vector<16x128xbf16>
    %351 = vector.extract_strided_slice %323 {offsets = [0, 0], sizes = [16, 128], strides = [1, 1]} : vector<32x128xbf16> to vector<16x128xbf16>
    %352 = vector.extract_strided_slice %327 {offsets = [0, 0], sizes = [16, 128], strides = [1, 1]} : vector<32x128xbf16> to vector<16x128xbf16>
    %353 = vector.extract_strided_slice %332 {offsets = [0, 0], sizes = [16, 128], strides = [1, 1]} : vector<32x128xbf16> to vector<16x128xbf16>
    %354 = vector.extract_strided_slice %337 {offsets = [0, 0], sizes = [16, 128], strides = [1, 1]} : vector<32x128xbf16> to vector<16x128xbf16>
    %355 = vector.extract_strided_slice %342 {offsets = [0, 0], sizes = [16, 128], strides = [1, 1]} : vector<32x128xbf16> to vector<16x128xbf16>
    %356 = vector.extract_strided_slice %347 {offsets = [0, 0], sizes = [16, 128], strides = [1, 1]} : vector<32x128xbf16> to vector<16x128xbf16>
    %357 = tpu.concatenate %348, %349, %350, %351, %352, %353, %354, %355, %356 in 0 : vector<16x128xbf16>, vector<16x128xbf16>, vector<16x128xbf16>, vector<16x128xbf16>, vector<16x128xbf16>, vector<16x128xbf16>, vector<16x128xbf16>, vector<16x128xbf16>, vector<16x128xbf16> -> vector<144x128xbf16>
    %358 = vector.extract_strided_slice %308 {offsets = [16, 0], sizes = [16, 128], strides = [1, 1]} : vector<32x128xbf16> to vector<16x128xbf16>
    %359 = vector.extract_strided_slice %313 {offsets = [16, 0], sizes = [16, 128], strides = [1, 1]} : vector<32x128xbf16> to vector<16x128xbf16>
    %360 = vector.extract_strided_slice %318 {offsets = [16, 0], sizes = [16, 128], strides = [1, 1]} : vector<32x128xbf16> to vector<16x128xbf16>
    %361 = vector.extract_strided_slice %323 {offsets = [16, 0], sizes = [16, 128], strides = [1, 1]} : vector<32x128xbf16> to vector<16x128xbf16>
    %362 = vector.extract_strided_slice %327 {offsets = [16, 0], sizes = [16, 128], strides = [1, 1]} : vector<32x128xbf16> to vector<16x128xbf16>
    %363 = vector.extract_strided_slice %332 {offsets = [16, 0], sizes = [16, 128], strides = [1, 1]} : vector<32x128xbf16> to vector<16x128xbf16>
    %364 = vector.extract_strided_slice %337 {offsets = [16, 0], sizes = [16, 128], strides = [1, 1]} : vector<32x128xbf16> to vector<16x128xbf16>
    %365 = vector.extract_strided_slice %342 {offsets = [16, 0], sizes = [16, 128], strides = [1, 1]} : vector<32x128xbf16> to vector<16x128xbf16>
    %366 = vector.extract_strided_slice %347 {offsets = [16, 0], sizes = [16, 128], strides = [1, 1]} : vector<32x128xbf16> to vector<16x128xbf16>
    %367 = tpu.concatenate %358, %359, %360, %361, %362, %363, %364, %365, %366 in 0 : vector<16x128xbf16>, vector<16x128xbf16>, vector<16x128xbf16>, vector<16x128xbf16>, vector<16x128xbf16>, vector<16x128xbf16>, vector<16x128xbf16>, vector<16x128xbf16>, vector<16x128xbf16> -> vector<144x128xbf16>
    %c2_99 = arith.constant 2 : index
    %c0_100 = arith.constant 0 : index
    %c0_101 = arith.constant 0 : index
    %368 = vector.load %arg8[%c2_99, %c0_100, %c0_101] : memref<3x32x144xbf16, #tpu.memory_space<vmem>>, vector<1x32x144xbf16>
    %369 = vector.shape_cast %368 : vector<1x32x144xbf16> to vector<32x144xbf16>
    %370 = vector.extract_strided_slice %369 {offsets = [0, 0], sizes = [16, 144], strides = [1, 1]} : vector<32x144xbf16> to vector<16x144xbf16>
    %cst_102 = arith.constant dense<0.000000e+00> : vector<16x128xf32>
    %371 = tpu.matmul %370, %357, %cst_102 {dimension_numbers = #tpu.dot_dimension_numbers<[1], [0], [0], [1], [0, 0, 1, 1], [], []>} : vector<16x144xbf16>, vector<144x128xbf16>, vector<16x128xf32> -> vector<16x128xf32>
    %372 = vector.extract_strided_slice %289 {offsets = [0, 0], sizes = [16, 1], strides = [1, 1]} : vector<32x1xf32> to vector<16x1xf32>
    %373 = vector.broadcast %372 : vector<16x1xf32> to vector<16x128xf32>
    %374 = arith.addf %371, %373 : vector<16x128xf32>
    %375 = vector.extract_strided_slice %369 {offsets = [16, 0], sizes = [16, 144], strides = [1, 1]} : vector<32x144xbf16> to vector<16x144xbf16>
    %cst_103 = arith.constant dense<0.000000e+00> : vector<16x128xf32>
    %376 = tpu.matmul %375, %367, %cst_103 {dimension_numbers = #tpu.dot_dimension_numbers<[1], [0], [0], [1], [0, 0, 1, 1], [], []>} : vector<16x144xbf16>, vector<144x128xbf16>, vector<16x128xf32> -> vector<16x128xf32>
    %377 = vector.extract_strided_slice %289 {offsets = [16, 0], sizes = [16, 1], strides = [1, 1]} : vector<32x1xf32> to vector<16x1xf32>
    %378 = vector.broadcast %377 : vector<16x1xf32> to vector<16x128xf32>
    %379 = arith.addf %376, %378 : vector<16x128xf32>
    %380 = math.sin %379 : vector<16x128xf32>
    %381 = arith.mulf %374, %380 : vector<16x128xf32>
    %382 = arith.truncf %381 : vector<16x128xf32> to vector<16x128xbf16>
    %c2_104 = arith.constant 2 : index
    %c0_105 = arith.constant 0 : index
    %c0_106 = arith.constant 0 : index
    %383 = vector.load %arg9[%c2_104, %c0_105, %c0_106] : memref<3x32x16xbf16, #tpu.memory_space<vmem>>, vector<1x32x16xbf16>
    %384 = vector.shape_cast %383 : vector<1x32x16xbf16> to vector<32x16xbf16>
    %cst_107 = arith.constant dense<0.000000e+00> : vector<32x128xf32>
    %385 = tpu.matmul %384, %382, %cst_107 {dimension_numbers = #tpu.dot_dimension_numbers<[1], [0], [0], [1], [0, 0, 1, 1], [], []>} : vector<32x16xbf16>, vector<16x128xbf16>, vector<32x128xf32> -> vector<32x128xf32>
    %386 = arith.addf %285, %385 : vector<32x128xf32>
    %387 = vector.broadcast %291 : vector<32x1xf32> to vector<32x128xf32>
    %388 = arith.addf %386, %387 : vector<32x128xf32>
    %389 = arith.truncf %388 : vector<32x128xf32> to vector<32x128xbf16>
    %cst_108 = arith.constant dense<0.000000e+00> : vector<8x128xf32>
    %390 = tpu.matmul %10, %389, %cst_108 {dimension_numbers = #tpu.dot_dimension_numbers<[1], [0], [0], [1], [0, 0, 1, 1], [], []>} : vector<8x32xbf16>, vector<32x128xbf16>, vector<8x128xf32> -> vector<8x128xf32>
    %391 = arith.truncf %390 : vector<8x128xf32> to vector<8x128xbf16>
    %392 = vector.extract_strided_slice %391 {offsets = [0, 0], sizes = [2, 128], strides = [1, 1]} : vector<8x128xbf16> to vector<2x128xbf16>
    %c0_109 = arith.constant 0 : index
    %c0_110 = arith.constant 0 : index
    %c0_111 = arith.constant 0 : index
    %393 = vector.load %arg6[%c0_109, %c0_110, %c0_111] : memref<4x128x512xbf16, #tpu.memory_space<vmem>>, vector<1x128x512xbf16>
    %394 = vector.shape_cast %393 : vector<1x128x512xbf16> to vector<128x512xbf16>
    %cst_112 = arith.constant dense<0.000000e+00> : vector<2x512xf32>
    %395 = tpu.matmul %392, %394, %cst_112 {dimension_numbers = #tpu.dot_dimension_numbers<[1], [0], [0], [1], [0, 0, 1, 1], [], []>} : vector<2x128xbf16>, vector<128x512xbf16>, vector<2x512xf32> -> vector<2x512xf32>
    %396 = vector.extract_strided_slice %391 {offsets = [2, 0], sizes = [2, 128], strides = [1, 1]} : vector<8x128xbf16> to vector<2x128xbf16>
    %c1_113 = arith.constant 1 : index
    %c0_114 = arith.constant 0 : index
    %c0_115 = arith.constant 0 : index
    %397 = vector.load %arg6[%c1_113, %c0_114, %c0_115] : memref<4x128x512xbf16, #tpu.memory_space<vmem>>, vector<1x128x512xbf16>
    %398 = vector.shape_cast %397 : vector<1x128x512xbf16> to vector<128x512xbf16>
    %cst_116 = arith.constant dense<0.000000e+00> : vector<2x512xf32>
    %399 = tpu.matmul %396, %398, %cst_116 {dimension_numbers = #tpu.dot_dimension_numbers<[1], [0], [0], [1], [0, 0, 1, 1], [], []>} : vector<2x128xbf16>, vector<128x512xbf16>, vector<2x512xf32> -> vector<2x512xf32>
    %400 = arith.addf %395, %399 : vector<2x512xf32>
    %401 = vector.extract_strided_slice %391 {offsets = [4, 0], sizes = [2, 128], strides = [1, 1]} : vector<8x128xbf16> to vector<2x128xbf16>
    %c2_117 = arith.constant 2 : index
    %c0_118 = arith.constant 0 : index
    %c0_119 = arith.constant 0 : index
    %402 = vector.load %arg6[%c2_117, %c0_118, %c0_119] : memref<4x128x512xbf16, #tpu.memory_space<vmem>>, vector<1x128x512xbf16>
    %403 = vector.shape_cast %402 : vector<1x128x512xbf16> to vector<128x512xbf16>
    %cst_120 = arith.constant dense<0.000000e+00> : vector<2x512xf32>
    %404 = tpu.matmul %401, %403, %cst_120 {dimension_numbers = #tpu.dot_dimension_numbers<[1], [0], [0], [1], [0, 0, 1, 1], [], []>} : vector<2x128xbf16>, vector<128x512xbf16>, vector<2x512xf32> -> vector<2x512xf32>
    %405 = arith.addf %400, %404 : vector<2x512xf32>
    %406 = vector.extract_strided_slice %391 {offsets = [6, 0], sizes = [2, 128], strides = [1, 1]} : vector<8x128xbf16> to vector<2x128xbf16>
    %c3_121 = arith.constant 3 : index
    %c0_122 = arith.constant 0 : index
    %c0_123 = arith.constant 0 : index
    %407 = vector.load %arg6[%c3_121, %c0_122, %c0_123] : memref<4x128x512xbf16, #tpu.memory_space<vmem>>, vector<1x128x512xbf16>
    %408 = vector.shape_cast %407 : vector<1x128x512xbf16> to vector<128x512xbf16>
    %cst_124 = arith.constant dense<0.000000e+00> : vector<2x512xf32>
    %409 = tpu.matmul %406, %408, %cst_124 {dimension_numbers = #tpu.dot_dimension_numbers<[1], [0], [0], [1], [0, 0, 1, 1], [], []>} : vector<2x128xbf16>, vector<128x512xbf16>, vector<2x512xf32> -> vector<2x512xf32>
    %410 = arith.addf %405, %409 : vector<2x512xf32>
    %411 = vector.broadcast %5 : vector<2x1xf32> to vector<2x512xf32>
    %412 = arith.addf %410, %411 : vector<2x512xf32>
    %c0_125 = arith.constant 0 : index
    %c0_126 = arith.constant 0 : index
    %413 = vector.load %arg3[%c0_125, %c0_126] : memref<512x512xbf16, #tpu.memory_space<vmem>>, vector<512x512xbf16>
    %414 = arith.mulf %412, %412 : vector<2x512xf32>
    %415 = arith.truncf %414 : vector<2x512xf32> to vector<2x512xbf16>
    %cst_127 = arith.constant dense<0.000000e+00> : vector<2x512xf32>
    %416 = tpu.matmul %415, %413, %cst_127 {dimension_numbers = #tpu.dot_dimension_numbers<[1], [0], [0], [1], [0, 0, 1, 1], [], []>} : vector<2x512xbf16>, vector<512x512xbf16>, vector<2x512xf32> -> vector<2x512xf32>
    %417 = math.sqrt %416 : vector<2x512xf32>
    %cst_128 = arith.constant 2.500000e-01 : f32
    %418 = vector.broadcast %cst_128 : f32 to vector<2x512xf32>
    %419 = arith.mulf %417, %418 : vector<2x512xf32>
    %420 = vector.broadcast %6 : vector<2x1xf32> to vector<2x512xf32>
    %421 = arith.mulf %420, %412 : vector<2x512xf32>
    %cst_129 = arith.constant 9.99999993E-9 : f32
    %422 = vector.broadcast %cst_129 : f32 to vector<2x512xf32>
    %423 = arith.addf %419, %422 : vector<2x512xf32>
    %424 = tpu.reciprocal %423 {approx = true} : vector<2x512xf32> -> vector<2x512xf32>
    %425 = arith.mulf %421, %424 : vector<2x512xf32>
    %c17_i32_130 = arith.constant 17 : i32
    %426 = tpu.dynamic_rotate %425 by %c17_i32_130 dim 1 : vector<2x512xf32>, i32 -> vector<2x512xf32>
    %427 = vector.extract_strided_slice %1 {offsets = [0, 0], sizes = [1, 512], strides = [1, 1]} : vector<9x512xf32> to vector<1x512xf32>
    %428 = vector.broadcast %427 : vector<1x512xf32> to vector<2x512xf32>
    %429 = arith.mulf %426, %428 : vector<2x512xf32>
    %430 = arith.truncf %429 : vector<2x512xf32> to vector<2x512xbf16>
    %c16_i32_131 = arith.constant 16 : i32
    %431 = tpu.dynamic_rotate %425 by %c16_i32_131 dim 1 : vector<2x512xf32>, i32 -> vector<2x512xf32>
    %432 = vector.extract_strided_slice %1 {offsets = [1, 0], sizes = [1, 512], strides = [1, 1]} : vector<9x512xf32> to vector<1x512xf32>
    %433 = vector.broadcast %432 : vector<1x512xf32> to vector<2x512xf32>
    %434 = arith.mulf %431, %433 : vector<2x512xf32>
    %435 = arith.truncf %434 : vector<2x512xf32> to vector<2x512xbf16>
    %c15_i32_132 = arith.constant 15 : i32
    %436 = tpu.dynamic_rotate %425 by %c15_i32_132 dim 1 : vector<2x512xf32>, i32 -> vector<2x512xf32>
    %437 = vector.extract_strided_slice %1 {offsets = [2, 0], sizes = [1, 512], strides = [1, 1]} : vector<9x512xf32> to vector<1x512xf32>
    %438 = vector.broadcast %437 : vector<1x512xf32> to vector<2x512xf32>
    %439 = arith.mulf %436, %438 : vector<2x512xf32>
    %440 = arith.truncf %439 : vector<2x512xf32> to vector<2x512xbf16>
    %c1_i32_133 = arith.constant 1 : i32
    %441 = tpu.dynamic_rotate %425 by %c1_i32_133 dim 1 : vector<2x512xf32>, i32 -> vector<2x512xf32>
    %442 = vector.extract_strided_slice %1 {offsets = [3, 0], sizes = [1, 512], strides = [1, 1]} : vector<9x512xf32> to vector<1x512xf32>
    %443 = vector.broadcast %442 : vector<1x512xf32> to vector<2x512xf32>
    %444 = arith.mulf %441, %443 : vector<2x512xf32>
    %445 = arith.truncf %444 : vector<2x512xf32> to vector<2x512xbf16>
    %446 = vector.extract_strided_slice %1 {offsets = [4, 0], sizes = [1, 512], strides = [1, 1]} : vector<9x512xf32> to vector<1x512xf32>
    %447 = vector.broadcast %446 : vector<1x512xf32> to vector<2x512xf32>
    %448 = arith.mulf %425, %447 : vector<2x512xf32>
    %449 = arith.truncf %448 : vector<2x512xf32> to vector<2x512xbf16>
    %c511_i32_134 = arith.constant 511 : i32
    %450 = tpu.dynamic_rotate %425 by %c511_i32_134 dim 1 : vector<2x512xf32>, i32 -> vector<2x512xf32>
    %451 = vector.extract_strided_slice %1 {offsets = [5, 0], sizes = [1, 512], strides = [1, 1]} : vector<9x512xf32> to vector<1x512xf32>
    %452 = vector.broadcast %451 : vector<1x512xf32> to vector<2x512xf32>
    %453 = arith.mulf %450, %452 : vector<2x512xf32>
    %454 = arith.truncf %453 : vector<2x512xf32> to vector<2x512xbf16>
    %c497_i32_135 = arith.constant 497 : i32
    %455 = tpu.dynamic_rotate %425 by %c497_i32_135 dim 1 : vector<2x512xf32>, i32 -> vector<2x512xf32>
    %456 = vector.extract_strided_slice %1 {offsets = [6, 0], sizes = [1, 512], strides = [1, 1]} : vector<9x512xf32> to vector<1x512xf32>
    %457 = vector.broadcast %456 : vector<1x512xf32> to vector<2x512xf32>
    %458 = arith.mulf %455, %457 : vector<2x512xf32>
    %459 = arith.truncf %458 : vector<2x512xf32> to vector<2x512xbf16>
    %c496_i32_136 = arith.constant 496 : i32
    %460 = tpu.dynamic_rotate %425 by %c496_i32_136 dim 1 : vector<2x512xf32>, i32 -> vector<2x512xf32>
    %461 = vector.extract_strided_slice %1 {offsets = [7, 0], sizes = [1, 512], strides = [1, 1]} : vector<9x512xf32> to vector<1x512xf32>
    %462 = vector.broadcast %461 : vector<1x512xf32> to vector<2x512xf32>
    %463 = arith.mulf %460, %462 : vector<2x512xf32>
    %464 = arith.truncf %463 : vector<2x512xf32> to vector<2x512xbf16>
    %c495_i32_137 = arith.constant 495 : i32
    %465 = tpu.dynamic_rotate %425 by %c495_i32_137 dim 1 : vector<2x512xf32>, i32 -> vector<2x512xf32>
    %466 = vector.extract_strided_slice %1 {offsets = [8, 0], sizes = [1, 512], strides = [1, 1]} : vector<9x512xf32> to vector<1x512xf32>
    %467 = vector.broadcast %466 : vector<1x512xf32> to vector<2x512xf32>
    %468 = arith.mulf %465, %467 : vector<2x512xf32>
    %469 = arith.truncf %468 : vector<2x512xf32> to vector<2x512xbf16>
    %470 = tpu.concatenate %430, %435, %440, %445, %449, %454, %459, %464, %469 in 0 : vector<2x512xbf16>, vector<2x512xbf16>, vector<2x512xbf16>, vector<2x512xbf16>, vector<2x512xbf16>, vector<2x512xbf16>, vector<2x512xbf16>, vector<2x512xbf16>, vector<2x512xbf16> -> vector<18x512xbf16>
    %cst_138 = arith.constant dense<0.000000e+00> : vector<4x512xf32>
    %471 = tpu.matmul %11, %470, %cst_138 {dimension_numbers = #tpu.dot_dimension_numbers<[1], [0], [0], [1], [0, 0, 1, 1], [], []>} : vector<4x18xbf16>, vector<18x512xbf16>, vector<4x512xf32> -> vector<4x512xf32>
    %472 = vector.broadcast %7 : vector<4x1xf32> to vector<4x512xf32>
    %473 = arith.addf %471, %472 : vector<4x512xf32>
    %474 = math.tanh %473 : vector<4x512xf32>
    %c0_139 = arith.constant 0 : index
    %c0_140 = arith.constant 0 : index
    %475 = vector.load %arg12[%c0_139, %c0_140] : memref<4x512xf32, #tpu.memory_space<vmem>>, vector<4x512xf32>
    tpu.vector_store %arg12[%c0_139, %c0_140], %474 {strides = array<i32>} : memref<4x512xf32, #tpu.memory_space<vmem>>, vector<4x512xf32>,
    return
  }
  func.func @transform_0(%arg0: i32) -> (i32, i32) {
    %c0_i32 = arith.constant 0 : i32
    %c0_i32_0 = arith.constant 0 : i32
    %c0_i32_1 = arith.constant 0 : i32
    return %c0_i32, %c0_i32_0 : i32, i32
  }
  func.func @transform_1(%arg0: i32) -> (i32, i32) {
    %c0_i32 = arith.constant 0 : i32
    %c0_i32_0 = arith.constant 0 : i32
    %c0_i32_1 = arith.constant 0 : i32
    return %c0_i32, %c0_i32_0 : i32, i32
  }
  func.func @transform_2(%arg0: i32) -> (i32, i32) {
    %c0_i32 = arith.constant 0 : i32
    %c0_i32_0 = arith.constant 0 : i32
    %c0_i32_1 = arith.constant 0 : i32
    return %c0_i32, %c0_i32_0 : i32, i32
  }
  func.func @transform_3(%arg0: i32) -> (i32, i32) {
    %c0_i32 = arith.constant 0 : i32
    %c0_i32_0 = arith.constant 0 : i32
    %c0_i32_1 = arith.constant 0 : i32
    return %c0_i32, %c0_i32_0 : i32, i32
  }
  func.func @transform_4(%arg0: i32) -> (i32, i32, i32) {
    %c0_i32 = arith.constant 0 : i32
    %c0_i32_0 = arith.constant 0 : i32
    %c0_i32_1 = arith.constant 0 : i32
    %c0_i32_2 = arith.constant 0 : i32
    return %c0_i32, %c0_i32_0, %c0_i32_1 : i32, i32, i32
  }
  func.func @transform_5(%arg0: i32) -> (i32, i32, i32) {
    %c0_i32 = arith.constant 0 : i32
    %c0_i32_0 = arith.constant 0 : i32
    %c0_i32_1 = arith.constant 0 : i32
    %c0_i32_2 = arith.constant 0 : i32
    return %c0_i32, %c0_i32_0, %c0_i32_1 : i32, i32, i32
  }
  func.func @transform_6(%arg0: i32) -> (i32, i32) {
    %c0_i32 = arith.constant 0 : i32
    %c0_i32_0 = arith.constant 0 : i32
    %c0_i32_1 = arith.constant 0 : i32
    return %c0_i32, %c0_i32_0 : i32, i32
  }
  func.func @transform_7(%arg0: i32) -> (i32, i32, i32) {
    %c0_i32 = arith.constant 0 : i32
    %c0_i32_0 = arith.constant 0 : i32
    %c0_i32_1 = arith.constant 0 : i32
    %c0_i32_2 = arith.constant 0 : i32
    return %c0_i32, %c0_i32_0, %c0_i32_1 : i32, i32, i32
  }
  func.func @transform_8(%arg0: i32) -> (i32, i32, i32) {
    %c0_i32 = arith.constant 0 : i32
    %c0_i32_0 = arith.constant 0 : i32
    %c0_i32_1 = arith.constant 0 : i32
    %c0_i32_2 = arith.constant 0 : i32
    return %c0_i32, %c0_i32_0, %c0_i32_1 : i32, i32, i32
  }
  func.func @transform_9(%arg0: i32) -> (i32, i32) {
    %c0_i32 = arith.constant 0 : i32
    %c0_i32_0 = arith.constant 0 : i32
    %c0_i32_1 = arith.constant 0 : i32
    return %c0_i32, %c0_i32_0 : i32, i32
  }
  func.func @transform_10(%arg0: i32) -> (i32, i32, i32) {
    %c0_i32 = arith.constant 0 : i32
    %c0_i32_0 = arith.constant 0 : i32
    %c0_i32_1 = arith.constant 0 : i32
    %c0_i32_2 = arith.constant 0 : i32
    return %c0_i32, %c0_i32_0, %c0_i32_1 : i32, i32, i32
  }
  func.func @transform_11(%arg0: i32) -> (i32, i32) {
    %c0_i32 = arith.constant 0 : i32
    %c0_i32_0 = arith.constant 0 : i32
    %c0_i32_1 = arith.constant 0 : i32
    return %c0_i32, %c0_i32_0 : i32, i32
  }
}

</mosaic_0001>

<bundles_post_ra>
// kernel: generator_forward.1
= control target key start
LH: loop header
LB: loop body
LE: loop exit
PB: predicated region body
PF: predicated region fallthrough
CT: control target
= control target key end

     0   :  { %s8662_s21 = smov 16   ;;  %s8663_s22 = smov 15   ;;  %v11648_v4 = vmov 0   ;;  %v80_v9 = vlaneseq  ;;  %vm454_vm4 = vcmask 1041408   ;;  %vm11658_vm5 = vcmask 1043456   ;;  %s11636_s0 = inlined_call_operand.vmem [shape: f32[4,512], index: 0, kind: input, shape index: {}]   ;;  %s11637_s6 = inlined_call_operand.vmem [shape: bf16[32,512], index: 6, kind: input, shape index: {}]   ;;  %s11638_s4 = inlined_call_operand.vmem [shape: bf16[4,512,128], index: 4, kind: input, shape index: {}]   ;;  %s11639_s9 = inlined_call_operand.vmem [shape: f32[64,1], index: 9, kind: input, shape index: {}]   ;;  %s11640_s10 = inlined_call_operand.vmem [shape: f32[3,96,1], index: 10, kind: input, shape index: {}]   ;;  %s11641_s1 = inlined_call_operand.vmem [shape: f32[9,640], index: 1, kind: input, shape index: {}]   ;;  %s11642_s3 = inlined_call_operand.vmem [shape: bf16[128,128], index: 3, kind: input, shape index: {}]   ;;  %s11643_s7 = inlined_call_operand.vmem [shape: bf16[3,32,144], index: 7, kind: input, shape index: {}]   ;;  %s11644_s8 = inlined_call_operand.vmem [shape: bf16[3,32,16], index: 8, kind: input, shape index: {}]   ;;  %s11645_s5 = inlined_call_operand.vmem [shape: bf16[4,128,512], index: 5, kind: input, shape index: {}]   ;;  %s11646_s2 = inlined_call_operand.vmem [shape: bf16[512,512], index: 2, kind: input, shape index: {}]   ;;  %s11647_s11 = inlined_call_operand.vmem [shape: f32[4,512], index: 11, kind: output, shape index: {}]  }
   0x1   :  { %v8748_v0 = vld [vmem:[%s11636_s0 + $0x8] sm:$0xff]  ;;  %v8753_v1 = vld [vmem:[%s11636_s0] sm:$0xff]  ;;  %s8664_s0 = smov 17   ;;  %s8665_s23 = smov 1   ;;  %574 = vmatprep.mubr.bf16.mxu0 %v11648_v4  ;;  %615 = vmatprep.mubr.bf16.mxu1 %v11648_v4  ;;  %v52_v6 = vld [vmem:[%s11639_s9 + $0x18] sm:$0xff]  ;;  %vm11657_vm6 = vcmask 1045504  }
   0x2   :  { %115 = vrot.lane.b32.xlu1 %v8748_v0, %s8662_s21  ;;  %111 = vrot.lane.b32.xlu0 %v8753_v1, %s8662_s21  ;;  %v69_v2 = vcombine.high %v8748_v0, %v8748_v0  ;;  %v68_v3 = vcombine.high %v8753_v1, %v8753_v1  ;;  %s8666_s24 = smov 127   ;;  %s11666_s25 = smov 113   ;;  %v49_v5 = vld [vmem:[%s11639_s9] sm:$0x3]  ;;  %v2095_v7 = vld [vmem:[%s11640_s10 + $0x10] sm:$0xff]  ;;  %v8823_v10 = vshrl.u32 %v80_v9, 7 }
   0x3   :  { %s11664_s26 = smov 112   ;;  %7994 = vset.pattern.permute.xlu0 %v11648_v4  ;;  %7995 = vset.pattern.permute.xlu1 %v11648_v4  ;;  %s11662_s27 = smov 111   ;;  %v2093_v8 = vld [vmem:[%s11640_s10] sm:$0xff]  ;;  %v8825_v11 = vand.u32 127, %v80_v9  ;;  %v8848_v17 = vld [vmem:[%s11641_s1 + $0x18] sm:$0xff]  ;;  %v8853_v18 = vld [vmem:[%s11641_s1 + $0x8] sm:$0xff] }
   0x4   :  { %v8828_v12 = vsub.s32 1, %v8823_v10  ;;  %v8831_v13 = vsub.s32 2, %v8823_v10  ;;  %v8834_v14 = vsub.s32 0, %v8823_v10  ;;  %v8837_v15 = vsub.s32 3, %v8823_v10  ;;  %v8843_v16 = vld [vmem:[%s11641_s1] sm:$0xff]  ;;  %v8858_v19 = vld [vmem:[%s11641_s1 + $0x10] sm:$0xff] }
   0x5   :  { %vm119_vm0 = vcmp.lt.s32.totalorder %v8825_v11, 16  ;;  %vm156_vm1 = vcmp.lt.s32.totalorder %v8825_v11, 15  ;;  %vm82_vm2 = vcmp.lt.s32.totalorder %v8825_v11, 17  ;;  %v8913_v47 = vsub.s32 5, %v8823_v10  ;;  %s8671_s20 = smov 9   ;;  %s8672_s28 = smov 8  }
   0x6   :  { %117 = vrot.lane.b32.xlu1 %v69_v2, %s8662_s21  ;;  %113 = vrot.lane.b32.xlu0 %v68_v3, %s8662_s21  ;;  %v8863_v22 = vrot.slane %v8843_v16, %v8828_v12  ;;  %v8867_v23 = vrot.slane %v8848_v17, %v8828_v12  ;;  %v8871_v24 = vrot.slane %v8853_v18, %v8828_v12  ;;  %v8916_v48 = vsub.s32 4, %v8823_v10  ;;  %s8673_s29 = smov 7   ;;  %s8674_s30 = smov 121  }
   0x7   :  { %v8875_v25 = vrot.slane %v8858_v19, %v8828_v12  ;;  %v8892_v36 = vrot.slane %v8853_v18, %v8831_v13  ;;  %v8898_v42 = vrot.slane %v8843_v16, %v8831_v13  ;;  %v8902_v43 = vrot.slane %v8858_v19, %v8831_v13  ;;  %s8675_s12 = smov 120   ;;  %s8676_s15 = smov 119  }
   0x8   :  { %v8906_v44 = vrot.slane %v8848_v17, %v8831_v13  ;;  %vm193_vm3 = vcmp.lt.s32.totalorder %v8825_v11, 1  ;;  %vm266_vm7 = vcmp.lt.s32.totalorder %v8825_v11, 127  ;;  %vm11694_vm8 = vcmp.lt.s32.totalorder %v8825_v11, 113  ;;  %s11739_s14 = smov 111  }
   0x9   :  { %11698 = vst [vmem:[#allocation2_spill] sm:$0xff] %v8898_v42  ;;  %vm340_vm9 = vcmp.lt.s32.totalorder %v8825_v11, 112  ;;  %vm11659_vm10 = vcmp.lt.s32.totalorder %v8825_v11, 111  ;;  %vm526_vm11 = vcmask 293888   ;;  %vm2018_vm12 = vcmask 64512  }
   0xa   :  { %150 = vrot.lane.b32.xlu1 %v68_v3, %s8663_s22  ;;  %148 = vrot.lane.b32.xlu0 %v8753_v1, %s8663_s22  ;;  %11699 = vst [vmem:[#allocation3_spill] sm:$0xff] %v8906_v44 }
   0xe   :  { %154 = vrot.lane.b32.xlu1 %v69_v2, %s8663_s22  ;;  %152 = vrot.lane.b32.xlu0 %v8748_v0, %s8663_s22 }
  0x12   :  { %74 = vrot.lane.b32.xlu1 %v68_v3, %s8664_s0  ;;  %72 = vrot.lane.b32.xlu0 %v8753_v1, %s8664_s0 }
  0x16   :  { %78 = vrot.lane.b32.xlu1 %v69_v2, %s8664_s0  ;;  %76 = vrot.lane.b32.xlu0 %v8748_v0, %s8664_s0 }
  0x1a   :  { %187 = vrot.lane.b32.xlu1 %v68_v3, %s8665_s23  ;;  %185 = vrot.lane.b32.xlu0 %v8753_v1, %s8665_s23 }
  0x1e   :  { %191 = vrot.lane.b32.xlu1 %v69_v2, %s8665_s23  ;;  %189 = vrot.lane.b32.xlu0 %v8748_v0, %s8665_s23 }
  0x22   :  { %260 = vrot.lane.b32.xlu1 %v68_v3, %s8666_s24  ;;  %258 = vrot.lane.b32.xlu0 %v8753_v1, %s8666_s24 }
  0x26   :  { %264 = vrot.lane.b32.xlu1 %v69_v2, %s8666_s24  ;;  %262 = vrot.lane.b32.xlu0 %v8748_v0, %s8666_s24 }
  0x2a   :  { %297 = vrot.lane.b32.xlu1 %v68_v3, %s11666_s25  ;;  %295 = vrot.lane.b32.xlu0 %v8753_v1, %s11666_s25 }
  0x2e   :  { %301 = vrot.lane.b32.xlu1 %v69_v2, %s11666_s25  ;;  %299 = vrot.lane.b32.xlu0 %v8748_v0, %s11666_s25 }
  0x32   :  { %334 = vrot.lane.b32.xlu1 %v68_v3, %s11664_s26  ;;  %332 = vrot.lane.b32.xlu0 %v8753_v1, %s11664_s26 }
  0x36   :  { %338 = vrot.lane.b32.xlu1 %v69_v2, %s11664_s26  ;;  %336 = vrot.lane.b32.xlu0 %v8748_v0, %s11664_s26 }
  0x3a   :  { %371 = vrot.lane.b32.xlu1 %v68_v3, %s11662_s27  ;;  %369 = vrot.lane.b32.xlu0 %v8753_v1, %s11662_s27 }
  0x3e   :  { %375 = vrot.lane.b32.xlu1 %v69_v2, %s11662_s27  ;;  %373 = vrot.lane.b32.xlu0 %v8748_v0, %s11662_s27 }
  0x42   :  { %523 = vperm.xlu0 %7994, %v49_v5  }
  0x46   :  { %2000 = vperm.xlu0 %7994, %v52_v6   ;;  %v8931_v6 = vrot.slane %v8853_v18, %v8834_v14 }
  0x48   :  { %11700 = vst [vmem:[#allocation4_spill] sm:$0xff] %v8931_v6 }
  0x4a   :  { %2252 = vperm.xlu0 %7994, %v2095_v7  }
  0x4e   :  { %2242 = vperm.xlu0 %7994, %v2093_v8  }
  0x74   :  { %v116_v20 = vpop.permute.xlu1 %115  ;;  %v112_v21 = vpop.permute.xlu0 %111 }
  0x78   :  { %v118_v26 = vpop.permute.xlu1 %117  ;;  %v114_v27 = vpop.permute.xlu0 %113 }
  0x79   :  { %v120_v28 = vsel %vm119_vm0, %v116_v20, %v118_v26  ;;  %v123_v29 = vsel %vm119_vm0, %v118_v26, %v112_v21  ;;  %v121_v30 = vsel %vm119_vm0, %v114_v27, %v116_v20  ;;  %v122_v31 = vsel %vm119_vm0, %v112_v21, %v114_v27 }
  0x7a   :  { %v140_v32 = vmul.f32 %v8863_v22, %v123_v29  ;;  %v143_v33 = vmul.f32 %v8867_v23, %v120_v28  ;;  %v141_v34 = vmul.f32 %v8871_v24, %v122_v31  ;;  %v142_v35 = vmul.f32 %v8875_v25, %v121_v30 }
  0x7b   :  { %v8937_v27 = vrot.slane %v8843_v16, %v8834_v14  ;;  %v8941_v28 = vrot.slane %v8858_v19, %v8834_v14  ;;  %v8945_v29 = vrot.slane %v8848_v17, %v8834_v14 }
  0x7c   :  { %v144_v37 = vpack.c.bf16 %v140_v32, %v140_v32  ;;  %v147_v38 = vpack.c.bf16 %v143_v33, %v143_v33  ;;  %v151_v39 = vpop.permute.xlu1 %150  ;;  %v149_v40 = vpop.permute.xlu0 %148  ;;  %v145_v49 = vpack.c.bf16 %v141_v34, %v141_v34  ;;  %v146_v50 = vpack.c.bf16 %v142_v35, %v142_v35 }
  0x7d   :  { %v159_v41 = vsel %vm156_vm1, %v149_v40, %v151_v39  ;;  %11701 = vst [vmem:[#allocation5_spill] sm:$0xff] %v8937_v27  ;;  %11702 = vst [vmem:[#allocation6_spill] sm:$0xff] %v8941_v28 }
  0x7e   :  { %v8908_v45 = vrot.slane %v144_v37, 6  ;;  %v8910_v46 = vrot.slane %v147_v38, 6  ;;  %v178_v51 = vmul.f32 %v8892_v36, %v159_v41  ;;  %v411_v61 = vrot.slane %v145_v49, 6  ;;  %11703 = vst [vmem:[#allocation7_spill] sm:$0xff] %v8945_v29 }
  0x7f   :  { %v412_v62 = vrot.slane %v146_v50, 6  ;;  %v8956_v37 = vrot.slane %v8853_v18, %v8837_v15 }
  0x80   :  { %v155_v52 = vpop.permute.xlu1 %154  ;;  %v153_v53 = vpop.permute.xlu0 %152  ;;  %v182_v57 = vpack.c.bf16 %v178_v51, %v178_v51 }
  0x81   :  { %v160_v54 = vsel %vm156_vm1, %v155_v52, %v149_v40  ;;  %v157_v55 = vsel %vm156_vm1, %v153_v53, %v155_v52  ;;  %v158_v56 = vsel %vm156_vm1, %v151_v39, %v153_v53  ;;  %11704 = vst [vmem:[#allocation8_spill] sm:$0xff] %v8956_v37  ;;  %v8966_v53 = vrot.slane %v8843_v16, %v8837_v15 }
  0x82   :  { %v177_v58 = vmul.f32 %v8898_v42, %v160_v54  ;;  %v179_v59 = vmul.f32 %v8902_v43, %v158_v56  ;;  %v180_v60 = vmul.f32 %v8906_v44, %v157_v55  ;;  %v419_v9 = vrot.slane %v182_v57, 4 }
  0x83   :  { %11705 = vst [vmem:[#allocation9_spill] sm:$0xff] %v8966_v53  ;;  %v8970_v54 = vrot.slane %v8858_v19, %v8837_v15  ;;  %v8974_v55 = vrot.slane %v8848_v17, %v8837_v15 }
  0x84   :  { %v181_v63 = vpack.c.bf16 %v177_v58, %v177_v58  ;;  %v183_v2 = vpack.c.bf16 %v179_v59, %v179_v59  ;;  %v184_v3 = vpack.c.bf16 %v180_v60, %v180_v60  ;;  %v75_v5 = vpop.permute.xlu1 %74  ;;  %v73_v7 = vpop.permute.xlu0 %72  ;;  %v8978_v59 = vrot.slane %v8843_v16, %v8916_v48 }
  0x85   :  { %v85_v8 = vsel %vm82_vm2, %v73_v7, %v75_v5  ;;  %11706 = vst [vmem:[#allocation10_spill] sm:$0xff] %v8970_v54  ;;  %11707 = vst [vmem:[#allocation11_spill] sm:$0xff] %v8974_v55 }
  0x86   :  { %v418_v20 = vrot.slane %v181_v63, 4  ;;  %v420_v21 = vrot.slane %v183_v2, 4  ;;  %v421_v26 = vrot.slane %v184_v3, 4  ;;  %v104_v30 = vmul.f32 %v8931_v6, %v85_v8 }
  0x88   :  { %v79_v31 = vpop.permute.xlu1 %78  ;;  %v77_v32 = vpop.permute.xlu0 %76  ;;  %v108_v41 = vpack.c.bf16 %v104_v30, %v104_v30 }
  0x89   :  { %v86_v33 = vsel %vm82_vm2, %v79_v31, %v73_v7  ;;  %v83_v34 = vsel %vm82_vm2, %v77_v32, %v79_v31  ;;  %v84_v35 = vsel %vm82_vm2, %v75_v5, %v77_v32  ;;  %v8984_v5 = vrot.slane %v8853_v18, %v8916_v48 }
  0x8a   :  { %v103_v38 = vmul.f32 %v8937_v27, %v86_v33  ;;  %v105_v39 = vmul.f32 %v8941_v28, %v84_v35  ;;  %v106_v40 = vmul.f32 %v8945_v29, %v83_v34  ;;  %v460_v3 = vsel %vm454_vm4, %v108_v41, %v411_v61 }
  0x8b   :  { %v8988_v7 = vrot.slane %v8858_v19, %v8916_v48  ;;  %v8998_v61 = vrot.slane %v8848_v17, %v8916_v48 }
  0x8c   :  { %v188_v49 = vpop.permute.xlu1 %187  ;;  %v186_v50 = vpop.permute.xlu0 %185  ;;  %v107_v56 = vpack.c.bf16 %v103_v38, %v103_v38  ;;  %v109_v57 = vpack.c.bf16 %v105_v39, %v105_v39  ;;  %v110_v58 = vpack.c.bf16 %v106_v40, %v106_v40  ;;  %v471_v38 = vsel %vm11658_vm5, %v460_v3, %v419_v9 }
  0x8d   :  { %v196_v51 = vsel %vm193_vm3, %v186_v50, %v188_v49  ;;  %v9011_v9 = vsub.s32 6, %v8823_v10 }
  0x8e   :  { %v215_v52 = vmul.f32 %v8956_v37, %v196_v51  ;;  %v457_v39 = vsel %vm454_vm4, %v107_v56, %v8908_v45  ;;  %v466_v40 = vsel %vm454_vm4, %v110_v58, %v8910_v46  ;;  %v463_v41 = vsel %vm454_vm4, %v109_v57, %v412_v62 }
  0x8f   :  { %v469_v45 = vsel %vm11658_vm5, %v457_v39, %v418_v20  ;;  %v475_v46 = vsel %vm11658_vm5, %v466_v40, %v421_v26  ;;  %v473_v62 = vsel %vm11658_vm5, %v463_v41, %v420_v21  ;;  %v242_v56 = vcombine.low %v8978_v59, %v8984_v5 }
  0x90   :  { %v192_v60 = vpop.permute.xlu1 %191  ;;  %v190_v63 = vpop.permute.xlu0 %189  ;;  %v219_v2 = vpack.c.bf16 %v215_v52, %v215_v52  ;;  %v9025_v20 = vrot.slane %v8843_v16, %v8913_v47  ;;  %v9032_v26 = vrot.slane %v8848_v17, %v8913_v47 }
  0x91   :  { %v197_v8 = vsel %vm193_vm3, %v192_v60, %v186_v50  ;;  %v194_v30 = vsel %vm193_vm3, %v190_v63, %v192_v60  ;;  %v195_v31 = vsel %vm193_vm3, %v188_v49, %v190_v63  ;;  %v9043_v40 = vmul.f32 %v242_v56, %v8753_v1 }
  0x92   :  { %v214_v32 = vmul.f32 %v8966_v53, %v197_v8  ;;  %v216_v33 = vmul.f32 %v8970_v54, %v195_v31  ;;  %v217_v34 = vmul.f32 %v8974_v55, %v194_v30  ;;  %v427_v35 = vrot.slane %v219_v2, 2  ;;  %11708 = vst [vmem:[#allocation12_spill] sm:$0xff] %v9025_v20  ;;  %11709 = vst [vmem:[#allocation13_spill] sm:$0xff] %v9032_v26 }
  0x94   :  { %v218_v49 = vpack.c.bf16 %v214_v32, %v214_v32  ;;  %v220_v50 = vpack.c.bf16 %v216_v33, %v216_v33  ;;  %v261_v51 = vpop.permute.xlu1 %260  ;;  %v259_v52 = vpop.permute.xlu0 %258  ;;  %v481_v60 = vsel %vm11657_vm6, %v471_v38, %v427_v35  ;;  %v221_v63 = vpack.c.bf16 %v217_v34, %v217_v34 }
  0x95   :  { %542 = vmatprep.subr.bf16.mxu0 %v481_v60  ;;  %v243_v33 = vcombine.low %v8988_v7, %v8998_v61  ;;  %v269_v21 = vsel %vm266_vm7, %v259_v52, %v261_v51  ;;  %v9036_v34 = vrot.slane %v8853_v18, %v8913_v47  ;;  %v9040_v35 = vrot.slane %v8858_v19, %v8913_v47 }
  0x96   :  { %v426_v8 = vrot.slane %v218_v49, 2  ;;  %v429_v2 = vrot.slane %v221_v63, 2  ;;  %v428_v30 = vrot.slane %v220_v50, 2  ;;  %v9056_v63 = vrot.slane %v8843_v16, %v9011_v9 }
  0x97   :  { %11710 = vst [vmem:[#allocation14_spill] sm:$0xff] %v9036_v34  ;;  %11711 = vst [vmem:[#allocation15_spill] sm:$0xff] %v9040_v35  ;;  %v9046_v41 = vmul.f32 %v243_v33, %v8748_v0  ;;  %v9062_v0 = vsub.s32 7, %v8823_v10 }
  0x98   :  { %v265_v57 = vpop.permute.xlu1 %264  ;;  %v263_v58 = vpop.permute.xlu0 %262  ;;  %v478_v3 = vsel %vm11657_vm6, %v469_v45, %v426_v8  ;;  %v487_v31 = vsel %vm11657_vm6, %v475_v46, %v429_v2  ;;  %v484_v32 = vsel %vm11657_vm6, %v473_v62, %v428_v30  ;;  %11712 = vst [vmem:[#allocation16_spill] sm:$0xff] %v9056_v63  ;;  %v287_v8 = vmul.f32 %v9025_v20, %v269_v21 }
  0x99   :  { %543 = vmatpush1.bf16.msra.mxu0 %v478_v3  ;;  %583 = vmatprep.subr.bf16.mxu1 %v487_v31  ;;  %v270_v49 = vsel %vm266_vm7, %v265_v57, %v259_v52  ;;  %v267_v50 = vsel %vm266_vm7, %v263_v58, %v265_v57  ;;  %v268_v60 = vsel %vm266_vm7, %v261_v51, %v263_v58 }
  0x9a   :  { %584 = vmatpush1.bf16.msra.mxu1 %v484_v32  ;;  %v9066_v52 = vrot.slane %v8848_v17, %v9011_v9  ;;  %v9070_v2 = vrot.slane %v8853_v18, %v9011_v9  ;;  %v9074_v51 = vrot.slane %v8858_v19, %v9011_v9  ;;  %v9078_v30 = vcombine.high %v9043_v40, %v9043_v40 }
  0x9b   :  { %v290_v45 = vmul.f32 %v9032_v26, %v270_v49  ;;  %v288_v10 = vmul.f32 %v9036_v34, %v268_v60  ;;  %v289_v46 = vmul.f32 %v9040_v35, %v267_v50  ;;  %v251_v57 = vcombine.high %v9046_v41, %v9046_v41 }
  0x9c   :  { %v298_v38 = vpop.permute.xlu1 %297  ;;  %v296_v39 = vpop.permute.xlu0 %295  ;;  %11713 = vst [vmem:[#allocation17_spill] sm:$0xff] %v9066_v52  ;;  %11714 = vst [vmem:[#allocation18_spill] sm:$0xff] %v9070_v2  ;;  %v291_v33 = vpack.c.bf16 %v287_v8, %v287_v8  ;;  %v9095_v21 = vrot.slane %v8843_v16, %v9062_v0  ;;  %v254_v49 = vpack.c.bf16 %v9043_v40, %v9043_v40 }
  0x9d   :  { %v306_v1 = vsel %vm11694_vm8, %v296_v39, %v298_v38  ;;  %11715 = vst [vmem:[#allocation19_spill] sm:$0xff] %v9074_v51  ;;  %v292_v8 = vpack.c.bf16 %v288_v10, %v288_v10  ;;  %v256_v16 = vpack.c.bf16 %v9046_v41, %v9046_v41  ;;  %v9119_v10 = vrot.slane %v8858_v19, %v9062_v0 }
  0x9e   :  { %v324_v58 = vmul.f32 %v9056_v63, %v306_v1  ;;  %11716 = vst [vmem:[#allocation20_spill] sm:$0xff] %v9095_v21  ;;  %v255_v1 = vpack.c.bf16 %v9078_v30, %v9078_v30 }
  0x9f   :  { %11719 = vst [vmem:[#allocation23_spill] sm:$0xff] %v9119_v10 }
  0xa0   :  { %v302_v62 = vpop.permute.xlu1 %301  ;;  %v300_v56 = vpop.permute.xlu0 %299  ;;  %v328_v26 = vpack.c.bf16 %v324_v58, %v324_v58 }
  0xa1   :  { %v307_v3 = vsel %vm11694_vm8, %v302_v62, %v296_v39  ;;  %v304_v31 = vsel %vm11694_vm8, %v300_v56, %v302_v62  ;;  %v305_v32 = vsel %vm11694_vm8, %v298_v38, %v300_v56  ;;  %v294_v38 = vpack.c.bf16 %v290_v45, %v290_v45 }
  0xa2   :  { %v327_v50 = vmul.f32 %v9066_v52, %v307_v3  ;;  %v325_v39 = vmul.f32 %v9070_v2, %v305_v32  ;;  %v326_v60 = vmul.f32 %v9074_v51, %v304_v31  ;;  %v293_v62 = vpack.c.bf16 %v289_v46, %v289_v46 }
  0xa3   :  { %v9110_v3 = vrot.slane %v8848_v17, %v9062_v0  ;;  %v257_v31 = vpack.c.bf16 %v251_v57, %v251_v57  ;;  %v434_v32 = vrot.slane %v291_v33, 6  ;;  %v9115_v45 = vrot.slane %v8853_v18, %v9062_v0 }
  0xa4   :  { %v335_v56 = vpop.permute.xlu1 %334  ;;  %v333_v4 = vpop.permute.xlu0 %332  ;;  %v331_v41 = vpack.c.bf16 %v327_v50, %v327_v50  ;;  %v329_v46 = vpack.c.bf16 %v325_v39, %v325_v39  ;;  %v330_v58 = vpack.c.bf16 %v326_v60, %v326_v60  ;;  %v437_v35 = vrot.slane %v294_v38, 6 }
  0xa5   :  { %v343_v40 = vsel %vm340_vm9, %v333_v4, %v335_v56  ;;  %11717 = vst [vmem:[#allocation21_spill] sm:$0xff] %v9110_v3  ;;  %11718 = vst [vmem:[#allocation22_spill] sm:$0xff] %v9115_v45  ;;  %v435_v17 = vrot.slane %v292_v8, 6  ;;  %v436_v52 = vrot.slane %v293_v62, 6  ;;  %v491_v38 = vsel %vm454_vm4, %v254_v49, %v434_v32 }
  0xa6   :  { %v361_v30 = vmul.f32 %v9095_v21, %v343_v40  ;;  %v442_v40 = vrot.slane %v328_v26, 4  ;;  %v445_v8 = vrot.slane %v331_v41, 4  ;;  %v443_v62 = vrot.slane %v329_v46, 4 }
  0xa7   :  { %v444_v26 = vrot.slane %v330_v58, 4  ;;  %v500_v49 = vsel %vm454_vm4, %v257_v31, %v437_v35  ;;  %v497_v41 = vsel %vm454_vm4, %v256_v16, %v436_v52 }
  0xa8   :  { %v365_v57 = vpack.c.bf16 %v361_v30, %v361_v30  ;;  %v339_v33 = vpop.permute.xlu1 %338  ;;  %v337_v51 = vpop.permute.xlu0 %336  ;;  %v502_v32 = vsel %vm11658_vm5, %v491_v38, %v442_v40  ;;  %v508_v35 = vsel %vm11658_vm5, %v500_v49, %v445_v8 }
  0xa9   :  { %v344_v18 = vsel %vm340_vm9, %v339_v33, %v333_v4  ;;  %v341_v2 = vsel %vm340_vm9, %v337_v51, %v339_v33  ;;  %v342_v19 = vsel %vm340_vm9, %v335_v56, %v337_v51  ;;  %v6833_v4 = vld [vmem:[%s11641_s1 + $0x28] ss:$0 sm:$0xff]  ;;  %v506_v52 = vsel %vm11658_vm5, %v497_v41, %v444_v26 }
  0xaa   :  { %v364_v50 = vmul.f32 %v9110_v3, %v344_v18  ;;  %v362_v39 = vmul.f32 %v9115_v45, %v342_v19  ;;  %v363_v60 = vmul.f32 %v9119_v10, %v341_v2  ;;  %v450_v30 = vrot.slane %v365_v57, 2 }
  0xab   :  { %v494_v18 = vsel %vm454_vm4, %v255_v1, %v435_v17  ;;  %v6834_v1 = vld [vmem:[%s11641_s1 + $0x30] ss:$0 sm:$0xff] }
  0xac   :  { %v368_v33 = vpack.c.bf16 %v364_v50, %v364_v50  ;;  %v366_v63 = vpack.c.bf16 %v362_v39, %v362_v39  ;;  %v367_v21 = vpack.c.bf16 %v363_v60, %v363_v60  ;;  %v372_v51 = vpop.permute.xlu1 %371  ;;  %v370_v56 = vpop.permute.xlu0 %369  ;;  %v6836_v50 = vld [vmem:[%s11641_s1 + $0x40] ss:$0 sm:$0xff]  ;;  %v504_v17 = vsel %vm11658_vm5, %v494_v18, %v443_v62 }
  0xad   :  { %v380_v2 = vsel %vm11659_vm10, %v370_v56, %v372_v51  ;;  %v510_v31 = vsel %vm11657_vm6, %v502_v32, %v450_v30  ;;  %v7999_v32 = vld [vmem:[%s11638_s4 + $0xc0] sm:$0xff]  }
  0xae   :  { %v453_v46 = vrot.slane %v368_v33, 2  ;;  %v451_v58 = vrot.slane %v366_v63, 2  ;;  %v452_v57 = vrot.slane %v367_v21, 2  ;;  %v398_v19 = vmul.f32 %v6833_v4, %v380_v2  ;;  %v6835_v63 = vld [vmem:[%s11641_s1 + $0x38] ss:$0 sm:$0xff] }
  0xb0   :  { %v376_v21 = vpop.permute.xlu1 %375  ;;  %v374_v16 = vpop.permute.xlu0 %373  ;;  %v513_v40 = vsel %vm11657_vm6, %v504_v17, %v451_v58  ;;  %v519_v39 = vsel %vm11657_vm6, %v508_v35, %v453_v46  ;;  %v516_v60 = vsel %vm11657_vm6, %v506_v52, %v452_v57  ;;  %v402_v38 = vpack.c.bf16 %v398_v19, %v398_v19  ;;  %v57_v46 = vld [vmem:[%s11637_s6] sm:$0x1]  ;;  %v8002_v19 = vld [vmem:[%s11638_s4 + $0x48] sm:$0xff]   ;;  %v8006_v35 = vld [vmem:[%s11638_s4 + $0x50] sm:$0xff]  }
  0xb1   :  { %v381_v8 = vsel %vm11659_vm10, %v376_v21, %v370_v56  ;;  %v378_v62 = vsel %vm11659_vm10, %v374_v16, %v376_v21  ;;  %v379_v26 = vsel %vm11659_vm10, %v372_v51, %v374_v16  ;;  %544 = vmatprep.subr.bf16.mxu0 %v513_v40  ;;  %585 = vmatprep.subr.bf16.mxu1 %v519_v39  ;;  %v7998_v56 = vld [vmem:[%s11638_s4 + $0x40] sm:$0xff]   ;;  %v8005_v17 = vld [vmem:[%s11638_s4 + $0x88] sm:$0xff]   ;;  %v8008_v52 = vld [vmem:[%s11638_s4 + $0x10] sm:$0xff]  }
  0xb2   :  { %v401_v30 = vmul.f32 %v6836_v50, %v381_v8  ;;  %v399_v4 = vmul.f32 %v6834_v1, %v379_v26  ;;  %545 = vmatpush1.bf16.msra.mxu0 %v510_v31  ;;  %586 = vmatpush1.bf16.msra.mxu1 %v516_v60  ;;  %v400_v33 = vmul.f32 %v6835_v63, %v378_v62  ;;  %v531_v51 = vsel %vm454_vm4, %v402_v38, 0  ;;  %v8000_v58 = vld [vmem:[%s11638_s4] sm:$0xff]   ;;  %v8003_v50 = vld [vmem:[%s11638_s4 + $0xc8] sm:$0xff]   ;;  %v8007_v31 = vld [vmem:[%s11638_s4 + $0xd0] sm:$0xff]  }
  0xb3   :  { %v8001_v57 = vld [vmem:[%s11638_s4 + $0x80] sm:$0xff]   ;;  %v8004_v1 = vld [vmem:[%s11638_s4 + $0x8] sm:$0xff]   ;;  %v8009_v63 = vld [vmem:[%s11638_s4 + $0x90] sm:$0xff]  }
  0xb4   :  { %v405_v18 = vpack.c.bf16 %v401_v30, %v401_v30  ;;  %v403_v2 = vpack.c.bf16 %v399_v4, %v399_v4  ;;  %v404_v49 = vpack.c.bf16 %v400_v33, %v400_v33  ;;  %v8010_v21 = vld [vmem:[%s11638_s4 + $0x58] sm:$0xff]   ;;  %v8014_v60 = vld [vmem:[%s11638_s4 + $0x60] sm:$0xff]   ;;  %v8018_v26 = vld [vmem:[%s11638_s4 + $0x68] sm:$0xff]  }
  0xb5   :  { %v8011_v16 = vld [vmem:[%s11638_s4 + $0xd8] sm:$0xff]   ;;  %v8015_v38 = vld [vmem:[%s11638_s4 + $0xe0] sm:$0xff]   ;;  %v8019_v30 = vld [vmem:[%s11638_s4 + $0xe8] sm:$0xff]  }
  0xb6   :  { %6837 = vmatprep.subr.msk.bf16.mxu0 %vm454_vm4, %v403_v2  ;;  %6839 = vmatprep.subr.msk.bf16.mxu1 %vm454_vm4, %v405_v18  ;;  %v537_v41 = vsel %vm454_vm4, %v404_v49, 0  ;;  %v8012_v40 = vld [vmem:[%s11638_s4 + $0x18] sm:$0xff]   ;;  %v8016_v8 = vld [vmem:[%s11638_s4 + $0x20] sm:$0xff]   ;;  %v8020_v4 = vld [vmem:[%s11638_s4 + $0x28] sm:$0xff]  }
  0xb7   :  { %547 = vmatpush1.bf16.msra.mxu0 %v531_v51  ;;  %588 = vmatpush1.bf16.msra.mxu1 %v537_v41  ;;  %v8013_v39 = vld [vmem:[%s11638_s4 + $0x98] sm:$0xff]   ;;  %v8017_v62 = vld [vmem:[%s11638_s4 + $0xa0] sm:$0xff]   ;;  %v8021_v33 = vld [vmem:[%s11638_s4 + $0xa8] sm:$0xff]  }
  0xb8   :  { %7625 = vmatprep.subr.bf16.mxu0 %v7998_v56  ;;  %7647 = vmatprep.subr.bf16.mxu1 %v7999_v32  ;;  %v8022_v18 = vld [vmem:[%s11638_s4 + $0x70] sm:$0xff]   ;;  %v8026_v32 = vld [vmem:[%s11638_s4 + $0x78] sm:$0xff]  }
  0xb9   :  { %v8023_v2 = vld [vmem:[%s11638_s4 + $0xf0] sm:$0xff]   ;;  %v8027_v51 = vld [vmem:[%s11638_s4 + $0xf8] sm:$0xff]  }
  0xba   :  { %6838 = vmatmul.mubr.msk.bf16.vlgmr.msra.gmra.mrb[0].mxu0 %vm526_vm11, %v57_v46  ;;  %6840 = vmatmul.mubr.msk.bf16.vlgmr.msra.gmra.mrb[0].mxu1 %vm526_vm11, %v57_v46  ;;  %v8024_v49 = vld [vmem:[%s11638_s4 + $0x30] sm:$0xff]   ;;  %v8028_v41 = vld [vmem:[%s11638_s4 + $0x38] sm:$0xff]  }
  0xbb   :  { %7626 = vmatpush3.bf16.msra.mxu0 %v8000_v58  ;;  %7648 = vmatpush3.bf16.msra.mxu1 %v8001_v57  ;;  %v8025_v56 = vld [vmem:[%s11638_s4 + $0xb0] sm:$0xff]   ;;  %v8029_v46 = vld [vmem:[%s11638_s4 + $0xb8] sm:$0xff]   ;;  %v8030_v58 = vld [vmem:[%s11638_s4 + $0x140] sm:$0xff]  }
  0xbc   :  { %7627 = vmatprep.subr.bf16.mxu0 %v8002_v19  ;;  %7649 = vmatprep.subr.bf16.mxu1 %v8003_v50  ;;  %v8031_v57 = vld [vmem:[%s11638_s4 + $0x1c0] sm:$0xff]  }
  0xbf   :  { %7628 = vmatpush3.bf16.msra.mxu0 %v8004_v1  ;;  %7650 = vmatpush3.bf16.msra.mxu1 %v8005_v17 }
  0xc0   :  { %7629 = vmatprep.subr.bf16.mxu0 %v8006_v35  ;;  %7651 = vmatprep.subr.bf16.mxu1 %v8007_v31 }
  0xc1   :  { %v524_v19 = vpop.permute.xlu0 %523 }
  0xc3   :  { %7630 = vmatpush3.bf16.msra.mxu0 %v8008_v52  ;;  %7652 = vmatpush3.bf16.msra.mxu1 %v8009_v63 }
  0xc4   :  { %7631 = vmatprep.subr.bf16.mxu0 %v8010_v21  ;;  %7653 = vmatprep.subr.bf16.mxu1 %v8011_v16 }
  0xc7   :  { %7632 = vmatpush3.bf16.msra.mxu0 %v8012_v40  ;;  %7654 = vmatpush3.bf16.msra.mxu1 %v8013_v39 }
  0xc8   :  { %7633 = vmatprep.subr.bf16.mxu0 %v8014_v60  ;;  %7655 = vmatprep.subr.bf16.mxu1 %v8015_v38 }
  0xcb   :  { %7634 = vmatpush3.bf16.msra.mxu0 %v8016_v8  ;;  %7656 = vmatpush3.bf16.msra.mxu1 %v8017_v62  ;;  %v8032_v62 = vld [vmem:[%s11638_s4 + $0x100] sm:$0xff]  }
  0xcc   :  { %7635 = vmatprep.subr.bf16.mxu0 %v8018_v26  ;;  %7657 = vmatprep.subr.bf16.mxu1 %v8019_v30  ;;  %v8033_v26 = vld [vmem:[%s11638_s4 + $0x180] sm:$0xff]  }
  0xcf   :  { %7636 = vmatpush3.bf16.msra.mxu0 %v8020_v4  ;;  %7658 = vmatpush3.bf16.msra.mxu1 %v8021_v33  ;;  %v8034_v33 = vld [vmem:[%s11638_s4 + $0x148] sm:$0xff]  }
  0xd0   :  { %7637 = vmatprep.subr.bf16.mxu0 %v8022_v18  ;;  %7659 = vmatprep.subr.bf16.mxu1 %v8023_v2  ;;  %v8035_v18 = vld [vmem:[%s11638_s4 + $0x1c8] sm:$0xff]  }
  0xd1   :  { %v8036_v2 = vld [vmem:[%s11638_s4 + $0x108] sm:$0xff]  }
  0xd3   :  { %7638 = vmatpush3.bf16.msra.mxu0 %v8024_v49  ;;  %7660 = vmatpush3.bf16.msra.mxu1 %v8025_v56  ;;  %v8037_v49 = vld [vmem:[%s11638_s4 + $0x188] sm:$0xff]   ;;  %v8038_v56 = vld [vmem:[%s11638_s4 + $0x150] sm:$0xff]  }
  0xd4   :  { %7639 = vmatprep.subr.bf16.mxu0 %v8026_v32  ;;  %7661 = vmatprep.subr.bf16.mxu1 %v8027_v51  ;;  %v8039_v32 = vld [vmem:[%s11638_s4 + $0x1d0] sm:$0xff]  }
  0xd5   :  { %v8040_v51 = vld [vmem:[%s11638_s4 + $0x110] sm:$0xff]  }
  0xd7   :  { %7640 = vmatpush3.bf16.msra.mxu0 %v8028_v41  ;;  %7662 = vmatpush3.bf16.msra.mxu1 %v8029_v46  ;;  %v8041_v41 = vld [vmem:[%s11638_s4 + $0x190] sm:$0xff]   ;;  %v8042_v46 = vld [vmem:[%s11638_s4 + $0x158] sm:$0xff]  }
  0xd8   :  { %7669 = vmatprep.subr.bf16.mxu0 %v8030_v58  ;;  %7691 = vmatprep.subr.bf16.mxu1 %v8031_v57  ;;  %v8043_v58 = vld [vmem:[%s11638_s4 + $0x1d8] sm:$0xff]  }
  0xd9   :  { %v8044_v57 = vld [vmem:[%s11638_s4 + $0x118] sm:$0xff]  }
 0x18d   :  { %v576_v50 = vpop.f32.mrb[0].mxu0  ;;  %v617_v1 = vpop.f32.mrb[0].mxu1 }
 0x18e   :  { %v577_v17 = vadd.f32 %v576_v50, %v524_v19  ;;  %v618_v35 = vadd.f32 %v617_v1, %v524_v19  ;;  %v578_v31 = vpop.f32.mrb[1].mxu0  ;;  %v619_v52 = vpop.f32.mrb[1].mxu1  ;;  %v8046_v50 = vld [vmem:[%s11638_s4 + $0x160] sm:$0xff]  }
 0x18f   :  { %v579_v63 = vadd.f32 %v578_v31, %v524_v19  ;;  %v620_v21 = vadd.f32 %v619_v52, %v524_v19  ;;  %v580_v16 = vpop.f32.mrb[2].mxu0  ;;  %v621_v40 = vpop.f32.mrb[2].mxu1  ;;  %v8045_v19 = vld [vmem:[%s11638_s4 + $0x198] sm:$0xff]   ;;  %v8047_v1 = vld [vmem:[%s11638_s4 + $0x1e0] sm:$0xff]   ;;  %v8050_v31 = vld [vmem:[%s11638_s4 + $0x168] sm:$0xff]  }
 0x190   :  { %v581_v39 = vpop.f32.mrb[3].mxu0  ;;  %v622_v60 = vpop.f32.mrb[3].mxu1  ;;  %v9282_v30 = vpack.c.bf16 %v577_v17, %v577_v17  ;;  %v9284_v4 = vpack.c.bf16 %v618_v35, %v618_v35  ;;  %v8048_v17 = vld [vmem:[%s11638_s4 + $0x120] sm:$0xff]   ;;  %v8051_v52 = vld [vmem:[%s11638_s4 + $0x1e8] sm:$0xff]   ;;  %v8054_v16 = vld [vmem:[%s11638_s4 + $0x170] sm:$0xff]  }
 0x191   :  { %v9272_v38 = vpack.c.bf16 %v579_v63, %v579_v63  ;;  %v9274_v8 = vpack.c.bf16 %v620_v21, %v620_v21  ;;  %v8049_v35 = vld [vmem:[%s11638_s4 + $0x1a0] sm:$0xff]   ;;  %v8052_v63 = vld [vmem:[%s11638_s4 + $0x128] sm:$0xff]   ;;  %v8055_v40 = vld [vmem:[%s11638_s4 + $0x1f0] sm:$0xff]  }
 0x192   :  { %v8053_v21 = vld [vmem:[%s11638_s4 + $0x1a8] sm:$0xff]   ;;  %v8056_v39 = vld [vmem:[%s11638_s4 + $0x130] sm:$0xff]  }
 0x193   :  { %916 = vmatprep.mubr.bf16.mxu0 %v9272_v38  ;;  %956 = vmatprep.mubr.bf16.mxu1 %v9274_v8  ;;  %v8057_v60 = vld [vmem:[%s11638_s4 + $0x1b0] sm:$0xff]  }
 0x194   :  { %917 = vmatmul.mubr.bf16.vlgmr.msra.gmra.mrb[4].mxu0 %v9282_v30  ;;  %957 = vmatmul.mubr.bf16.vlgmr.msra.gmra.mrb[4].mxu1 %v9284_v4 }
 0x195   :  { %7670 = vmatpush3.bf16.msra.mxu0 %v8032_v62  ;;  %7692 = vmatpush3.bf16.msra.mxu1 %v8033_v26  ;;  %v8058_v62 = vld [vmem:[%s11638_s4 + $0x178] sm:$0xff]  }
 0x196   :  { %1253 = vmatprep.mubr.bf16.mxu0 %v9272_v38  ;;  %1293 = vmatprep.mubr.bf16.mxu1 %v9274_v8  ;;  %v8059_v26 = vld [vmem:[%s11638_s4 + $0x1f8] sm:$0xff]  }
 0x197   :  { %7671 = vmatprep.subr.bf16.mxu0 %v8034_v33  ;;  %7693 = vmatprep.subr.bf16.mxu1 %v8035_v18  ;;  %v8060_v33 = vld [vmem:[%s11638_s4 + $0x138] sm:$0xff]  }
 0x198   :  { %v8061_v18 = vld [vmem:[%s11638_s4 + $0x1b8] sm:$0xff]  }
 0x199   :  { %7672 = vmatpush3.bf16.msra.mxu0 %v8036_v2  ;;  %7694 = vmatpush3.bf16.msra.mxu1 %v8037_v49  ;;  %v8062_v2 = vld [vmem:[%s11638_s4 + $0x240] sm:$0xff]  }
 0x19a   :  { %7673 = vmatprep.subr.bf16.mxu0 %v8038_v56  ;;  %7695 = vmatprep.subr.bf16.mxu1 %v8039_v32  ;;  %v8063_v49 = vld [vmem:[%s11638_s4 + $0x2c0] sm:$0xff]  }
 0x19b   :  { %v8064_v56 = vld [vmem:[%s11638_s4 + $0x200] sm:$0xff]  }
 0x19c   :  { %v8065_v32 = vld [vmem:[%s11638_s4 + $0x280] sm:$0xff]  }
 0x19d   :  { %7674 = vmatpush3.bf16.msra.mxu0 %v8040_v51  ;;  %7696 = vmatpush3.bf16.msra.mxu1 %v8041_v41  ;;  %v8066_v51 = vld [vmem:[%s11638_s4 + $0x248] sm:$0xff]  }
 0x19e   :  { %7675 = vmatprep.subr.bf16.mxu0 %v8042_v46  ;;  %7697 = vmatprep.subr.bf16.mxu1 %v8043_v58  ;;  %v8067_v41 = vld [vmem:[%s11638_s4 + $0x2c8] sm:$0xff]  }
 0x19f   :  { %v8068_v46 = vld [vmem:[%s11638_s4 + $0x208] sm:$0xff]  }
 0x1a0   :  { %v8069_v58 = vld [vmem:[%s11638_s4 + $0x288] sm:$0xff]  }
 0x1a1   :  { %7676 = vmatpush3.bf16.msra.mxu0 %v8044_v57  ;;  %7698 = vmatpush3.bf16.msra.mxu1 %v8045_v19  ;;  %v8070_v57 = vld [vmem:[%s11638_s4 + $0x250] sm:$0xff]  }
 0x1a2   :  { %7677 = vmatprep.subr.bf16.mxu0 %v8046_v50  ;;  %7699 = vmatprep.subr.bf16.mxu1 %v8047_v1  ;;  %v8071_v19 = vld [vmem:[%s11638_s4 + $0x2d0] sm:$0xff]  }
 0x1a3   :  { %v8072_v50 = vld [vmem:[%s11638_s4 + $0x210] sm:$0xff]  }
 0x1a4   :  { %v8073_v1 = vld [vmem:[%s11638_s4 + $0x290] sm:$0xff]  }
 0x1a5   :  { %7678 = vmatpush3.bf16.msra.mxu0 %v8048_v17  ;;  %7700 = vmatpush3.bf16.msra.mxu1 %v8049_v35  ;;  %v8074_v17 = vld [vmem:[%s11638_s4 + $0x258] sm:$0xff]  }
 0x1a6   :  { %7679 = vmatprep.subr.bf16.mxu0 %v8050_v31  ;;  %7701 = vmatprep.subr.bf16.mxu1 %v8051_v52  ;;  %v8075_v35 = vld [vmem:[%s11638_s4 + $0x2d8] sm:$0xff]  }
 0x1a7   :  { %v8076_v31 = vld [vmem:[%s11638_s4 + $0x218] sm:$0xff]  }
 0x1a8   :  { %v8077_v52 = vld [vmem:[%s11638_s4 + $0x298] sm:$0xff]  }
 0x1a9   :  { %7680 = vmatpush3.bf16.msra.mxu0 %v8052_v63  ;;  %7702 = vmatpush3.bf16.msra.mxu1 %v8053_v21  ;;  %v8078_v63 = vld [vmem:[%s11638_s4 + $0x260] sm:$0xff]  }
 0x1aa   :  { %7681 = vmatprep.subr.bf16.mxu0 %v8054_v16  ;;  %7703 = vmatprep.subr.bf16.mxu1 %v8055_v40  ;;  %v8079_v21 = vld [vmem:[%s11638_s4 + $0x2e0] sm:$0xff]  }
 0x1ab   :  { %v8080_v16 = vld [vmem:[%s11638_s4 + $0x220] sm:$0xff]  }
 0x1ac   :  { %v8081_v40 = vld [vmem:[%s11638_s4 + $0x2a0] sm:$0xff]  }
 0x1ad   :  { %7682 = vmatpush3.bf16.msra.mxu0 %v8056_v39  ;;  %7704 = vmatpush3.bf16.msra.mxu1 %v8057_v60  ;;  %v8082_v39 = vld [vmem:[%s11638_s4 + $0x268] sm:$0xff]  }
 0x1ae   :  { %7683 = vmatprep.subr.bf16.mxu0 %v8058_v62  ;;  %7705 = vmatprep.subr.bf16.mxu1 %v8059_v26  ;;  %v8083_v60 = vld [vmem:[%s11638_s4 + $0x2e8] sm:$0xff]  }
 0x1af   :  { %v8084_v62 = vld [vmem:[%s11638_s4 + $0x228] sm:$0xff]  }
 0x1b0   :  { %v8085_v26 = vld [vmem:[%s11638_s4 + $0x2a8] sm:$0xff]  }
 0x1b1   :  { %7684 = vmatpush3.bf16.msra.mxu0 %v8060_v33  ;;  %7706 = vmatpush3.bf16.msra.mxu1 %v8061_v18  ;;  %v8086_v33 = vld [vmem:[%s11638_s4 + $0x270] sm:$0xff]  }
 0x1b2   :  { %7713 = vmatprep.subr.bf16.mxu0 %v8062_v2  ;;  %7735 = vmatprep.subr.bf16.mxu1 %v8063_v49  ;;  %v8087_v18 = vld [vmem:[%s11638_s4 + $0x2f0] sm:$0xff]  }
 0x1b3   :  { %v8088_v2 = vld [vmem:[%s11638_s4 + $0x230] sm:$0xff]  }
 0x1b4   :  { %1254 = vmatmul.mubr.bf16.vlgmr.msra.gmra.mrb[8].mxu0 %v9282_v30  ;;  %1294 = vmatmul.mubr.bf16.vlgmr.msra.gmra.mrb[8].mxu1 %v9284_v4  ;;  %v8089_v49 = vld [vmem:[%s11638_s4 + $0x2b0] sm:$0xff]  }
 0x1b5   :  { %7714 = vmatpush3.bf16.msra.mxu0 %v8064_v56  ;;  %1590 = vmatprep.mubr.bf16.mxu0 %v9272_v38  ;;  %v8090_v56 = vld [vmem:[%s11638_s4 + $0x278] sm:$0xff]  }
 0x1b6   :  { %7736 = vmatpush3.bf16.msra.mxu1 %v8065_v32  ;;  %1630 = vmatprep.mubr.bf16.mxu1 %v9274_v8  ;;  %v8091_v32 = vld [vmem:[%s11638_s4 + $0x2f8] sm:$0xff]  }
 0x1b7   :  { %7715 = vmatprep.subr.bf16.mxu0 %v8066_v51  ;;  %7737 = vmatprep.subr.bf16.mxu1 %v8067_v41  ;;  %v8092_v51 = vld [vmem:[%s11638_s4 + $0x238] sm:$0xff]  }
 0x1b8   :  { %v8093_v41 = vld [vmem:[%s11638_s4 + $0x2b8] sm:$0xff]  }
 0x1b9   :  { %7716 = vmatpush3.bf16.msra.mxu0 %v8068_v46  ;;  %v8094_v46 = vld [vmem:[%s11638_s4 + $0x340] sm:$0xff]  }
 0x1ba   :  { %7738 = vmatpush3.bf16.msra.mxu1 %v8069_v58  ;;  %7717 = vmatprep.subr.bf16.mxu0 %v8070_v57  ;;  %v8095_v58 = vld [vmem:[%s11638_s4 + $0x3c0] sm:$0xff]  }
 0x1bb   :  { %7739 = vmatprep.subr.bf16.mxu1 %v8071_v19  ;;  %v8096_v57 = vld [vmem:[%s11638_s4 + $0x300] sm:$0xff]  }
 0x1bc   :  { %v8097_v19 = vld [vmem:[%s11638_s4 + $0x380] sm:$0xff]  }
 0x1bd   :  { %7718 = vmatpush3.bf16.msra.mxu0 %v8072_v50  ;;  %v8098_v50 = vld [vmem:[%s11638_s4 + $0x348] sm:$0xff]  }
 0x1be   :  { %7740 = vmatpush3.bf16.msra.mxu1 %v8073_v1  ;;  %7719 = vmatprep.subr.bf16.mxu0 %v8074_v17  ;;  %v8099_v1 = vld [vmem:[%s11638_s4 + $0x3c8] sm:$0xff]  }
 0x1bf   :  { %7741 = vmatprep.subr.bf16.mxu1 %v8075_v35  ;;  %v8100_v17 = vld [vmem:[%s11638_s4 + $0x308] sm:$0xff]  }
 0x1c0   :  { %v8101_v35 = vld [vmem:[%s11638_s4 + $0x388] sm:$0xff]  }
 0x1c1   :  { %7720 = vmatpush3.bf16.msra.mxu0 %v8076_v31  ;;  %v8102_v31 = vld [vmem:[%s11638_s4 + $0x350] sm:$0xff]  }
 0x1c2   :  { %7742 = vmatpush3.bf16.msra.mxu1 %v8077_v52  ;;  %7721 = vmatprep.subr.bf16.mxu0 %v8078_v63  ;;  %v8103_v52 = vld [vmem:[%s11638_s4 + $0x3d0] sm:$0xff]  }
 0x1c3   :  { %7743 = vmatprep.subr.bf16.mxu1 %v8079_v21  ;;  %v8105_v63 = vld [vmem:[%s11638_s4 + $0x390] sm:$0xff]   ;;  %v8107_v21 = vld [vmem:[%s11638_s4 + $0x3d8] sm:$0xff]  }
 0x1c5   :  { %7722 = vmatpush3.bf16.msra.mxu0 %v8080_v16  ;;  %v8108_v16 = vld [vmem:[%s11638_s4 + $0x318] sm:$0xff]  }
 0x1c6   :  { %7744 = vmatpush3.bf16.msra.mxu1 %v8081_v40  ;;  %7723 = vmatprep.subr.bf16.mxu0 %v8082_v39  ;;  %v8109_v40 = vld [vmem:[%s11638_s4 + $0x398] sm:$0xff]   ;;  %v8110_v39 = vld [vmem:[%s11638_s4 + $0x360] sm:$0xff]  }
 0x1c7   :  { %7745 = vmatprep.subr.bf16.mxu1 %v8083_v60  ;;  %v8111_v60 = vld [vmem:[%s11638_s4 + $0x3e0] sm:$0xff]  }
 0x1c9   :  { %7724 = vmatpush3.bf16.msra.mxu0 %v8084_v62  ;;  %v8112_v62 = vld [vmem:[%s11638_s4 + $0x320] sm:$0xff]  }
 0x1ca   :  { %7746 = vmatpush3.bf16.msra.mxu1 %v8085_v26  ;;  %7725 = vmatprep.subr.bf16.mxu0 %v8086_v33  ;;  %v8113_v26 = vld [vmem:[%s11638_s4 + $0x3a0] sm:$0xff]   ;;  %v8114_v33 = vld [vmem:[%s11638_s4 + $0x368] sm:$0xff]  }
 0x1cb   :  { %7747 = vmatprep.subr.bf16.mxu1 %v8087_v18  ;;  %v8115_v18 = vld [vmem:[%s11638_s4 + $0x3e8] sm:$0xff]  }
 0x1cd   :  { %7726 = vmatpush3.bf16.msra.mxu0 %v8088_v2  ;;  %v8116_v2 = vld [vmem:[%s11638_s4 + $0x328] sm:$0xff]  }
 0x1ce   :  { %7748 = vmatpush3.bf16.msra.mxu1 %v8089_v49  ;;  %7727 = vmatprep.subr.bf16.mxu0 %v8090_v56  ;;  %v8117_v49 = vld [vmem:[%s11638_s4 + $0x3a8] sm:$0xff]   ;;  %v8118_v56 = vld [vmem:[%s11638_s4 + $0x370] sm:$0xff]  }
 0x1cf   :  { %7749 = vmatprep.subr.bf16.mxu1 %v8091_v32  ;;  %v8119_v32 = vld [vmem:[%s11638_s4 + $0x3f0] sm:$0xff]  }
 0x1d1   :  { %7728 = vmatpush3.bf16.msra.mxu0 %v8092_v51  ;;  %v8120_v51 = vld [vmem:[%s11638_s4 + $0x330] sm:$0xff]  }
 0x1d2   :  { %7750 = vmatpush3.bf16.msra.mxu1 %v8093_v41  ;;  %7757 = vmatprep.subr.bf16.mxu0 %v8094_v46  ;;  %v8121_v41 = vld [vmem:[%s11638_s4 + $0x3b0] sm:$0xff]   ;;  %v8122_v46 = vld [vmem:[%s11638_s4 + $0x378] sm:$0xff]  }
 0x1d3   :  { %7779 = vmatprep.subr.bf16.mxu1 %v8095_v58  ;;  %v8123_v58 = vld [vmem:[%s11638_s4 + $0x3f8] sm:$0xff]  }
 0x1d4   :  { %1591 = vmatmul.mubr.bf16.vlgmr.msra.gmra.mrb[12].mxu0 %v9282_v30 }
 0x1d5   :  { %1631 = vmatmul.mubr.bf16.vlgmr.msra.gmra.mrb[12].mxu1 %v9284_v4  ;;  %7758 = vmatpush3.bf16.msra.mxu0 %v8096_v57  ;;  %v8124_v57 = vld [vmem:[%s11638_s4 + $0x338] sm:$0xff]  }
 0x1d6   :  { %1927 = vmatprep.mubr.bf16.mxu0 %v9272_v38  ;;  %7780 = vmatpush3.bf16.msra.mxu1 %v8097_v19  ;;  %v8104_v38 = vld [vmem:[%s11638_s4 + $0x310] sm:$0xff]   ;;  %v8125_v19 = vld [vmem:[%s11638_s4 + $0x3b8] sm:$0xff]  }
 0x1d7   :  { %1967 = vmatprep.mubr.bf16.mxu1 %v9274_v8  ;;  %7759 = vmatprep.subr.bf16.mxu0 %v8098_v50  ;;  %v8106_v8 = vld [vmem:[%s11638_s4 + $0x358] sm:$0xff]   ;;  %v8126_v50 = vld [vmem:[%s11637_s6 + $0x4] ss:$16 sps:$4 sm:$0xff]  }
 0x1d8   :  { %7781 = vmatprep.subr.bf16.mxu1 %v8099_v1  ;;  %v50_v1 = vld [vmem:[%s11639_s9 + $0x8] sm:$0xff] }
 0x1d9   :  { %7760 = vmatpush3.bf16.msra.mxu0 %v8100_v17  ;;  %1990 = vperm.xlu1 %7995, %v50_v1   ;;  %v51_v17 = vld [vmem:[%s11639_s9 + $0x10] sm:$0xff] }
 0x1da   :  { %7782 = vmatpush3.bf16.msra.mxu1 %v8101_v35  ;;  %7761 = vmatprep.subr.bf16.mxu0 %v8102_v31  ;;  %v53_v35 = vld [vmem:[%s11639_s9 + $0x20] sm:$0xff]  ;;  %v8130_v31 = vld [vmem:[%s11642_s3 + $0x10] sm:$0xff]  }
 0x1db   :  { %7783 = vmatprep.subr.bf16.mxu1 %v8103_v52  ;;  %v2096_v52 = vld [vmem:[%s11640_s10 + $0x18] sm:$0xff] }
 0x1dd   :  { %7762 = vmatpush3.bf16.msra.mxu0 %v8104_v38  ;;  %1995 = vperm.xlu1 %7995, %v51_v17   ;;  %v8131_v38 = vld [vmem:[%s11642_s3 + $0x18] sm:$0xff]  }
 0x1de   :  { %7784 = vmatpush3.bf16.msra.mxu1 %v8105_v63  ;;  %7763 = vmatprep.subr.bf16.mxu0 %v8106_v8  ;;  %v2094_v63 = vld [vmem:[%s11640_s10 + $0x8] sm:$0xff]  ;;  %v8132_v8 = vld [vmem:[%s11642_s3 + $0x20] sm:$0xff]  }
 0x1df   :  { %7785 = vmatprep.subr.bf16.mxu1 %v8107_v21 }
 0x1e1   :  { %7764 = vmatpush3.bf16.msra.mxu0 %v8108_v16  ;;  %2005 = vperm.xlu1 %7995, %v53_v35  }
 0x1e2   :  { %7786 = vmatpush3.bf16.msra.mxu1 %v8109_v40  ;;  %7765 = vmatprep.subr.bf16.mxu0 %v8110_v39 }
 0x1e3   :  { %7787 = vmatprep.subr.bf16.mxu1 %v8111_v60 }
 0x1e5   :  { %7766 = vmatpush3.bf16.msra.mxu0 %v8112_v62  ;;  %2257 = vperm.xlu1 %7995, %v2096_v52  }
 0x1e6   :  { %7788 = vmatpush3.bf16.msra.mxu1 %v8113_v26  ;;  %7767 = vmatprep.subr.bf16.mxu0 %v8114_v33 }
 0x1e7   :  { %7789 = vmatprep.subr.bf16.mxu1 %v8115_v18  ;;  %v8133_v18 = vld [vmem:[%s11642_s3 + $0x28] sm:$0xff]  }
 0x1e9   :  { %7768 = vmatpush3.bf16.msra.mxu0 %v8116_v2  ;;  %2247 = vperm.xlu1 %7995, %v2094_v63  }
 0x1ea   :  { %7790 = vmatpush3.bf16.msra.mxu1 %v8117_v49  ;;  %7769 = vmatprep.subr.bf16.mxu0 %v8118_v56 }
 0x1eb   :  { %7791 = vmatprep.subr.bf16.mxu1 %v8119_v32 }
 0x1ed   :  { %7770 = vmatpush3.bf16.msra.mxu0 %v8120_v51 }
 0x1ee   :  { %7792 = vmatpush3.bf16.msra.mxu1 %v8121_v41  ;;  %7771 = vmatprep.subr.bf16.mxu0 %v8122_v46 }
 0x1ef   :  { %7793 = vmatprep.subr.bf16.mxu1 %v8123_v58 }
 0x1f1   :  { %7772 = vmatpush3.bf16.msra.mxu0 %v8124_v57 }
 0x1f2   :  { %7794 = vmatpush3.bf16.msra.mxu1 %v8125_v19 }
 0x1f4   :  { %1928 = vmatmul.mubr.bf16.vlgmr.msra.gmra.mrb[16].mxu0 %v9282_v30  ;;  %v8128_v30 = vld [vmem:[%s11642_s3] sm:$0xff]  }
 0x1f5   :  { %1968 = vmatmul.mubr.bf16.vlgmr.msra.gmra.mrb[16].mxu1 %v9284_v4  ;;  %7848 = vmatprep.mubr.msk.bf16.mxu0 %vm2018_vm12, %v8126_v50  ;;  %v8129_v4 = vld [vmem:[%s11642_s3 + $0x8] sm:$0xff]  }
 0x1f6   :  { %7852 = vmatprep.subr.bf16.mxu1 %v8128_v30 }
 0x1f7   :  { %7853 = vmatpush3.bf16.msra.mxu1 %v8128_v30 }
 0x1f8   :  { %7854 = vmatprep.subr.bf16.mxu1 %v8129_v4 }
 0x1fb   :  { %7855 = vmatpush3.bf16.msra.mxu1 %v8129_v4 }
 0x1fc   :  { %7856 = vmatprep.subr.bf16.mxu1 %v8130_v31 }
 0x1ff   :  { %7857 = vmatpush3.bf16.msra.mxu1 %v8130_v31 }
 0x200   :  { %7858 = vmatprep.subr.bf16.mxu1 %v8131_v38 }
 0x203   :  { %7859 = vmatpush3.bf16.msra.mxu1 %v8131_v38 }
 0x204   :  { %7860 = vmatprep.subr.bf16.mxu1 %v8132_v8 }
 0x207   :  { %7861 = vmatpush3.bf16.msra.mxu1 %v8132_v8 }
 0x208   :  { %7862 = vmatprep.subr.bf16.mxu1 %v8133_v18 }
 0x20b   :  { %7863 = vmatpush3.bf16.msra.mxu1 %v8133_v18 }
 0x267   :  { %v7641_v21 = vpop.f32.mrb[4].mxu0  ;;  %v7663_v16 = vpop.f32.mrb[4].mxu1 }
 0x268   :  { %v7642_v40 = vpop.f32.mrb[5].mxu0  ;;  %v7664_v39 = vpop.f32.mrb[5].mxu1 }
 0x269   :  { %v7643_v60 = vadd.f32 %v7642_v40, %v7641_v21  ;;  %v7665_v62 = vadd.f32 %v7664_v39, %v7663_v16  ;;  %v7644_v26 = vpop.f32.mrb[6].mxu0  ;;  %v7666_v33 = vpop.f32.mrb[6].mxu1 }
 0x26a   :  { %v7645_v2 = vpop.f32.mrb[7].mxu0  ;;  %v7667_v49 = vpop.f32.mrb[7].mxu1 }
 0x26b   :  { %v959_v56 = vadd.f32 %v7665_v62, %v7643_v60 }
 0x287   :  { %v7685_v32 = vpop.f32.mrb[8].mxu0  ;;  %v7707_v51 = vpop.f32.mrb[8].mxu1 }
 0x288   :  { %v7686_v41 = vpop.f32.mrb[9].mxu0  ;;  %v7708_v46 = vpop.f32.mrb[9].mxu1 }
 0x289   :  { %v7687_v58 = vadd.f32 %v7686_v41, %v7685_v32  ;;  %v7709_v57 = vadd.f32 %v7708_v46, %v7707_v51  ;;  %v7688_v19 = vpop.f32.mrb[10].mxu0  ;;  %v7710_v50 = vpop.f32.mrb[10].mxu1 }
 0x28a   :  { %v7689_v1 = vpop.f32.mrb[11].mxu0  ;;  %v7711_v17 = vpop.f32.mrb[11].mxu1 }
 0x28b   :  { %v1296_v30 = vadd.f32 %v7709_v57, %v7687_v58 }
 0x28d   :  { %v1976_v4 = vrot.slane %v1296_v30, 6 }
 0x28f   :  { %v1984_v35 = vsel %vm454_vm4, %v959_v56, %v1976_v4  ;;  %v8127_v4 = vld [vmem:[%s11637_s6 + $0x24] ss:$16 sps:$4 sm:$0xff]  }
 0x2a7   :  { %v7729_v31 = vpop.f32.mrb[12].mxu0 }
 0x2a8   :  { %v7751_v52 = vpop.f32.mrb[12].mxu1  ;;  %v7730_v38 = vpop.f32.mrb[13].mxu0 }
 0x2a9   :  { %v7731_v63 = vadd.f32 %v7730_v38, %v7729_v31  ;;  %v7752_v8 = vpop.f32.mrb[13].mxu1  ;;  %v7732_v21 = vpop.f32.mrb[14].mxu0  ;;  %v8134_v31 = vld [vmem:[%s11642_s3 + $0x30] sm:$0xff]  }
 0x2aa   :  { %v7753_v16 = vadd.f32 %v7752_v8, %v7751_v52  ;;  %v7754_v40 = vpop.f32.mrb[14].mxu1  ;;  %v7733_v39 = vpop.f32.mrb[15].mxu0  ;;  %7864 = vmatprep.subr.bf16.mxu1 %v8134_v31  ;;  %v8135_v52 = vld [vmem:[%s11642_s3 + $0x38] sm:$0xff]  }
 0x2ab   :  { %v7755_v60 = vpop.f32.mrb[15].mxu1  ;;  %7865 = vmatpush3.bf16.msra.mxu1 %v8134_v31  ;;  %v1991_v38 = vpop.permute.xlu1 %1990 }
 0x2ac   :  { %v1633_v62 = vadd.f32 %v7753_v16, %v7731_v63  ;;  %7866 = vmatprep.subr.bf16.mxu1 %v8135_v52  ;;  %v2001_v21 = vpop.permute.xlu0 %2000 }
 0x2ae   :  { %v1979_v26 = vrot.slane %v1633_v62, 4 }
 0x2af   :  { %7867 = vmatpush3.bf16.msra.mxu1 %v8135_v52  ;;  %v1996_v63 = vpop.permute.xlu1 %1995 }
 0x2b0   :  { %v1985_v33 = vsel %vm11658_vm5, %v1984_v35, %v1979_v26  ;;  %v11720_v35 = vmov 0  }
 0x2b1   :  { %2520 = vmatprep.subr.bf16.mxu1 %v11720_v35 }
 0x2b3   :  { %v2006_v40 = vpop.permute.xlu1 %2005 }
 0x2c7   :  { %v7773_v18 = vpop.f32.mrb[16].mxu0 }
 0x2c8   :  { %v7795_v2 = vpop.f32.mrb[16].mxu1  ;;  %v7774_v49 = vpop.f32.mrb[17].mxu0 }
 0x2c9   :  { %v7775_v32 = vadd.f32 %v7774_v49, %v7773_v18  ;;  %v7796_v51 = vpop.f32.mrb[17].mxu1  ;;  %v7776_v56 = vpop.f32.mrb[18].mxu0 }
 0x2ca   :  { %v7797_v41 = vadd.f32 %v7796_v51, %v7795_v2  ;;  %v7798_v46 = vpop.f32.mrb[18].mxu1  ;;  %v7777_v58 = vpop.f32.mrb[19].mxu0 }
 0x2cb   :  { %v7799_v57 = vpop.f32.mrb[19].mxu1 }
 0x2cc   :  { %v1970_v19 = vadd.f32 %v7797_v41, %v7775_v32 }
 0x2ce   :  { %v1982_v50 = vrot.slane %v1970_v19, 2 }
 0x2d0   :  { %v1986_v1 = vsel %vm11657_vm6, %v1985_v33, %v1982_v50 }
 0x2d1   :  { %v1987_v17 = vpack.c.bf16 %v1986_v1, %v1986_v1 }
 0x2d3   :  { %7946 = vmatprep.subr.msk.bf16.mxu0 %vm11658_vm5, %v1987_v17  ;;  %v2026_v30 = vsel %vm11658_vm5, %v1987_v17, 0 }
 0x2d4   :  { %7847 = vmatpush3.bf16.msra.mxu0 %v2026_v30 }
 0x2d5   :  { %2457 = vmatprep.subr.bf16.mxu0 %v11720_v35 }
 0x2d7   :  { %7849 = vmatmul.mubr.msk.bf16.vlgmr.msra.gmra.mrb[20].mxu0 %vm2018_vm12, %v8127_v4 }
 0x3aa   :  { %v7850_v8 = vpop.f32.mrb[20].mxu0 }
 0x3ab   :  { %v2062_v16 = vpop.f32.mrb[21].mxu0  ;;  %v9634_v62 = vadd.f32 %v7850_v8, %v2001_v21 }
 0x3ac   :  { %v9632_v39 = vadd.f32 %v2062_v16, %v1991_v38  ;;  %v7851_v60 = vpop.f32.mrb[22].mxu0 }
 0x3ad   :  { %v9636_v26 = vadd.f32 %v7851_v60, %v2006_v40  ;;  %v2065_v33 = vpop.f32.mrb[23].mxu0  ;;  %v2107_v51 = vmul.f32 %v9634_v62, %v9634_v62 }
 0x3ae   :  { %v9638_v18 = vadd.f32 %v2065_v33, %v1996_v63  ;;  %v2105_v49 = vmul.f32 %v9632_v39, %v9632_v39 }
 0x3af   :  { %v2108_v2 = vmul.f32 %v9636_v26, %v9636_v26 }
 0x3b0   :  { %v2106_v32 = vmul.f32 %v9638_v18, %v9638_v18 }
 0x3b1   :  { %v2110_v41 = vpack.c.bf16 %v2108_v2, %v2107_v51 }
 0x3b2   :  { %v2109_v56 = vpack.c.bf16 %v2106_v32, %v2105_v49 }
 0x3b4   :  { %7868 = vmatprep.mubr.bf16.mxu1 %v2109_v56 }
 0x3b5   :  { %7869 = vmatmul.mubr.bf16.vlgmr.msra.gmra.mrb[20].mxu1 %v2110_v41 }
 0x488   :  { %v7870_v46 = vpop.f32.mrb[20].mxu1 }
 0x489   :  { %8544 = vrsqrt.f32 %v7870_v46  ;;  %v2193_v58 = vpop.f32.mrb[21].mxu1  ;;  %vm2224_vm13 = vcmp.eq.f32.partialorder %v7870_v46, inf  ;;  %vm2226_vm14 = vcmp.eq.f32.partialorder %v7870_v46, 0.0  ;;  %v2227_v30 = vand.u32 2147483648, %v7870_v46 }
 0x48a   :  { %8546 = vrsqrt.f32 %v2193_v58  ;;  %v7871_v57 = vpop.f32.mrb[22].mxu1  ;;  %vm2210_vm15 = vcmp.eq.f32.partialorder %v2193_v58, inf  ;;  %vm2212_vm11 = vcmp.eq.f32.partialorder %v2193_v58, 0.0  ;;  %v2213_v52 = vand.u32 2147483648, %v2193_v58 }
 0x48b   :  { %8548 = vrsqrt.f32 %v7871_v57  ;;  %v2196_v19 = vpop.f32.mrb[23].mxu1  ;;  %vm2231_vm12 = vcmp.eq.f32.partialorder %v7871_v57, inf  ;;  %vm2233_vm6 = vcmp.eq.f32.partialorder %v7871_v57, 0.0  ;;  %v2234_v21 = vand.u32 2147483648, %v7871_v57 }
 0x48c   :  { %8550 = vrsqrt.f32 %v2196_v19  ;;  %vm2217_vm5 = vcmp.eq.f32.partialorder %v2196_v19, inf  ;;  %v2220_v32 = vand.u32 2147483648, %v2196_v19  ;;  %vm2219_vm10 = vcmp.eq.f32.partialorder %v2196_v19, 0.0 }
 0x493   :  { %v8545_v50 = vpop.eup %8544 }
 0x494   :  { %v8547_v1 = vpop.eup %8546  ;;  %v2223_v17 = vmul.f32 %v8545_v50, %v7870_v46 }
 0x495   :  { %v8549_v4 = vpop.eup %8548  ;;  %v2209_v31 = vmul.f32 %v8547_v1, %v2193_v58 }
 0x496   :  { %v8551_v38 = vpop.eup %8550  ;;  %v2225_v63 = vsel %vm2224_vm13, %v7870_v46, %v2223_v17  ;;  %v2230_v8 = vmul.f32 %v8549_v4, %v7871_v57  ;;  %v2258_v4 = vpop.permute.xlu1 %2257 }
 0x497   :  { %v2228_v16 = vsel %vm2226_vm14, %v2227_v30, %v2225_v63  ;;  %v2211_v40 = vsel %vm2210_vm15, %v2193_v58, %v2209_v31  ;;  %v2216_v60 = vmul.f32 %v8551_v38, %v2196_v19  ;;  %v2253_v58 = vpop.permute.xlu0 %2252 }
 0x498   :  { %v2238_v33 = vmul.f32 0.35355338, %v2228_v16  ;;  %v2214_v2 = vsel %vm2212_vm11, %v2213_v52, %v2211_v40  ;;  %v2232_v49 = vsel %vm2231_vm12, %v7871_v57, %v2230_v8  ;;  %v9651_v57 = vld [vmem:[%s11641_s1 + $0x20] sm:$0xff]  ;;  %v2263_v8 = vmul.f32 %v2258_v4, %v9636_v26  ;;  %v2098_v4 = vld [vmem:[%s11640_s10 + $0x28] sm:$0xff] }
 0x499   :  { %v2236_v51 = vmul.f32 0.35355338, %v2214_v2  ;;  %v2235_v56 = vsel %vm2233_vm6, %v2234_v21, %v2232_v49  ;;  %v2218_v41 = vsel %vm2217_vm5, %v2196_v19, %v2216_v60  ;;  %v2262_v19 = vmul.f32 %v2253_v58, %v9634_v62  ;;  %v2097_v58 = vld [vmem:[%s11640_s10 + $0x20] sm:$0xff] }
 0x49a   :  { %v2266_v50 = vadd.f32 1e-08, %v2238_v33  ;;  %v2239_v1 = vmul.f32 0.35355338, %v2235_v56  ;;  %v2221_v3 = vsel %vm2219_vm10, %v2220_v32, %v2218_v41  ;;  %v2248_v63 = vpop.permute.xlu1 %2247  ;;  %vm2453_vm5 = vcmask 130048  }
 0x49b   :  { %v2264_v10 = vadd.f32 1e-08, %v2236_v51  ;;  %v2237_v46 = vmul.f32 0.35355338, %v2221_v3  ;;  %v2243_v31 = vpop.permute.xlu0 %2242  ;;  %v2261_v40 = vmul.f32 %v2248_v63, %v9638_v18  ;;  %v7195_v63 = vld [vmem:[%s11640_s10 + $0x78] sm:$0xff] }
 0x49c   :  { %8552 = vrcp.f32 %v2266_v50  ;;  %v2267_v17 = vadd.f32 1e-08, %v2239_v1  ;;  %v2260_v38 = vmul.f32 %v2243_v31, %v9632_v39  ;;  %v8136_v1 = vld [vmem:[%s11643_s7 + $0x14] ss:$8 sps:$4 sm:$0xff]   ;;  %v2101_v31 = vld [vmem:[%s11640_s10 + $0x40] sm:$0xff] }
 0x49d   :  { %8554 = vrcp.f32 %v2264_v10  ;;  %v2265_v30 = vadd.f32 1e-08, %v2237_v46  ;;  %v9657_v10 = vrot.slane %v9651_v57, %v8916_v48  ;;  %7179 = vmatprep.mubr.msk.bf16.mxu1 %vm2453_vm5, %v8136_v1  ;;  %v8139_v46 = vld [vmem:[%s11643_s7 + $0x4] ss:$8 sps:$4 sm:$0xff]  }
 0x49e   :  { %8556 = vrcp.f32 %v2267_v17  ;;  %7176 = vmatprep.mubr.msk.bf16.mxu0 %vm2453_vm5, %v8139_v46  ;;  %v2099_v17 = vld [vmem:[%s11640_s10 + $0x30] sm:$0xff] }
 0x49f   :  { %8558 = vrcp.f32 %v2265_v30  ;;  %v2100_v30 = vld [vmem:[%s11640_s10 + $0x38] sm:$0xff] }
 0x4a6   :  { %v8553_v52 = vpop.eup %8552 }
 0x4a7   :  { %v8555_v3 = vpop.eup %8554  ;;  %v2274_v21 = vmul.f32 %v8553_v52, %v2262_v19  ;;  %v2102_v19 = vld [vmem:[%s11640_s10 + $0x48] sm:$0xff]  ;;  %v2103_v52 = vld [vmem:[%s11640_s10 + $0x50] sm:$0xff] }
 0x4a8   :  { %v8557_v16 = vpop.eup %8556  ;;  %v2272_v60 = vmul.f32 %v8555_v3, %v2260_v38  ;;  %v2104_v38 = vld [vmem:[%s11640_s10 + $0x58] sm:$0xff]  ;;  %v7194_v3 = vld [vmem:[%s11640_s10 + $0x70] sm:$0xff] }
 0x4a9   :  { %v8559_v33 = vpop.eup %8558  ;;  %v2275_v2 = vmul.f32 %v8557_v16, %v2263_v8  ;;  %2280 = vrot.lane.b32.xlu0 %v2274_v21, %s8671_s20  ;;  %v9664_v32 = vmul.f32 %v9657_v10, %v2274_v21  ;;  %v7192_v8 = vld [vmem:[%s11640_s10 + $0x60] sm:$0xff]  ;;  %v9755_v16 = vrot.slane %v9651_v57, %v8834_v14 }
 0x4aa   :  { %v2273_v49 = vmul.f32 %v8559_v33, %v2261_v40  ;;  %v9670_v51 = vmul.f32 %v9657_v10, %v2272_v60  ;;  %v9759_v33 = vrot.slane %v9651_v57, %v8828_v12 }
 0x4ab   :  { %2282 = vrot.lane.b32.xlu1 %v2275_v2, %s8671_s20  ;;  %v9667_v48 = vmul.f32 %v9657_v10, %v2275_v2 }
 0x4ac   :  { %v9673_v56 = vmul.f32 %v9657_v10, %v2273_v49 }
 0x4ad   :  { %2298 = vrot.lane.b32.xlu0 %v2274_v21, %s8672_s28  ;;  %v2357_v41 = vpack.c.bf16 %v9667_v48, %v9664_v32 }
 0x4ae   :  { %v2356_v50 = vpack.c.bf16 %v9673_v56, %v9670_v51 }
 0x4af   :  { %2300 = vrot.lane.b32.xlu1 %v2275_v2, %s8672_s28 }
 0x4b1   :  { %2316 = vrot.lane.b32.xlu0 %v2274_v21, %s8673_s29 }
 0x4b3   :  { %2318 = vrot.lane.b32.xlu1 %v2275_v2, %s8673_s29 }
 0x4b5   :  { %2334 = vrot.lane.b32.xlu0 %v2274_v21, %s8665_s23 }
 0x4b7   :  { %2336 = vrot.lane.b32.xlu1 %v2275_v2, %s8665_s23 }
 0x4b9   :  { %2362 = vrot.lane.b32.xlu0 %v2274_v21, %s8666_s24 }
 0x4bb   :  { %2364 = vrot.lane.b32.xlu1 %v2275_v2, %s8666_s24 }
 0x4bd   :  { %2380 = vrot.lane.b32.xlu0 %v2274_v21, %s8674_s30 }
 0x4bf   :  { %2382 = vrot.lane.b32.xlu1 %v2275_v2, %s8674_s30 }
 0x4c1   :  { %2398 = vrot.lane.b32.xlu0 %v2274_v21, %s8675_s12 }
 0x4c3   :  { %2400 = vrot.lane.b32.xlu1 %v2275_v2, %s8675_s12 }
 0x4c5   :  { %2416 = vrot.lane.b32.xlu0 %v2274_v21, %s8676_s15  ;;  %v7193_v21 = vld [vmem:[%s11640_s10 + $0x68] sm:$0xff] }
 0x4c7   :  { %2418 = vrot.lane.b32.xlu1 %v2275_v2, %s8676_s15 }
 0x4c9   :  { %2276 = vrot.lane.b32.xlu0 %v2272_v60, %s8671_s20 }
 0x4cb   :  { %2278 = vrot.lane.b32.xlu1 %v2273_v49, %s8671_s20 }
 0x4cd   :  { %2294 = vrot.lane.b32.xlu0 %v2272_v60, %s8672_s28 }
 0x4cf   :  { %2296 = vrot.lane.b32.xlu1 %v2273_v49, %s8672_s28 }
 0x4d1   :  { %2312 = vrot.lane.b32.xlu0 %v2272_v60, %s8673_s29 }
 0x4d3   :  { %2314 = vrot.lane.b32.xlu1 %v2273_v49, %s8673_s29 }
 0x4d5   :  { %2330 = vrot.lane.b32.xlu0 %v2272_v60, %s8665_s23 }
 0x4d7   :  { %2332 = vrot.lane.b32.xlu1 %v2273_v49, %s8665_s23 }
 0x4d9   :  { %2358 = vrot.lane.b32.xlu0 %v2272_v60, %s8666_s24 }
 0x4db   :  { %2360 = vrot.lane.b32.xlu1 %v2273_v49, %s8666_s24 }
 0x4dd   :  { %2376 = vrot.lane.b32.xlu0 %v2272_v60, %s8674_s30 }
 0x4df   :  { %2378 = vrot.lane.b32.xlu1 %v2273_v49, %s8674_s30 }
 0x4e1   :  { %2394 = vrot.lane.b32.xlu0 %v2272_v60, %s8675_s12 }
 0x4e3   :  { %2396 = vrot.lane.b32.xlu1 %v2273_v49, %s8675_s12 }
 0x4e5   :  { %2412 = vrot.lane.b32.xlu0 %v2272_v60, %s8676_s15 }
 0x4e7   :  { %2414 = vrot.lane.b32.xlu1 %v2273_v49, %s8676_s15 }
 0x4e9   :  { %2500 = vperm.xlu0 %7994, %v2099_v17  }
 0x4eb   :  { %2505 = vperm.xlu1 %7995, %v2100_v30   ;;  %v9765_v30 = vrot.slane %v9651_v57, %v8831_v13 }
 0x4ed   :  { %2436 = vperm.xlu0 %7994, %v2097_v58  }
 0x4ef   :  { %2441 = vperm.xlu1 %7995, %v2098_v4  }
 0x4f1   :  { %2847 = vperm.xlu0 %7994, %v2101_v31  }
 0x4f3   :  { %2852 = vperm.xlu1 %7995, %v2102_v19   ;;  %v9772_v19 = vrot.slane %v9651_v57, %v8837_v15 }
 0x4f5   :  { %2857 = vperm.xlu0 %7994, %v2103_v52  }
 0x4f7   :  { %2862 = vperm.xlu1 %7995, %v2104_v38  }
 0x4f9   :  { %2981 = vperm.xlu0 %7994, %v7194_v3  }
 0x4fb   :  { %2986 = vperm.xlu1 %7995, %v7195_v63  }
 0x4fd   :  { %2971 = vperm.xlu0 %7994, %v7192_v8  }
 0x4ff   :  { %2976 = vperm.xlu1 %7995, %v7193_v21  }
 0x51b   :  { %v2281_v40 = vpop.permute.xlu0 %2280 }
 0x51c   :  { %v2290_v2 = vmul.f32 %v9755_v16, %v2281_v40 }
 0x51d   :  { %v2283_v60 = vpop.permute.xlu1 %2282 }
 0x51e   :  { %v2291_v49 = vmul.f32 %v9755_v16, %v2283_v60 }
 0x51f   :  { %v2299_v1 = vpop.permute.xlu0 %2298 }
 0x520   :  { %v2293_v46 = vpack.c.bf16 %v2291_v49, %v2290_v2  ;;  %v2308_v14 = vmul.f32 %v9759_v33, %v2299_v1  ;;  %v9782_v2 = vrot.slane %v9651_v57, %v8913_v47 }
 0x521   :  { %v2301_v17 = vpop.permute.xlu1 %2300 }
 0x522   :  { %v2309_v58 = vmul.f32 %v9759_v33, %v2301_v17  ;;  %2521 = vmatpush1.bf16.msra.mxu1 %v2293_v46  ;;  %v9788_v17 = vrot.slane %v9651_v57, %v9011_v9 }
 0x523   :  { %v2317_v4 = vpop.permute.xlu0 %2316  ;;  %2522 = vmatprep.subr.bf16.mxu1 %v11720_v35 }
 0x524   :  { %v2311_v12 = vpack.c.bf16 %v2309_v58, %v2308_v14  ;;  %v2326_v52 = vmul.f32 %v9765_v30, %v2317_v4 }
 0x525   :  { %v2319_v31 = vpop.permute.xlu1 %2318 }
 0x526   :  { %v2327_v38 = vmul.f32 %v9765_v30, %v2319_v31  ;;  %2523 = vmatpush1.bf16.msra.mxu1 %v2311_v12  ;;  %v9798_v31 = vrot.slane %v9651_v57, %v9062_v0 }
 0x527   :  { %v2335_v13 = vpop.permute.xlu0 %2334  ;;  %2524 = vmatprep.subr.bf16.mxu1 %v11720_v35 }
 0x528   :  { %v2329_v3 = vpack.c.bf16 %v2327_v38, %v2326_v52  ;;  %v2344_v8 = vmul.f32 %v9772_v19, %v2335_v13  ;;  %v9807_v13 = vld [vmem:[%s11641_s1 + $0x48] ss:$0 sm:$0xff] }
 0x529   :  { %v2337_v63 = vpop.permute.xlu1 %2336 }
 0x52a   :  { %v2345_v21 = vmul.f32 %v9772_v19, %v2337_v63  ;;  %2525 = vmatpush1.bf16.msra.mxu1 %v2329_v3 }
 0x52b   :  { %v2363_v40 = vpop.permute.xlu0 %2362  ;;  %2526 = vmatprep.subr.bf16.mxu1 %v11720_v35 }
 0x52c   :  { %v2347_v15 = vpack.c.bf16 %v2345_v21, %v2344_v8  ;;  %v2372_v14 = vmul.f32 %v9782_v2, %v2363_v40 }
 0x52d   :  { %v2365_v60 = vpop.permute.xlu1 %2364 }
 0x52e   :  { %2527 = vmatpush1.bf16.msra.mxu1 %v2347_v15  ;;  %v2373_v1 = vmul.f32 %v9782_v2, %v2365_v60 }
 0x52f   :  { %v2381_v49 = vpop.permute.xlu0 %2380  ;;  %2528 = vmatprep.subr.bf16.mxu1 %v11720_v35 }
 0x530   :  { %v2375_v47 = vpack.c.bf16 %v2373_v1, %v2372_v14  ;;  %v2390_v9 = vmul.f32 %v9788_v17, %v2381_v49 }
 0x531   :  { %v2383_v46 = vpop.permute.xlu1 %2382 }
 0x532   :  { %2529 = vmatpush1.bf16.msra.mxu1 %v2357_v41  ;;  %v2391_v4 = vmul.f32 %v9788_v17, %v2383_v46  ;;  %v8138_v46 = vld [vmem:[%s11643_s7 + $0x10] ss:$8 sps:$4 sm:$0xff]  }
 0x533   :  { %v2399_v58 = vpop.permute.xlu0 %2398  ;;  %2530 = vmatprep.subr.bf16.mxu1 %v11720_v35 }
 0x534   :  { %v2393_v38 = vpack.c.bf16 %v2391_v4, %v2390_v9  ;;  %v2408_v41 = vmul.f32 %v9798_v31, %v2399_v58 }
 0x535   :  { %v2401_v12 = vpop.permute.xlu1 %2400 }
 0x536   :  { %2531 = vmatpush1.bf16.msra.mxu1 %v2375_v47  ;;  %v2409_v32 = vmul.f32 %v9798_v31, %v2401_v12 }
 0x537   :  { %v2417_v52 = vpop.permute.xlu0 %2416  ;;  %2532 = vmatprep.subr.bf16.mxu1 %v11720_v35 }
 0x538   :  { %v2411_v57 = vpack.c.bf16 %v2409_v32, %v2408_v41  ;;  %v2426_v8 = vmul.f32 %v9807_v13, %v2417_v52 }
 0x539   :  { %v2419_v48 = vpop.permute.xlu1 %2418 }
 0x53a   :  { %2533 = vmatpush1.bf16.msra.mxu1 %v2393_v38  ;;  %v2427_v3 = vmul.f32 %v9807_v13, %v2419_v48 }
 0x53b   :  { %v2277_v0 = vpop.permute.xlu0 %2276  ;;  %2534 = vmatprep.subr.bf16.mxu1 %v11720_v35 }
 0x53c   :  { %v2288_v21 = vmul.f32 %v9755_v16, %v2277_v0  ;;  %v2429_v60 = vpack.c.bf16 %v2427_v3, %v2426_v8 }
 0x53d   :  { %v2279_v63 = vpop.permute.xlu1 %2278 }
 0x53e   :  { %v2289_v40 = vmul.f32 %v9755_v16, %v2279_v63  ;;  %2535 = vmatpush1.bf16.msra.mxu1 %v2411_v57 }
 0x53f   :  { %v2295_v15 = vpop.permute.xlu0 %2294  ;;  %2536 = vmatprep.subr.bf16.mxu1 %v11720_v35 }
 0x540   :  { %v2292_v49 = vpack.c.bf16 %v2289_v40, %v2288_v21  ;;  %v2306_v14 = vmul.f32 %v9759_v33, %v2295_v15 }
 0x541   :  { %v2297_v1 = vpop.permute.xlu1 %2296 }
 0x542   :  { %v2307_v58 = vmul.f32 %v9759_v33, %v2297_v1  ;;  %2458 = vmatpush1.bf16.msra.mxu0 %v2292_v49  ;;  %2537 = vmatpush1.bf16.msra.mxu1 %v2429_v60 }
 0x543   :  { %v2313_v47 = vpop.permute.xlu0 %2312  ;;  %2459 = vmatprep.subr.bf16.mxu0 %v11720_v35  ;;  %3150 = vmatprep.subr.bf16.mxu1 %v11720_v35 }
 0x544   :  { %v2310_v4 = vpack.c.bf16 %v2307_v58, %v2306_v14  ;;  %v2324_v9 = vmul.f32 %v9765_v30, %v2313_v47 }
 0x545   :  { %v2315_v12 = vpop.permute.xlu1 %2314  ;;  %2553 = vmatmul.mubr.bf16.vlgmr.msra.gmra.mrb[24].mxu1 %v8138_v46 }
 0x546   :  { %v2325_v52 = vmul.f32 %v9765_v30, %v2315_v12  ;;  %2460 = vmatpush1.bf16.msra.mxu0 %v2310_v4 }
 0x547   :  { %v2331_v38 = vpop.permute.xlu0 %2330  ;;  %2461 = vmatprep.subr.bf16.mxu0 %v11720_v35 }
 0x548   :  { %v2328_v32 = vpack.c.bf16 %v2325_v52, %v2324_v9  ;;  %v2342_v41 = vmul.f32 %v9772_v19, %v2331_v38  ;;  %v8141_v38 = vld [vmem:[%s11643_s7] ss:$8 sps:$4 sm:$0xff]  }
 0x549   :  { %v2333_v48 = vpop.permute.xlu1 %2332 }
 0x54a   :  { %v2343_v0 = vmul.f32 %v9772_v19, %v2333_v48  ;;  %2462 = vmatpush1.bf16.msra.mxu0 %v2328_v32  ;;  %v8142_v32 = vld [vmem:[%s11644_s8] sm:$0xff]  }
 0x54b   :  { %v2359_v57 = vpop.permute.xlu0 %2358  ;;  %2463 = vmatprep.subr.bf16.mxu0 %v11720_v35 }
 0x54c   :  { %v2346_v3 = vpack.c.bf16 %v2343_v0, %v2342_v41  ;;  %v2370_v15 = vmul.f32 %v9782_v2, %v2359_v57 }
 0x54d   :  { %v2361_v63 = vpop.permute.xlu1 %2360 }
 0x54e   :  { %2464 = vmatpush1.bf16.msra.mxu0 %v2346_v3  ;;  %v2371_v21 = vmul.f32 %v9782_v2, %v2361_v63 }
 0x54f   :  { %v2377_v8 = vpop.permute.xlu0 %2376  ;;  %2465 = vmatprep.subr.bf16.mxu0 %v11720_v35 }
 0x550   :  { %v2374_v60 = vpack.c.bf16 %v2371_v21, %v2370_v15  ;;  %v2388_v14 = vmul.f32 %v9788_v17, %v2377_v8 }
 0x551   :  { %v2379_v40 = vpop.permute.xlu1 %2378 }
 0x552   :  { %2466 = vmatpush1.bf16.msra.mxu0 %v2356_v50  ;;  %v2389_v49 = vmul.f32 %v9788_v17, %v2379_v40 }
 0x553   :  { %2467 = vmatprep.subr.bf16.mxu0 %v11720_v35  ;;  %v2395_v1 = vpop.permute.xlu0 %2394 }
 0x554   :  { %v2392_v58 = vpack.c.bf16 %v2389_v49, %v2388_v14  ;;  %v2406_v12 = vmul.f32 %v9798_v31, %v2395_v1 }
 0x555   :  { %v2397_v46 = vpop.permute.xlu1 %2396 }
 0x556   :  { %2468 = vmatpush1.bf16.msra.mxu0 %v2374_v60  ;;  %v2407_v47 = vmul.f32 %v9798_v31, %v2397_v46 }
 0x557   :  { %2469 = vmatprep.subr.bf16.mxu0 %v11720_v35  ;;  %v2413_v51 = vpop.permute.xlu0 %2412 }
 0x558   :  { %v2410_v56 = vpack.c.bf16 %v2407_v47, %v2406_v12  ;;  %v2424_v9 = vmul.f32 %v9807_v13, %v2413_v51 }
 0x559   :  { %v2415_v4 = vpop.permute.xlu1 %2414 }
 0x55a   :  { %2470 = vmatpush1.bf16.msra.mxu0 %v2392_v58  ;;  %v2425_v50 = vmul.f32 %v9807_v13, %v2415_v4 }
 0x55b   :  { %2471 = vmatprep.subr.bf16.mxu0 %v11720_v35 }
 0x55c   :  { %v2428_v52 = vpack.c.bf16 %v2425_v50, %v2424_v9 }
 0x55e   :  { %2472 = vmatpush1.bf16.msra.mxu0 %v2410_v56 }
 0x55f   :  { %2473 = vmatprep.subr.bf16.mxu0 %v11720_v35 }
 0x562   :  { %2474 = vmatpush1.bf16.msra.mxu0 %v2428_v52 }
 0x565   :  { %2490 = vmatmul.mubr.bf16.vlgmr.msra.gmra.mrb[24].mxu0 %v8141_v38 }
 0x566   :  { %7874 = vmatprep.mubr.msk.bf16.mxu0 %vm2453_vm5, %v8142_v32  ;;  %v11679_v32 = vmov 683565275  }
 0x568   :  { %v2501_v48 = vpop.permute.xlu0 %2500 }
 0x56a   :  { %v2506_v57 = vpop.permute.xlu1 %2505 }
 0x618   :  { %v2554_v41 = vpop.f32.mrb[24].mxu1 }
 0x619   :  { %v9851_v0 = vadd.f32 %v2554_v41, %v2501_v48  ;;  %v2556_v13 = vpop.f32.mrb[25].mxu1 }
 0x61a   :  { %v2557_v3 = vpop.f32.mrb[26].mxu1  ;;  %v11672_v13 = vmov 2475754826  }
 0x61b   :  { %v11669_v63 = vand.u32 2147483647, %v9851_v0  ;;  %v2564_v8 = vand.u32 2139095040, %v9851_v0  ;;  %v9855_v21 = vadd.f32 %v2557_v3, %v2506_v57  ;;  %v2559_v40 = vpop.f32.mrb[27].mxu1  ;;  %v11674_v3 = vmov 2131351028  }
 0x61c   :  { %v11676_v40 = vmov 2102212464  }
 0x61d   :  { %v2565_v15 = vshrl.u32 %v2564_v8, 23  ;;  %v2568_v60 = vand.u32 8388607, %v11669_v63  ;;  %v2668_v49 = vand.u32 2139095040, %v9855_v21  ;;  %v11668_v46 = vand.u32 2147483647, %v9855_v21 }
 0x61f   :  { %v7180_v1 = vadd.s32 4294967169, %v2565_v15  ;;  %v2669_v14 = vshrl.u32 %v2668_v49, 23  ;;  %v2569_v47 = vor.u32 8388608, %v2568_v60  ;;  %v2672_v12 = vand.u32 8388607, %v11668_v46 }
 0x620   :  { %v11681_v60 = vmov 920167782  }
 0x621   :  { %v2571_v58 = vadd.s32 1, %v7180_v1  ;;  %v7184_v4 = vadd.s32 4294967169, %v2669_v14  ;;  %v9863_v52 = vshll.u32 %v2569_v47, 8  ;;  %v2673_v41 = vor.u32 8388608, %v2672_v12 }
 0x622   :  { %v11684_v12 = vmov 1326507024  }
 0x623   :  { %vm2572_vm6 = vcmp.gt.s32.totalorder %v2571_v58, 0  ;;  %v2675_v56 = vadd.s32 1, %v7184_v4 }
 0x624   :  { %v2573_v51 = vsel %vm2572_vm6, %v2571_v58, 0 }
 0x625   :  { %v2574_v50 = vshrl.u32 %v2573_v51, 5  ;;  %v2575_v9 = vand.u32 31, %v2573_v51  ;;  %vm2676_vm10 = vcmp.gt.s32.totalorder %v2675_v56, 0 }
 0x627   :  { %v2576_v38 = vsub.s32 32, %v2575_v9  ;;  %v2578_v48 = vshll.u32 %v11679_v32, %v2575_v9  ;;  %v2581_v57 = vshll.u32 %v11672_v13, %v2575_v9  ;;  %v2584_v8 = vshll.u32 %v11674_v3, %v2575_v9 }
 0x628   :  { %v2587_v15 = vshll.u32 %v11676_v40, %v2575_v9  ;;  %v2590_v49 = vshll.u32 %v11681_v60, %v2575_v9  ;;  %vm2593_vm13 = vcmp.lt.s32.totalorder %v2574_v50, 1  ;;  %vm2595_vm14 = vcmp.lt.s32.totalorder %v2574_v50, 3 }
 0x629   :  { %v2579_v1 = vshrl.u32 %v11672_v13, %v2576_v38  ;;  %v2582_v14 = vshrl.u32 %v11674_v3, %v2576_v38  ;;  %v2585_v58 = vshrl.u32 %v11676_v40, %v2576_v38  ;;  %v2577_v47 = vshrl.u32 %v11679_v32, %v2576_v38 }
 0x62a   :  { %v2588_v4 = vshrl.u32 %v11681_v60, %v2576_v38  ;;  %v2591_v51 = vshrl.u32 %v11684_v12, %v2576_v38  ;;  %v2677_v9 = vsel %vm2676_vm10, %v2675_v56, 0  ;;  %vm2596_vm15 = vcmp.lt.s32.totalorder %v2574_v50, 4 }
 0x62b   :  { %v2580_v46 = vor.u32 %v2579_v1, %v2578_v48  ;;  %v2583_v63 = vor.u32 %v2582_v14, %v2581_v57  ;;  %v2586_v45 = vor.u32 %v2585_v58, %v2584_v8  ;;  %v2679_v3 = vand.u32 31, %v2677_v9 }
 0x62c   :  { %v2589_v55 = vor.u32 %v2588_v4, %v2587_v15  ;;  %v2592_v13 = vor.u32 %v2591_v51, %v2590_v49  ;;  %vm2594_vm11 = vcmp.lt.s32.totalorder %v2574_v50, 2  ;;  %v9883_v8 = vshll.u32 %v2673_v41, 8 }
 0x62d   :  { %v2597_v40 = vsel %vm2593_vm13, %v2577_v47, %v2580_v46  ;;  %v2598_v53 = vsel %vm2596_vm15, %v2586_v45, 2102212464  ;;  %v2601_v32 = vsel %vm2593_vm13, %v2580_v46, %v2583_v63  ;;  %v2605_v60 = vsel %vm2593_vm13, %v2583_v63, %v2586_v45 }
 0x62e   :  { %v2599_v34 = vsel %vm2595_vm14, %v2583_v63, %v2598_v53  ;;  %v2602_v38 = vsel %vm2596_vm15, %v2589_v55, 920167782  ;;  %v2606_v12 = vsel %vm2596_vm15, %v2592_v13, 1326507024  ;;  %v2680_v48 = vsub.s32 32, %v2679_v3 }
 0x62f   :  { %v2603_v57 = vsel %vm2595_vm14, %v2586_v45, %v2602_v38  ;;  %v2607_v56 = vsel %vm2595_vm14, %v2589_v55, %v2606_v12  ;;  %v2600_v15 = vsel %vm2594_vm11, %v2597_v40, %v2599_v34  ;;  %v2678_v14 = vshrl.u32 %v2677_v9, 5 }
 0x630   :  { %v2604_v49 = vsel %vm2594_vm11, %v2601_v32, %v2603_v57  ;;  %v2608_v1 = vsel %vm2594_vm11, %v2605_v60, %v2607_v56  ;;  %v11721_v13 = vmov 683565275   ;;  %v11722_v45 = vmov 2475754826  }
 0x631   :  { %v9886_v46 = vmul.u32.u64.low %v9863_v52, %v2608_v1  ;;  %v9887_v58 = vmul.u32.u64.high %v9863_v52, %v2608_v1, %v9886_v46  ;;  %v9890_v53 = vmul.u32.u64.low %v9863_v52, %v2604_v49  ;;  %v9891_v63 = vmul.u32.u64.high %v9863_v52, %v2604_v49, %v9890_v53 }
 0x632   :  { %v2682_v47 = vshll.u32 %v11721_v13, %v2679_v3  ;;  %v2683_v50 = vshrl.u32 %v11722_v45, %v2680_v48  ;;  %v2685_v55 = vshll.u32 %v11722_v45, %v2679_v3  ;;  %v11723_v41 = vmov 2131351028  }
 0x633   :  { %v2686_v34 = vshrl.u32 %v11723_v41, %v2680_v48  ;;  %v2688_v32 = vshll.u32 %v11723_v41, %v2679_v3  ;;  %v11724_v40 = vmov 2102212464   ;;  %v11725_v12 = vmov 920167782  }
 0x634   :  { %v2689_v60 = vshrl.u32 %v11724_v40, %v2680_v48  ;;  %v2691_v4 = vshll.u32 %v11724_v40, %v2679_v3  ;;  %v2692_v51 = vshrl.u32 %v11725_v12, %v2680_v48  ;;  %v2684_v9 = vor.u32 %v2683_v50, %v2682_v47 }
 0x635   :  { %v2687_v38 = vor.u32 %v2686_v34, %v2685_v55  ;;  %v2694_v57 = vshll.u32 %v11725_v12, %v2679_v3  ;;  %v11726_v56 = vmov 1326507024   ;;  %v2616_v1 = vmul.u32 %v9863_v52, %v2600_v15 }
 0x636   :  { %v2695_v49 = vshrl.u32 %v11726_v56, %v2680_v48  ;;  %vm2618_vm12 = vc.u32 %v9887_v58, %v9890_v53  ;;  %v2619_v46 = vadd.s32 1, %v9891_v63  ;;  %v2690_v20 = vor.u32 %v2689_v60, %v2688_v32 }
 0x637   :  { %v2681_v54 = vshrl.u32 %v11721_v13, %v2680_v48  ;;  %v2693_v37 = vor.u32 %v2692_v51, %v2691_v4  ;;  %vm2697_vm6 = vcmp.lt.s32.totalorder %v2678_v14, 1  ;;  %vm2699_vm10 = vcmp.lt.s32.totalorder %v2678_v14, 3 }
 0x638   :  { %v2696_v29 = vor.u32 %v2695_v49, %v2694_v57  ;;  %v2620_v47 = vsel %vm2618_vm12, %v2619_v46, %v9891_v63  ;;  %vm2700_vm13 = vcmp.lt.s32.totalorder %v2678_v14, 4  ;;  %v2705_v3 = vsel %vm2697_vm6, %v2684_v9, %v2687_v38  ;;  %v9910_v15 = vpop.f32.mrb[24].mxu0 }
 0x639   :  { %v2621_v50 = vadd.s32 %v2620_v47, %v2616_v1  ;;  %v2702_v55 = vsel %vm2700_vm13, %v2690_v20, 2102212464  ;;  %v2706_v34 = vsel %vm2700_vm13, %v2693_v37, 920167782  ;;  %v2709_v52 = vsel %vm2697_vm6, %v2687_v38, %v2690_v20  ;;  %v2493_v48 = vpop.f32.mrb[25].mxu0 }
 0x63a   :  { %vm2698_vm14 = vcmp.lt.s32.totalorder %v2678_v14, 2  ;;  %v2701_v27 = vsel %vm2697_vm6, %v2681_v54, %v2684_v9  ;;  %v2707_v32 = vsel %vm2699_vm10, %v2690_v20, %v2706_v34  ;;  %v2710_v60 = vsel %vm2700_vm13, %v2696_v29, 1326507024  ;;  %v9915_v49 = vpop.f32.mrb[26].mxu0 }
 0x63b   :  { %v2622_v4 = vadd.s32 536870912, %v2621_v50  ;;  %v2703_v51 = vsel %vm2699_vm10, %v2687_v38, %v2702_v55  ;;  %v2708_v57 = vsel %vm2698_vm14, %v2705_v3, %v2707_v32  ;;  %v2711_v63 = vsel %vm2699_vm10, %v2693_v37, %v2710_v60  ;;  %v2496_v44 = vpop.f32.mrb[27].mxu0 }
 0x63c   :  { %v2712_v1 = vsel %vm2698_vm14, %v2709_v52, %v2711_v63  ;;  %v9918_v46 = vmul.u32.u64.low %v9883_v8, %v2708_v57  ;;  %v9919_v47 = vmul.u32.u64.high %v9883_v8, %v2708_v57, %v9918_v46  ;;  %v2704_v29 = vsel %vm2698_vm14, %v2701_v27, %v2703_v51 }
 0x63d   :  { %v2623_v42 = vshrl.u32 %v2622_v4, 30  ;;  %v9922_v54 = vmul.u32.u64.low %v9883_v8, %v2712_v1  ;;  %v9923_v20 = vmul.u32.u64.high %v9883_v8, %v2712_v1, %v9922_v54  ;;  %v2720_v37 = vmul.u32 %v9883_v8, %v2704_v29 }
 0x63e   :  { %v2723_v38 = vadd.s32 1, %v9919_v47  ;;  %vm2563_vm10 = vcmp.lt.s32.totalorder %v9851_v0, 0  ;;  %vm2667_vm13 = vcmp.lt.s32.totalorder %v9855_v21, 0 }
 0x63f   :  { %v2624_v9 = vshll.u32 %v2623_v42, 30  ;;  %vm2722_vm15 = vc.u32 %v9923_v20, %v9918_v46 }
 0x640   :  { %v2724_v14 = vsel %vm2722_vm15, %v2723_v38, %v9919_v47 }
 0x641   :  { %v2625_v3 = vsub.s32 %v2621_v50, %v2624_v9  ;;  %v2725_v34 = vadd.s32 %v2724_v14, %v2720_v37  ;;  %v2617_v50 = vadd.s32 %v9890_v53, %v9887_v58  ;;  %v2721_v58 = vadd.s32 %v9918_v46, %v9923_v20 }
 0x643   :  { %v2627_v55 = vsub.s32 0, %v2625_v3  ;;  %v2726_v44 = vadd.s32 536870912, %v2725_v34 }
 0x645   :  { %v7181_v52 = vmin.u32 %v2627_v55, %v2625_v3  ;;  %v2727_v60 = vshrl.u32 %v2726_v44, 30 }
 0x647   :  { %v2629_v32 = vclz %v7181_v52  ;;  %v2728_v4 = vshll.u32 %v2727_v60, 30 }
 0x649   :  { %v7182_v48 = vadd.s32 4294967294, %v2629_v32  ;;  %v2729_v27 = vsub.s32 %v2725_v34, %v2728_v4  ;;  %v2647_v32 = vsub.s32 4, %v2623_v42 }
 0x64b   :  { %vm7183_vm11 = vcmp.lt.s32.totalorder %v7182_v48, 0  ;;  %v2731_v63 = vsub.s32 0, %v2729_v27 }
 0x64c   :  { %v2632_v51 = vsel %vm7183_vm11, 0, %v7182_v48 }
 0x64d   :  { %v2633_v57 = vsub.s32 32, %v2632_v51  ;;  %v2637_v8 = vsub.s32 4294967266, %v2632_v51  ;;  %v2634_v1 = vshll.u32 %v2625_v3, %v2632_v51  ;;  %v7185_v29 = vmin.u32 %v2731_v63, %v2729_v27 }
 0x64f   :  { %v2635_v54 = vshrl.u32 %v2617_v50, %v2633_v57  ;;  %v2638_v47 = vadd.s32 127, %v2637_v8  ;;  %v2733_v37 = vclz %v7185_v29  ;;  %v11727_v57 = vand.u32 2147483647, %v9851_v0 }
 0x651   :  { %v2636_v9 = vor.u32 %v2635_v54, %v2634_v1  ;;  %v2639_v38 = vshll.u32 %v2638_v47, 23  ;;  %v7186_v55 = vadd.s32 4294967294, %v2733_v37  ;;  %vm2562_vm6 = vcmp.le.f32.partialorder %v11727_v57, 0.7853982 }
 0x652   :  { %v2648_v54 = vsel %vm2563_vm10, %v2647_v32, %v2623_v42  ;;  %v2751_v37 = vsub.s32 4, %v2727_v60 }
 0x653   :  { %v2640_v14 = vor.u32 4788187, %v2639_v38  ;;  %v2643_v44 = vcvt.s32.f32 %v2636_v9  ;;  %vm7187_vm12 = vcmp.lt.s32.totalorder %v7186_v55, 0  ;;  %v2650_v46 = vsel %vm2562_vm6, 0, %v2648_v54 }
 0x654   :  { %v2736_v34 = vsel %vm7187_vm12, 0, %v7186_v55  ;;  %v2654_v38 = vadd.s32 3, %v2650_v46  ;;  %v11728_v55 = vand.u32 2147483647, %v9855_v21 }
 0x655   :  { %v2641_v52 = vand.u32 2147483647, %v2640_v14  ;;  %v2737_v53 = vsub.s32 32, %v2736_v34  ;;  %v2741_v4 = vsub.s32 4294967266, %v2736_v34  ;;  %v2738_v3 = vshll.u32 %v2729_v27, %v2736_v34 }
 0x656   :  { %vm9939_vm14 = vcmp.le.f32.partialorder %v11728_v55, 0.7853982 }
 0x657   :  { %v2644_v48 = vmul.f32 %v2643_v44, %v2641_v52  ;;  %v2739_v51 = vshrl.u32 %v2721_v58, %v2737_v53  ;;  %v2742_v50 = vadd.s32 127, %v2741_v4  ;;  %v2655_v52 = vand.u32 3, %v2654_v38 }
 0x658   :  { %v2752_v44 = vsel %vm2667_vm13, %v2751_v37, %v2727_v60 }
 0x659   :  { %v2645_v28 = vxor.u32 2147483648, %v2644_v48  ;;  %v2740_v63 = vor.u32 %v2739_v51, %v2738_v3  ;;  %v2743_v1 = vshll.u32 %v2742_v50, 23  ;;  %v2754_v53 = vsel %vm9939_vm14, 0, %v2752_v44  ;;  %v2437_v51 = vpop.permute.xlu0 %2436  ;;  %v8644_v44 = vld [vmem:[%s11642_s3 + $0x20] sm:$0xff]  }
 0x65a   :  { %vm2660_vm15 = vcmp.eq.s32.totalorder %v2655_v52, 2  ;;  %vm2657_vm11 = vcmp.eq.s32.totalorder %v2655_v52, 0  ;;  %vm2656_vm12 = vcmp.lt.s32.totalorder %v2655_v52, 2  ;;  %v2758_v60 = vadd.s32 3, %v2754_v53  ;;  %v8643_v52 = vld [vmem:[%s11642_s3 + $0x18] sm:$0xff]  }
 0x65b   :  { %v2646_v8 = vsel %vm2563_vm10, %v2645_v28, %v2644_v48  ;;  %v2744_v29 = vor.u32 4788187, %v2743_v1  ;;  %v2747_v9 = vcvt.s32.f32 %v2740_v63  ;;  %v2492_v57 = vadd.f32 %v9910_v15, %v2437_v51  ;;  %v8143_v28 = vld [vmem:[%s11644_s8 + $0x8] sm:$0xff]  }
 0x65c   :  { %v2649_v47 = vsel %vm2562_vm6, %v9851_v0, %v2646_v8  ;;  %vm2653_vm6 = vweird.f32 %v9851_v0  ;;  %v2759_v54 = vand.u32 3, %v2758_v60 }
 0x65d   :  { %8560 = vcosq.f32 %v2649_v47  ;;  %v2745_v20 = vand.u32 2147483647, %v2744_v29 }
 0x65e   :  { %8562 = vsinq.f32 %v2649_v47  ;;  %vm2764_vm10 = vcmp.eq.s32.totalorder %v2759_v54, 2 }
 0x65f   :  { %v2748_v27 = vmul.f32 %v2747_v9, %v2745_v20 }
 0x661   :  { %v2749_v14 = vxor.u32 2147483648, %v2748_v27 }
 0x663   :  { %v2750_v42 = vsel %vm2667_vm13, %v2749_v14, %v2748_v27  ;;  %vm2761_vm13 = vcmp.eq.s32.totalorder %v2759_v54, 0  ;;  %v2442_v27 = vpop.permute.xlu1 %2441 }
 0x664   :  { %v2753_v34 = vsel %vm9939_vm14, %v9855_v21, %v2750_v42  ;;  %vm2760_vm14 = vcmp.lt.s32.totalorder %v2759_v54, 2  ;;  %v2495_v37 = vadd.f32 %v9915_v49, %v2442_v27  ;;  %v8640_v42 = vld [vmem:[%s11642_s3] sm:$0xff]   ;;  %v8642_v49 = vld [vmem:[%s11642_s3 + $0x10] sm:$0xff]  }
 0x665   :  { %8564 = vcosq.f32 %v2753_v34 }
 0x666   :  { %8566 = vsinq.f32 %v2753_v34  ;;  %v8645_v34 = vld [vmem:[%s11642_s3 + $0x28] sm:$0xff]  }
 0x667   :  { %v8561_v32 = vpop.eup %8560  ;;  %v2853_v53 = vpop.permute.xlu1 %2852 }
 0x668   :  { %v8563_v48 = vpop.eup %8562  ;;  %v2661_v58 = vxor.u32 2147483648, %v8561_v32 }
 0x669   :  { %v2658_v4 = vxor.u32 2147483648, %v8563_v48 }
 0x66a   :  { %v2662_v3 = vsel %vm2660_vm15, %v2661_v58, %v8563_v48  ;;  %vm2757_vm15 = vweird.f32 %v9855_v21  ;;  %v8641_v21 = vld [vmem:[%s11642_s3 + $0x8] sm:$0xff]   ;;  %v8647_v48 = vld [vmem:[%s11642_s3 + $0x38] sm:$0xff]   ;;  %v2848_v58 = vpop.permute.xlu0 %2847 }
 0x66b   :  { %v2659_v50 = vsel %vm2657_vm11, %v8561_v32, %v2658_v4  ;;  %v8646_v32 = vld [vmem:[%s11642_s3 + $0x30] sm:$0xff]  }
 0x66c   :  { %v2663_v8 = vsel %vm2656_vm12, %v2659_v50, %v2662_v3 }
 0x66d   :  { %v2664_v63 = vsel %vm2653_vm6, nan, %v2663_v8 }
 0x66e   :  { %v2769_v1 = vmul.f32 %v2664_v63, %v2492_v57  ;;  %v2858_v63 = vpop.permute.xlu0 %2857 }
 0x66f   :  { %v8565_v47 = vpop.eup %8564 }
 0x670   :  { %v8567_v29 = vpop.eup %8566  ;;  %v2765_v46 = vxor.u32 2147483648, %v8565_v47 }
 0x671   :  { %v2762_v20 = vxor.u32 2147483648, %v8567_v29 }
 0x672   :  { %v2766_v9 = vsel %vm2764_vm10, %v2765_v46, %v8567_v29 }
 0x673   :  { %v2763_v38 = vsel %vm2761_vm13, %v8565_v47, %v2762_v20 }
 0x674   :  { %v2767_v15 = vsel %vm2760_vm14, %v2763_v38, %v2766_v9 }
 0x675   :  { %v2768_v0 = vsel %vm2757_vm15, nan, %v2767_v15 }
 0x676   :  { %v2770_v14 = vmul.f32 %v2768_v0, %v2495_v37 }
 0x678   :  { %v2771_v55 = vpack.c.bf16 %v2770_v14, %v2769_v1  ;;  %v2863_v1 = vpop.permute.xlu1 %2862 }
 0x67a   :  { %7872 = vmatprep.subr.bf16.mxu0 %v2771_v55 }
 0x67b   :  { %7873 = vmatpush3.bf16.msra.mxu0 %v2771_v55 }
 0x67c   :  { %7878 = vmatprep.subr.bf16.mxu0 %v8640_v42 }
 0x67e   :  { %7875 = vmatmul.mubr.msk.bf16.vlgmr.msra.gmra.mrb[28].mxu0 %vm2453_vm5, %v8143_v28 }
 0x67f   :  { %7879 = vmatpush3.bf16.msra.mxu0 %v8640_v42 }
 0x680   :  { %7880 = vmatprep.subr.bf16.mxu0 %v8641_v21 }
 0x683   :  { %7881 = vmatpush3.bf16.msra.mxu0 %v8641_v21 }
 0x684   :  { %7882 = vmatprep.subr.bf16.mxu0 %v8642_v49 }
 0x687   :  { %7883 = vmatpush3.bf16.msra.mxu0 %v8642_v49 }
 0x688   :  { %7884 = vmatprep.subr.bf16.mxu0 %v8643_v52 }
 0x68b   :  { %7885 = vmatpush3.bf16.msra.mxu0 %v8643_v52 }
 0x68c   :  { %7886 = vmatprep.subr.bf16.mxu0 %v8644_v44 }
 0x68f   :  { %7887 = vmatpush3.bf16.msra.mxu0 %v8644_v44 }
 0x690   :  { %7888 = vmatprep.subr.bf16.mxu0 %v8645_v34 }
 0x693   :  { %7889 = vmatpush3.bf16.msra.mxu0 %v8645_v34 }
 0x694   :  { %7890 = vmatprep.subr.bf16.mxu0 %v8646_v32 }
 0x697   :  { %7891 = vmatpush3.bf16.msra.mxu0 %v8646_v32 }
 0x698   :  { %7892 = vmatprep.subr.bf16.mxu0 %v8647_v48 }
 0x69b   :  { %7893 = vmatpush3.bf16.msra.mxu0 %v8647_v48 }
 0x69c   :  { %3213 = vmatprep.subr.bf16.mxu0 %v11720_v35 }
 0x751   :  { %v7876_v4 = vpop.f32.mrb[28].mxu0 }
 0x752   :  { %v2843_v3 = vadd.f32 %v7876_v4, %v9634_v62  ;;  %v2826_v51 = vpop.f32.mrb[29].mxu0 }
 0x753   :  { %v2841_v50 = vadd.f32 %v2826_v51, %v9632_v39  ;;  %v7877_v60 = vpop.f32.mrb[30].mxu0 }
 0x754   :  { %v2844_v57 = vadd.f32 %v7877_v60, %v9636_v26  ;;  %v2829_v8 = vpop.f32.mrb[31].mxu0  ;;  %v9987_v29 = vadd.f32 %v2858_v63, %v2843_v3 }
 0x755   :  { %v9984_v54 = vadd.f32 %v2848_v58, %v2841_v50  ;;  %v2842_v47 = vadd.f32 %v2829_v8, %v9638_v18 }
 0x756   :  { %v9989_v46 = vadd.f32 %v2863_v1, %v2844_v57  ;;  %v2884_v9 = vmul.f32 %v9987_v29, %v9987_v29 }
 0x757   :  { %v9991_v20 = vadd.f32 %v2853_v53, %v2842_v47  ;;  %v2882_v39 = vmul.f32 %v9984_v54, %v9984_v54 }
 0x758   :  { %v2885_v62 = vmul.f32 %v9989_v46, %v9989_v46 }
 0x759   :  { %v2883_v26 = vmul.f32 %v9991_v20, %v9991_v20 }
 0x75a   :  { %v2887_v18 = vpack.c.bf16 %v2885_v62, %v2884_v9 }
 0x75b   :  { %v2886_v27 = vpack.c.bf16 %v2883_v26, %v2882_v39 }
 0x75d   :  { %7894 = vmatprep.mubr.bf16.mxu0 %v2886_v27 }
 0x75e   :  { %7895 = vmatmul.mubr.bf16.vlgmr.msra.gmra.mrb[32].mxu0 %v2887_v18  ;;  %v2982_v18 = vpop.permute.xlu0 %2981 }
 0x831   :  { %v7896_v38 = vpop.f32.mrb[32].mxu0 }
 0x832   :  { %8568 = vrsqrt.f32 %v7896_v38  ;;  %v2922_v37 = vpop.f32.mrb[33].mxu0  ;;  %vm2953_vm11 = vcmp.eq.f32.partialorder %v7896_v38, inf  ;;  %vm2955_vm12 = vcmp.eq.f32.partialorder %v7896_v38, 0.0  ;;  %v2956_v42 = vand.u32 2147483648, %v7896_v38 }
 0x833   :  { %8570 = vrsqrt.f32 %v2922_v37  ;;  %v7897_v15 = vpop.f32.mrb[34].mxu0  ;;  %vm2939_vm6 = vcmp.eq.f32.partialorder %v2922_v37, inf  ;;  %vm2941_vm10 = vcmp.eq.f32.partialorder %v2922_v37, 0.0  ;;  %v2942_v52 = vand.u32 2147483648, %v2922_v37 }
 0x834   :  { %8572 = vrsqrt.f32 %v7897_v15  ;;  %v2925_v0 = vpop.f32.mrb[35].mxu0  ;;  %vm2960_vm13 = vcmp.eq.f32.partialorder %v7897_v15, inf  ;;  %vm2962_vm14 = vcmp.eq.f32.partialorder %v7897_v15, 0.0  ;;  %v2963_v48 = vand.u32 2147483648, %v7897_v15 }
 0x835   :  { %8574 = vrsqrt.f32 %v2925_v0  ;;  %vm2946_vm15 = vcmp.eq.f32.partialorder %v2925_v0, inf  ;;  %v2949_v60 = vand.u32 2147483648, %v2925_v0  ;;  %vm2948_vm8 = vcmp.eq.f32.partialorder %v2925_v0, 0.0 }
 0x83c   :  { %v8569_v14 = vpop.eup %8568 }
 0x83d   :  { %v8571_v55 = vpop.eup %8570  ;;  %v2952_v28 = vmul.f32 %v8569_v14, %v7896_v38 }
 0x83e   :  { %v8573_v21 = vpop.eup %8572  ;;  %v2938_v49 = vmul.f32 %v8571_v55, %v2922_v37 }
 0x83f   :  { %v8575_v44 = vpop.eup %8574  ;;  %v2954_v34 = vsel %vm2953_vm11, %v7896_v38, %v2952_v28  ;;  %v2959_v32 = vmul.f32 %v8573_v21, %v7897_v15  ;;  %v2987_v38 = vpop.permute.xlu1 %2986 }
 0x840   :  { %v2957_v58 = vsel %vm2955_vm12, %v2956_v42, %v2954_v34  ;;  %v2940_v53 = vsel %vm2939_vm6, %v2922_v37, %v2938_v49  ;;  %v2945_v4 = vmul.f32 %v8575_v44, %v2925_v0  ;;  %v2972_v37 = vpop.permute.xlu0 %2971  ;;  %v2992_v42 = vmul.f32 %v2987_v38, %v9989_v46  ;;  %v7230_v38 = vld [vmem:[%s11640_s10 + $0xc0] sm:$0xff] }
 0x841   :  { %v2967_v3 = vmul.f32 0.35355338, %v2957_v58  ;;  %v2943_v51 = vsel %vm2941_vm10, %v2942_v52, %v2940_v53  ;;  %v2961_v50 = vsel %vm2960_vm13, %v7897_v15, %v2959_v32  ;;  %v2991_v15 = vmul.f32 %v2982_v18, %v9987_v29  ;;  %v7233_v18 = vld [vmem:[%s11640_s10 + $0xd8] sm:$0xff] }
 0x842   :  { %v2965_v57 = vmul.f32 0.35355338, %v2943_v51  ;;  %v2964_v8 = vsel %vm2962_vm14, %v2963_v48, %v2961_v50  ;;  %v2947_v63 = vsel %vm2946_vm15, %v2925_v0, %v2945_v4  ;;  %v2989_v55 = vmul.f32 %v2972_v37, %v9984_v54  ;;  %v7231_v37 = vld [vmem:[%s11640_s10 + $0xc8] sm:$0xff] }
 0x843   :  { %v2995_v1 = vadd.f32 1e-08, %v2967_v3  ;;  %v2968_v47 = vmul.f32 0.35355338, %v2964_v8  ;;  %v2950_v62 = vsel %vm2948_vm8, %v2949_v60, %v2947_v63  ;;  %v2977_v28 = vpop.permute.xlu1 %2976  ;;  %v8144_v60 = vld [vmem:[%s11643_s7 + $0x34] ss:$8 sps:$4 sm:$0xff]  }
 0x844   :  { %v2993_v39 = vadd.f32 1e-08, %v2965_v57  ;;  %v2966_v26 = vmul.f32 0.35355338, %v2950_v62  ;;  %v2990_v52 = vmul.f32 %v2977_v28, %v9991_v20  ;;  %7213 = vmatprep.mubr.msk.bf16.mxu0 %vm2453_vm5, %v8144_v60  ;;  %v8147_v57 = vld [vmem:[%s11643_s7 + $0x24] ss:$8 sps:$4 sm:$0xff]  }
 0x845   :  { %8576 = vrcp.f32 %v2995_v1  ;;  %v2996_v9 = vadd.f32 1e-08, %v2968_v47  ;;  %7210 = vmatprep.mubr.msk.bf16.mxu1 %vm2453_vm5, %v8147_v57  ;;  %v7198_v8 = vld [vmem:[%s11640_s10 + $0x90] sm:$0xff]  ;;  %v7199_v63 = vld [vmem:[%s11640_s10 + $0x98] sm:$0xff]  ;;  %v7196_v1 = vld [vmem:[%s11640_s10 + $0x80] sm:$0xff] }
 0x846   :  { %8578 = vrcp.f32 %v2993_v39  ;;  %v2994_v27 = vadd.f32 1e-08, %v2966_v26  ;;  %v7197_v47 = vld [vmem:[%s11640_s10 + $0x88] sm:$0xff]  ;;  %v7200_v62 = vld [vmem:[%s11640_s10 + $0xa0] sm:$0xff]  ;;  %v7202_v26 = vld [vmem:[%s11640_s10 + $0xb0] sm:$0xff] }
 0x847   :  { %8580 = vrcp.f32 %v2996_v9  ;;  %v7201_v39 = vld [vmem:[%s11640_s10 + $0xa8] sm:$0xff]  ;;  %v7203_v9 = vld [vmem:[%s11640_s10 + $0xb8] sm:$0xff] }
 0x848   :  { %8582 = vrcp.f32 %v2994_v27  ;;  %v7232_v27 = vld [vmem:[%s11640_s10 + $0xd0] sm:$0xff] }
 0x84f   :  { %v8577_v14 = vpop.eup %8576 }
 0x850   :  { %v8579_v0 = vpop.eup %8578  ;;  %v3003_v21 = vmul.f32 %v8577_v14, %v2991_v15 }
 0x851   :  { %v8581_v49 = vpop.eup %8580  ;;  %v3001_v44 = vmul.f32 %v8579_v0, %v2989_v55 }
 0x852   :  { %v8583_v34 = vpop.eup %8582  ;;  %v3004_v32 = vmul.f32 %v8581_v49, %v2992_v42  ;;  %3009 = vrot.lane.b32.xlu0 %v3003_v21, %s8671_s20  ;;  %v10008_v58 = vmul.f32 %v3003_v21, %v9657_v10 }
 0x853   :  { %v3002_v48 = vmul.f32 %v8583_v34, %v2990_v52  ;;  %v10014_v4 = vmul.f32 %v3001_v44, %v9657_v10 }
 0x854   :  { %3011 = vrot.lane.b32.xlu1 %v3004_v32, %s8671_s20  ;;  %v10011_v53 = vmul.f32 %v3004_v32, %v9657_v10 }
 0x855   :  { %v10017_v3 = vmul.f32 %v3002_v48, %v9657_v10 }
 0x856   :  { %3023 = vrot.lane.b32.xlu0 %v3003_v21, %s8672_s28  ;;  %v3066_v51 = vpack.c.bf16 %v10011_v53, %v10008_v58 }
 0x857   :  { %v3065_v50 = vpack.c.bf16 %v10017_v3, %v10014_v4 }
 0x858   :  { %3025 = vrot.lane.b32.xlu1 %v3004_v32, %s8672_s28 }
 0x85a   :  { %3037 = vrot.lane.b32.xlu0 %v3003_v21, %s8673_s29 }
 0x85c   :  { %3039 = vrot.lane.b32.xlu1 %v3004_v32, %s8673_s29 }
 0x85e   :  { %3051 = vrot.lane.b32.xlu0 %v3003_v21, %s8665_s23 }
 0x860   :  { %3053 = vrot.lane.b32.xlu1 %v3004_v32, %s8665_s23 }
 0x862   :  { %3071 = vrot.lane.b32.xlu0 %v3003_v21, %s8666_s24 }
 0x864   :  { %3073 = vrot.lane.b32.xlu1 %v3004_v32, %s8666_s24 }
 0x866   :  { %3085 = vrot.lane.b32.xlu0 %v3003_v21, %s8674_s30 }
 0x868   :  { %3087 = vrot.lane.b32.xlu1 %v3004_v32, %s8674_s30 }
 0x86a   :  { %3099 = vrot.lane.b32.xlu0 %v3003_v21, %s8675_s12 }
 0x86c   :  { %3101 = vrot.lane.b32.xlu1 %v3004_v32, %s8675_s12 }
 0x86e   :  { %3113 = vrot.lane.b32.xlu0 %v3003_v21, %s8676_s15 }
 0x870   :  { %3115 = vrot.lane.b32.xlu1 %v3004_v32, %s8676_s15 }
 0x872   :  { %3005 = vrot.lane.b32.xlu0 %v3001_v44, %s8671_s20 }
 0x874   :  { %3007 = vrot.lane.b32.xlu1 %v3002_v48, %s8671_s20 }
 0x876   :  { %3019 = vrot.lane.b32.xlu0 %v3001_v44, %s8672_s28 }
 0x878   :  { %3021 = vrot.lane.b32.xlu1 %v3002_v48, %s8672_s28 }
 0x87a   :  { %3033 = vrot.lane.b32.xlu0 %v3001_v44, %s8673_s29 }
 0x87c   :  { %3035 = vrot.lane.b32.xlu1 %v3002_v48, %s8673_s29 }
 0x87e   :  { %3047 = vrot.lane.b32.xlu0 %v3001_v44, %s8665_s23 }
 0x880   :  { %3049 = vrot.lane.b32.xlu1 %v3002_v48, %s8665_s23 }
 0x882   :  { %3067 = vrot.lane.b32.xlu0 %v3001_v44, %s8666_s24 }
 0x884   :  { %3069 = vrot.lane.b32.xlu1 %v3002_v48, %s8666_s24 }
 0x886   :  { %3081 = vrot.lane.b32.xlu0 %v3001_v44, %s8674_s30 }
 0x888   :  { %3083 = vrot.lane.b32.xlu1 %v3002_v48, %s8674_s30 }
 0x88a   :  { %3095 = vrot.lane.b32.xlu0 %v3001_v44, %s8675_s12 }
 0x88c   :  { %3097 = vrot.lane.b32.xlu1 %v3002_v48, %s8675_s12 }
 0x88e   :  { %3109 = vrot.lane.b32.xlu0 %v3001_v44, %s8676_s15 }
 0x890   :  { %3111 = vrot.lane.b32.xlu1 %v3002_v48, %s8676_s15 }
 0x892   :  { %3193 = vperm.xlu0 %7994, %v7198_v8  }
 0x894   :  { %3198 = vperm.xlu1 %7995, %v7199_v63  }
 0x896   :  { %3130 = vperm.xlu0 %7994, %v7196_v1  }
 0x898   :  { %3135 = vperm.xlu1 %7995, %v7197_v47  }
 0x89a   :  { %3541 = vperm.xlu0 %7994, %v7200_v62  }
 0x89c   :  { %3546 = vperm.xlu1 %7995, %v7201_v39  }
 0x89e   :  { %3551 = vperm.xlu0 %7994, %v7202_v26  }
 0x8a0   :  { %3556 = vperm.xlu1 %7995, %v7203_v9  }
 0x8a2   :  { %3675 = vperm.xlu0 %7994, %v7232_v27  }
 0x8a4   :  { %3680 = vperm.xlu1 %7995, %v7233_v18  }
 0x8a6   :  { %3665 = vperm.xlu0 %7994, %v7230_v38  }
 0x8a8   :  { %3670 = vperm.xlu1 %7995, %v7231_v37  }
 0x8c4   :  { %v3010_v15 = vpop.permute.xlu0 %3009 }
 0x8c5   :  { %v3015_v55 = vmul.f32 %v3010_v15, %v9755_v16 }
 0x8c6   :  { %v3012_v14 = vpop.permute.xlu1 %3011 }
 0x8c7   :  { %v3016_v0 = vmul.f32 %v3012_v14, %v9755_v16 }
 0x8c8   :  { %v3024_v28 = vpop.permute.xlu0 %3023 }
 0x8c9   :  { %v3018_v42 = vpack.c.bf16 %v3016_v0, %v3015_v55  ;;  %v3029_v49 = vmul.f32 %v3024_v28, %v9759_v33 }
 0x8ca   :  { %v3026_v21 = vpop.permute.xlu1 %3025 }
 0x8cb   :  { %v3030_v52 = vmul.f32 %v3026_v21, %v9759_v33  ;;  %3214 = vmatpush1.bf16.msra.mxu0 %v3018_v42 }
 0x8cc   :  { %v3038_v44 = vpop.permute.xlu0 %3037  ;;  %3215 = vmatprep.subr.bf16.mxu0 %v11720_v35 }
 0x8cd   :  { %v3032_v34 = vpack.c.bf16 %v3030_v52, %v3029_v49  ;;  %v3043_v48 = vmul.f32 %v3038_v44, %v9765_v30  ;;  %v10124_v52 = vld [vmem:[%s11641_s1 + $0x48] ss:$0 sm:$0xff] }
 0x8ce   :  { %v3040_v32 = vpop.permute.xlu1 %3039 }
 0x8cf   :  { %v3044_v60 = vmul.f32 %v3040_v32, %v9765_v30  ;;  %3216 = vmatpush1.bf16.msra.mxu0 %v3032_v34 }
 0x8d0   :  { %v3052_v57 = vpop.permute.xlu0 %3051  ;;  %3217 = vmatprep.subr.bf16.mxu0 %v11720_v35 }
 0x8d1   :  { %v3046_v8 = vpack.c.bf16 %v3044_v60, %v3043_v48  ;;  %v3057_v1 = vmul.f32 %v3052_v57, %v9772_v19 }
 0x8d2   :  { %v3054_v63 = vpop.permute.xlu1 %3053 }
 0x8d3   :  { %v3058_v47 = vmul.f32 %v3054_v63, %v9772_v19  ;;  %3218 = vmatpush1.bf16.msra.mxu0 %v3046_v8 }
 0x8d4   :  { %v3072_v62 = vpop.permute.xlu0 %3071  ;;  %3219 = vmatprep.subr.bf16.mxu0 %v11720_v35 }
 0x8d5   :  { %v3060_v39 = vpack.c.bf16 %v3058_v47, %v3057_v1  ;;  %v3077_v38 = vmul.f32 %v3072_v62, %v9782_v2  ;;  %v8146_v47 = vld [vmem:[%s11643_s7 + $0x30] ss:$8 sps:$4 sm:$0xff]  }
 0x8d6   :  { %v3074_v26 = vpop.permute.xlu1 %3073 }
 0x8d7   :  { %3220 = vmatpush1.bf16.msra.mxu0 %v3060_v39  ;;  %v3078_v27 = vmul.f32 %v3074_v26, %v9782_v2 }
 0x8d8   :  { %v3086_v9 = vpop.permute.xlu0 %3085  ;;  %3221 = vmatprep.subr.bf16.mxu0 %v11720_v35 }
 0x8d9   :  { %v3080_v15 = vpack.c.bf16 %v3078_v27, %v3077_v38  ;;  %v3091_v0 = vmul.f32 %v3086_v9, %v9788_v17 }
 0x8da   :  { %v3088_v18 = vpop.permute.xlu1 %3087 }
 0x8db   :  { %3222 = vmatpush1.bf16.msra.mxu0 %v3066_v51  ;;  %v3092_v14 = vmul.f32 %v3088_v18, %v9788_v17 }
 0x8dc   :  { %v3100_v37 = vpop.permute.xlu0 %3099  ;;  %3223 = vmatprep.subr.bf16.mxu0 %v11720_v35 }
 0x8dd   :  { %v3094_v42 = vpack.c.bf16 %v3092_v14, %v3091_v0  ;;  %v3105_v58 = vmul.f32 %v3100_v37, %v9798_v31 }
 0x8de   :  { %v3102_v55 = vpop.permute.xlu1 %3101 }
 0x8df   :  { %3224 = vmatpush1.bf16.msra.mxu0 %v3080_v15  ;;  %v3106_v21 = vmul.f32 %v3102_v55, %v9798_v31 }
 0x8e0   :  { %v3114_v28 = vpop.permute.xlu0 %3113  ;;  %3225 = vmatprep.subr.bf16.mxu0 %v11720_v35 }
 0x8e1   :  { %v3108_v51 = vpack.c.bf16 %v3106_v21, %v3105_v58  ;;  %v3119_v32 = vmul.f32 %v10124_v52, %v3114_v28 }
 0x8e2   :  { %v3116_v49 = vpop.permute.xlu1 %3115 }
 0x8e3   :  { %3226 = vmatpush1.bf16.msra.mxu0 %v3094_v42  ;;  %v3120_v44 = vmul.f32 %v10124_v52, %v3116_v49 }
 0x8e4   :  { %v3006_v53 = vpop.permute.xlu0 %3005  ;;  %3227 = vmatprep.subr.bf16.mxu0 %v11720_v35 }
 0x8e5   :  { %v3013_v48 = vmul.f32 %v3006_v53, %v9755_v16  ;;  %v3122_v8 = vpack.c.bf16 %v3120_v44, %v3119_v32 }
 0x8e6   :  { %v3008_v34 = vpop.permute.xlu1 %3007 }
 0x8e7   :  { %v3014_v60 = vmul.f32 %v3008_v34, %v9755_v16  ;;  %3228 = vmatpush1.bf16.msra.mxu0 %v3108_v51 }
 0x8e8   :  { %v3020_v57 = vpop.permute.xlu0 %3019  ;;  %3229 = vmatprep.subr.bf16.mxu0 %v11720_v35 }
 0x8e9   :  { %v3017_v63 = vpack.c.bf16 %v3014_v60, %v3013_v48  ;;  %v3027_v62 = vmul.f32 %v3020_v57, %v9759_v33 }
 0x8ea   :  { %v3022_v1 = vpop.permute.xlu1 %3021 }
 0x8eb   :  { %v3028_v39 = vmul.f32 %v3022_v1, %v9759_v33  ;;  %3151 = vmatpush1.bf16.msra.mxu1 %v3017_v63  ;;  %3230 = vmatpush1.bf16.msra.mxu0 %v3122_v8 }
 0x8ec   :  { %v3034_v26 = vpop.permute.xlu0 %3033  ;;  %3152 = vmatprep.subr.bf16.mxu1 %v11720_v35  ;;  %3844 = vmatprep.subr.bf16.mxu0 %v11720_v35 }
 0x8ed   :  { %v3031_v9 = vpack.c.bf16 %v3028_v39, %v3027_v62  ;;  %v3041_v18 = vmul.f32 %v3034_v26, %v9765_v30  ;;  %v8149_v39 = vld [vmem:[%s11643_s7 + $0x20] ss:$8 sps:$4 sm:$0xff]   ;;  %v8150_v26 = vld [vmem:[%s11644_s8 + $0x10] sm:$0xff]  }
 0x8ee   :  { %v3036_v27 = vpop.permute.xlu1 %3035  ;;  %3246 = vmatmul.mubr.bf16.vlgmr.msra.gmra.mrb[36].mxu0 %v8146_v47 }
 0x8ef   :  { %v3042_v38 = vmul.f32 %v3036_v27, %v9765_v30  ;;  %3153 = vmatpush1.bf16.msra.mxu1 %v3031_v9 }
 0x8f0   :  { %v3048_v37 = vpop.permute.xlu0 %3047  ;;  %3154 = vmatprep.subr.bf16.mxu1 %v11720_v35 }
 0x8f1   :  { %v3045_v15 = vpack.c.bf16 %v3042_v38, %v3041_v18  ;;  %v3055_v55 = vmul.f32 %v3048_v37, %v9772_v19 }
 0x8f2   :  { %v3050_v14 = vpop.permute.xlu1 %3049 }
 0x8f3   :  { %v3056_v0 = vmul.f32 %v3050_v14, %v9772_v19  ;;  %3155 = vmatpush1.bf16.msra.mxu1 %v3045_v15 }
 0x8f4   :  { %v3068_v28 = vpop.permute.xlu0 %3067  ;;  %3156 = vmatprep.subr.bf16.mxu1 %v11720_v35 }
 0x8f5   :  { %v3059_v42 = vpack.c.bf16 %v3056_v0, %v3055_v55  ;;  %v3075_v51 = vmul.f32 %v3068_v28, %v9782_v2 }
 0x8f6   :  { %v3070_v21 = vpop.permute.xlu1 %3069 }
 0x8f7   :  { %3157 = vmatpush1.bf16.msra.mxu1 %v3059_v42  ;;  %v3076_v58 = vmul.f32 %v3070_v21, %v9782_v2 }
 0x8f8   :  { %v3082_v49 = vpop.permute.xlu0 %3081  ;;  %3158 = vmatprep.subr.bf16.mxu1 %v11720_v35 }
 0x8f9   :  { %v3079_v44 = vpack.c.bf16 %v3076_v58, %v3075_v51  ;;  %v3089_v60 = vmul.f32 %v3082_v49, %v9788_v17 }
 0x8fa   :  { %v3084_v53 = vpop.permute.xlu1 %3083 }
 0x8fb   :  { %3159 = vmatpush1.bf16.msra.mxu1 %v3065_v50  ;;  %v3090_v34 = vmul.f32 %v3084_v53, %v9788_v17 }
 0x8fc   :  { %3160 = vmatprep.subr.bf16.mxu1 %v11720_v35  ;;  %v3096_v32 = vpop.permute.xlu0 %3095 }
 0x8fd   :  { %v3093_v57 = vpack.c.bf16 %v3090_v34, %v3089_v60  ;;  %v3103_v1 = vmul.f32 %v3096_v32, %v9798_v31 }
 0x8fe   :  { %v3098_v48 = vpop.permute.xlu1 %3097 }
 0x8ff   :  { %3161 = vmatpush1.bf16.msra.mxu1 %v3079_v44  ;;  %v3104_v8 = vmul.f32 %v3098_v48, %v9798_v31 }
 0x900   :  { %3162 = vmatprep.subr.bf16.mxu1 %v11720_v35  ;;  %v3110_v4 = vpop.permute.xlu0 %3109 }
 0x901   :  { %v3107_v3 = vpack.c.bf16 %v3104_v8, %v3103_v1  ;;  %v3117_v47 = vmul.f32 %v10124_v52, %v3110_v4 }
 0x902   :  { %v3112_v63 = vpop.permute.xlu1 %3111 }
 0x903   :  { %3163 = vmatpush1.bf16.msra.mxu1 %v3093_v57  ;;  %v3118_v50 = vmul.f32 %v10124_v52, %v3112_v63 }
 0x904   :  { %3164 = vmatprep.subr.bf16.mxu1 %v11720_v35 }
 0x905   :  { %v3121_v62 = vpack.c.bf16 %v3118_v50, %v3117_v47 }
 0x907   :  { %3165 = vmatpush1.bf16.msra.mxu1 %v3107_v3 }
 0x908   :  { %3166 = vmatprep.subr.bf16.mxu1 %v11720_v35 }
 0x90b   :  { %3167 = vmatpush1.bf16.msra.mxu1 %v3121_v62 }
 0x90e   :  { %3183 = vmatmul.mubr.bf16.vlgmr.msra.gmra.mrb[28].mxu1 %v8149_v39 }
 0x90f   :  { %7900 = vmatprep.mubr.msk.bf16.mxu1 %vm2453_vm5, %v8150_v26 }
 0x911   :  { %v3194_v9 = vpop.permute.xlu0 %3193 }
 0x913   :  { %v3199_v37 = vpop.permute.xlu1 %3198 }
 0x9c1   :  { %v3247_v27 = vpop.f32.mrb[36].mxu0 }
 0x9c2   :  { %v10167_v18 = vadd.f32 %v3247_v27, %v3194_v9  ;;  %v3249_v38 = vpop.f32.mrb[37].mxu0 }
 0x9c3   :  { %v3250_v15 = vpop.f32.mrb[38].mxu0 }
 0x9c4   :  { %v11696_v14 = vand.u32 2147483647, %v10167_v18  ;;  %v3257_v55 = vand.u32 2139095040, %v10167_v18  ;;  %v10171_v0 = vadd.f32 %v3250_v15, %v3199_v37  ;;  %v3252_v28 = vpop.f32.mrb[39].mxu0 }
 0x9c6   :  { %v3258_v42 = vshrl.u32 %v3257_v55, 23  ;;  %v3261_v21 = vand.u32 8388607, %v11696_v14  ;;  %v3361_v49 = vand.u32 2139095040, %v10171_v0  ;;  %v11695_v53 = vand.u32 2147483647, %v10171_v0 }
 0x9c8   :  { %v7214_v58 = vadd.s32 4294967169, %v3258_v42  ;;  %v3362_v51 = vshrl.u32 %v3361_v49, 23  ;;  %v3262_v34 = vor.u32 8388608, %v3261_v21  ;;  %v3365_v48 = vand.u32 8388607, %v11695_v53 }
 0x9ca   :  { %v3264_v44 = vadd.s32 1, %v7214_v58  ;;  %v7218_v32 = vadd.s32 4294967169, %v3362_v51  ;;  %v10179_v1 = vshll.u32 %v3262_v34, 8  ;;  %v3366_v50 = vor.u32 8388608, %v3365_v48 }
 0x9cc   :  { %vm3265_vm8 = vcmp.gt.s32.totalorder %v3264_v44, 0  ;;  %v3368_v57 = vadd.s32 1, %v7218_v32 }
 0x9cd   :  { %v3266_v60 = vsel %vm3265_vm8, %v3264_v44, 0 }
 0x9ce   :  { %v3267_v8 = vshrl.u32 %v3266_v60, 5  ;;  %v3268_v63 = vand.u32 31, %v3266_v60  ;;  %vm3369_vm11 = vcmp.gt.s32.totalorder %v3368_v57, 0 }
 0x9cf   :  { %v3370_v49 = vsel %vm3369_vm11, %v3368_v57, 0 }
 0x9d0   :  { %v3269_v4 = vsub.s32 32, %v3268_v63  ;;  %v3271_v3 = vshll.u32 %v11721_v13, %v3268_v63  ;;  %v3274_v47 = vshll.u32 %v11722_v45, %v3268_v63  ;;  %v3277_v62 = vshll.u32 %v11723_v41, %v3268_v63 }
 0x9d1   :  { %v3280_v39 = vshll.u32 %v11724_v40, %v3268_v63  ;;  %v3283_v26 = vshll.u32 %v11725_v12, %v3268_v63  ;;  %vm3286_vm12 = vcmp.lt.s32.totalorder %v3267_v8, 1  ;;  %vm3288_vm6 = vcmp.lt.s32.totalorder %v3267_v8, 3 }
 0x9d2   :  { %v3272_v9 = vshrl.u32 %v11722_v45, %v3269_v4  ;;  %v3275_v27 = vshrl.u32 %v11723_v41, %v3269_v4  ;;  %v3278_v38 = vshrl.u32 %v11724_v40, %v3269_v4  ;;  %v3270_v37 = vshrl.u32 %v11721_v13, %v3269_v4 }
 0x9d3   :  { %v3281_v15 = vshrl.u32 %v11725_v12, %v3269_v4  ;;  %v3284_v55 = vshrl.u32 %v11726_v56, %v3269_v4  ;;  %vm3289_vm10 = vcmp.lt.s32.totalorder %v3267_v8, 4  ;;  %v3372_v44 = vand.u32 31, %v3370_v49 }
 0x9d4   :  { %v3273_v28 = vor.u32 %v3272_v9, %v3271_v3  ;;  %v3276_v42 = vor.u32 %v3275_v27, %v3274_v47  ;;  %v3279_v21 = vor.u32 %v3278_v38, %v3277_v62  ;;  %vm3287_vm13 = vcmp.lt.s32.totalorder %v3267_v8, 2 }
 0x9d5   :  { %v3282_v58 = vor.u32 %v3281_v15, %v3280_v39  ;;  %v3285_v51 = vor.u32 %v3284_v55, %v3283_v26  ;;  %v3373_v3 = vsub.s32 32, %v3372_v44  ;;  %v10199_v62 = vshll.u32 %v3366_v50, 8 }
 0x9d6   :  { %v3290_v34 = vsel %vm3286_vm12, %v3270_v37, %v3273_v28  ;;  %v3291_v32 = vsel %vm3289_vm10, %v3279_v21, 2102212464  ;;  %v3294_v48 = vsel %vm3286_vm12, %v3273_v28, %v3276_v42  ;;  %v3298_v60 = vsel %vm3286_vm12, %v3276_v42, %v3279_v21 }
 0x9d7   :  { %v3292_v63 = vsel %vm3288_vm6, %v3276_v42, %v3291_v32  ;;  %v3295_v4 = vsel %vm3289_vm10, %v3282_v58, 920167782  ;;  %v3299_v53 = vsel %vm3289_vm10, %v3285_v51, 1326507024  ;;  %v3371_v27 = vshrl.u32 %v3370_v49, 5 }
 0x9d8   :  { %v3296_v47 = vsel %vm3288_vm6, %v3279_v21, %v3295_v4  ;;  %v3300_v57 = vsel %vm3288_vm6, %v3282_v58, %v3299_v53  ;;  %v3293_v39 = vsel %vm3287_vm13, %v3290_v34, %v3292_v63  ;;  %v3375_v28 = vshll.u32 %v11721_v13, %v3372_v44 }
 0x9d9   :  { %v3297_v26 = vsel %vm3287_vm13, %v3294_v48, %v3296_v47  ;;  %v3301_v9 = vsel %vm3287_vm13, %v3298_v60, %v3300_v57  ;;  %v3376_v8 = vshrl.u32 %v11722_v45, %v3373_v3  ;;  %v3378_v53 = vshll.u32 %v11722_v45, %v3372_v44 }
 0x9da   :  { %v10202_v38 = vmul.u32.u64.low %v10179_v1, %v3301_v9  ;;  %v10203_v37 = vmul.u32.u64.high %v10179_v1, %v3301_v9, %v10202_v38  ;;  %v10206_v15 = vmul.u32.u64.low %v10179_v1, %v3297_v26  ;;  %v10207_v55 = vmul.u32.u64.high %v10179_v1, %v3297_v26, %v10206_v15 }
 0x9db   :  { %v3379_v50 = vshrl.u32 %v11723_v41, %v3373_v3  ;;  %v3381_v42 = vshll.u32 %v11723_v41, %v3372_v44  ;;  %v3382_v21 = vshrl.u32 %v11724_v40, %v3373_v3  ;;  %v3384_v49 = vshll.u32 %v11724_v40, %v3372_v44 }
 0x9dc   :  { %v3385_v58 = vshrl.u32 %v11725_v12, %v3373_v3  ;;  %v3377_v51 = vor.u32 %v3376_v8, %v3375_v28  ;;  %v3387_v32 = vshll.u32 %v11725_v12, %v3372_v44  ;;  %v3388_v48 = vshrl.u32 %v11726_v56, %v3373_v3 }
 0x9dd   :  { %v3380_v34 = vor.u32 %v3379_v50, %v3378_v53  ;;  %v3309_v60 = vmul.u32 %v10179_v1, %v3293_v39  ;;  %vm3311_vm14 = vc.u32 %v10203_v37, %v10206_v15  ;;  %v3312_v63 = vadd.s32 1, %v10207_v55 }
 0x9de   :  { %v3383_v4 = vor.u32 %v3382_v21, %v3381_v42  ;;  %v3374_v47 = vshrl.u32 %v11721_v13, %v3373_v3  ;;  %v3386_v57 = vor.u32 %v3385_v58, %v3384_v49  ;;  %v3389_v26 = vor.u32 %v3388_v48, %v3387_v32 }
 0x9df   :  { %vm3390_vm15 = vcmp.lt.s32.totalorder %v3371_v27, 1  ;;  %v3313_v9 = vsel %vm3311_vm14, %v3312_v63, %v10207_v55  ;;  %vm3392_vm8 = vcmp.lt.s32.totalorder %v3371_v27, 3  ;;  %vm3393_vm11 = vcmp.lt.s32.totalorder %v3371_v27, 4 }
 0x9e0   :  { %v3398_v44 = vsel %vm3390_vm15, %v3377_v51, %v3380_v34  ;;  %v3314_v38 = vadd.s32 %v3313_v9, %v3309_v60  ;;  %v3395_v28 = vsel %vm3393_vm11, %v3383_v4, 2102212464  ;;  %v3399_v8 = vsel %vm3393_vm11, %v3386_v57, 920167782 }
 0x9e1   :  { %v3402_v1 = vsel %vm3390_vm15, %v3380_v34, %v3383_v4  ;;  %v10226_v39 = vpop.f32.mrb[28].mxu1  ;;  %vm3391_vm12 = vcmp.lt.s32.totalorder %v3371_v27, 2  ;;  %v3394_v53 = vsel %vm3390_vm15, %v3374_v47, %v3377_v51  ;;  %v3400_v50 = vsel %vm3392_vm8, %v3383_v4, %v3399_v8 }
 0x9e2   :  { %v3403_v42 = vsel %vm3393_vm11, %v3389_v26, 1326507024  ;;  %v3186_v3 = vpop.f32.mrb[29].mxu1  ;;  %v3315_v21 = vadd.s32 536870912, %v3314_v38  ;;  %v3396_v49 = vsel %vm3392_vm8, %v3380_v34, %v3395_v28  ;;  %v3401_v58 = vsel %vm3391_vm12, %v3398_v44, %v3400_v50 }
 0x9e3   :  { %v3404_v55 = vsel %vm3392_vm8, %v3386_v57, %v3403_v42  ;;  %v10231_v32 = vpop.f32.mrb[30].mxu1  ;;  %v10234_v60 = vmul.u32.u64.low %v10199_v62, %v3401_v58  ;;  %v10235_v63 = vmul.u32.u64.high %v10199_v62, %v3401_v58, %v10234_v60  ;;  %v3397_v47 = vsel %vm3391_vm12, %v3394_v53, %v3396_v49 }
 0x9e4   :  { %v3405_v48 = vsel %vm3391_vm12, %v3402_v1, %v3404_v55  ;;  %v3189_v9 = vpop.f32.mrb[31].mxu1  ;;  %v3316_v14 = vshrl.u32 %v3315_v21, 30  ;;  %v3413_v27 = vmul.u32 %v10199_v62, %v3397_v47  ;;  %vm3256_vm15 = vcmp.lt.s32.totalorder %v10167_v18, 0 }
 0x9e5   :  { %v10238_v51 = vmul.u32.u64.low %v10199_v62, %v3405_v48  ;;  %v10239_v4 = vmul.u32.u64.high %v10199_v62, %v3405_v48, %v10238_v51  ;;  %v3416_v34 = vadd.s32 1, %v10235_v63  ;;  %vm3360_vm8 = vcmp.lt.s32.totalorder %v10171_v0, 0 }
 0x9e6   :  { %v3317_v26 = vshll.u32 %v3316_v14, 30 }
 0x9e7   :  { %vm3415_vm6 = vc.u32 %v10239_v4, %v10234_v60 }
 0x9e8   :  { %v3318_v44 = vsub.s32 %v3314_v38, %v3317_v26  ;;  %v3417_v57 = vsel %vm3415_vm6, %v3416_v34, %v10235_v63  ;;  %v3310_v38 = vadd.s32 %v10206_v15, %v10203_v37  ;;  %v3414_v37 = vadd.s32 %v10234_v60, %v10239_v4 }
 0x9e9   :  { %v3418_v8 = vadd.s32 %v3417_v57, %v3413_v27 }
 0x9ea   :  { %v3320_v28 = vsub.s32 0, %v3318_v44 }
 0x9eb   :  { %v3419_v50 = vadd.s32 536870912, %v3418_v8 }
 0x9ec   :  { %v7215_v1 = vmin.u32 %v3320_v28, %v3318_v44 }
 0x9ed   :  { %v3420_v3 = vshrl.u32 %v3419_v50, 30 }
 0x9ee   :  { %v3322_v42 = vclz %v7215_v1 }
 0x9ef   :  { %v3421_v58 = vshll.u32 %v3420_v3, 30 }
 0x9f0   :  { %v7216_v21 = vadd.s32 4294967294, %v3322_v42  ;;  %v3340_v42 = vsub.s32 4, %v3316_v14 }
 0x9f1   :  { %v3422_v53 = vsub.s32 %v3418_v8, %v3421_v58 }
 0x9f2   :  { %vm7217_vm10 = vcmp.lt.s32.totalorder %v7216_v21, 0 }
 0x9f3   :  { %v3325_v49 = vsel %vm7217_vm10, 0, %v7216_v21  ;;  %v3424_v48 = vsub.s32 0, %v3422_v53 }
 0x9f4   :  { %v3326_v55 = vsub.s32 32, %v3325_v49  ;;  %v3330_v62 = vsub.s32 4294967266, %v3325_v49  ;;  %v3327_v9 = vshll.u32 %v3318_v44, %v3325_v49 }
 0x9f5   :  { %v7219_v47 = vmin.u32 %v3424_v48, %v3422_v53 }
 0x9f6   :  { %v3328_v51 = vshrl.u32 %v3310_v38, %v3326_v55  ;;  %v3331_v63 = vadd.s32 127, %v3330_v62  ;;  %v11731_v55 = vand.u32 2147483647, %v10167_v18 }
 0x9f7   :  { %v3426_v27 = vclz %v7219_v47 }
 0x9f8   :  { %v3329_v26 = vor.u32 %v3328_v51, %v3327_v9  ;;  %v3332_v34 = vshll.u32 %v3331_v63, 23  ;;  %vm3255_vm14 = vcmp.le.f32.partialorder %v11731_v55, 0.7853982  ;;  %v3341_v51 = vsel %vm3256_vm15, %v3340_v42, %v3316_v14 }
 0x9f9   :  { %v7220_v28 = vadd.s32 4294967294, %v3426_v27  ;;  %v3343_v60 = vsel %vm3255_vm14, 0, %v3341_v51  ;;  %v3444_v27 = vsub.s32 4, %v3420_v3 }
 0x9fa   :  { %v3333_v57 = vor.u32 4788187, %v3332_v34  ;;  %v3336_v50 = vcvt.s32.f32 %v3329_v26  ;;  %v3347_v34 = vadd.s32 3, %v3343_v60 }
 0x9fb   :  { %vm7221_vm13 = vcmp.lt.s32.totalorder %v7220_v28, 0 }
 0x9fc   :  { %v3334_v1 = vand.u32 2147483647, %v3333_v57  ;;  %v3429_v8 = vsel %vm7221_vm13, 0, %v7220_v28  ;;  %v11732_v28 = vand.u32 2147483647, %v10171_v0  ;;  %vm3346_vm13 = vweird.f32 %v10167_v18 }
 0x9fd   :  { %v3430_v15 = vsub.s32 32, %v3429_v8  ;;  %v3434_v58 = vsub.s32 4294967266, %v3429_v8  ;;  %v3431_v44 = vshll.u32 %v3422_v53, %v3429_v8 }
 0x9fe   :  { %v3337_v21 = vmul.f32 %v3336_v50, %v3334_v1  ;;  %vm10255_vm11 = vcmp.le.f32.partialorder %v11732_v28, 0.7853982  ;;  %v3348_v1 = vand.u32 3, %v3347_v34  ;;  %v3445_v50 = vsel %vm3360_vm8, %v3444_v27, %v3420_v3 }
 0x9ff   :  { %v3432_v49 = vshrl.u32 %v3414_v37, %v3430_v15  ;;  %v3435_v38 = vadd.s32 127, %v3434_v58  ;;  %v3447_v15 = vsel %vm10255_vm11, 0, %v3445_v50  ;;  %v8653_v50 = vld [vmem:[%s11642_s3 + $0x20] sm:$0xff]  }
 0xa00   :  { %v3338_v6 = vxor.u32 2147483648, %v3337_v21  ;;  %vm3353_vm12 = vcmp.eq.s32.totalorder %v3348_v1, 2  ;;  %vm3350_vm6 = vcmp.eq.s32.totalorder %v3348_v1, 0  ;;  %vm3349_vm10 = vcmp.lt.s32.totalorder %v3348_v1, 2  ;;  %v8652_v1 = vld [vmem:[%s11642_s3 + $0x18] sm:$0xff]  }
 0xa01   :  { %v3433_v48 = vor.u32 %v3432_v49, %v3431_v44  ;;  %v3436_v9 = vshll.u32 %v3435_v38, 23  ;;  %v3131_v49 = vpop.permute.xlu0 %3130  ;;  %v3451_v3 = vadd.s32 3, %v3447_v15 }
 0xa02   :  { %v3339_v62 = vsel %vm3256_vm15, %v3338_v6, %v3337_v21  ;;  %v3185_v55 = vadd.f32 %v10226_v39, %v3131_v49  ;;  %v8151_v6 = vld [vmem:[%s11644_s8 + $0x18] sm:$0xff]  }
 0xa03   :  { %v3342_v63 = vsel %vm3255_vm14, %v10167_v18, %v3339_v62  ;;  %v3437_v47 = vor.u32 4788187, %v3436_v9  ;;  %v3440_v26 = vcvt.s32.f32 %v3433_v48  ;;  %v3452_v51 = vand.u32 3, %v3451_v3 }
 0xa04   :  { %8584 = vcosq.f32 %v3342_v63 }
 0xa05   :  { %8586 = vsinq.f32 %v3342_v63  ;;  %v3438_v4 = vand.u32 2147483647, %v3437_v47  ;;  %vm3457_vm14 = vcmp.eq.s32.totalorder %v3452_v51, 2  ;;  %vm3454_vm15 = vcmp.eq.s32.totalorder %v3452_v51, 0 }
 0xa07   :  { %v3441_v53 = vmul.f32 %v3440_v26, %v3438_v4 }
 0xa09   :  { %v3442_v57 = vxor.u32 2147483648, %v3441_v53 }
 0xa0b   :  { %v3443_v14 = vsel %vm3360_vm8, %v3442_v57, %v3441_v53  ;;  %v3136_v53 = vpop.permute.xlu1 %3135  ;;  %vm3453_vm8 = vcmp.lt.s32.totalorder %v3452_v51, 2 }
 0xa0c   :  { %v3446_v8 = vsel %vm10255_vm11, %v10171_v0, %v3443_v14  ;;  %v3188_v27 = vadd.f32 %v10231_v32, %v3136_v53  ;;  %vm3450_vm11 = vweird.f32 %v10171_v0  ;;  %v8649_v14 = vld [vmem:[%s11642_s3] sm:$0xff]   ;;  %v8650_v0 = vld [vmem:[%s11642_s3 + $0x8] sm:$0xff]   ;;  %v8651_v32 = vld [vmem:[%s11642_s3 + $0x10] sm:$0xff]  }
 0xa0d   :  { %8588 = vcosq.f32 %v3446_v8 }
 0xa0e   :  { %v8585_v42 = vpop.eup %8584  ;;  %8590 = vsinq.f32 %v3446_v8  ;;  %v8654_v8 = vld [vmem:[%s11642_s3 + $0x28] sm:$0xff]  }
 0xa0f   :  { %v8587_v21 = vpop.eup %8586  ;;  %v3354_v37 = vxor.u32 2147483648, %v8585_v42  ;;  %v3547_v15 = vpop.permute.xlu1 %3546 }
 0xa10   :  { %v3351_v58 = vxor.u32 2147483648, %v8587_v21 }
 0xa11   :  { %v3355_v44 = vsel %vm3353_vm12, %v3354_v37, %v8587_v21  ;;  %v8656_v21 = vld [vmem:[%s11642_s3 + $0x38] sm:$0xff]   ;;  %v3542_v37 = vpop.permute.xlu0 %3541 }
 0xa12   :  { %v3352_v38 = vsel %vm3350_vm6, %v8585_v42, %v3351_v58  ;;  %v8655_v42 = vld [vmem:[%s11642_s3 + $0x30] sm:$0xff]   ;;  %s11738_s3 = smov 112  }
 0xa13   :  { %v3356_v62 = vsel %vm3349_vm10, %v3352_v38, %v3355_v44 }
 0xa14   :  { %v3357_v48 = vsel %vm3346_vm13, nan, %v3356_v62 }
 0xa15   :  { %v3462_v9 = vmul.f32 %v3357_v48, %v3185_v55  ;;  %v3552_v48 = vpop.permute.xlu0 %3551 }
 0xa17   :  { %v8589_v63 = vpop.eup %8588 }
 0xa18   :  { %v8591_v47 = vpop.eup %8590  ;;  %v3458_v60 = vxor.u32 2147483648, %v8589_v63 }
 0xa19   :  { %v3455_v4 = vxor.u32 2147483648, %v8591_v47 }
 0xa1a   :  { %v3459_v26 = vsel %vm3457_vm14, %v3458_v60, %v8591_v47 }
 0xa1b   :  { %v3456_v34 = vsel %vm3454_vm15, %v8589_v63, %v3455_v4 }
 0xa1c   :  { %v3460_v39 = vsel %vm3453_vm8, %v3456_v34, %v3459_v26 }
 0xa1d   :  { %v3461_v18 = vsel %vm3450_vm11, nan, %v3460_v39 }
 0xa1e   :  { %v3463_v57 = vmul.f32 %v3461_v18, %v3188_v27 }
 0xa20   :  { %v3464_v28 = vpack.c.bf16 %v3463_v57, %v3462_v9  ;;  %v3557_v9 = vpop.permute.xlu1 %3556 }
 0xa22   :  { %7898 = vmatprep.subr.bf16.mxu1 %v3464_v28 }
 0xa23   :  { %7899 = vmatpush3.bf16.msra.mxu1 %v3464_v28 }
 0xa24   :  { %7904 = vmatprep.subr.bf16.mxu1 %v8649_v14 }
 0xa26   :  { %7901 = vmatmul.mubr.msk.bf16.vlgmr.msra.gmra.mrb[32].mxu1 %vm2453_vm5, %v8151_v6 }
 0xa27   :  { %7905 = vmatpush3.bf16.msra.mxu1 %v8649_v14 }
 0xa28   :  { %7906 = vmatprep.subr.bf16.mxu1 %v8650_v0 }
 0xa2b   :  { %7907 = vmatpush3.bf16.msra.mxu1 %v8650_v0 }
 0xa2c   :  { %7908 = vmatprep.subr.bf16.mxu1 %v8651_v32 }
 0xa2f   :  { %7909 = vmatpush3.bf16.msra.mxu1 %v8651_v32 }
 0xa30   :  { %7910 = vmatprep.subr.bf16.mxu1 %v8652_v1 }
 0xa33   :  { %7911 = vmatpush3.bf16.msra.mxu1 %v8652_v1 }
 0xa34   :  { %7912 = vmatprep.subr.bf16.mxu1 %v8653_v50 }
 0xa37   :  { %7913 = vmatpush3.bf16.msra.mxu1 %v8653_v50 }
 0xa38   :  { %7914 = vmatprep.subr.bf16.mxu1 %v8654_v8 }
 0xa3b   :  { %7915 = vmatpush3.bf16.msra.mxu1 %v8654_v8 }
 0xa3c   :  { %7916 = vmatprep.subr.bf16.mxu1 %v8655_v42 }
 0xa3f   :  { %7917 = vmatpush3.bf16.msra.mxu1 %v8655_v42 }
 0xa40   :  { %7918 = vmatprep.subr.bf16.mxu1 %v8656_v21 }
 0xa43   :  { %7919 = vmatpush3.bf16.msra.mxu1 %v8656_v21 }
 0xa44   :  { %3907 = vmatprep.subr.bf16.mxu1 %v11720_v35 }
 0xaf9   :  { %v7902_v58 = vpop.f32.mrb[32].mxu1 }
 0xafa   :  { %v3537_v44 = vadd.f32 %v7902_v58, %v9987_v29  ;;  %v3520_v49 = vpop.f32.mrb[33].mxu1 }
 0xafb   :  { %v3535_v38 = vadd.f32 %v3520_v49, %v9984_v54  ;;  %v7903_v3 = vpop.f32.mrb[34].mxu1 }
 0xafc   :  { %v3538_v55 = vadd.f32 %v7903_v3, %v9989_v46  ;;  %v3523_v62 = vpop.f32.mrb[35].mxu1  ;;  %v10303_v47 = vadd.f32 %v3552_v48, %v3537_v44 }
 0xafd   :  { %v10300_v51 = vadd.f32 %v3542_v37, %v3535_v38  ;;  %v3536_v63 = vadd.f32 %v3523_v62, %v9991_v20 }
 0xafe   :  { %v10305_v60 = vadd.f32 %v3557_v9, %v3538_v55  ;;  %v3578_v26 = vmul.f32 %v10303_v47, %v10303_v47 }
 0xaff   :  { %v10307_v4 = vadd.f32 %v3547_v15, %v3536_v63  ;;  %v3576_v54 = vmul.f32 %v10300_v51, %v10300_v51 }
 0xb00   :  { %v3579_v29 = vmul.f32 %v10305_v60, %v10305_v60 }
 0xb01   :  { %v3577_v46 = vmul.f32 %v10307_v4, %v10307_v4 }
 0xb02   :  { %v3581_v20 = vpack.c.bf16 %v3579_v29, %v3578_v26 }
 0xb03   :  { %v3580_v53 = vpack.c.bf16 %v3577_v46, %v3576_v54 }
 0xb05   :  { %7920 = vmatprep.mubr.bf16.mxu1 %v3580_v53 }
 0xb06   :  { %7921 = vmatmul.mubr.bf16.vlgmr.msra.gmra.mrb[36].mxu1 %v3581_v20  ;;  %v3676_v20 = vpop.permute.xlu0 %3675 }
 0xbd9   :  { %v7922_v34 = vpop.f32.mrb[36].mxu1 }
 0xbda   :  { %8592 = vrsqrt.f32 %v7922_v34  ;;  %v3616_v27 = vpop.f32.mrb[37].mxu1  ;;  %vm3647_vm12 = vcmp.eq.f32.partialorder %v7922_v34, inf  ;;  %vm3649_vm6 = vcmp.eq.f32.partialorder %v7922_v34, 0.0  ;;  %v3650_v14 = vand.u32 2147483648, %v7922_v34 }
 0xbdb   :  { %8594 = vrsqrt.f32 %v3616_v27  ;;  %v7923_v39 = vpop.f32.mrb[38].mxu1  ;;  %vm3633_vm10 = vcmp.eq.f32.partialorder %v3616_v27, inf  ;;  %vm3635_vm13 = vcmp.eq.f32.partialorder %v3616_v27, 0.0  ;;  %v3636_v1 = vand.u32 2147483648, %v3616_v27 }
 0xbdc   :  { %8596 = vrsqrt.f32 %v7923_v39  ;;  %v3619_v18 = vpop.f32.mrb[39].mxu1  ;;  %vm3654_vm14 = vcmp.eq.f32.partialorder %v7923_v39, inf  ;;  %vm3656_vm15 = vcmp.eq.f32.partialorder %v7923_v39, 0.0  ;;  %v3657_v21 = vand.u32 2147483648, %v7923_v39 }
 0xbdd   :  { %8598 = vrsqrt.f32 %v3619_v18  ;;  %vm3640_vm8 = vcmp.eq.f32.partialorder %v3619_v18, inf  ;;  %v3643_v3 = vand.u32 2147483648, %v3619_v18  ;;  %vm3642_vm11 = vcmp.eq.f32.partialorder %v3619_v18, 0.0 }
 0xbe4   :  { %v8593_v57 = vpop.eup %8592 }
 0xbe5   :  { %v8595_v28 = vpop.eup %8594  ;;  %v3646_v6 = vmul.f32 %v8593_v57, %v7922_v34 }
 0xbe6   :  { %v8597_v0 = vpop.eup %8596  ;;  %v3632_v32 = vmul.f32 %v8595_v28, %v3616_v27 }
 0xbe7   :  { %v8599_v50 = vpop.eup %8598  ;;  %v3648_v8 = vsel %vm3647_vm12, %v7922_v34, %v3646_v6  ;;  %v3653_v42 = vmul.f32 %v8597_v0, %v7923_v39  ;;  %v3681_v34 = vpop.permute.xlu1 %3680 }
 0xbe8   :  { %v3651_v37 = vsel %vm3649_vm6, %v3650_v14, %v3648_v8  ;;  %v3634_v15 = vsel %vm3633_vm10, %v3616_v27, %v3632_v32  ;;  %v3639_v58 = vmul.f32 %v8599_v50, %v3619_v18  ;;  %v3666_v27 = vpop.permute.xlu0 %3665  ;;  %v3686_v14 = vmul.f32 %v3681_v34, %v10305_v60 }
 0xbe9   :  { %v3661_v44 = vmul.f32 0.35355338, %v3651_v37  ;;  %v3637_v49 = vsel %vm3635_vm13, %v3636_v1, %v3634_v15  ;;  %v3655_v38 = vsel %vm3654_vm14, %v7923_v39, %v3653_v42  ;;  %v3685_v39 = vmul.f32 %v3676_v20, %v10303_v47 }
 0xbea   :  { %v3659_v55 = vmul.f32 0.35355338, %v3637_v49  ;;  %v3658_v62 = vsel %vm3656_vm15, %v3657_v21, %v3655_v38  ;;  %v3641_v48 = vsel %vm3640_vm8, %v3619_v18, %v3639_v58  ;;  %v3683_v28 = vmul.f32 %v3666_v27, %v10300_v51 }
 0xbeb   :  { %v3689_v9 = vadd.f32 1e-08, %v3661_v44  ;;  %v3662_v63 = vmul.f32 0.35355338, %v3658_v62  ;;  %v3644_v29 = vsel %vm3642_vm11, %v3643_v3, %v3641_v48  ;;  %v3671_v6 = vpop.permute.xlu1 %3670  ;;  %v8155_v3 = vld [vmem:[%s11643_s7 + $0x44] ss:$8 sps:$4 sm:$0xff]  }
 0xbec   :  { %v3687_v54 = vadd.f32 1e-08, %v3659_v55  ;;  %v3660_v46 = vmul.f32 0.35355338, %v3644_v29  ;;  %v3684_v1 = vmul.f32 %v3671_v6, %v10307_v4  ;;  %7248 = vmatprep.mubr.msk.bf16.mxu0 %vm2453_vm5, %v8155_v3  ;;  %v7236_v55 = vld [vmem:[%s11640_s10 + $0xf0] sm:$0xff]  ;;  %v7237_v62 = vld [vmem:[%s11640_s10 + $0xf8] sm:$0xff] }
 0xbed   :  { %8600 = vrcp.f32 %v3689_v9  ;;  %v3690_v26 = vadd.f32 1e-08, %v3662_v63  ;;  %v7234_v48 = vld [vmem:[%s11640_s10 + $0xe0] sm:$0xff]  ;;  %v7235_v9 = vld [vmem:[%s11640_s10 + $0xe8] sm:$0xff] }
 0xbee   :  { %8602 = vrcp.f32 %v3687_v54  ;;  %v3688_v53 = vadd.f32 1e-08, %v3660_v46  ;;  %v7238_v63 = vld [vmem:[%s11640_s10 + $0x100] sm:$0xff]  ;;  %v7239_v29 = vld [vmem:[%s11640_s10 + $0x108] sm:$0xff]  ;;  %v7240_v54 = vld [vmem:[%s11640_s10 + $0x110] sm:$0xff] }
 0xbef   :  { %8604 = vrcp.f32 %v3690_v26  ;;  %v7241_v46 = vld [vmem:[%s11640_s10 + $0x118] sm:$0xff]  ;;  %v54_v26 = vld [vmem:[%s11639_s9 + $0x28] sm:$0x3] }
 0xbf0   :  { %8606 = vrcp.f32 %v3688_v53  ;;  %v55_v53 = vld [vmem:[%s11639_s9 + $0x30] sm:$0x3] }
 0xbf7   :  { %v8601_v57 = vpop.eup %8600 }
 0xbf8   :  { %v8603_v18 = vpop.eup %8602  ;;  %v3697_v0 = vmul.f32 %v8601_v57, %v3685_v39 }
 0xbf9   :  { %v8605_v32 = vpop.eup %8604  ;;  %v3695_v50 = vmul.f32 %v8603_v18, %v3683_v28 }
 0xbfa   :  { %v8607_v8 = vpop.eup %8606  ;;  %v3698_v42 = vmul.f32 %v8605_v32, %v3686_v14  ;;  %3703 = vrot.lane.b32.xlu0 %v3697_v0, %s8671_s20  ;;  %v10324_v37 = vmul.f32 %v3697_v0, %v9657_v10 }
 0xbfb   :  { %v3696_v21 = vmul.f32 %v8607_v8, %v3684_v1  ;;  %v10330_v58 = vmul.f32 %v3695_v50, %v9657_v10 }
 0xbfc   :  { %3705 = vrot.lane.b32.xlu1 %v3698_v42, %s8671_s20  ;;  %v10327_v15 = vmul.f32 %v3698_v42, %v9657_v10 }
 0xbfd   :  { %v10333_v44 = vmul.f32 %v3696_v21, %v9657_v10  ;;  %v8152_v10 = vld [vmem:[%s11643_s7 + $0x54] ss:$8 sps:$4 sm:$0xff]  }
 0xbfe   :  { %3717 = vrot.lane.b32.xlu0 %v3697_v0, %s8672_s28  ;;  %v3760_v49 = vpack.c.bf16 %v10327_v15, %v10324_v37  ;;  %7251 = vmatprep.mubr.msk.bf16.mxu1 %vm2453_vm5, %v8152_v10 }
 0xbff   :  { %v3759_v38 = vpack.c.bf16 %v10333_v44, %v10330_v58 }
 0xc00   :  { %3719 = vrot.lane.b32.xlu1 %v3698_v42, %s8672_s28 }
 0xc02   :  { %3731 = vrot.lane.b32.xlu0 %v3697_v0, %s8673_s29 }
 0xc04   :  { %3733 = vrot.lane.b32.xlu1 %v3698_v42, %s8673_s29 }
 0xc06   :  { %3745 = vrot.lane.b32.xlu0 %v3697_v0, %s8665_s23 }
 0xc08   :  { %3747 = vrot.lane.b32.xlu1 %v3698_v42, %s8665_s23 }
 0xc0a   :  { %3765 = vrot.lane.b32.xlu0 %v3697_v0, %s8666_s24 }
 0xc0c   :  { %3767 = vrot.lane.b32.xlu1 %v3698_v42, %s8666_s24 }
 0xc0e   :  { %3779 = vrot.lane.b32.xlu0 %v3697_v0, %s8674_s30 }
 0xc10   :  { %3781 = vrot.lane.b32.xlu1 %v3698_v42, %s8674_s30 }
 0xc12   :  { %3793 = vrot.lane.b32.xlu0 %v3697_v0, %s8675_s12 }
 0xc14   :  { %3795 = vrot.lane.b32.xlu1 %v3698_v42, %s8675_s12 }
 0xc16   :  { %3807 = vrot.lane.b32.xlu0 %v3697_v0, %s8676_s15 }
 0xc18   :  { %3809 = vrot.lane.b32.xlu1 %v3698_v42, %s8676_s15 }
 0xc1a   :  { %3699 = vrot.lane.b32.xlu0 %v3695_v50, %s8671_s20 }
 0xc1c   :  { %3701 = vrot.lane.b32.xlu1 %v3696_v21, %s8671_s20 }
 0xc1e   :  { %3713 = vrot.lane.b32.xlu0 %v3695_v50, %s8672_s28 }
 0xc20   :  { %3715 = vrot.lane.b32.xlu1 %v3696_v21, %s8672_s28 }
 0xc22   :  { %3727 = vrot.lane.b32.xlu0 %v3695_v50, %s8673_s29 }
 0xc24   :  { %3729 = vrot.lane.b32.xlu1 %v3696_v21, %s8673_s29 }
 0xc26   :  { %3741 = vrot.lane.b32.xlu0 %v3695_v50, %s8665_s23 }
 0xc28   :  { %3743 = vrot.lane.b32.xlu1 %v3696_v21, %s8665_s23 }
 0xc2a   :  { %3761 = vrot.lane.b32.xlu0 %v3695_v50, %s8666_s24 }
 0xc2c   :  { %3763 = vrot.lane.b32.xlu1 %v3696_v21, %s8666_s24 }
 0xc2e   :  { %3775 = vrot.lane.b32.xlu0 %v3695_v50, %s8674_s30 }
 0xc30   :  { %3777 = vrot.lane.b32.xlu1 %v3696_v21, %s8674_s30 }
 0xc32   :  { %3789 = vrot.lane.b32.xlu0 %v3695_v50, %s8675_s12 }
 0xc34   :  { %3791 = vrot.lane.b32.xlu1 %v3696_v21, %s8675_s12 }
 0xc36   :  { %3803 = vrot.lane.b32.xlu0 %v3695_v50, %s8676_s15 }
 0xc38   :  { %3805 = vrot.lane.b32.xlu1 %v3696_v21, %s8676_s15 }
 0xc3a   :  { %3887 = vperm.xlu0 %7994, %v7236_v55  }
 0xc3c   :  { %3892 = vperm.xlu1 %7995, %v7237_v62  }
 0xc3e   :  { %3824 = vperm.xlu0 %7994, %v7234_v48  }
 0xc40   :  { %3829 = vperm.xlu1 %7995, %v7235_v9  }
 0xc42   :  { %4235 = vperm.xlu0 %7994, %v7238_v63  }
 0xc44   :  { %4240 = vperm.xlu1 %7995, %v7239_v29  }
 0xc46   :  { %4245 = vperm.xlu0 %7994, %v7240_v54  }
 0xc48   :  { %4250 = vperm.xlu1 %7995, %v7241_v46  }
 0xc4a   :  { %5420 = vperm.xlu0 %7994, %v54_v26  }
 0xc4c   :  { %6401 = vperm.xlu1 %7995, %v55_v53  }
 0xc6c   :  { %v3704_v20 = vpop.permute.xlu0 %3703 }
 0xc6d   :  { %v3709_v27 = vmul.f32 %v3704_v20, %v9755_v16 }
 0xc6e   :  { %v3706_v34 = vpop.permute.xlu1 %3705 }
 0xc6f   :  { %v3710_v39 = vmul.f32 %v3706_v34, %v9755_v16 }
 0xc70   :  { %v3718_v57 = vpop.permute.xlu0 %3717 }
 0xc71   :  { %v3712_v28 = vpack.c.bf16 %v3710_v39, %v3709_v27  ;;  %v3723_v6 = vmul.f32 %v3718_v57, %v9759_v33 }
 0xc72   :  { %v3720_v18 = vpop.permute.xlu1 %3719 }
 0xc73   :  { %v3724_v14 = vmul.f32 %v3720_v18, %v9759_v33  ;;  %3908 = vmatpush1.bf16.msra.mxu1 %v3712_v28 }
 0xc74   :  { %v3732_v0 = vpop.permute.xlu0 %3731  ;;  %3909 = vmatprep.subr.bf16.mxu1 %v11720_v35 }
 0xc75   :  { %v3726_v32 = vpack.c.bf16 %v3724_v14, %v3723_v6  ;;  %v3737_v50 = vmul.f32 %v3732_v0, %v9765_v30  ;;  %v8657_v0 = vld [vmem:[%s11641_s1 + $0x48] ss:$0 sm:$0xff] }
 0xc76   :  { %v3734_v1 = vpop.permute.xlu1 %3733 }
 0xc77   :  { %v3738_v8 = vmul.f32 %v3734_v1, %v9765_v30  ;;  %3910 = vmatpush1.bf16.msra.mxu1 %v3726_v32 }
 0xc78   :  { %v3746_v42 = vpop.permute.xlu0 %3745  ;;  %3911 = vmatprep.subr.bf16.mxu1 %v11720_v35 }
 0xc79   :  { %v3740_v21 = vpack.c.bf16 %v3738_v8, %v3737_v50  ;;  %v3751_v3 = vmul.f32 %v3746_v42, %v9772_v19 }
 0xc7a   :  { %v3748_v10 = vpop.permute.xlu1 %3747 }
 0xc7b   :  { %v3752_v55 = vmul.f32 %v3748_v10, %v9772_v19  ;;  %3912 = vmatpush1.bf16.msra.mxu1 %v3740_v21 }
 0xc7c   :  { %v3766_v62 = vpop.permute.xlu0 %3765  ;;  %3913 = vmatprep.subr.bf16.mxu1 %v11720_v35 }
 0xc7d   :  { %v3754_v48 = vpack.c.bf16 %v3752_v55, %v3751_v3  ;;  %v3771_v46 = vmul.f32 %v3766_v62, %v9782_v2 }
 0xc7e   :  { %v3768_v9 = vpop.permute.xlu1 %3767 }
 0xc7f   :  { %3914 = vmatpush1.bf16.msra.mxu1 %v3754_v48  ;;  %v3772_v29 = vmul.f32 %v3768_v9, %v9782_v2 }
 0xc80   :  { %v3780_v63 = vpop.permute.xlu0 %3779  ;;  %3915 = vmatprep.subr.bf16.mxu1 %v11720_v35 }
 0xc81   :  { %v3774_v53 = vpack.c.bf16 %v3772_v29, %v3771_v46  ;;  %v3785_v27 = vmul.f32 %v3780_v63, %v9788_v17 }
 0xc82   :  { %v3782_v54 = vpop.permute.xlu1 %3781 }
 0xc83   :  { %3916 = vmatpush1.bf16.msra.mxu1 %v3760_v49  ;;  %v3786_v20 = vmul.f32 %v3782_v54, %v9788_v17 }
 0xc84   :  { %v3794_v26 = vpop.permute.xlu0 %3793  ;;  %3917 = vmatprep.subr.bf16.mxu1 %v11720_v35 }
 0xc85   :  { %v3788_v57 = vpack.c.bf16 %v3786_v20, %v3785_v27  ;;  %v3799_v37 = vmul.f32 %v3794_v26, %v9798_v31 }
 0xc86   :  { %v3796_v34 = vpop.permute.xlu1 %3795 }
 0xc87   :  { %3918 = vmatpush1.bf16.msra.mxu1 %v3774_v53  ;;  %v3800_v28 = vmul.f32 %v3796_v34, %v9798_v31 }
 0xc88   :  { %v3808_v39 = vpop.permute.xlu0 %3807  ;;  %3919 = vmatprep.subr.bf16.mxu1 %v11720_v35 }
 0xc89   :  { %v3802_v49 = vpack.c.bf16 %v3800_v28, %v3799_v37  ;;  %v3813_v32 = vmul.f32 %v8657_v0, %v3808_v39 }
 0xc8a   :  { %v3810_v18 = vpop.permute.xlu1 %3809 }
 0xc8b   :  { %3920 = vmatpush1.bf16.msra.mxu1 %v3788_v57  ;;  %v3814_v6 = vmul.f32 %v10124_v52, %v3810_v18  ;;  %v8154_v52 = vld [vmem:[%s11643_s7 + $0x50] ss:$8 sps:$4 sm:$0xff]  }
 0xc8c   :  { %v3700_v15 = vpop.permute.xlu0 %3699  ;;  %3921 = vmatprep.subr.bf16.mxu1 %v11720_v35 }
 0xc8d   :  { %v3707_v1 = vmul.f32 %v3700_v15, %v9755_v16  ;;  %v3816_v42 = vpack.c.bf16 %v3814_v6, %v3813_v32 }
 0xc8e   :  { %v3702_v14 = vpop.permute.xlu1 %3701 }
 0xc8f   :  { %v3708_v50 = vmul.f32 %v3702_v14, %v9755_v16  ;;  %3922 = vmatpush1.bf16.msra.mxu1 %v3802_v49 }
 0xc90   :  { %v3714_v8 = vpop.permute.xlu0 %3713  ;;  %3923 = vmatprep.subr.bf16.mxu1 %v11720_v35 }
 0xc91   :  { %v3711_v21 = vpack.c.bf16 %v3708_v50, %v3707_v1  ;;  %v3721_v3 = vmul.f32 %v3714_v8, %v9759_v33  ;;  %v8157_v1 = vld [vmem:[%s11643_s7 + $0x40] ss:$8 sps:$4 sm:$0xff]  }
 0xc92   :  { %v3716_v10 = vpop.permute.xlu1 %3715 }
 0xc93   :  { %v3722_v55 = vmul.f32 %v3716_v10, %v9759_v33  ;;  %3845 = vmatpush1.bf16.msra.mxu0 %v3711_v21  ;;  %3924 = vmatpush1.bf16.msra.mxu1 %v3816_v42 }
 0xc94   :  { %v3728_v62 = vpop.permute.xlu0 %3727  ;;  %3846 = vmatprep.subr.bf16.mxu0 %v11720_v35 }
 0xc95   :  { %v3725_v16 = vpack.c.bf16 %v3722_v55, %v3721_v3  ;;  %v3735_v9 = vmul.f32 %v3728_v62, %v9765_v30 }
 0xc96   :  { %v3730_v48 = vpop.permute.xlu1 %3729  ;;  %3940 = vmatmul.mubr.bf16.vlgmr.msra.gmra.mrb[40].mxu1 %v8154_v52 }
 0xc97   :  { %v3736_v63 = vmul.f32 %v3730_v48, %v9765_v30  ;;  %3847 = vmatpush1.bf16.msra.mxu0 %v3725_v16  ;;  %4605 = vmatprep.mubr.bf16.mxu1 %v11720_v35 }
 0xc98   :  { %v3742_v29 = vpop.permute.xlu0 %3741  ;;  %3848 = vmatprep.subr.bf16.mxu0 %v11720_v35 }
 0xc99   :  { %v3739_v54 = vpack.c.bf16 %v3736_v63, %v3735_v9  ;;  %v3749_v46 = vmul.f32 %v3742_v29, %v9772_v19 }
 0xc9a   :  { %v3744_v33 = vpop.permute.xlu1 %3743 }
 0xc9b   :  { %v3750_v26 = vmul.f32 %v3744_v33, %v9772_v19  ;;  %3849 = vmatpush1.bf16.msra.mxu0 %v3739_v54 }
 0xc9c   :  { %v3762_v53 = vpop.permute.xlu0 %3761  ;;  %3850 = vmatprep.subr.bf16.mxu0 %v11720_v35 }
 0xc9d   :  { %v3753_v20 = vpack.c.bf16 %v3750_v26, %v3749_v46  ;;  %v3769_v57 = vmul.f32 %v3762_v53, %v9782_v2 }
 0xc9e   :  { %v3764_v34 = vpop.permute.xlu1 %3763 }
 0xc9f   :  { %3851 = vmatpush1.bf16.msra.mxu0 %v3753_v20  ;;  %v3770_v27 = vmul.f32 %v3764_v34, %v9782_v2 }
 0xca0   :  { %v3776_v30 = vpop.permute.xlu0 %3775  ;;  %3852 = vmatprep.subr.bf16.mxu0 %v11720_v35 }
 0xca1   :  { %v3773_v19 = vpack.c.bf16 %v3770_v27, %v3769_v57  ;;  %v3783_v15 = vmul.f32 %v3776_v30, %v9788_v17 }
 0xca2   :  { %v3778_v39 = vpop.permute.xlu1 %3777 }
 0xca3   :  { %3853 = vmatpush1.bf16.msra.mxu0 %v3759_v38  ;;  %v3784_v28 = vmul.f32 %v3778_v39, %v9788_v17 }
 0xca4   :  { %3854 = vmatprep.subr.bf16.mxu0 %v11720_v35  ;;  %v3790_v18 = vpop.permute.xlu0 %3789 }
 0xca5   :  { %v3787_v49 = vpack.c.bf16 %v3784_v28, %v3783_v15  ;;  %v3797_v14 = vmul.f32 %v3790_v18, %v9798_v31 }
 0xca6   :  { %v3792_v37 = vpop.permute.xlu1 %3791 }
 0xca7   :  { %3855 = vmatpush1.bf16.msra.mxu0 %v3773_v19  ;;  %v3798_v6 = vmul.f32 %v3792_v37, %v9798_v31  ;;  %v8158_v31 = vld [vmem:[%s11644_s8 + $0x20] sm:$0xff]  }
 0xca8   :  { %3856 = vmatprep.subr.bf16.mxu0 %v11720_v35  ;;  %v3804_v58 = vpop.permute.xlu0 %3803 }
 0xca9   :  { %v3801_v44 = vpack.c.bf16 %v3798_v6, %v3797_v14  ;;  %v3811_v32 = vmul.f32 %v8657_v0, %v3804_v58 }
 0xcaa   :  { %v3806_v2 = vpop.permute.xlu1 %3805 }
 0xcab   :  { %3857 = vmatpush1.bf16.msra.mxu0 %v3787_v49  ;;  %v3812_v38 = vmul.f32 %v8657_v0, %v3806_v2 }
 0xcac   :  { %3858 = vmatprep.subr.bf16.mxu0 %v11720_v35 }
 0xcad   :  { %v3815_v17 = vpack.c.bf16 %v3812_v38, %v3811_v32 }
 0xcaf   :  { %3859 = vmatpush1.bf16.msra.mxu0 %v3801_v44 }
 0xcb0   :  { %3860 = vmatprep.subr.bf16.mxu0 %v11720_v35 }
 0xcb3   :  { %3861 = vmatpush1.bf16.msra.mxu0 %v3815_v17 }
 0xcb6   :  { %3877 = vmatmul.mubr.bf16.vlgmr.msra.gmra.mrb[40].mxu0 %v8157_v1 }
 0xcb7   :  { %7926 = vmatprep.mubr.msk.bf16.mxu0 %vm2453_vm5, %v8158_v31 }
 0xcb9   :  { %v3888_v50 = vpop.permute.xlu0 %3887 }
 0xcbb   :  { %v3893_v21 = vpop.permute.xlu1 %3892 }
 0xd69   :  { %v3941_v8 = vpop.f32.mrb[40].mxu1 }
 0xd6a   :  { %v10472_v42 = vadd.f32 %v3941_v8, %v3888_v50  ;;  %v3943_v0 = vpop.f32.mrb[41].mxu1 }
 0xd6b   :  { %v3944_v10 = vpop.f32.mrb[42].mxu1 }
 0xd6c   :  { %v3948_v52 = vand.u32 2147483647, %v10472_v42  ;;  %v3951_v3 = vand.u32 2139095040, %v10472_v42  ;;  %v10476_v55 = vadd.f32 %v3944_v10, %v3893_v21  ;;  %v3946_v62 = vpop.f32.mrb[43].mxu1 }
 0xd6e   :  { %v3952_v16 = vshrl.u32 %v3951_v3, 23  ;;  %v3955_v48 = vand.u32 8388607, %v3948_v52  ;;  %v4055_v9 = vand.u32 2139095040, %v10476_v55  ;;  %v4052_v29 = vand.u32 2147483647, %v10476_v55 }
 0xd70   :  { %v7252_v63 = vadd.s32 4294967169, %v3952_v16  ;;  %v4056_v54 = vshrl.u32 %v4055_v9, 23  ;;  %v3956_v46 = vor.u32 8388608, %v3955_v48  ;;  %v4059_v53 = vand.u32 8388607, %v4052_v29 }
 0xd72   :  { %v3958_v33 = vadd.s32 1, %v7252_v63  ;;  %v7256_v26 = vadd.s32 4294967169, %v4056_v54  ;;  %v10484_v39 = vshll.u32 %v3956_v46, 8  ;;  %v4060_v28 = vor.u32 8388608, %v4059_v53 }
 0xd74   :  { %vm3959_vm12 = vcmp.gt.s32.totalorder %v3958_v33, 0  ;;  %v4062_v34 = vadd.s32 1, %v7256_v26  ;;  %v10504_v46 = vshll.u32 %v4060_v28, 8 }
 0xd75   :  { %v3960_v20 = vsel %vm3959_vm12, %v3958_v33, 0 }
 0xd76   :  { %v3961_v30 = vshrl.u32 %v3960_v20, 5  ;;  %v3962_v27 = vand.u32 31, %v3960_v20  ;;  %vm4063_vm6 = vcmp.gt.s32.totalorder %v4062_v34, 0 }
 0xd77   :  { %v4064_v31 = vsel %vm4063_vm6, %v4062_v34, 0 }
 0xd78   :  { %v3963_v57 = vsub.s32 32, %v3962_v27  ;;  %v3965_v19 = vshll.u32 %v11721_v13, %v3962_v27  ;;  %v3968_v18 = vshll.u32 %v11722_v45, %v3962_v27  ;;  %v3971_v37 = vshll.u32 %v11723_v41, %v3962_v27 }
 0xd79   :  { %v3974_v15 = vshll.u32 %v11724_v40, %v3962_v27  ;;  %v3977_v49 = vshll.u32 %v11725_v12, %v3962_v27  ;;  %vm3980_vm10 = vcmp.lt.s32.totalorder %v3961_v30, 1  ;;  %vm3982_vm13 = vcmp.lt.s32.totalorder %v3961_v30, 3 }
 0xd7a   :  { %v3966_v6 = vshrl.u32 %v11722_v45, %v3963_v57  ;;  %v3969_v2 = vshrl.u32 %v11723_v41, %v3963_v57  ;;  %v3972_v14 = vshrl.u32 %v11724_v40, %v3963_v57  ;;  %v3964_v58 = vshrl.u32 %v11721_v13, %v3963_v57 }
 0xd7b   :  { %v3975_v44 = vshrl.u32 %v11725_v12, %v3963_v57  ;;  %v3978_v38 = vshrl.u32 %v11726_v56, %v3963_v57  ;;  %vm3983_vm14 = vcmp.lt.s32.totalorder %v3961_v30, 4  ;;  %v4066_v0 = vand.u32 31, %v4064_v31 }
 0xd7c   :  { %v3967_v32 = vor.u32 %v3966_v6, %v3965_v19  ;;  %v3970_v17 = vor.u32 %v3969_v2, %v3968_v18  ;;  %v3973_v1 = vor.u32 %v3972_v14, %v3971_v37  ;;  %vm3981_vm15 = vcmp.lt.s32.totalorder %v3961_v30, 2 }
 0xd7d   :  { %v3976_v50 = vor.u32 %v3975_v44, %v3974_v15  ;;  %v3979_v8 = vor.u32 %v3978_v38, %v3977_v49  ;;  %v4067_v63 = vsub.s32 32, %v4066_v0  ;;  %v4065_v34 = vshrl.u32 %v4064_v31, 5 }
 0xd7e   :  { %v3984_v21 = vsel %vm3980_vm10, %v3964_v58, %v3967_v32  ;;  %v3985_v10 = vsel %vm3983_vm14, %v3973_v1, 2102212464  ;;  %v3988_v3 = vsel %vm3980_vm10, %v3967_v32, %v3970_v17  ;;  %v3992_v62 = vsel %vm3980_vm10, %v3970_v17, %v3973_v1 }
 0xd7f   :  { %v3986_v16 = vsel %vm3982_vm13, %v3970_v17, %v3985_v10  ;;  %v3989_v48 = vsel %vm3983_vm14, %v3976_v50, 920167782  ;;  %v3993_v9 = vsel %vm3983_vm14, %v3979_v8, 1326507024  ;;  %v4069_v37 = vshll.u32 %v11721_v13, %v4066_v0 }
 0xd80   :  { %v3990_v54 = vsel %vm3982_vm13, %v3973_v1, %v3989_v48  ;;  %v3994_v33 = vsel %vm3982_vm13, %v3976_v50, %v3993_v9  ;;  %v3987_v26 = vsel %vm3981_vm15, %v3984_v21, %v3986_v16  ;;  %v4070_v30 = vshrl.u32 %v11722_v45, %v4067_v63 }
 0xd81   :  { %v3991_v53 = vsel %vm3981_vm15, %v3988_v3, %v3990_v54  ;;  %v3995_v20 = vsel %vm3981_vm15, %v3992_v62, %v3994_v33  ;;  %v4072_v28 = vshll.u32 %v11722_v45, %v4066_v0  ;;  %v4073_v15 = vshrl.u32 %v11723_v41, %v4067_v63 }
 0xd82   :  { %v10507_v27 = vmul.u32.u64.low %v10484_v39, %v3995_v20  ;;  %v10508_v57 = vmul.u32.u64.high %v10484_v39, %v3995_v20, %v10507_v27  ;;  %v10511_v19 = vmul.u32.u64.low %v10484_v39, %v3991_v53  ;;  %v10512_v18 = vmul.u32.u64.high %v10484_v39, %v3991_v53, %v10511_v19 }
 0xd83   :  { %v4075_v49 = vshll.u32 %v11723_v41, %v4066_v0  ;;  %v4076_v6 = vshrl.u32 %v11724_v40, %v4067_v63  ;;  %v4078_v2 = vshll.u32 %v11724_v40, %v4066_v0  ;;  %v4079_v14 = vshrl.u32 %v11725_v12, %v4067_v63 }
 0xd84   :  { %v4071_v58 = vor.u32 %v4070_v30, %v4069_v37  ;;  %v4074_v44 = vor.u32 %v4073_v15, %v4072_v28  ;;  %v4081_v38 = vshll.u32 %v11725_v12, %v4066_v0  ;;  %v4082_v32 = vshrl.u32 %v11726_v56, %v4067_v63 }
 0xd85   :  { %v4003_v17 = vmul.u32 %v10484_v39, %v3987_v26  ;;  %vm4005_vm8 = vc.u32 %v10508_v57, %v10511_v19  ;;  %v4006_v45 = vadd.s32 1, %v10512_v18  ;;  %v4077_v41 = vor.u32 %v4076_v6, %v4075_v49 }
 0xd86   :  { %v4068_v1 = vshrl.u32 %v11721_v13, %v4067_v63  ;;  %v4080_v31 = vor.u32 %v4079_v14, %v4078_v2  ;;  %v4083_v40 = vor.u32 %v4082_v32, %v4081_v38  ;;  %vm4084_vm11 = vcmp.lt.s32.totalorder %v4065_v34, 1 }
 0xd87   :  { %v4007_v50 = vsel %vm4005_vm8, %v4006_v45, %v10512_v18  ;;  %vm4086_vm12 = vcmp.lt.s32.totalorder %v4065_v34, 3  ;;  %vm4087_vm6 = vcmp.lt.s32.totalorder %v4065_v34, 4  ;;  %v4092_v12 = vsel %vm4084_vm11, %v4071_v58, %v4074_v44 }
 0xd88   :  { %v4008_v8 = vadd.s32 %v4007_v50, %v4003_v17  ;;  %v4089_v56 = vsel %vm4087_vm6, %v4077_v41, 2102212464  ;;  %v4093_v0 = vsel %vm4087_vm6, %v4080_v31, 920167782  ;;  %v4096_v39 = vsel %vm4084_vm11, %v4074_v44, %v4077_v41 }
 0xd89   :  { %v10531_v21 = vpop.f32.mrb[40].mxu0  ;;  %vm4085_vm10 = vcmp.lt.s32.totalorder %v4065_v34, 2  ;;  %v4088_v10 = vsel %vm4084_vm11, %v4068_v1, %v4071_v58  ;;  %v4094_v3 = vsel %vm4086_vm12, %v4077_v41, %v4093_v0  ;;  %v4097_v62 = vsel %vm4087_vm6, %v4083_v40, 1326507024 }
 0xd8a   :  { %v3880_v13 = vpop.f32.mrb[41].mxu0  ;;  %v4009_v16 = vadd.s32 536870912, %v4008_v8  ;;  %v4090_v48 = vsel %vm4086_vm12, %v4074_v44, %v4089_v56  ;;  %v4095_v9 = vsel %vm4085_vm10, %v4092_v12, %v4094_v3  ;;  %v4098_v63 = vsel %vm4086_vm12, %v4080_v31, %v4097_v62 }
 0xd8b   :  { %v10536_v54 = vpop.f32.mrb[42].mxu0  ;;  %v4099_v33 = vsel %vm4085_vm10, %v4096_v39, %v4098_v63  ;;  %v10539_v26 = vmul.u32.u64.low %v10504_v46, %v4095_v9  ;;  %v10540_v53 = vmul.u32.u64.high %v10504_v46, %v4095_v9, %v10539_v26  ;;  %v4091_v30 = vsel %vm4085_vm10, %v4088_v10, %v4090_v48 }
 0xd8c   :  { %v3883_v20 = vpop.f32.mrb[43].mxu0  ;;  %v4010_v27 = vshrl.u32 %v4009_v16, 30  ;;  %v10543_v18 = vmul.u32.u64.low %v10504_v46, %v4099_v33  ;;  %v10544_v37 = vmul.u32.u64.high %v10504_v46, %v4099_v33, %v10543_v18  ;;  %v4107_v34 = vmul.u32 %v10504_v46, %v4091_v30 }
 0xd8d   :  { %v4110_v15 = vadd.s32 1, %v10540_v53  ;;  %v4004_v31 = vadd.s32 %v10511_v19, %v10508_v57  ;;  %vm3949_vm8 = vcmp.le.f32.partialorder %v3948_v52, 0.7853982  ;;  %vm3950_vm11 = vcmp.lt.s32.totalorder %v10472_v42, 0 }
 0xd8e   :  { %v4011_v28 = vshll.u32 %v4010_v27, 30  ;;  %vm4109_vm13 = vc.u32 %v10544_v37, %v10539_v26  ;;  %v4034_v63 = vsub.s32 4, %v4010_v27  ;;  %v4108_v57 = vadd.s32 %v10539_v26, %v10544_v37 }
 0xd8f   :  { %v4111_v6 = vsel %vm4109_vm13, %v4110_v15, %v10540_v53  ;;  %vm4054_vm12 = vcmp.lt.s32.totalorder %v10476_v55, 0  ;;  %vm10560_vm6 = vcmp.le.f32.partialorder %v4052_v29, 0.7853982 }
 0xd90   :  { %v4012_v49 = vsub.s32 %v4008_v8, %v4011_v28  ;;  %v4112_v14 = vadd.s32 %v4111_v6, %v4107_v34  ;;  %v4035_v6 = vsel %vm3950_vm11, %v4034_v63, %v4010_v27 }
 0xd91   :  { %v4037_v26 = vsel %vm3949_vm8, 0, %v4035_v6  ;;  %v8175_v6 = vld [vmem:[%s11645_s5 + $0x148] ss:$16 sps:$4 sm:$0xff]  }
 0xd92   :  { %v4014_v2 = vsub.s32 0, %v4012_v49  ;;  %v4113_v44 = vadd.s32 536870912, %v4112_v14 }
 0xd94   :  { %v7253_v58 = vmin.u32 %v4014_v2, %v4012_v49  ;;  %v4114_v32 = vshrl.u32 %v4113_v44, 30 }
 0xd96   :  { %v4016_v38 = vclz %v7253_v58  ;;  %v4115_v45 = vshll.u32 %v4114_v32, 30 }
 0xd98   :  { %v7254_v17 = vadd.s32 4294967294, %v4016_v38  ;;  %v4116_v41 = vsub.s32 %v4112_v14, %v4115_v45  ;;  %v4041_v38 = vadd.s32 3, %v4037_v26  ;;  %v8189_v26 = vld [vmem:[%s11645_s5 + $0x18c] ss:$16 sps:$4 sm:$0xff]  }
 0xd9a   :  { %vm7255_vm14 = vcmp.lt.s32.totalorder %v7254_v17, 0  ;;  %v4118_v50 = vsub.s32 0, %v4116_v41 }
 0xd9b   :  { %v4019_v1 = vsel %vm7255_vm14, 0, %v7254_v17  ;;  %v4138_v17 = vsub.s32 4, %v4114_v32 }
 0xd9c   :  { %v4020_v40 = vsub.s32 32, %v4019_v1  ;;  %v4024_v46 = vsub.s32 4294967266, %v4019_v1  ;;  %v4021_v12 = vshll.u32 %v4012_v49, %v4019_v1  ;;  %v7257_v0 = vmin.u32 %v4118_v50, %v4116_v41 }
 0xd9d   :  { %v4139_v1 = vsel %vm4054_vm12, %v4138_v17, %v4114_v32  ;;  %v8199_v17 = vld [vmem:[%s11645_s5 + $0x1c8] ss:$16 sps:$4 sm:$0xff]  }
 0xd9e   :  { %v4022_v8 = vshrl.u32 %v4004_v31, %v4020_v40  ;;  %v4025_v56 = vadd.s32 127, %v4024_v46  ;;  %v4120_v3 = vclz %v7257_v0 }
 0xda0   :  { %v4023_v39 = vor.u32 %v4022_v8, %v4021_v12  ;;  %v4026_v10 = vshll.u32 %v4025_v56, 23  ;;  %v7258_v13 = vadd.s32 4294967294, %v4120_v3  ;;  %v4141_v12 = vsel %vm10560_vm6, 0, %v4139_v1  ;;  %v3825_v56 = vpop.permute.xlu0 %3824 }
 0xda1   :  { %v4145_v32 = vadd.s32 3, %v4141_v12 }
 0xda2   :  { %v4027_v62 = vor.u32 4788187, %v4026_v10  ;;  %v4030_v48 = vcvt.s32.f32 %v4023_v39  ;;  %vm7259_vm15 = vcmp.lt.s32.totalorder %v7258_v13, 0  ;;  %v3879_v39 = vadd.f32 %v10531_v21, %v3825_v56 }
 0xda3   :  { %v4123_v9 = vsel %vm7259_vm15, 0, %v7258_v13  ;;  %vm4040_vm15 = vweird.f32 %v10472_v42  ;;  %v4146_v13 = vand.u32 3, %v4145_v32 }
 0xda4   :  { %v4028_v16 = vand.u32 2147483647, %v4027_v62  ;;  %v4124_v19 = vsub.s32 32, %v4123_v9  ;;  %v4128_v53 = vsub.s32 4294967266, %v4123_v9  ;;  %v4125_v18 = vshll.u32 %v4116_v41, %v4123_v9 }
 0xda5   :  { %v4042_v41 = vand.u32 3, %v4041_v38  ;;  %v8201_v38 = vld [vmem:[%s11645_s5 + $0x1cc] ss:$16 sps:$4 sm:$0xff]  }
 0xda6   :  { %v4031_v33 = vmul.f32 %v4030_v48, %v4028_v16  ;;  %v4126_v30 = vshrl.u32 %v4108_v57, %v4124_v19  ;;  %v4129_v28 = vadd.s32 127, %v4128_v53  ;;  %v3830_v57 = vpop.permute.xlu1 %3829 }
 0xda7   :  { %vm4047_vm10 = vcmp.eq.s32.totalorder %v4042_v41, 2  ;;  %vm4044_vm13 = vcmp.eq.s32.totalorder %v4042_v41, 0  ;;  %vm4043_vm14 = vcmp.lt.s32.totalorder %v4042_v41, 2  ;;  %v3882_v53 = vadd.f32 %v10536_v54, %v3830_v57  ;;  %v8165_v54 = vld [vmem:[%s11645_s5 + $0x10c] ss:$16 sps:$4 sm:$0xff]  }
 0xda8   :  { %v4032_v20 = vxor.u32 2147483648, %v4031_v33  ;;  %v4127_v49 = vor.u32 %v4126_v30, %v4125_v18  ;;  %v4130_v34 = vshll.u32 %v4129_v28, 23  ;;  %v8159_v30 = vld [vmem:[%s11644_s8 + $0x28] sm:$0xff]   ;;  %v8683_v28 = vmov 0.0   ;;  %4573 = vmatprep.subr.bf16.mxu1 %v8165_v54  ;;  %v8192_v57 = vld [vmem:[%s11645_s5 + $0x1a4] ss:$16 sps:$4 sm:$0xff]  }
 0xdaa   :  { %v4033_v15 = vsel %vm3950_vm11, %v4032_v20, %v4031_v33  ;;  %v4131_v14 = vor.u32 4788187, %v4130_v34  ;;  %v4134_v58 = vcvt.s32.f32 %v4127_v49  ;;  %vm4148_vm11 = vcmp.eq.s32.totalorder %v4146_v13, 0  ;;  %v8171_v49 = vld [vmem:[%s11645_s5 + $0x12c] ss:$16 sps:$4 sm:$0xff]   ;;  %v4241_v52 = vpop.permute.xlu1 %4240 }
 0xdab   :  { %v4036_v2 = vsel %vm3949_vm8, %v10472_v42, %v4033_v15  ;;  %vm4151_vm8 = vcmp.eq.s32.totalorder %v4146_v13, 2  ;;  %v8169_v15 = vld [vmem:[%s11645_s5 + $0x128] ss:$16 sps:$4 sm:$0xff]   ;;  %v8177_v34 = vld [vmem:[%s11645_s5 + $0x14c] ss:$16 sps:$4 sm:$0xff]  }
 0xdac   :  { %8608 = vcosq.f32 %v4036_v2  ;;  %v4132_v37 = vand.u32 2147483647, %v4131_v14  ;;  %v8181_v14 = vld [vmem:[%s11645_s5 + $0x168] ss:$16 sps:$4 sm:$0xff]  }
 0xdad   :  { %8610 = vsinq.f32 %v4036_v2  ;;  %v8183_v2 = vld [vmem:[%s11645_s5 + $0x16c] ss:$16 sps:$4 sm:$0xff]  }
 0xdae   :  { %v4135_v44 = vmul.f32 %v4134_v58, %v4132_v37  ;;  %v8187_v37 = vld [vmem:[%s11645_s5 + $0x188] ss:$16 sps:$4 sm:$0xff]   ;;  %v8195_v58 = vld [vmem:[%s11645_s5 + $0x1ac] ss:$16 sps:$4 sm:$0xff]  }
 0xdb0   :  { %v4136_v45 = vxor.u32 2147483648, %v4135_v44 }
 0xdb2   :  { %v4137_v27 = vsel %vm4054_vm12, %v4136_v45, %v4135_v44  ;;  %vm4147_vm12 = vcmp.lt.s32.totalorder %v4146_v13, 2  ;;  %v8193_v44 = vld [vmem:[%s11645_s5 + $0x1a8] ss:$16 sps:$4 sm:$0xff]   ;;  %v4236_v45 = vpop.permute.xlu0 %4235  ;;  %v8174_v13 = vld [vmem:[%s11645_s5 + $0x144] ss:$16 sps:$4 sm:$0xff]  }
 0xdb3   :  { %v4140_v31 = vsel %vm10560_vm6, %v10476_v55, %v4137_v27  ;;  %vm4144_vm6 = vweird.f32 %v10476_v55  ;;  %v8163_v55 = vld [vmem:[%s11645_s5 + $0x108] ss:$16 sps:$4 sm:$0xff]  }
 0xdb4   :  { %8612 = vcosq.f32 %v4140_v31  ;;  %4574 = vmatpush1.bf16.msra.mxu1 %v8163_v55  ;;  %v8213_v55 = vld [vmem:[%s11645_s5 + $0xc] ss:$16 sps:$4 sm:$0xff]  }
 0xdb5   :  { %8614 = vsinq.f32 %v4140_v31  ;;  %4575 = vmatprep.subr.bf16.mxu1 %v8171_v49 }
 0xdb6   :  { %v8609_v40 = vpop.eup %8608  ;;  %v4246_v12 = vpop.permute.xlu0 %4245 }
 0xdb7   :  { %v8611_v46 = vpop.eup %8610  ;;  %v4048_v50 = vxor.u32 2147483648, %v8609_v40 }
 0xdb8   :  { %v4045_v8 = vxor.u32 2147483648, %v8611_v46  ;;  %4576 = vmatpush1.bf16.msra.mxu1 %v8169_v15 }
 0xdb9   :  { %v4049_v29 = vsel %vm4047_vm10, %v4048_v50, %v8611_v46  ;;  %vm8684_vm10 = vmmov 0   ;;  %4577 = vmatprep.subr.bf16.mxu1 %v8177_v34 }
 0xdba   :  { %v4046_v0 = vsel %vm4044_vm13, %v8609_v40, %v4045_v8  ;;  %v4251_v8 = vpop.permute.xlu1 %4250 }
 0xdbb   :  { %v4050_v10 = vsel %vm4043_vm14, %v4046_v0, %v4049_v29 }
 0xdbc   :  { %v4051_v3 = vsel %vm4040_vm15, nan, %v4050_v10  ;;  %4578 = vmatpush1.bf16.msra.mxu1 %v8175_v6  ;;  %v8208_v6 = vld [vmem:[%s11645_s5] ss:$16 sps:$4 sm:$0xff]  }
 0xdbd   :  { %v4156_v62 = vmul.f32 %v4051_v3, %v3879_v39  ;;  %4579 = vmatprep.subr.bf16.mxu1 %v8183_v2  ;;  %v8211_v2 = vld [vmem:[%s11645_s5 + $0x8] ss:$16 sps:$4 sm:$0xff]  }
 0xdbe   :  { %v8613_v16 = vpop.eup %8612 }
 0xdbf   :  { %v8615_v48 = vpop.eup %8614  ;;  %v4152_v9 = vxor.u32 2147483648, %v8613_v16 }
 0xdc0   :  { %v4149_v63 = vxor.u32 2147483648, %v8615_v48  ;;  %4580 = vmatpush1.bf16.msra.mxu1 %v8181_v14 }
 0xdc1   :  { %v4153_v33 = vsel %vm4151_vm8, %v4152_v9, %v8615_v48  ;;  %4581 = vmatprep.subr.bf16.mxu1 %v8189_v26  ;;  %v8180_v48 = vld [vmem:[%s11645_s5 + $0x164] ss:$16 sps:$4 sm:$0xff]   ;;  %v8178_v9 = vld [vmem:[%s11645_s5 + $0x160] ss:$16 sps:$4 sm:$0xff]  }
 0xdc2   :  { %v4150_v19 = vsel %vm4148_vm11, %v8613_v16, %v4149_v63  ;;  %v8172_v16 = vld [vmem:[%s11645_s5 + $0x140] ss:$16 sps:$4 sm:$0xff]   ;;  %v8186_v63 = vld [vmem:[%s11645_s5 + $0x184] ss:$16 sps:$4 sm:$0xff]  }
 0xdc3   :  { %v4154_v21 = vsel %vm4147_vm12, %v4150_v19, %v4153_v33  ;;  %v8184_v33 = vld [vmem:[%s11645_s5 + $0x180] ss:$16 sps:$4 sm:$0xff]  }
 0xdc4   :  { %v4155_v42 = vsel %vm4144_vm6, nan, %v4154_v21  ;;  %4582 = vmatpush1.bf16.msra.mxu1 %v8187_v37  ;;  %v8190_v19 = vld [vmem:[%s11645_s5 + $0x1a0] ss:$16 sps:$4 sm:$0xff]   ;;  %v8216_v37 = vld [vmem:[%s11645_s5 + $0x24] ss:$16 sps:$4 sm:$0xff]  }
 0xdc5   :  { %v4157_v20 = vmul.f32 %v4155_v42, %v3882_v53  ;;  %4583 = vmatprep.subr.bf16.mxu1 %v8195_v58  ;;  %v8198_v53 = vld [vmem:[%s11645_s5 + $0x1c4] ss:$16 sps:$4 sm:$0xff]   ;;  %v8196_v21 = vld [vmem:[%s11645_s5 + $0x1c0] ss:$16 sps:$4 sm:$0xff]   ;;  %v8219_v58 = vld [vmem:[%s11645_s5 + $0x2c] ss:$16 sps:$4 sm:$0xff]  }
 0xdc6   :  { %v8202_v42 = vld [vmem:[%s11645_s5 + $0x1e0] ss:$16 sps:$4 sm:$0xff]  }
 0xdc7   :  { %v4158_v18 = vpack.c.bf16 %v4157_v20, %v4156_v62  ;;  %v8166_v62 = vld [vmem:[%s11645_s5 + $0x120] ss:$16 sps:$4 sm:$0xff]   ;;  %v8204_v20 = vld [vmem:[%s11645_s5 + $0x1e4] ss:$16 sps:$4 sm:$0xff]  }
 0xdc8   :  { %4584 = vmatpush1.bf16.msra.mxu1 %v8193_v44  ;;  %v8214_v44 = vld [vmem:[%s11645_s5 + $0x20] ss:$16 sps:$4 sm:$0xff]  }
 0xdc9   :  { %7924 = vmatprep.subr.bf16.mxu0 %v4158_v18  ;;  %4585 = vmatprep.subr.bf16.mxu1 %v8201_v38  ;;  %v8217_v38 = vld [vmem:[%s11645_s5 + $0x28] ss:$16 sps:$4 sm:$0xff]  }
 0xdca   :  { %7925 = vmatpush3.bf16.msra.mxu0 %v4158_v18  ;;  %v8205_v18 = vld [vmem:[%s11645_s5 + $0x1e8] ss:$16 sps:$4 sm:$0xff]  }
 0xdcb   :  { %7930 = vmatprep.subr.bf16.mxu0 %v8683_v28 }
 0xdcc   :  { %4586 = vmatpush1.bf16.msra.mxu1 %v8199_v17  ;;  %v8222_v17 = vld [vmem:[%s11645_s5 + $0x44] ss:$16 sps:$4 sm:$0xff]  }
 0xdcd   :  { %7927 = vmatmul.mubr.msk.bf16.vlgmr.msra.gmra.mrb[44].mxu0 %vm2453_vm5, %v8159_v30  ;;  %vm4259_vm5 = vcmask 261120   ;;  %v8207_v30 = vld [vmem:[%s11645_s5 + $0x1ec] ss:$16 sps:$4 sm:$0xff]  }
 0xdce   :  { %7934 = vmatprep.mubr.msk.bf16.mxu0 %vm8684_vm10, %v8683_v28  ;;  %4587 = vmatprep.subr.bf16.mxu1 %v8207_v30  ;;  %v8279_v30 = vld [vmem:[%s11645_s5 + $0x26c] ss:$16 sps:$4 sm:$0xff]  }
 0xdd0   :  { %4588 = vmatpush1.bf16.msra.mxu1 %v8205_v18  ;;  %v8276_v18 = vld [vmem:[%s11645_s5 + $0x264] ss:$16 sps:$4 sm:$0xff]  }
 0xdd1   :  { %4815 = vmatprep.subr.bf16.mxu1 %v8213_v55  ;;  %v8277_v55 = vld [vmem:[%s11645_s5 + $0x268] ss:$16 sps:$4 sm:$0xff]  }
 0xea0   :  { %v7928_v27 = vpop.f32.mrb[44].mxu0 }
 0xea1   :  { %v4231_v41 = vadd.f32 %v7928_v27, %v10303_v47  ;;  %v4214_v1 = vpop.f32.mrb[45].mxu0  ;;  %v62_v47 = vld [vmem:[%s11637_s6 + $0x8] sm:$0xf] }
 0xea2   :  { %v4229_v31 = vadd.f32 %v4214_v1, %v10300_v51  ;;  %v7929_v40 = vpop.f32.mrb[46].mxu0  ;;  %v8162_v51 = vld [vmem:[%s11645_s5 + $0x104] ss:$16 sps:$4 sm:$0xff]   ;;  %v8223_v27 = vld [vmem:[%s11645_s5 + $0x48] ss:$16 sps:$4 sm:$0xff]  }
 0xea3   :  { %v4232_v46 = vadd.f32 %v7929_v40, %v10305_v60  ;;  %v4217_v50 = vpop.f32.mrb[47].mxu0  ;;  %v4255_v56 = vadd.f32 %v4246_v12, %v4231_v41  ;;  %v8160_v60 = vld [vmem:[%s11645_s5 + $0x100] ss:$16 sps:$4 sm:$0xff]   ;;  %v8228_v41 = vld [vmem:[%s11645_s5 + $0x64] ss:$16 sps:$4 sm:$0xff]  }
 0xea4   :  { %v4230_v29 = vadd.f32 %v4217_v50, %v10307_v4  ;;  %v4253_v32 = vadd.f32 %v4236_v45, %v4229_v31  ;;  %v8168_v4 = vld [vmem:[%s11645_s5 + $0x124] ss:$16 sps:$4 sm:$0xff]   ;;  %v8225_v45 = vld [vmem:[%s11645_s5 + $0x4c] ss:$16 sps:$4 sm:$0xff]   ;;  %v8226_v31 = vld [vmem:[%s11645_s5 + $0x60] ss:$16 sps:$4 sm:$0xff]  }
 0xea5   :  { %v4256_v0 = vadd.f32 %v4251_v8, %v4232_v46  ;;  %v8231_v1 = vld [vmem:[%s11645_s5 + $0x6c] ss:$16 sps:$4 sm:$0xff]   ;;  %v8229_v40 = vld [vmem:[%s11645_s5 + $0x68] ss:$16 sps:$4 sm:$0xff]   ;;  %v8234_v46 = vld [vmem:[%s11645_s5 + $0x84] ss:$16 sps:$4 sm:$0xff]  }
 0xea6   :  { %v4254_v39 = vadd.f32 %v4241_v52, %v4230_v29  ;;  %v8220_v52 = vld [vmem:[%s11645_s5 + $0x40] ss:$16 sps:$4 sm:$0xff]   ;;  %v8237_v50 = vld [vmem:[%s11645_s5 + $0x8c] ss:$16 sps:$4 sm:$0xff]   ;;  %v8235_v8 = vld [vmem:[%s11645_s5 + $0x88] ss:$16 sps:$4 sm:$0xff]  }
 0xea7   :  { %v4258_v10 = vpack.c.bf16 %v4256_v0, %v4255_v56  ;;  %v8232_v12 = vld [vmem:[%s11645_s5 + $0x80] ss:$16 sps:$4 sm:$0xff]   ;;  %v8240_v29 = vld [vmem:[%s11645_s5 + $0xa4] ss:$16 sps:$4 sm:$0xff]   ;;  %v8243_v56 = vld [vmem:[%s11645_s5 + $0xac] ss:$16 sps:$4 sm:$0xff]  }
 0xea8   :  { %v4257_v3 = vpack.c.bf16 %v4254_v39, %v4253_v32  ;;  %v8238_v0 = vld [vmem:[%s11645_s5 + $0xa0] ss:$16 sps:$4 sm:$0xff]   ;;  %v8241_v32 = vld [vmem:[%s11645_s5 + $0xa8] ss:$16 sps:$4 sm:$0xff]   ;;  %v8246_v39 = vld [vmem:[%s11645_s5 + $0xc4] ss:$16 sps:$4 sm:$0xff]  }
 0xeaa   :  { %7931 = vmatpush3.bf16.msra.mxu0 %v4257_v3  ;;  %v8244_v3 = vld [vmem:[%s11645_s5 + $0xc0] ss:$16 sps:$4 sm:$0xff]  }
 0xeab   :  { %7932 = vmatprep.subr.bf16.mxu0 %v8683_v28  ;;  %v8210_v28 = vld [vmem:[%s11645_s5 + $0x4] ss:$16 sps:$4 sm:$0xff]  }
 0xeae   :  { %7933 = vmatpush3.bf16.msra.mxu0 %v4258_v10  ;;  %v8249_v10 = vld [vmem:[%s11645_s5 + $0xcc] ss:$16 sps:$4 sm:$0xff]  }
 0xeaf   :  { %4532 = vmatprep.subr.bf16.mxu0 %v8162_v51  ;;  %v8247_v51 = vld [vmem:[%s11645_s5 + $0xc8] ss:$16 sps:$4 sm:$0xff]  }
 0xeb1   :  { %7935 = vmatmul.mubr.msk.bf16.vlgmr.msra.gmra.mrb[48].mxu0 %vm4259_vm5, %v62_v47  ;;  %v8252_v47 = vld [vmem:[%s11645_s5 + $0xe4] ss:$16 sps:$4 sm:$0xff]   ;;  %vm6644_vm5 = vcmask 1040384  }
 0xeb2   :  { %4533 = vmatpush1.bf16.msra.mxu0 %v8160_v60  ;;  %4564 = vmatprep.mubr.bf16.mxu0 %v11720_v35  ;;  %v8255_v60 = vld [vmem:[%s11645_s5 + $0xec] ss:$16 sps:$4 sm:$0xff]  }
 0xeb3   :  { %4534 = vmatprep.subr.bf16.mxu0 %v8168_v4  ;;  %v8250_v4 = vld [vmem:[%s11645_s5 + $0xe0] ss:$16 sps:$4 sm:$0xff]  }
 0xeb6   :  { %4535 = vmatpush1.bf16.msra.mxu0 %v8166_v62  ;;  %v8253_v62 = vld [vmem:[%s11645_s5 + $0xe8] ss:$16 sps:$4 sm:$0xff]  }
 0xeb7   :  { %4536 = vmatprep.subr.bf16.mxu0 %v8174_v13  ;;  %v8258_v13 = vld [vmem:[%s11645_s5 + $0x204] ss:$16 sps:$4 sm:$0xff]  }
 0xeba   :  { %4537 = vmatpush1.bf16.msra.mxu0 %v8172_v16  ;;  %v8261_v16 = vld [vmem:[%s11645_s5 + $0x20c] ss:$16 sps:$4 sm:$0xff]  }
 0xebb   :  { %4538 = vmatprep.subr.bf16.mxu0 %v8180_v48  ;;  %v8256_v48 = vld [vmem:[%s11645_s5 + $0x200] ss:$16 sps:$4 sm:$0xff]  }
 0xebe   :  { %4539 = vmatpush1.bf16.msra.mxu0 %v8178_v9  ;;  %v8259_v9 = vld [vmem:[%s11645_s5 + $0x208] ss:$16 sps:$4 sm:$0xff]  }
 0xebf   :  { %4540 = vmatprep.subr.bf16.mxu0 %v8186_v63  ;;  %v8264_v63 = vld [vmem:[%s11645_s5 + $0x224] ss:$16 sps:$4 sm:$0xff]  }
 0xec2   :  { %4541 = vmatpush1.bf16.msra.mxu0 %v8184_v33  ;;  %v8267_v33 = vld [vmem:[%s11645_s5 + $0x22c] ss:$16 sps:$4 sm:$0xff]  }
 0xec3   :  { %4542 = vmatprep.subr.bf16.mxu0 %v8192_v57  ;;  %v8262_v57 = vld [vmem:[%s11645_s5 + $0x220] ss:$16 sps:$4 sm:$0xff]  }
 0xec6   :  { %4543 = vmatpush1.bf16.msra.mxu0 %v8190_v19  ;;  %v8265_v19 = vld [vmem:[%s11645_s5 + $0x228] ss:$16 sps:$4 sm:$0xff]  }
 0xec7   :  { %4544 = vmatprep.subr.bf16.mxu0 %v8198_v53  ;;  %v8270_v53 = vld [vmem:[%s11645_s5 + $0x244] ss:$16 sps:$4 sm:$0xff]  }
 0xeca   :  { %4545 = vmatpush1.bf16.msra.mxu0 %v8196_v21  ;;  %v8273_v21 = vld [vmem:[%s11645_s5 + $0x24c] ss:$16 sps:$4 sm:$0xff]  }
 0xecb   :  { %4546 = vmatprep.subr.bf16.mxu0 %v8204_v20  ;;  %v8271_v20 = vld [vmem:[%s11645_s5 + $0x248] ss:$16 sps:$4 sm:$0xff]  }
 0xece   :  { %4547 = vmatpush1.bf16.msra.mxu0 %v8202_v42  ;;  %v8268_v42 = vld [vmem:[%s11645_s5 + $0x240] ss:$16 sps:$4 sm:$0xff]  }
 0xecf   :  { %4774 = vmatprep.subr.bf16.mxu0 %v8210_v28  ;;  %v8274_v28 = vld [vmem:[%s11645_s5 + $0x260] ss:$16 sps:$4 sm:$0xff]  }
 0xf84   :  { %v4297_v54 = vpop.f32.mrb[48].mxu0 }
 0xf85   :  { %v10687_v15 = vpack.c.bf16 %v4297_v54, %v4297_v54  ;;  %v7936_v49 = vpop.f32.mrb[49].mxu0  ;;  %v8282_v54 = vld [vmem:[%s11645_s5 + $0x284] ss:$16 sps:$4 sm:$0xff]  }
 0xf86   :  { %v4300_v34 = vpop.f32.mrb[50].mxu0  ;;  %v8285_v49 = vld [vmem:[%s11645_s5 + $0x28c] ss:$16 sps:$4 sm:$0xff]  }
 0xf87   :  { %v7937_v14 = vpop.f32.mrb[51].mxu0  ;;  %v4370_v26 = vrot.slane %v10687_v15, 1  ;;  %v8280_v34 = vld [vmem:[%s11645_s5 + $0x280] ss:$16 sps:$4 sm:$0xff]  }
 0xf88   :  { %v8291_v14 = vld [vmem:[%s11645_s5 + $0x2ac] ss:$16 sps:$4 sm:$0xff]  }
 0xf89   :  { %4565 = vmatmul.mubr.bf16.vlgmr.msra.gmra.mrb[52].mxu0 %v4370_v26  ;;  %4606 = vmatmul.mubr.bf16.vlgmr.msra.gmra.mrb[44].mxu1 %v4370_v26  ;;  %v8286_v26 = vld [vmem:[%s11645_s5 + $0x2a0] ss:$16 sps:$4 sm:$0xff]  }
 0xf8a   :  { %4775 = vmatpush1.bf16.msra.mxu0 %v8208_v6  ;;  %4816 = vmatpush1.bf16.msra.mxu1 %v8211_v2  ;;  %v8283_v6 = vld [vmem:[%s11645_s5 + $0x288] ss:$16 sps:$4 sm:$0xff]   ;;  %v8288_v2 = vld [vmem:[%s11645_s5 + $0x2a4] ss:$16 sps:$4 sm:$0xff]  }
 0xf8b   :  { %4776 = vmatprep.subr.bf16.mxu0 %v8216_v37  ;;  %4817 = vmatprep.subr.bf16.mxu1 %v8219_v58  ;;  %v8289_v37 = vld [vmem:[%s11645_s5 + $0x2a8] ss:$16 sps:$4 sm:$0xff]   ;;  %v8294_v58 = vld [vmem:[%s11645_s5 + $0x2c4] ss:$16 sps:$4 sm:$0xff]  }
 0xf8c   :  { %4806 = vmatprep.mubr.bf16.mxu0 %v11720_v35  ;;  %4847 = vmatprep.mubr.bf16.mxu1 %v11720_v35 }
 0xf8e   :  { %4777 = vmatpush1.bf16.msra.mxu0 %v8214_v44  ;;  %4818 = vmatpush1.bf16.msra.mxu1 %v8217_v38  ;;  %v8297_v44 = vld [vmem:[%s11645_s5 + $0x2cc] ss:$16 sps:$4 sm:$0xff]   ;;  %v8292_v38 = vld [vmem:[%s11645_s5 + $0x2c0] ss:$16 sps:$4 sm:$0xff]  }
 0xf8f   :  { %4778 = vmatprep.subr.bf16.mxu0 %v8222_v17  ;;  %4819 = vmatprep.subr.bf16.mxu1 %v8225_v45  ;;  %v8295_v17 = vld [vmem:[%s11645_s5 + $0x2c8] ss:$16 sps:$4 sm:$0xff]   ;;  %v8300_v45 = vld [vmem:[%s11645_s5 + $0x2e4] ss:$16 sps:$4 sm:$0xff]  }
 0xf92   :  { %4779 = vmatpush1.bf16.msra.mxu0 %v8220_v52  ;;  %4820 = vmatpush1.bf16.msra.mxu1 %v8223_v27  ;;  %v8303_v52 = vld [vmem:[%s11645_s5 + $0x2ec] ss:$16 sps:$4 sm:$0xff]   ;;  %v8298_v27 = vld [vmem:[%s11645_s5 + $0x2e0] ss:$16 sps:$4 sm:$0xff]  }
 0xf93   :  { %4780 = vmatprep.subr.bf16.mxu0 %v8228_v41  ;;  %4821 = vmatprep.subr.bf16.mxu1 %v8231_v1  ;;  %v8301_v41 = vld [vmem:[%s11645_s5 + $0x2e8] ss:$16 sps:$4 sm:$0xff]   ;;  %v8306_v1 = vld [vmem:[%s11645_s5 + $0x304] ss:$16 sps:$4 sm:$0xff]  }
 0xf96   :  { %4781 = vmatpush1.bf16.msra.mxu0 %v8226_v31  ;;  %4822 = vmatpush1.bf16.msra.mxu1 %v8229_v40  ;;  %v8309_v31 = vld [vmem:[%s11645_s5 + $0x30c] ss:$16 sps:$4 sm:$0xff]   ;;  %v8304_v40 = vld [vmem:[%s11645_s5 + $0x300] ss:$16 sps:$4 sm:$0xff]  }
 0xf97   :  { %4782 = vmatprep.subr.bf16.mxu0 %v8234_v46  ;;  %4823 = vmatprep.subr.bf16.mxu1 %v8237_v50  ;;  %v8307_v46 = vld [vmem:[%s11645_s5 + $0x308] ss:$16 sps:$4 sm:$0xff]   ;;  %v4889_v50 = vrot.slane %v10687_v15, 2 }
 0xf9a   :  { %4783 = vmatpush1.bf16.msra.mxu0 %v8232_v12  ;;  %4824 = vmatpush1.bf16.msra.mxu1 %v8235_v8  ;;  %v8312_v12 = vld [vmem:[%s11645_s5 + $0x324] ss:$16 sps:$4 sm:$0xff]   ;;  %v8315_v8 = vld [vmem:[%s11645_s5 + $0x32c] ss:$16 sps:$4 sm:$0xff]  }
 0xf9b   :  { %4784 = vmatprep.subr.bf16.mxu0 %v8240_v29  ;;  %4825 = vmatprep.subr.bf16.mxu1 %v8243_v56  ;;  %v8310_v29 = vld [vmem:[%s11645_s5 + $0x320] ss:$16 sps:$4 sm:$0xff]   ;;  %v8313_v56 = vld [vmem:[%s11645_s5 + $0x328] ss:$16 sps:$4 sm:$0xff]  }
 0xf9e   :  { %4785 = vmatpush1.bf16.msra.mxu0 %v8238_v0  ;;  %4826 = vmatpush1.bf16.msra.mxu1 %v8241_v32  ;;  %v8318_v0 = vld [vmem:[%s11645_s5 + $0x344] ss:$16 sps:$4 sm:$0xff]   ;;  %v8321_v32 = vld [vmem:[%s11645_s5 + $0x34c] ss:$16 sps:$4 sm:$0xff]  }
 0xf9f   :  { %4786 = vmatprep.subr.bf16.mxu0 %v8246_v39  ;;  %4827 = vmatprep.subr.bf16.mxu1 %v8249_v10  ;;  %v8316_v39 = vld [vmem:[%s11645_s5 + $0x340] ss:$16 sps:$4 sm:$0xff]   ;;  %v8319_v10 = vld [vmem:[%s11645_s5 + $0x348] ss:$16 sps:$4 sm:$0xff]  }
 0xfa2   :  { %4787 = vmatpush1.bf16.msra.mxu0 %v8244_v3  ;;  %4828 = vmatpush1.bf16.msra.mxu1 %v8247_v51  ;;  %v8324_v3 = vld [vmem:[%s11645_s5 + $0x364] ss:$16 sps:$4 sm:$0xff]   ;;  %v8327_v51 = vld [vmem:[%s11645_s5 + $0x36c] ss:$16 sps:$4 sm:$0xff]  }
 0xfa3   :  { %4788 = vmatprep.subr.bf16.mxu0 %v8252_v47  ;;  %4829 = vmatprep.subr.bf16.mxu1 %v8255_v60  ;;  %v8322_v47 = vld [vmem:[%s11645_s5 + $0x360] ss:$16 sps:$4 sm:$0xff]   ;;  %v8325_v60 = vld [vmem:[%s11645_s5 + $0x368] ss:$16 sps:$4 sm:$0xff]  }
 0xfa6   :  { %4789 = vmatpush1.bf16.msra.mxu0 %v8250_v4  ;;  %4830 = vmatpush1.bf16.msra.mxu1 %v8253_v62  ;;  %v8330_v4 = vld [vmem:[%s11645_s5 + $0x384] ss:$16 sps:$4 sm:$0xff]   ;;  %v8333_v62 = vld [vmem:[%s11645_s5 + $0x38c] ss:$16 sps:$4 sm:$0xff]  }
 0xfa7   :  { %5051 = vmatprep.subr.bf16.mxu0 %v8258_v13  ;;  %5092 = vmatprep.subr.bf16.mxu1 %v8261_v16  ;;  %v8328_v13 = vld [vmem:[%s11645_s5 + $0x380] ss:$16 sps:$4 sm:$0xff]   ;;  %v8331_v16 = vld [vmem:[%s11645_s5 + $0x388] ss:$16 sps:$4 sm:$0xff]  }
 0xfa9   :  { %4807 = vmatmul.mubr.bf16.vlgmr.msra.gmra.mrb[56].mxu0 %v10687_v15  ;;  %4848 = vmatmul.mubr.bf16.vlgmr.msra.gmra.mrb[48].mxu1 %v10687_v15 }
 0xfaa   :  { %5052 = vmatpush1.bf16.msra.mxu0 %v8256_v48  ;;  %5093 = vmatpush1.bf16.msra.mxu1 %v8259_v9  ;;  %v8336_v48 = vld [vmem:[%s11645_s5 + $0x3a4] ss:$16 sps:$4 sm:$0xff]   ;;  %v8339_v9 = vld [vmem:[%s11645_s5 + $0x3ac] ss:$16 sps:$4 sm:$0xff]  }
 0xfab   :  { %5053 = vmatprep.subr.bf16.mxu0 %v8264_v63  ;;  %5094 = vmatprep.subr.bf16.mxu1 %v8267_v33  ;;  %v8334_v63 = vld [vmem:[%s11645_s5 + $0x3a0] ss:$16 sps:$4 sm:$0xff]   ;;  %v8337_v33 = vld [vmem:[%s11645_s5 + $0x3a8] ss:$16 sps:$4 sm:$0xff]  }
 0xfac   :  { %5083 = vmatprep.mubr.bf16.mxu0 %v11720_v35  ;;  %5124 = vmatprep.mubr.bf16.mxu1 %v11720_v35 }
 0xfae   :  { %5054 = vmatpush1.bf16.msra.mxu0 %v8262_v57  ;;  %5095 = vmatpush1.bf16.msra.mxu1 %v8265_v19  ;;  %v8342_v57 = vld [vmem:[%s11645_s5 + $0x3c4] ss:$16 sps:$4 sm:$0xff]   ;;  %v8345_v19 = vld [vmem:[%s11645_s5 + $0x3cc] ss:$16 sps:$4 sm:$0xff]  }
 0xfaf   :  { %5055 = vmatprep.subr.bf16.mxu0 %v8270_v53  ;;  %5096 = vmatprep.subr.bf16.mxu1 %v8273_v21  ;;  %v8340_v53 = vld [vmem:[%s11645_s5 + $0x3c0] ss:$16 sps:$4 sm:$0xff]   ;;  %v8343_v21 = vld [vmem:[%s11645_s5 + $0x3c8] ss:$16 sps:$4 sm:$0xff]  }
 0xfb2   :  { %5056 = vmatpush1.bf16.msra.mxu0 %v8268_v42  ;;  %5097 = vmatpush1.bf16.msra.mxu1 %v8271_v20  ;;  %v8348_v42 = vld [vmem:[%s11645_s5 + $0x3e4] ss:$16 sps:$4 sm:$0xff]   ;;  %v8351_v20 = vld [vmem:[%s11645_s5 + $0x3ec] ss:$16 sps:$4 sm:$0xff]  }
 0xfb3   :  { %5057 = vmatprep.subr.bf16.mxu0 %v8276_v18  ;;  %5098 = vmatprep.subr.bf16.mxu1 %v8279_v30  ;;  %v8346_v18 = vld [vmem:[%s11645_s5 + $0x3e0] ss:$16 sps:$4 sm:$0xff]   ;;  %v8349_v30 = vld [vmem:[%s11645_s5 + $0x3e8] ss:$16 sps:$4 sm:$0xff]  }
 0xfb6   :  { %5058 = vmatpush1.bf16.msra.mxu0 %v8274_v28  ;;  %5099 = vmatpush1.bf16.msra.mxu1 %v8277_v55  ;;  %v5170_v28 = vrot.slane %v10687_v15, 3  ;;  %v8352_v55 = vld [vmem:[%s11646_s2] ss:$16 sps:$4 sm:$0xff]  }
 0xfb7   :  { %5059 = vmatprep.subr.bf16.mxu0 %v8282_v54  ;;  %5100 = vmatprep.subr.bf16.mxu1 %v8285_v49  ;;  %v8354_v54 = vld [vmem:[%s11646_s2 + $0x4] ss:$16 sps:$4 sm:$0xff]   ;;  %v8355_v49 = vld [vmem:[%s11646_s2 + $0x8] ss:$16 sps:$4 sm:$0xff]   ;;  %v8358_v15 = vld [vmem:[%s11646_s2 + $0x20] ss:$16 sps:$4 sm:$0xff]  }
 0xfba   :  { %5060 = vmatpush1.bf16.msra.mxu0 %v8280_v34  ;;  %5101 = vmatpush1.bf16.msra.mxu1 %v8283_v6  ;;  %v8357_v34 = vld [vmem:[%s11646_s2 + $0xc] ss:$16 sps:$4 sm:$0xff]   ;;  %v8360_v6 = vld [vmem:[%s11646_s2 + $0x24] ss:$16 sps:$4 sm:$0xff]  }
 0xfbb   :  { %5061 = vmatprep.subr.bf16.mxu0 %v8288_v2  ;;  %5102 = vmatprep.subr.bf16.mxu1 %v8291_v14  ;;  %v8361_v2 = vld [vmem:[%s11646_s2 + $0x28] ss:$16 sps:$4 sm:$0xff]   ;;  %v8363_v14 = vld [vmem:[%s11646_s2 + $0x2c] ss:$16 sps:$4 sm:$0xff]  }
 0xfbe   :  { %5062 = vmatpush1.bf16.msra.mxu0 %v8286_v26  ;;  %5103 = vmatpush1.bf16.msra.mxu1 %v8289_v37  ;;  %v8366_v26 = vld [vmem:[%s11646_s2 + $0x44] ss:$16 sps:$4 sm:$0xff]   ;;  %v8364_v37 = vld [vmem:[%s11646_s2 + $0x40] ss:$16 sps:$4 sm:$0xff]  }
 0xfbf   :  { %5063 = vmatprep.subr.bf16.mxu0 %v8294_v58  ;;  %5104 = vmatprep.subr.bf16.mxu1 %v8297_v44  ;;  %v8369_v58 = vld [vmem:[%s11646_s2 + $0x4c] ss:$16 sps:$4 sm:$0xff]   ;;  %v8367_v44 = vld [vmem:[%s11646_s2 + $0x48] ss:$16 sps:$4 sm:$0xff]  }
 0xfc2   :  { %5064 = vmatpush1.bf16.msra.mxu0 %v8292_v38  ;;  %5105 = vmatpush1.bf16.msra.mxu1 %v8295_v17  ;;  %v8372_v38 = vld [vmem:[%s11646_s2 + $0x64] ss:$16 sps:$4 sm:$0xff]   ;;  %v8375_v17 = vld [vmem:[%s11646_s2 + $0x6c] ss:$16 sps:$4 sm:$0xff]  }
 0xfc3   :  { %5065 = vmatprep.subr.bf16.mxu0 %v8300_v45  ;;  %5106 = vmatprep.subr.bf16.mxu1 %v8303_v52  ;;  %v8370_v45 = vld [vmem:[%s11646_s2 + $0x60] ss:$16 sps:$4 sm:$0xff]   ;;  %v8373_v52 = vld [vmem:[%s11646_s2 + $0x68] ss:$16 sps:$4 sm:$0xff]  }
 0xfc6   :  { %5066 = vmatpush1.bf16.msra.mxu0 %v8298_v27  ;;  %5107 = vmatpush1.bf16.msra.mxu1 %v8301_v41  ;;  %v8378_v27 = vld [vmem:[%s11646_s2 + $0x84] ss:$16 sps:$4 sm:$0xff]   ;;  %v8376_v41 = vld [vmem:[%s11646_s2 + $0x80] ss:$16 sps:$4 sm:$0xff]  }
 0xfc7   :  { %5332 = vmatprep.subr.bf16.mxu0 %v8306_v1  ;;  %5373 = vmatprep.subr.bf16.mxu1 %v8309_v31  ;;  %v8381_v1 = vld [vmem:[%s11646_s2 + $0x8c] ss:$16 sps:$4 sm:$0xff]   ;;  %v8379_v31 = vld [vmem:[%s11646_s2 + $0x88] ss:$16 sps:$4 sm:$0xff]  }
 0xfc9   :  { %5084 = vmatmul.mubr.bf16.vlgmr.msra.gmra.mrb[60].mxu0 %v4889_v50  ;;  %5125 = vmatmul.mubr.bf16.vlgmr.msra.gmra.mrb[52].mxu1 %v4889_v50  ;;  %v8382_v50 = vld [vmem:[%s11646_s2 + $0xa0] ss:$16 sps:$4 sm:$0xff]  }
 0xfca   :  { %5333 = vmatpush1.bf16.msra.mxu0 %v8304_v40  ;;  %5374 = vmatpush1.bf16.msra.mxu1 %v8307_v46  ;;  %v8384_v40 = vld [vmem:[%s11646_s2 + $0xa4] ss:$16 sps:$4 sm:$0xff]   ;;  %v8387_v46 = vld [vmem:[%s11646_s2 + $0xac] ss:$16 sps:$4 sm:$0xff]  }
 0xfcb   :  { %5334 = vmatprep.subr.bf16.mxu0 %v8312_v12  ;;  %5375 = vmatprep.subr.bf16.mxu1 %v8315_v8  ;;  %v8385_v12 = vld [vmem:[%s11646_s2 + $0xa8] ss:$16 sps:$4 sm:$0xff]   ;;  %v8388_v8 = vld [vmem:[%s11646_s2 + $0xc0] ss:$16 sps:$4 sm:$0xff]  }
 0xfcc   :  { %5364 = vmatprep.mubr.bf16.mxu0 %v11720_v35  ;;  %5405 = vmatprep.mubr.bf16.mxu1 %v11720_v35 }
 0xfce   :  { %5335 = vmatpush1.bf16.msra.mxu0 %v8310_v29  ;;  %5376 = vmatpush1.bf16.msra.mxu1 %v8313_v56  ;;  %v8390_v29 = vld [vmem:[%s11646_s2 + $0xc4] ss:$16 sps:$4 sm:$0xff]   ;;  %v8391_v56 = vld [vmem:[%s11646_s2 + $0xc8] ss:$16 sps:$4 sm:$0xff]  }
 0xfcf   :  { %5336 = vmatprep.subr.bf16.mxu0 %v8318_v0  ;;  %5377 = vmatprep.subr.bf16.mxu1 %v8321_v32  ;;  %v8393_v0 = vld [vmem:[%s11646_s2 + $0xcc] ss:$16 sps:$4 sm:$0xff]   ;;  %v8396_v32 = vld [vmem:[%s11646_s2 + $0xe4] ss:$16 sps:$4 sm:$0xff]  }
 0xfd2   :  { %5337 = vmatpush1.bf16.msra.mxu0 %v8316_v39  ;;  %5378 = vmatpush1.bf16.msra.mxu1 %v8319_v10  ;;  %v8399_v39 = vld [vmem:[%s11646_s2 + $0xec] ss:$16 sps:$4 sm:$0xff]   ;;  %v8394_v10 = vld [vmem:[%s11646_s2 + $0xe0] ss:$16 sps:$4 sm:$0xff]  }
 0xfd3   :  { %5338 = vmatprep.subr.bf16.mxu0 %v8324_v3  ;;  %5379 = vmatprep.subr.bf16.mxu1 %v8327_v51  ;;  %v8397_v3 = vld [vmem:[%s11646_s2 + $0xe8] ss:$16 sps:$4 sm:$0xff]   ;;  %v8402_v51 = vld [vmem:[%s11646_s2 + $0x104] ss:$16 sps:$4 sm:$0xff]  }
 0xfd6   :  { %5339 = vmatpush1.bf16.msra.mxu0 %v8322_v47  ;;  %5380 = vmatpush1.bf16.msra.mxu1 %v8325_v60  ;;  %v8405_v47 = vld [vmem:[%s11646_s2 + $0x10c] ss:$16 sps:$4 sm:$0xff]   ;;  %v8400_v60 = vld [vmem:[%s11646_s2 + $0x100] ss:$16 sps:$4 sm:$0xff]  }
 0xfd7   :  { %5340 = vmatprep.subr.bf16.mxu0 %v8330_v4  ;;  %5381 = vmatprep.subr.bf16.mxu1 %v8333_v62  ;;  %v8403_v4 = vld [vmem:[%s11646_s2 + $0x108] ss:$16 sps:$4 sm:$0xff]   ;;  %v8408_v62 = vld [vmem:[%s11646_s2 + $0x124] ss:$16 sps:$4 sm:$0xff]  }
 0xfda   :  { %5341 = vmatpush1.bf16.msra.mxu0 %v8328_v13  ;;  %5382 = vmatpush1.bf16.msra.mxu1 %v8331_v16  ;;  %v8406_v13 = vld [vmem:[%s11646_s2 + $0x120] ss:$16 sps:$4 sm:$0xff]   ;;  %v8411_v16 = vld [vmem:[%s11646_s2 + $0x12c] ss:$16 sps:$4 sm:$0xff]  }
 0xfdb   :  { %5342 = vmatprep.subr.bf16.mxu0 %v8336_v48  ;;  %5383 = vmatprep.subr.bf16.mxu1 %v8339_v9  ;;  %v8409_v48 = vld [vmem:[%s11646_s2 + $0x128] ss:$16 sps:$4 sm:$0xff]   ;;  %v8414_v9 = vld [vmem:[%s11646_s2 + $0x144] ss:$16 sps:$4 sm:$0xff]  }
 0xfde   :  { %5343 = vmatpush1.bf16.msra.mxu0 %v8334_v63  ;;  %5384 = vmatpush1.bf16.msra.mxu1 %v8337_v33  ;;  %v8417_v63 = vld [vmem:[%s11646_s2 + $0x14c] ss:$16 sps:$4 sm:$0xff]   ;;  %v8412_v33 = vld [vmem:[%s11646_s2 + $0x140] ss:$16 sps:$4 sm:$0xff]  }
 0xfdf   :  { %5344 = vmatprep.subr.bf16.mxu0 %v8342_v57  ;;  %5385 = vmatprep.subr.bf16.mxu1 %v8345_v19  ;;  %v8415_v57 = vld [vmem:[%s11646_s2 + $0x148] ss:$16 sps:$4 sm:$0xff]   ;;  %v8420_v19 = vld [vmem:[%s11646_s2 + $0x164] ss:$16 sps:$4 sm:$0xff]  }
 0xfe2   :  { %5345 = vmatpush1.bf16.msra.mxu0 %v8340_v53  ;;  %5386 = vmatpush1.bf16.msra.mxu1 %v8343_v21  ;;  %v8423_v53 = vld [vmem:[%s11646_s2 + $0x16c] ss:$16 sps:$4 sm:$0xff]   ;;  %v8418_v21 = vld [vmem:[%s11646_s2 + $0x160] ss:$16 sps:$4 sm:$0xff]  }
 0xfe3   :  { %5346 = vmatprep.subr.bf16.mxu0 %v8348_v42  ;;  %5387 = vmatprep.subr.bf16.mxu1 %v8351_v20  ;;  %v8421_v42 = vld [vmem:[%s11646_s2 + $0x168] ss:$16 sps:$4 sm:$0xff]   ;;  %v8426_v20 = vld [vmem:[%s11646_s2 + $0x184] ss:$16 sps:$4 sm:$0xff]  }
 0xfe6   :  { %5347 = vmatpush1.bf16.msra.mxu0 %v8346_v18  ;;  %5388 = vmatpush1.bf16.msra.mxu1 %v8349_v30  ;;  %v8429_v18 = vld [vmem:[%s11646_s2 + $0x18c] ss:$16 sps:$4 sm:$0xff]   ;;  %v8424_v30 = vld [vmem:[%s11646_s2 + $0x180] ss:$16 sps:$4 sm:$0xff]  }
 0xfe7   :  { %6203 = vmatprep.subr.bf16.mxu0 %v8354_v54  ;;  %6285 = vmatprep.subr.bf16.mxu1 %v8357_v34  ;;  %v8435_v54 = vld [vmem:[%s11646_s2 + $0x1ac] ss:$16 sps:$4 sm:$0xff]   ;;  %v8433_v34 = vld [vmem:[%s11646_s2 + $0x1a8] ss:$16 sps:$4 sm:$0xff]  }
 0xfe9   :  { %5365 = vmatmul.mubr.bf16.vlgmr.msra.gmra.mrb[64].mxu0 %v5170_v28  ;;  %5406 = vmatmul.mubr.bf16.vlgmr.msra.gmra.mrb[56].mxu1 %v5170_v28  ;;  %v8427_v28 = vld [vmem:[%s11646_s2 + $0x188] ss:$16 sps:$4 sm:$0xff]  }
 0xfea   :  { %6204 = vmatpush1.bf16.msra.mxu0 %v8352_v55  ;;  %6286 = vmatpush1.bf16.msra.mxu1 %v8355_v49  ;;  %v8432_v55 = vld [vmem:[%s11646_s2 + $0x1a4] ss:$16 sps:$4 sm:$0xff]   ;;  %v8430_v49 = vld [vmem:[%s11646_s2 + $0x1a0] ss:$16 sps:$4 sm:$0xff]  }
 0xfeb   :  { %6205 = vmatprep.subr.bf16.mxu0 %v8360_v6  ;;  %6287 = vmatprep.subr.bf16.mxu1 %v8363_v14  ;;  %v8441_v6 = vld [vmem:[%s11646_s2 + $0x1cc] ss:$16 sps:$4 sm:$0xff]   ;;  %v8439_v14 = vld [vmem:[%s11646_s2 + $0x1c8] ss:$16 sps:$4 sm:$0xff]  }
 0xfee   :  { %6206 = vmatpush1.bf16.msra.mxu0 %v8358_v15  ;;  %6288 = vmatpush1.bf16.msra.mxu1 %v8361_v2  ;;  %v8438_v15 = vld [vmem:[%s11646_s2 + $0x1c4] ss:$16 sps:$4 sm:$0xff]   ;;  %v8436_v2 = vld [vmem:[%s11646_s2 + $0x1c0] ss:$16 sps:$4 sm:$0xff]  }
 0xfef   :  { %6207 = vmatprep.subr.bf16.mxu0 %v8366_v26  ;;  %6289 = vmatprep.subr.bf16.mxu1 %v8369_v58  ;;  %v8442_v26 = vld [vmem:[%s11646_s2 + $0x1e0] ss:$16 sps:$4 sm:$0xff]   ;;  %v8445_v58 = vld [vmem:[%s11646_s2 + $0x1e8] ss:$16 sps:$4 sm:$0xff]  }
 0xff2   :  { %6208 = vmatpush1.bf16.msra.mxu0 %v8364_v37  ;;  %6290 = vmatpush1.bf16.msra.mxu1 %v8367_v44  ;;  %v8444_v37 = vld [vmem:[%s11646_s2 + $0x1e4] ss:$16 sps:$4 sm:$0xff]   ;;  %v8447_v44 = vld [vmem:[%s11646_s2 + $0x1ec] ss:$16 sps:$4 sm:$0xff]  }
 0xff3   :  { %6209 = vmatprep.subr.bf16.mxu0 %v8372_v38  ;;  %6291 = vmatprep.subr.bf16.mxu1 %v8375_v17  ;;  %v8450_v38 = vld [vmem:[%s11646_s2 + $0x204] ss:$16 sps:$4 sm:$0xff]   ;;  %v8453_v17 = vld [vmem:[%s11646_s2 + $0x20c] ss:$16 sps:$4 sm:$0xff]  }
 0xff6   :  { %6210 = vmatpush1.bf16.msra.mxu0 %v8370_v45  ;;  %6292 = vmatpush1.bf16.msra.mxu1 %v8373_v52 }
 0xff7   :  { %6211 = vmatprep.subr.bf16.mxu0 %v8378_v27  ;;  %6293 = vmatprep.subr.bf16.mxu1 %v8381_v1 }
 0xffa   :  { %6212 = vmatpush1.bf16.msra.mxu0 %v8376_v41  ;;  %6294 = vmatpush1.bf16.msra.mxu1 %v8379_v31 }
 0xffb   :  { %6213 = vmatprep.subr.bf16.mxu0 %v8384_v40  ;;  %6295 = vmatprep.subr.bf16.mxu1 %v8387_v46 }
 0xffe   :  { %6214 = vmatpush1.bf16.msra.mxu0 %v8382_v50  ;;  %6296 = vmatpush1.bf16.msra.mxu1 %v8385_v12 }
 0xfff   :  { %6215 = vmatprep.subr.bf16.mxu0 %v8390_v29  ;;  %6297 = vmatprep.subr.bf16.mxu1 %v8393_v0 }
0x1002   :  { %6216 = vmatpush1.bf16.msra.mxu0 %v8388_v8  ;;  %6298 = vmatpush1.bf16.msra.mxu1 %v8391_v56 }
0x1003   :  { %6217 = vmatprep.subr.bf16.mxu0 %v8396_v32  ;;  %6299 = vmatprep.subr.bf16.mxu1 %v8399_v39 }
0x1006   :  { %6218 = vmatpush1.bf16.msra.mxu0 %v8394_v10  ;;  %6300 = vmatpush1.bf16.msra.mxu1 %v8397_v3 }
0x1007   :  { %6219 = vmatprep.subr.bf16.mxu0 %v8402_v51  ;;  %6301 = vmatprep.subr.bf16.mxu1 %v8405_v47 }
0x100a   :  { %6220 = vmatpush1.bf16.msra.mxu0 %v8400_v60  ;;  %6302 = vmatpush1.bf16.msra.mxu1 %v8403_v4 }
0x100b   :  { %6221 = vmatprep.subr.bf16.mxu0 %v8408_v62  ;;  %6303 = vmatprep.subr.bf16.mxu1 %v8411_v16 }
0x100e   :  { %6222 = vmatpush1.bf16.msra.mxu0 %v8406_v13  ;;  %6304 = vmatpush1.bf16.msra.mxu1 %v8409_v48 }
0x100f   :  { %6223 = vmatprep.subr.bf16.mxu0 %v8414_v9  ;;  %6305 = vmatprep.subr.bf16.mxu1 %v8417_v63 }
0x1012   :  { %6224 = vmatpush1.bf16.msra.mxu0 %v8412_v33  ;;  %6306 = vmatpush1.bf16.msra.mxu1 %v8415_v57 }
0x1013   :  { %6225 = vmatprep.subr.bf16.mxu0 %v8420_v19  ;;  %6307 = vmatprep.subr.bf16.mxu1 %v8423_v53 }
0x1016   :  { %6226 = vmatpush1.bf16.msra.mxu0 %v8418_v21  ;;  %6308 = vmatpush1.bf16.msra.mxu1 %v8421_v42  ;;  %v11180_v21 = vpop.permute.xlu0 %5420 }
0x1017   :  { %6227 = vmatprep.subr.bf16.mxu0 %v8426_v20  ;;  %6309 = vmatprep.subr.bf16.mxu1 %v8429_v18 }
0x101a   :  { %6228 = vmatpush1.bf16.msra.mxu0 %v8424_v30  ;;  %6310 = vmatpush1.bf16.msra.mxu1 %v8427_v28 }
0x101b   :  { %6229 = vmatprep.subr.bf16.mxu0 %v8432_v55  ;;  %6311 = vmatprep.subr.bf16.mxu1 %v8435_v54 }
0x101e   :  { %6230 = vmatpush1.bf16.msra.mxu0 %v8430_v49  ;;  %6312 = vmatpush1.bf16.msra.mxu1 %v8433_v34 }
0x101f   :  { %6231 = vmatprep.subr.bf16.mxu0 %v8438_v15  ;;  %6313 = vmatprep.subr.bf16.mxu1 %v8441_v6 }
0x1022   :  { %6232 = vmatpush1.bf16.msra.mxu0 %v8436_v2  ;;  %6314 = vmatpush1.bf16.msra.mxu1 %v8439_v14 }
0x1023   :  { %6233 = vmatprep.subr.bf16.mxu0 %v8444_v37  ;;  %6315 = vmatprep.subr.bf16.mxu1 %v8447_v44 }
0x1026   :  { %6234 = vmatpush1.bf16.msra.mxu0 %v8442_v26  ;;  %6316 = vmatpush1.bf16.msra.mxu1 %v8445_v58 }
0x1027   :  { %6244 = vmatprep.subr.bf16.mxu0 %v8450_v38  ;;  %6326 = vmatprep.subr.bf16.mxu1 %v8453_v17 }
0x105c   :  { %v4566_v45 = vpop.f32.mrb[52].mxu0  ;;  %v4607_v52 = vpop.f32.mrb[44].mxu1 }
0x105d   :  { %v4568_v27 = vpop.f32.mrb[53].mxu0  ;;  %v4609_v41 = vpop.f32.mrb[45].mxu1 }
0x105e   :  { %v4570_v1 = vpop.f32.mrb[54].mxu0  ;;  %v4611_v31 = vpop.f32.mrb[46].mxu1 }
0x105f   :  { %v4571_v40 = vpop.f32.mrb[55].mxu0  ;;  %v4612_v46 = vpop.f32.mrb[47].mxu1  ;;  %v8459_v1 = vld [vmem:[%s11646_s2 + $0x22c] ss:$16 sps:$4 sm:$0xff]  }
0x1060   :  { %v8454_v40 = vld [vmem:[%s11646_s2 + $0x220] ss:$16 sps:$4 sm:$0xff]   ;;  %v8457_v46 = vld [vmem:[%s11646_s2 + $0x228] ss:$16 sps:$4 sm:$0xff]  }
0x107c   :  { %v4808_v50 = vpop.f32.mrb[56].mxu0  ;;  %v4849_v12 = vpop.f32.mrb[48].mxu1 }
0x107d   :  { %v4809_v8 = vadd.f32 %v4808_v50, %v4566_v45  ;;  %v4850_v29 = vadd.f32 %v4849_v12, %v4607_v52  ;;  %v4810_v56 = vpop.f32.mrb[57].mxu0  ;;  %v4851_v0 = vpop.f32.mrb[49].mxu1  ;;  %v8448_v45 = vld [vmem:[%s11646_s2 + $0x200] ss:$16 sps:$4 sm:$0xff]   ;;  %v8451_v52 = vld [vmem:[%s11646_s2 + $0x208] ss:$16 sps:$4 sm:$0xff]  }
0x107e   :  { %v4811_v32 = vadd.f32 %v4810_v56, %v4568_v27  ;;  %v4852_v39 = vadd.f32 %v4851_v0, %v4609_v41  ;;  %v4812_v10 = vpop.f32.mrb[58].mxu0  ;;  %v4853_v3 = vpop.f32.mrb[50].mxu1  ;;  %v8456_v41 = vld [vmem:[%s11646_s2 + $0x224] ss:$16 sps:$4 sm:$0xff]   ;;  %v8465_v12 = vld [vmem:[%s11646_s2 + $0x24c] ss:$16 sps:$4 sm:$0xff]  }
0x107f   :  { %v4813_v51 = vpop.f32.mrb[59].mxu0  ;;  %v4854_v47 = vpop.f32.mrb[51].mxu1  ;;  %v8462_v50 = vld [vmem:[%s11646_s2 + $0x244] ss:$16 sps:$4 sm:$0xff]   ;;  %v8471_v0 = vld [vmem:[%s11646_s2 + $0x26c] ss:$16 sps:$4 sm:$0xff]  }
0x1080   :  { %v8468_v56 = vld [vmem:[%s11646_s2 + $0x264] ss:$16 sps:$4 sm:$0xff]   ;;  %v8477_v3 = vld [vmem:[%s11646_s2 + $0x28c] ss:$16 sps:$4 sm:$0xff]   ;;  %v8472_v51 = vld [vmem:[%s11646_s2 + $0x280] ss:$16 sps:$4 sm:$0xff]  }
0x1081   :  { %v8474_v10 = vld [vmem:[%s11646_s2 + $0x284] ss:$16 sps:$4 sm:$0xff]   ;;  %v8475_v47 = vld [vmem:[%s11646_s2 + $0x288] ss:$16 sps:$4 sm:$0xff]  }
0x109c   :  { %v5085_v60 = vpop.f32.mrb[60].mxu0  ;;  %v5126_v4 = vpop.f32.mrb[52].mxu1 }
0x109d   :  { %v5133_v62 = vadd.f32 %v5085_v60, %v4809_v8  ;;  %v5135_v13 = vadd.f32 %v5126_v4, %v4850_v29  ;;  %v5087_v16 = vpop.f32.mrb[61].mxu0  ;;  %v5128_v48 = vpop.f32.mrb[53].mxu1  ;;  %v8460_v8 = vld [vmem:[%s11646_s2 + $0x240] ss:$16 sps:$4 sm:$0xff]   ;;  %v8463_v29 = vld [vmem:[%s11646_s2 + $0x248] ss:$16 sps:$4 sm:$0xff]  }
0x109e   :  { %v5134_v9 = vadd.f32 %v5087_v16, %v4811_v32  ;;  %v5136_v63 = vadd.f32 %v5128_v48, %v4852_v39  ;;  %v5089_v33 = vpop.f32.mrb[62].mxu0  ;;  %v5130_v57 = vpop.f32.mrb[54].mxu1  ;;  %v8466_v32 = vld [vmem:[%s11646_s2 + $0x260] ss:$16 sps:$4 sm:$0xff]   ;;  %v8469_v39 = vld [vmem:[%s11646_s2 + $0x268] ss:$16 sps:$4 sm:$0xff]  }
0x109f   :  { %v5090_v19 = vpop.f32.mrb[63].mxu0  ;;  %v5131_v53 = vpop.f32.mrb[55].mxu1  ;;  %v8480_v60 = vld [vmem:[%s11646_s2 + $0x2a4] ss:$16 sps:$4 sm:$0xff]   ;;  %v8483_v4 = vld [vmem:[%s11646_s2 + $0x2ac] ss:$16 sps:$4 sm:$0xff]  }
0x10a0   :  { %v8486_v16 = vld [vmem:[%s11646_s2 + $0x2c4] ss:$16 sps:$4 sm:$0xff]   ;;  %v8489_v48 = vld [vmem:[%s11646_s2 + $0x2cc] ss:$16 sps:$4 sm:$0xff]   ;;  %v8490_v19 = vld [vmem:[%s11646_s2 + $0x2e0] ss:$16 sps:$4 sm:$0xff]  }
0x10a1   :  { %v8492_v33 = vld [vmem:[%s11646_s2 + $0x2e4] ss:$16 sps:$4 sm:$0xff]   ;;  %v8495_v57 = vld [vmem:[%s11646_s2 + $0x2ec] ss:$16 sps:$4 sm:$0xff]   ;;  %v8493_v53 = vld [vmem:[%s11646_s2 + $0x2e8] ss:$16 sps:$4 sm:$0xff]  }
0x10bc   :  { %v5366_v42 = vpop.f32.mrb[64].mxu0  ;;  %v5407_v20 = vpop.f32.mrb[56].mxu1 }
0x10bd   :  { %v5414_v18 = vadd.f32 %v5366_v42, %v5133_v62  ;;  %v11182_v30 = vadd.f32 %v5407_v20, %v5135_v13  ;;  %v5368_v28 = vpop.f32.mrb[65].mxu0  ;;  %v5409_v55 = vpop.f32.mrb[57].mxu1  ;;  %v8478_v62 = vld [vmem:[%s11646_s2 + $0x2a0] ss:$16 sps:$4 sm:$0xff]   ;;  %v8481_v13 = vld [vmem:[%s11646_s2 + $0x2a8] ss:$16 sps:$4 sm:$0xff]  }
0x10be   :  { %v5415_v54 = vadd.f32 %v5368_v28, %v5134_v9  ;;  %v5417_v49 = vadd.f32 %v5409_v55, %v5136_v63  ;;  %v5370_v34 = vpop.f32.mrb[66].mxu0  ;;  %v5411_v15 = vpop.f32.mrb[58].mxu1  ;;  %v8484_v9 = vld [vmem:[%s11646_s2 + $0x2c0] ss:$16 sps:$4 sm:$0xff]   ;;  %v8487_v63 = vld [vmem:[%s11646_s2 + $0x2c8] ss:$16 sps:$4 sm:$0xff]  }
0x10bf   :  { %v11185_v6 = vadd.f32 %v11180_v21, %v5414_v18  ;;  %v5371_v2 = vpop.f32.mrb[67].mxu0  ;;  %v5412_v14 = vpop.f32.mrb[59].mxu1  ;;  %v8498_v42 = vld [vmem:[%s11646_s2 + $0x304] ss:$16 sps:$4 sm:$0xff]   ;;  %v8501_v20 = vld [vmem:[%s11646_s2 + $0x30c] ss:$16 sps:$4 sm:$0xff]  }
0x10c0   :  { %v11188_v26 = vadd.f32 %v11180_v21, %v5415_v54  ;;  %v11191_v37 = vadd.f32 %v11180_v21, %v5417_v49  ;;  %v8496_v18 = vld [vmem:[%s11646_s2 + $0x300] ss:$16 sps:$4 sm:$0xff]   ;;  %v8499_v28 = vld [vmem:[%s11646_s2 + $0x308] ss:$16 sps:$4 sm:$0xff]   ;;  %v8504_v55 = vld [vmem:[%s11646_s2 + $0x324] ss:$16 sps:$4 sm:$0xff]  }
0x10c1   :  { %v5555_v58 = vmul.f32 %v11185_v6, %v11185_v6  ;;  %v8507_v54 = vld [vmem:[%s11646_s2 + $0x32c] ss:$16 sps:$4 sm:$0xff]   ;;  %v8502_v49 = vld [vmem:[%s11646_s2 + $0x320] ss:$16 sps:$4 sm:$0xff]   ;;  %v8505_v34 = vld [vmem:[%s11646_s2 + $0x328] ss:$16 sps:$4 sm:$0xff]  }
0x10c2   :  { %v5556_v44 = vmul.f32 %v11188_v26, %v11188_v26  ;;  %v5558_v38 = vmul.f32 %v11191_v37, %v11191_v37  ;;  %v8510_v15 = vld [vmem:[%s11646_s2 + $0x344] ss:$16 sps:$4 sm:$0xff]   ;;  %v8513_v2 = vld [vmem:[%s11646_s2 + $0x34c] ss:$16 sps:$4 sm:$0xff]   ;;  %v8508_v14 = vld [vmem:[%s11646_s2 + $0x340] ss:$16 sps:$4 sm:$0xff]  }
0x10c3   :  { %v5559_v27 = vpack.c.bf16 %v5555_v58, %v5555_v58  ;;  %v8511_v58 = vld [vmem:[%s11646_s2 + $0x348] ss:$16 sps:$4 sm:$0xff]  }
0x10c4   :  { %v5560_v17 = vpack.c.bf16 %v5556_v44, %v5556_v44  ;;  %v5562_v31 = vpack.c.bf16 %v5558_v38, %v5558_v38  ;;  %v8516_v44 = vld [vmem:[%s11646_s2 + $0x364] ss:$16 sps:$4 sm:$0xff]   ;;  %v8519_v38 = vld [vmem:[%s11646_s2 + $0x36c] ss:$16 sps:$4 sm:$0xff]  }
0x10c6   :  { %6235 = vmatprep.mubr.bf16.mxu0 %v5560_v17  ;;  %6317 = vmatprep.mubr.bf16.mxu1 %v5560_v17  ;;  %v8514_v17 = vld [vmem:[%s11646_s2 + $0x360] ss:$16 sps:$4 sm:$0xff]  }
0x10c7   :  { %6236 = vmatmul.mubr.bf16.vlgmr.msra.gmra.mrb[68].mxu0 %v5559_v27  ;;  %6318 = vmatmul.mubr.bf16.vlgmr.msra.gmra.mrb[60].mxu1 %v5559_v27  ;;  %v8525_v27 = vld [vmem:[%s11646_s2 + $0x38c] ss:$16 sps:$4 sm:$0xff]  }
0x10c8   :  { %6245 = vmatpush1.bf16.msra.mxu0 %v8448_v45  ;;  %6327 = vmatpush1.bf16.msra.mxu1 %v8451_v52  ;;  %v8517_v45 = vld [vmem:[%s11646_s2 + $0x368] ss:$16 sps:$4 sm:$0xff]   ;;  %v8522_v52 = vld [vmem:[%s11646_s2 + $0x384] ss:$16 sps:$4 sm:$0xff]  }
0x10c9   :  { %6276 = vmatprep.mubr.bf16.mxu0 %v5562_v31  ;;  %6358 = vmatprep.mubr.bf16.mxu1 %v5562_v31  ;;  %v8528_v31 = vld [vmem:[%s11646_s2 + $0x3a4] ss:$16 sps:$4 sm:$0xff]  }
0x10ca   :  { %6246 = vmatprep.subr.bf16.mxu0 %v8456_v41  ;;  %6328 = vmatprep.subr.bf16.mxu1 %v8459_v1  ;;  %v8520_v41 = vld [vmem:[%s11646_s2 + $0x380] ss:$16 sps:$4 sm:$0xff]   ;;  %v8523_v1 = vld [vmem:[%s11646_s2 + $0x388] ss:$16 sps:$4 sm:$0xff]  }
0x10cc   :  { %6247 = vmatpush1.bf16.msra.mxu0 %v8454_v40  ;;  %6329 = vmatpush1.bf16.msra.mxu1 %v8457_v46  ;;  %v8531_v40 = vld [vmem:[%s11646_s2 + $0x3ac] ss:$16 sps:$4 sm:$0xff]   ;;  %v8526_v46 = vld [vmem:[%s11646_s2 + $0x3a0] ss:$16 sps:$4 sm:$0xff]  }
0x10cd   :  { %6248 = vmatprep.subr.bf16.mxu0 %v8462_v50  ;;  %6330 = vmatprep.subr.bf16.mxu1 %v8465_v12  ;;  %v8529_v50 = vld [vmem:[%s11646_s2 + $0x3a8] ss:$16 sps:$4 sm:$0xff]   ;;  %v8534_v12 = vld [vmem:[%s11646_s2 + $0x3c4] ss:$16 sps:$4 sm:$0xff]  }
0x10d0   :  { %6249 = vmatpush1.bf16.msra.mxu0 %v8460_v8  ;;  %6331 = vmatpush1.bf16.msra.mxu1 %v8463_v29  ;;  %v8537_v8 = vld [vmem:[%s11646_s2 + $0x3cc] ss:$16 sps:$4 sm:$0xff]   ;;  %v8532_v29 = vld [vmem:[%s11646_s2 + $0x3c0] ss:$16 sps:$4 sm:$0xff]  }
0x10d1   :  { %6250 = vmatprep.subr.bf16.mxu0 %v8468_v56  ;;  %6332 = vmatprep.subr.bf16.mxu1 %v8471_v0  ;;  %v8535_v56 = vld [vmem:[%s11646_s2 + $0x3c8] ss:$16 sps:$4 sm:$0xff]   ;;  %v11375_v0 = vadd.f32 %v11180_v21, %v11182_v30 }
0x10d2   :  { %v8541_v21 = vld [vmem:[%s11646_s2 + $0x3e8] ss:$16 sps:$4 sm:$0xff]  }
0x10d3   :  { %v5557_v30 = vmul.f32 %v11375_v0, %v11375_v0 }
0x10d4   :  { %6251 = vmatpush1.bf16.msra.mxu0 %v8466_v32  ;;  %6333 = vmatpush1.bf16.msra.mxu1 %v8469_v39  ;;  %v8540_v32 = vld [vmem:[%s11646_s2 + $0x3e4] ss:$16 sps:$4 sm:$0xff]   ;;  %v8543_v39 = vld [vmem:[%s11646_s2 + $0x3ec] ss:$16 sps:$4 sm:$0xff]  }
0x10d5   :  { %6252 = vmatprep.subr.bf16.mxu0 %v8474_v10  ;;  %6334 = vmatprep.subr.bf16.mxu1 %v8477_v3  ;;  %v8538_v10 = vld [vmem:[%s11646_s2 + $0x3e0] ss:$16 sps:$4 sm:$0xff]   ;;  %v5561_v3 = vpack.c.bf16 %v5557_v30, %v5557_v30  ;;  %s11737_s2 = smov 113  }
0x10d8   :  { %6253 = vmatpush1.bf16.msra.mxu0 %v8472_v51  ;;  %6335 = vmatpush1.bf16.msra.mxu1 %v8475_v47 }
0x10d9   :  { %6254 = vmatprep.subr.bf16.mxu0 %v8480_v60  ;;  %6336 = vmatprep.subr.bf16.mxu1 %v8483_v4 }
0x10dc   :  { %6255 = vmatpush1.bf16.msra.mxu0 %v8478_v62  ;;  %6337 = vmatpush1.bf16.msra.mxu1 %v8481_v13 }
0x10dd   :  { %6256 = vmatprep.subr.bf16.mxu0 %v8486_v16  ;;  %6338 = vmatprep.subr.bf16.mxu1 %v8489_v48 }
0x10e0   :  { %6257 = vmatpush1.bf16.msra.mxu0 %v8484_v9  ;;  %6339 = vmatpush1.bf16.msra.mxu1 %v8487_v63 }
0x10e1   :  { %6258 = vmatprep.subr.bf16.mxu0 %v8492_v33  ;;  %6340 = vmatprep.subr.bf16.mxu1 %v8495_v57 }
0x10e4   :  { %6259 = vmatpush1.bf16.msra.mxu0 %v8490_v19  ;;  %6341 = vmatpush1.bf16.msra.mxu1 %v8493_v53 }
0x10e5   :  { %6260 = vmatprep.subr.bf16.mxu0 %v8498_v42  ;;  %6342 = vmatprep.subr.bf16.mxu1 %v8501_v20 }
0x10e8   :  { %6261 = vmatpush1.bf16.msra.mxu0 %v8496_v18  ;;  %6343 = vmatpush1.bf16.msra.mxu1 %v8499_v28 }
0x10e9   :  { %6262 = vmatprep.subr.bf16.mxu0 %v8504_v55  ;;  %6344 = vmatprep.subr.bf16.mxu1 %v8507_v54 }
0x10ec   :  { %6263 = vmatpush1.bf16.msra.mxu0 %v8502_v49  ;;  %6345 = vmatpush1.bf16.msra.mxu1 %v8505_v34 }
0x10ed   :  { %6264 = vmatprep.subr.bf16.mxu0 %v8510_v15  ;;  %6346 = vmatprep.subr.bf16.mxu1 %v8513_v2 }
0x10f0   :  { %6265 = vmatpush1.bf16.msra.mxu0 %v8508_v14  ;;  %6347 = vmatpush1.bf16.msra.mxu1 %v8511_v58 }
0x10f1   :  { %6266 = vmatprep.subr.bf16.mxu0 %v8516_v44  ;;  %6348 = vmatprep.subr.bf16.mxu1 %v8519_v38 }
0x10f4   :  { %6267 = vmatpush1.bf16.msra.mxu0 %v8514_v17  ;;  %6349 = vmatpush1.bf16.msra.mxu1 %v8517_v45 }
0x10f5   :  { %6268 = vmatprep.subr.bf16.mxu0 %v8522_v52  ;;  %6350 = vmatprep.subr.bf16.mxu1 %v8525_v27 }
0x10f8   :  { %6269 = vmatpush1.bf16.msra.mxu0 %v8520_v41  ;;  %6351 = vmatpush1.bf16.msra.mxu1 %v8523_v1 }
0x10f9   :  { %6270 = vmatprep.subr.bf16.mxu0 %v8528_v31  ;;  %6352 = vmatprep.subr.bf16.mxu1 %v8531_v40 }
0x10fc   :  { %6271 = vmatpush1.bf16.msra.mxu0 %v8526_v46  ;;  %6353 = vmatpush1.bf16.msra.mxu1 %v8529_v50  ;;  %v6402_v46 = vpop.permute.xlu1 %6401 }
0x10fd   :  { %6272 = vmatprep.subr.bf16.mxu0 %v8534_v12  ;;  %6354 = vmatprep.subr.bf16.mxu1 %v8537_v8  ;;  %v6404_v50 = vmul.f32 %v6402_v46, %v11185_v6  ;;  %v6406_v8 = vmul.f32 %v6402_v46, %v11375_v0  ;;  %v56_v6 = vld [vmem:[%s11639_s9 + $0x38] sm:$0xf] }
0x1100   :  { %6273 = vmatpush1.bf16.msra.mxu0 %v8532_v29  ;;  %6355 = vmatpush1.bf16.msra.mxu1 %v8535_v56  ;;  %v6405_v56 = vmul.f32 %v6402_v46, %v11188_v26 }
0x1101   :  { %6274 = vmatprep.subr.bf16.mxu0 %v8540_v32  ;;  %6356 = vmatprep.subr.bf16.mxu1 %v8543_v39 }
0x1104   :  { %6275 = vmatpush1.bf16.msra.mxu0 %v8538_v10  ;;  %6357 = vmatpush1.bf16.msra.mxu1 %v8541_v21  ;;  %v6407_v10 = vmul.f32 %v6402_v46, %v11191_v37 }
0x1107   :  { %6277 = vmatmul.mubr.bf16.vlgmr.msra.gmra.mrb[68].mxu0 %v5561_v3  ;;  %6359 = vmatmul.mubr.bf16.vlgmr.msra.gmra.mrb[60].mxu1 %v5561_v3 }
0x1108   :  { %6765 = vmatprep.mubr.bf16.mxu0 %v11720_v35 }
0x11da   :  { %v6278_v51 = vpop.f32.mrb[68].mxu0  ;;  %v6360_v47 = vpop.f32.mrb[60].mxu1 }
0x11db   :  { %8616 = vrsqrt.f32 %v6278_v51  ;;  %v6280_v60 = vpop.f32.mrb[69].mxu0  ;;  %v6362_v4 = vpop.f32.mrb[61].mxu1  ;;  %vm6369_vm13 = vcmp.eq.f32.partialorder %v6278_v51, inf  ;;  %vm6371_vm14 = vcmp.eq.f32.partialorder %v6278_v51, 0.0  ;;  %v6372_v57 = vand.u32 2147483648, %v6278_v51 }
0x11dc   :  { %8618 = vrsqrt.f32 %v6360_v47  ;;  %v6282_v62 = vpop.f32.mrb[70].mxu0  ;;  %v6364_v13 = vpop.f32.mrb[62].mxu1  ;;  %vm6383_vm15 = vcmp.eq.f32.partialorder %v6360_v47, inf  ;;  %vm6385_vm8 = vcmp.eq.f32.partialorder %v6360_v47, 0.0  ;;  %v6386_v42 = vand.u32 2147483648, %v6360_v47 }
0x11dd   :  { %8620 = vrsqrt.f32 %v6280_v60  ;;  %v6283_v16 = vpop.f32.mrb[71].mxu0  ;;  %v6365_v48 = vpop.f32.mrb[63].mxu1  ;;  %vm6376_vm11 = vcmp.eq.f32.partialorder %v6280_v60, inf  ;;  %vm6378_vm12 = vcmp.eq.f32.partialorder %v6280_v60, 0.0  ;;  %v6379_v55 = vand.u32 2147483648, %v6280_v60 }
0x11de   :  { %8622 = vrsqrt.f32 %v6362_v4  ;;  %vm6390_vm6 = vcmp.eq.f32.partialorder %v6362_v4, inf  ;;  %v6393_v58 = vand.u32 2147483648, %v6362_v4  ;;  %vm6392_vm10 = vcmp.eq.f32.partialorder %v6362_v4, 0.0 }
0x11e5   :  { %v8617_v9 = vpop.eup %8616 }
0x11e6   :  { %v8619_v63 = vpop.eup %8618  ;;  %v6368_v33 = vmul.f32 %v8617_v9, %v6278_v51 }
0x11e7   :  { %v8621_v19 = vpop.eup %8620  ;;  %v6382_v53 = vmul.f32 %v8619_v63, %v6360_v47 }
0x11e8   :  { %v8623_v20 = vpop.eup %8622  ;;  %v6370_v18 = vsel %vm6369_vm13, %v6278_v51, %v6368_v33  ;;  %v6375_v28 = vmul.f32 %v8621_v19, %v6280_v60 }
0x11e9   :  { %v6373_v54 = vsel %vm6371_vm14, %v6372_v57, %v6370_v18  ;;  %v6384_v49 = vsel %vm6383_vm15, %v6360_v47, %v6382_v53  ;;  %v6389_v34 = vmul.f32 %v8623_v20, %v6362_v4  ;;  %vm11764_vm15 = vcmp.lt.s32.totalorder %v8825_v11, 111 }
0x11ea   :  { %v6395_v15 = vmul.f32 0.25, %v6373_v54  ;;  %v6387_v2 = vsel %vm6385_vm8, %v6386_v42, %v6384_v49  ;;  %v6377_v14 = vsel %vm6376_vm11, %v6280_v60, %v6375_v28  ;;  %vm11765_vm8 = vmmov %vm11764_vm15  ;;  %vm11766_vm11 = vcmask 1043456  }
0x11eb   :  { %v6397_v44 = vmul.f32 0.25, %v6387_v2  ;;  %v6380_v38 = vsel %vm6378_vm12, %v6379_v55, %v6377_v14  ;;  %v6391_v17 = vsel %vm6390_vm6, %v6362_v4, %v6389_v34  ;;  %vm11768_vm12 = vcmask 1045504  }
0x11ec   :  { %v6408_v45 = vadd.f32 1e-08, %v6395_v15  ;;  %v6396_v52 = vmul.f32 0.25, %v6380_v38  ;;  %v6394_v27 = vsel %vm6392_vm10, %v6393_v58, %v6391_v17  ;;  %vm11769_vm6 = vmmov %vm11768_vm12 }
0x11ed   :  { %v6410_v41 = vadd.f32 1e-08, %v6397_v44  ;;  %v6398_v1 = vmul.f32 0.25, %v6394_v27  ;;  %vm11772_vm10 = vmmov %vm11765_vm8 }
0x11ee   :  { %8624 = vrcp.f32 %v6408_v45  ;;  %v6409_v31 = vadd.f32 1e-08, %v6396_v52 }
0x11ef   :  { %8626 = vrcp.f32 %v6410_v41  ;;  %v6411_v40 = vadd.f32 1e-08, %v6398_v1 }
0x11f0   :  { %8628 = vrcp.f32 %v6409_v31 }
0x11f1   :  { %8630 = vrcp.f32 %v6411_v40 }
0x11f8   :  { %v8625_v12 = vpop.eup %8624 }
0x11f9   :  { %v8627_v29 = vpop.eup %8626  ;;  %v6416_v32 = vmul.f32 %v8625_v12, %v6404_v50 }
0x11fa   :  { %v8629_v39 = vpop.eup %8628  ;;  %v6418_v21 = vmul.f32 %v8627_v29, %v6406_v8 }
0x11fb   :  { %v8631_v30 = vpop.eup %8630  ;;  %v6417_v3 = vmul.f32 %v8629_v39, %v6405_v56  ;;  %6460 = vrot.lane.b32.xlu1 %v6416_v32, %s8663_s22  ;;  %6440 = vrot.lane.b32.xlu0 %v6416_v32, %s8662_s21  ;;  %v6500_v19 = vmul.f32 %v6416_v32, %v8978_v59  ;;  %v11740_v56 = vld [vmem:[#allocation4_spill] sm:$0xff]  ;;  %v11741_v39 = vld [vmem:[#allocation6_spill] sm:$0xff] }
0x11fc   :  { %v6419_v51 = vmul.f32 %v8631_v30, %v6407_v10  ;;  %v6502_v42 = vmul.f32 %v6418_v21, %v8988_v7 }
0x11fd   :  { %v6501_v53 = vmul.f32 %v6417_v3, %v8984_v5  ;;  %v6504_v34 = vpack.c.bf16 %v6500_v19, %v6500_v19 }
0x11fe   :  { %v6503_v28 = vmul.f32 %v6419_v51, %v8998_v61  ;;  %v6506_v59 = vpack.c.bf16 %v6502_v42, %v6502_v42 }
0x11ff   :  { %6420 = vrot.lane.b32.xlu1 %v6416_v32, %s8664_s0  ;;  %6480 = vrot.lane.b32.xlu0 %v6416_v32, %s8665_s23  ;;  %v6505_v15 = vpack.c.bf16 %v6501_v53, %v6501_v53  ;;  %v11471_v45 = vrot.slane %v6504_v34, 4  ;;  %v11743_v53 = vld [vmem:[#allocation3_spill] sm:$0xff] }
0x1200   :  { %v6507_v58 = vpack.c.bf16 %v6503_v28, %v6503_v28  ;;  %v11477_v1 = vrot.slane %v6506_v59, 4 }
0x1201   :  { %v11475_v41 = vrot.slane %v6505_v15, 4 }
0x1202   :  { %v11479_v12 = vrot.slane %v6507_v58, 4 }
0x1203   :  { %6512 = vrot.lane.b32.xlu1 %v6418_v21, %s8666_s24  ;;  %6508 = vrot.lane.b32.xlu0 %v6416_v32, %s8666_s24 }
0x1207   :  { %6528 = vrot.lane.b32.xlu1 %v6416_v32, %s11737_s2  ;;  %6532 = vrot.lane.b32.xlu0 %v6418_v21, %s11737_s2 }
0x120b   :  { %6552 = vrot.lane.b32.xlu1 %v6418_v21, %s11738_s3  ;;  %6548 = vrot.lane.b32.xlu0 %v6416_v32, %s11738_s3 }
0x120f   :  { %6444 = vrot.lane.b32.xlu1 %v6418_v21, %s8662_s21  ;;  %6464 = vrot.lane.b32.xlu0 %v6418_v21, %s8663_s22 }
0x1213   :  { %6424 = vrot.lane.b32.xlu1 %v6418_v21, %s8664_s0  ;;  %6484 = vrot.lane.b32.xlu0 %v6418_v21, %s8665_s23 }
0x1217   :  { %6568 = vrot.lane.b32.xlu1 %v6416_v32, %s11739_s14  ;;  %6446 = vrot.lane.b32.xlu0 %v6419_v51, %s8662_s21 }
0x121b   :  { %6462 = vrot.lane.b32.xlu0 %v6417_v3, %s8663_s22  ;;  %6442 = vrot.lane.b32.xlu1 %v6417_v3, %s8662_s21 }
0x121f   :  { %6422 = vrot.lane.b32.xlu0 %v6417_v3, %s8664_s0  ;;  %6466 = vrot.lane.b32.xlu1 %v6419_v51, %s8663_s22 }
0x1223   :  { %6426 = vrot.lane.b32.xlu0 %v6419_v51, %s8664_s0  ;;  %6482 = vrot.lane.b32.xlu1 %v6417_v3, %s8665_s23 }
0x1227   :  { %6510 = vrot.lane.b32.xlu0 %v6417_v3, %s8666_s24  ;;  %6486 = vrot.lane.b32.xlu1 %v6419_v51, %s8665_s23 }
0x122b   :  { %6550 = vrot.lane.b32.xlu0 %v6417_v3, %s11738_s3  ;;  %6530 = vrot.lane.b32.xlu1 %v6417_v3, %s11737_s2 }
0x122f   :  { %6534 = vrot.lane.b32.xlu0 %v6419_v51, %s11737_s2  ;;  %6514 = vrot.lane.b32.xlu1 %v6419_v51, %s8666_s24 }
0x1233   :  { %6570 = vrot.lane.b32.xlu0 %v6417_v3, %s11739_s14  ;;  %6572 = vrot.lane.b32.xlu1 %v6418_v21, %s11739_s14 }
0x1237   :  { %6554 = vrot.lane.b32.xlu0 %v6419_v51, %s11738_s3  ;;  %6574 = vrot.lane.b32.xlu1 %v6419_v51, %s11739_s14 }
0x123b   :  { %6714 = vperm.xlu0 %7994, %v56_v6  }
0x126d   :  { %v6461_v26 = vpop.permute.xlu1 %6460  ;;  %v6441_v37 = vpop.permute.xlu0 %6440 }
0x1271   :  { %v11431_v0 = vpop.permute.xlu1 %6420  ;;  %v11433_v47 = vpop.permute.xlu0 %6480 }
0x1275   :  { %v11435_v60 = vpop.permute.xlu1 %6512  ;;  %v11437_v4 = vpop.permute.xlu0 %6508 }
0x1279   :  { %v11439_v62 = vpop.permute.xlu1 %6528  ;;  %v11441_v13 = vpop.permute.xlu0 %6532 }
0x127d   :  { %v11443_v16 = vpop.permute.xlu1 %6552  ;;  %v11445_v48 = vpop.permute.xlu0 %6548 }
0x1281   :  { %v6445_v9 = vpop.permute.xlu1 %6444  ;;  %v6465_v63 = vpop.permute.xlu0 %6464 }
0x1285   :  { %v6425_v33 = vpop.permute.xlu1 %6424  ;;  %v11447_v57 = vpop.permute.xlu0 %6484 }
0x1289   :  { %v11452_v20 = vpop.permute.xlu1 %6568  ;;  %v6447_v18 = vpop.permute.xlu0 %6446 }
0x128a   :  { %v6448_v55 = vsel %vm119_vm0, %v6445_v9, %v6447_v18  ;;  %v6451_v54 = vsel %vm119_vm0, %v6447_v18, %v6441_v37 }
0x128b   :  { %v6452_v49 = vmul.f32 %v6451_v54, %v8863_v22  ;;  %v6455_v5 = vmul.f32 %v6448_v55, %v8867_v23 }
0x128d   :  { %v6456_v2 = vpack.c.bf16 %v6452_v49, %v6452_v49  ;;  %v6463_v7 = vpop.permute.xlu0 %6462  ;;  %v6443_v14 = vpop.permute.xlu1 %6442  ;;  %v6459_v31 = vpack.c.bf16 %v6455_v5, %v6455_v5 }
0x128e   :  { %v6469_v61 = vsel %vm156_vm1, %v6463_v7, %v6465_v63  ;;  %v6470_v44 = vsel %vm156_vm1, %v6461_v26, %v6463_v7  ;;  %v6449_v38 = vsel %vm119_vm0, %v6443_v14, %v6445_v9  ;;  %v6450_v22 = vsel %vm119_vm0, %v6441_v37, %v6443_v14  ;;  %v11742_v9 = vld [vmem:[#allocation2_spill] sm:$0xff]  ;;  %v11745_v14 = vld [vmem:[#allocation7_spill] sm:$0xff] }
0x128f   :  { %v6473_v17 = vmul.f32 %v6470_v44, %v8892_v36  ;;  %v6474_v23 = vmul.f32 %v6469_v61, %v8902_v43  ;;  %v6453_v52 = vmul.f32 %v6450_v22, %v8871_v24  ;;  %v6454_v27 = vmul.f32 %v6449_v38, %v8875_v25  ;;  %v11746_v44 = vld [vmem:[#allocation8_spill] sm:$0xff]  ;;  %v11747_v22 = vld [vmem:[#allocation10_spill] sm:$0xff] }
0x1290   :  { %v6592_v40 = vrot.slane %v6456_v2, 7  ;;  %v6595_v49 = vrot.slane %v6459_v31, 7  ;;  %v11744_v2 = vld [vmem:[#allocation5_spill] sm:$0xff]  ;;  %vm6665_vm0 = vcmask 1042432  }
0x1291   :  { %v6423_v46 = vpop.permute.xlu0 %6422  ;;  %v6467_v50 = vpop.permute.xlu1 %6466  ;;  %v6457_v36 = vpack.c.bf16 %v6453_v52, %v6453_v52  ;;  %v6458_v8 = vpack.c.bf16 %v6454_v27, %v6454_v27  ;;  %v6477_v25 = vpack.c.bf16 %v6473_v17, %v6473_v17  ;;  %v6478_v29 = vpack.c.bf16 %v6474_v23, %v6474_v23 }
0x1292   :  { %v6429_v43 = vsel %vm82_vm2, %v6423_v46, %v6425_v33  ;;  %v6430_v24 = vsel %vm82_vm2, %v11431_v0, %v6423_v46  ;;  %v6468_v3 = vsel %vm156_vm1, %v6465_v63, %v6467_v50  ;;  %v6471_v51 = vsel %vm156_vm1, %v6467_v50, %v6461_v26 }
0x1293   :  { %v6433_v32 = vmul.f32 %v6430_v24, %v11740_v56  ;;  %v6434_v10 = vmul.f32 %v6429_v43, %v11741_v39  ;;  %v6593_v21 = vrot.slane %v6457_v36, 7  ;;  %v6594_v30 = vrot.slane %v6458_v8, 7  ;;  %v11748_v43 = vld [vmem:[#allocation12_spill] sm:$0xff] }
0x1294   :  { %v6472_v19 = vmul.f32 %v6471_v51, %v11742_v9  ;;  %v6475_v42 = vmul.f32 %v6468_v3, %v11743_v53  ;;  %v6601_v34 = vrot.slane %v6477_v25, 6  ;;  %v6602_v15 = vrot.slane %v6478_v29, 6  ;;  %v11749_v25 = vld [vmem:[#allocation14_spill] sm:$0xff]  ;;  %v11750_v9 = vld [vmem:[#allocation9_spill] sm:$0xff]  ;;  %v11751_v53 = vld [vmem:[#allocation11_spill] sm:$0xff] }
0x1295   :  { %v6437_v6 = vpack.c.bf16 %v6433_v32, %v6433_v32  ;;  %v6438_v37 = vpack.c.bf16 %v6434_v10, %v6434_v10  ;;  %v6427_v18 = vpop.permute.xlu0 %6426  ;;  %v6483_v28 = vpop.permute.xlu1 %6482  ;;  %vm6682_vm1 = vcmask 1044480  }
0x1296   :  { %v6428_v55 = vsel %vm82_vm2, %v6425_v33, %v6427_v18  ;;  %v6431_v54 = vsel %vm82_vm2, %v6427_v18, %v11431_v0  ;;  %v6489_v63 = vsel %vm193_vm3, %v6483_v28, %v11447_v57  ;;  %v6490_v26 = vsel %vm193_vm3, %v11433_v47, %v6483_v28 }
0x1297   :  { %v6476_v59 = vpack.c.bf16 %v6472_v19, %v6472_v19  ;;  %v6650_v5 = vsel %vm6644_vm5, %v6437_v6, %v6593_v21  ;;  %v6653_v33 = vsel %vm6644_vm5, %v6438_v37, %v6594_v30  ;;  %v6432_v7 = vmul.f32 %v6431_v54, %v11744_v2 }
0x1298   :  { %v6435_v0 = vmul.f32 %v6428_v55, %v11745_v14  ;;  %v6479_v58 = vpack.c.bf16 %v6475_v42, %v6475_v42  ;;  %v6493_v38 = vmul.f32 %v6490_v26, %v11746_v44  ;;  %v6494_v17 = vmul.f32 %v6489_v63, %v11747_v22  ;;  %v11757_v44 = vld [vmem:[#allocation18_spill] sm:$0xff] }
0x1299   :  { %v6600_v61 = vrot.slane %v6476_v59, 6  ;;  %v6511_v23 = vpop.permute.xlu0 %6510  ;;  %v6487_v52 = vpop.permute.xlu1 %6486  ;;  %v6436_v27 = vpack.c.bf16 %v6432_v7, %v6432_v7  ;;  %v6660_v21 = vsel %vm454_vm4, %v6650_v5, %v6601_v34  ;;  %v6662_v30 = vsel %vm454_vm4, %v6653_v33, %v6602_v15  ;;  %v11753_v15 = vld [vmem:[#allocation22_spill] sm:$0xff] }
0x129a   :  { %v6439_v31 = vpack.c.bf16 %v6435_v0, %v6435_v0  ;;  %v6517_v46 = vsel %vm266_vm7, %v6511_v23, %v11435_v60  ;;  %v6518_v50 = vsel %vm266_vm7, %v11437_v4, %v6511_v23  ;;  %v6497_v36 = vpack.c.bf16 %v6493_v38, %v6493_v38 }
0x129b   :  { %v6498_v8 = vpack.c.bf16 %v6494_v17, %v6494_v17  ;;  %v6520_v24 = vmul.f32 %v6518_v50, %v11748_v43  ;;  %v6521_v29 = vmul.f32 %v6517_v46, %v11749_v25  ;;  %v6647_v56 = vsel %vm6644_vm5, %v6436_v27, %v6592_v40 }
0x129c   :  { %v6656_v32 = vsel %vm6644_vm5, %v6439_v31, %v6595_v49  ;;  %v6488_v39 = vsel %vm193_vm3, %v11447_v57, %v6487_v52  ;;  %v6491_v10 = vsel %vm193_vm3, %v6487_v52, %v11433_v47  ;;  %v6603_v3 = vrot.slane %v6479_v58, 6  ;;  %v11752_v49 = vld [vmem:[#allocation20_spill] sm:$0xff] }
0x129d   :  { %v6551_v51 = vpop.permute.xlu0 %6550  ;;  %v6531_v6 = vpop.permute.xlu1 %6530  ;;  %v6658_v40 = vsel %vm454_vm4, %v6647_v56, %v6600_v61  ;;  %v6609_v37 = vrot.slane %v6497_v36, 5  ;;  %v6492_v19 = vmul.f32 %v6491_v10, %v11750_v9  ;;  %v6495_v42 = vmul.f32 %v6488_v39, %v11751_v53  ;;  %v11756_v58 = vld [vmem:[#allocation16_spill] sm:$0xff]  ;;  %v11760_v56 = vld [vmem:[#allocation19_spill] sm:$0xff]  ;;  %v11761_v39 = vld [vmem:[#allocation17_spill] sm:$0xff] }
0x129e   :  { %v6664_v57 = vsel %vm454_vm4, %v6656_v32, %v6603_v3  ;;  %v6610_v18 = vrot.slane %v6498_v8, 5  ;;  %v6557_v47 = vsel %vm340_vm9, %v6551_v51, %v11443_v16  ;;  %v6558_v28 = vsel %vm340_vm9, %v11445_v48, %v6551_v51  ;;  %v11762_v3 = vld [vmem:[#allocation15_spill] sm:$0xff] }
0x129f   :  { %v6524_v55 = vpack.c.bf16 %v6520_v24, %v6520_v24  ;;  %v6525_v54 = vpack.c.bf16 %v6521_v29, %v6521_v29  ;;  %v6496_v63 = vpack.c.bf16 %v6492_v19, %v6492_v19  ;;  %v6499_v26 = vpack.c.bf16 %v6495_v42, %v6495_v42 }
0x12a0   :  { %v6560_v34 = vmul.f32 %v6558_v28, %v11752_v49  ;;  %v6561_v59 = vmul.f32 %v6557_v47, %v11753_v15  ;;  %vm11754_vm2 = vcmp.lt.s32.totalorder %v8825_v11, 113  ;;  %vm6699_vm4 = vcmask 1046528   ;;  %v8658_v47 = vld [vmem:[%s11641_s1 + $0x28] ss:$0 sm:$0xff]  ;;  %v8660_v11 = vld [vmem:[%s11641_s1 + $0x38] ss:$0 sm:$0xff] }
0x12a1   :  { %v6537_v5 = vsel %vm11754_vm2, %v6531_v6, %v11441_v13  ;;  %vm11755_vm3 = vmmov %vm11754_vm2  ;;  %v6535_v2 = vpop.permute.xlu0 %6534  ;;  %v6515_v7 = vpop.permute.xlu1 %6514  ;;  %v6669_v14 = vsel %vm6665_vm0, %v6660_v21, %v6609_v37  ;;  %v6608_v0 = vrot.slane %v6496_v63, 5  ;;  %v11551_v22 = vsel %vm6665_vm0, %v6662_v30, %v6610_v18 }
0x12a2   :  { %v6538_v33 = vsel %vm11755_vm3, %v11439_v62, %v6531_v6  ;;  %v6541_v38 = vmul.f32 %v6537_v5, %v11757_v44  ;;  %v6564_v17 = vpack.c.bf16 %v6560_v34, %v6560_v34  ;;  %vm11758_vm13 = vmmov %vm11754_vm2  ;;  %v6624_v27 = vrot.slane %v6524_v55, 3  ;;  %v11763_v6 = vld [vmem:[#allocation13_spill] sm:$0xff]  ;;  %v8659_v55 = vld [vmem:[%s11641_s1 + $0x30] ss:$0 sm:$0xff] }
0x12a3   :  { %v6540_v61 = vmul.f32 %v6538_v33, %v11756_v58  ;;  %v6536_v23 = vsel %vm11758_vm13, %v11441_v13, %v6535_v2  ;;  %vm11759_vm14 = vmmov %vm11754_vm2  ;;  %v6565_v31 = vpack.c.bf16 %v6561_v59, %v6561_v59  ;;  %v6625_v36 = vrot.slane %v6525_v54, 3 }
0x12a4   :  { %v6539_v52 = vsel %vm11759_vm14, %v6535_v2, %v11439_v62  ;;  %v6545_v50 = vpack.c.bf16 %v6541_v38, %v6541_v38  ;;  %v6611_v8 = vrot.slane %v6499_v26, 5  ;;  %v6667_v43 = vsel %vm6665_vm0, %v6658_v40, %v6608_v0  ;;  %v11771_v38 = vld [vmem:[#allocation21_spill] sm:$0xff]  ;;  %vm11776_vm13 = vmmov %vm11769_vm6 }
0x12a5   :  { %v6544_v46 = vpack.c.bf16 %v6540_v61, %v6540_v61  ;;  %v6640_v24 = vrot.slane %v6564_v17, 1  ;;  %v6571_v25 = vpop.permute.xlu0 %6570  ;;  %v6573_v29 = vpop.permute.xlu1 %6572  ;;  %v6542_v32 = vmul.f32 %v6536_v23, %v11760_v56  ;;  %v6543_v10 = vmul.f32 %v6539_v52, %v11761_v39  ;;  %v11770_v61 = vld [vmem:[#allocation23_spill] sm:$0xff]  ;;  %vm11777_vm14 = vmmov %vm11769_vm6 }
0x12a6   :  { %v6516_v13 = vsel %vm266_vm7, %v11435_v60, %v6515_v7  ;;  %v6519_v62 = vsel %vm266_vm7, %v6515_v7, %v11437_v4  ;;  %v6633_v30 = vrot.slane %v6545_v50, 2  ;;  %v6641_v37 = vrot.slane %v6565_v31, 1  ;;  %vm11767_vm7 = vmmov %vm11766_vm11 }
0x12a7   :  { %v6632_v21 = vrot.slane %v6544_v46, 2  ;;  %v6522_v51 = vmul.f32 %v6516_v13, %v11762_v3  ;;  %v6523_v40 = vmul.f32 %v6519_v62, %v11763_v6  ;;  %v6578_v9 = vsel %vm11764_vm15, %v11452_v20, %v6571_v25  ;;  %vm11775_vm2 = vmmov %vm11767_vm7 }
0x12a8   :  { %v6577_v19 = vsel %vm11765_vm8, %v6571_v25, %v6573_v29  ;;  %v6675_v60 = vsel %vm11766_vm11, %v6667_v43, %v11471_v45  ;;  %v6673_v53 = vsel %vm6665_vm0, %v6664_v57, %v6611_v8  ;;  %v6677_v18 = vsel %vm11767_vm7, %v6669_v14, %v11475_v41  ;;  %vm11773_vm0 = vmmov %vm11765_vm8  ;;  %v8661_v8 = vld [vmem:[%s11641_s1 + $0x40] ss:$0 sm:$0xff] }
0x12a9   :  { %v6526_v4 = vpack.c.bf16 %v6522_v51, %v6522_v51  ;;  %v6527_v42 = vpack.c.bf16 %v6523_v40, %v6523_v40  ;;  %v6580_v28 = vmul.f32 %v8658_v47, %v6578_v9  ;;  %v6581_v54 = vmul.f32 %v8659_v55, %v6577_v19  ;;  %v6555_v57 = vpop.permute.xlu0 %6554  ;;  %v6575_v15 = vpop.permute.xlu1 %6574 }
0x12aa   :  { %v6686_v63 = vsel %vm6682_vm1, %v6677_v18, %v6625_v36  ;;  %v6684_v45 = vsel %vm6682_vm1, %v6675_v60, %v6624_v27  ;;  %v6546_v26 = vpack.c.bf16 %v6542_v32, %v6542_v32  ;;  %v6547_v49 = vpack.c.bf16 %v6543_v10, %v6543_v10 }
0x12ab   :  { %v6694_v34 = vsel %vm11768_vm12, %v6686_v63, %v6633_v30  ;;  %v6692_v41 = vsel %vm11769_vm6, %v6684_v45, %v6632_v21  ;;  %v6584_v59 = vpack.c.bf16 %v6580_v28, %v6580_v28  ;;  %v6585_v5 = vpack.c.bf16 %v6581_v54, %v6581_v54 }
0x12ac   :  { %v6704_v33 = vsel %vm6699_vm4, %v6694_v34, %v6641_v37  ;;  %v6701_v2 = vsel %vm6699_vm4, %v6692_v41, %v6640_v24  ;;  %v6626_v7 = vrot.slane %v6526_v4, 3  ;;  %v6627_v14 = vrot.slane %v6527_v42, 3 }
0x12ad   :  { %6733 = vmatprep.subr.bf16.mxu0 %v6704_v33  ;;  %v6556_v0 = vsel %vm340_vm9, %v11443_v16, %v6555_v57  ;;  %v6559_v58 = vsel %vm340_vm9, %v6555_v57, %v11445_v48  ;;  %v6576_v23 = vsel %vm11772_vm10, %v6573_v29, %v6575_v15  ;;  %v6579_v52 = vsel %vm11773_vm0, %v6575_v15, %v11452_v20  ;;  %vm11774_vm9 = vmmov %vm11767_vm7 }
0x12ae   :  { %6734 = vmatpush1.bf16.msra.mxu0 %v6701_v2  ;;  %v6562_v44 = vmul.f32 %v6556_v0, %v11770_v61  ;;  %v6563_v17 = vmul.f32 %v6559_v58, %v11771_v38  ;;  %v6634_v27 = vrot.slane %v6546_v26, 2  ;;  %v6635_v31 = vrot.slane %v6547_v49, 2 }
0x12af   :  { %7621 = vmatprep.subr.msk.bf16.mxu0 %vm6644_vm5, %v6585_v5  ;;  %v6722_v16 = vsel %vm6644_vm5, %v6584_v59, 0  ;;  %v6681_v50 = vsel %vm11774_vm9, %v6673_v53, %v11479_v12  ;;  %v6679_v36 = vsel %vm11775_vm2, %v11551_v22, %v11477_v1  ;;  %v6582_v20 = vmul.f32 %v8660_v11, %v6576_v23  ;;  %v63_v1 = vld [vmem:[%s11637_s6 + $0xc] sm:$0x3] }
0x12b0   :  { %v6566_v46 = vpack.c.bf16 %v6562_v44, %v6562_v44  ;;  %v6567_v48 = vpack.c.bf16 %v6563_v17, %v6563_v17  ;;  %v6583_v43 = vmul.f32 %v8661_v8, %v6579_v52  ;;  %v6690_v24 = vsel %vm6682_vm1, %v6681_v50, %v6627_v14 }
0x12b1   :  { %v6688_v25 = vsel %vm6682_vm1, %v6679_v36, %v6626_v7  ;;  %vm6717_vm3 = vcmask 146432   ;;  %v6698_v22 = vsel %vm11776_vm13, %v6690_v24, %v6635_v31  ;;  %v6586_v10 = vpack.c.bf16 %v6582_v20, %v6582_v20 }
0x12b2   :  { %v6642_v29 = vrot.slane %v6566_v46, 1  ;;  %v6643_v12 = vrot.slane %v6567_v48, 1  ;;  %6736 = vmatpush1.bf16.msra.mxu0 %v6722_v16  ;;  %v6696_v56 = vsel %vm11777_vm14, %v6688_v25, %v6634_v27  ;;  %v6587_v13 = vpack.c.bf16 %v6583_v43, %v6583_v43 }
0x12b3   :  { %v6728_v62 = vsel %vm6644_vm5, %v6586_v10, 0 }
0x12b4   :  { %v6710_v32 = vsel %vm6699_vm4, %v6698_v22, %v6643_v12  ;;  %v6707_v39 = vsel %vm6699_vm4, %v6696_v56, %v6642_v29 }
0x12b5   :  { %7622 = vmatmul.mubr.msk.bf16.vlgmr.msra.gmra.mrb[72].mxu0 %vm6717_vm3, %v63_v1  ;;  %6774 = vmatprep.subr.bf16.mxu0 %v6710_v32 }
0x12b6   :  { %6775 = vmatpush1.bf16.msra.mxu0 %v6707_v39  ;;  %6806 = vmatprep.mubr.bf16.mxu0 %v11720_v35 }
0x12b7   :  { %7623 = vmatprep.subr.msk.bf16.mxu0 %vm6644_vm5, %v6587_v13 }
0x12ba   :  { %6777 = vmatpush1.bf16.msra.mxu0 %v6728_v62  ;;  %v6715_v21 = vpop.permute.xlu0 %6714 }
0x12bd   :  { %7624 = vmatmul.mubr.msk.bf16.vlgmr.msra.gmra.mrb[76].mxu0 %vm6717_vm3, %v63_v1 }
0x1388   :  { %v6767_v30 = vpop.f32.mrb[72].mxu0 }
0x1389   :  { %v6768_v3 = vadd.f32 %v6767_v30, %v6715_v21  ;;  %v6769_v51 = vpop.f32.mrb[73].mxu0 }
0x138a   :  { %v6770_v6 = vadd.f32 %v6769_v51, %v6715_v21  ;;  %v6771_v40 = vpop.f32.mrb[74].mxu0 }
0x138b   :  { %8632 = vtanh.f32 %v6768_v3  ;;  %v6772_v37 = vpop.f32.mrb[75].mxu0 }
0x138c   :  { %8634 = vtanh.f32 %v6770_v6 }
0x1390   :  { %v6808_v9 = vpop.f32.mrb[76].mxu0 }
0x1391   :  { %v6809_v19 = vadd.f32 %v6808_v9, %v6715_v21  ;;  %v6810_v60 = vpop.f32.mrb[77].mxu0 }
0x1392   :  { %v6811_v53 = vadd.f32 %v6810_v60, %v6715_v21  ;;  %v6812_v35 = vpop.f32.mrb[78].mxu0 }
0x1393   :  { %8636 = vtanh.f32 %v6809_v19  ;;  %v6813_v4 = vpop.f32.mrb[79].mxu0 }
0x1394   :  { %8638 = vtanh.f32 %v6811_v53 }
0x1395   :  { %v8633_v42 = vpop.eup %8632 }
0x1396   :  { %v8635_v18 = vpop.eup %8634 }
0x1397   :  { %v6823_v47 = vcombine.low %v8633_v42, %v8635_v18 }
0x1399   :  { %6827 = vst [vmem:[%s11647_s11] sm:$0xff] %v6823_v47 }
0x139d   :  { %v8637_v28 = vpop.eup %8636 }
0x139e   :  { %v8639_v55 = vpop.eup %8638 }
0x139f   :  { %v6824_v54 = vcombine.low %v8637_v28, %v8639_v55 }
0x13a1   :  { %6828 = vst [vmem:[%s11647_s11 + $0x8] sm:$0xff] %v6824_v54 }

</bundles_post_ra>
